<compile_context>
chip_gen: v7x
topology: tpu7x:2x2x1
jax: 0.10.0
libtpu: 0.0.40
codegen_flags: <defaults>
</compile_context>

<pallas_src>
import functools

import jax
import jax.numpy as jnp
from jax.experimental import pallas as pl
from jax.experimental.pallas import tpu as pltpu


# ----------------------------------------------------------------------------
# Fused ResBlock kernel (one grid step == one batch element)
# ----------------------------------------------------------------------------
def _resblock_kernel(x_ref, res_ref, w1_ref, w2_ref, w8_ref, mask_ref,
                     out_ref, patch_ref, act_ref, *,
                     ksize, cp, dim_d, dim_h, dim_w, pad_lanes):
    D, H, W = dim_d, dim_h, dim_w
    N = D * H * W
    half = ksize // 2
    two_cp = 2 * cp

    # Zero only the lane-pad columns of the activation scratch; the central
    # window is always fully overwritten before it is read.
    act_ref[:, :pad_lanes] = jnp.zeros((two_cp, pad_lanes), jnp.float32)
    act_ref[:, pad_lanes + N:] = jnp.zeros((two_cp, pad_lanes), jnp.float32)

    # 9 precomputed (dh, dw) H/W boundary masks, loaded once per grid step.
    masks = mask_ref[...]                                    # (ksize*ksize, N)

    def build_patch(src_ref):
        # src_ref: (2*cp, N + 2*pad_lanes) lane-padded activation Ref.
        # Patch row layout: tap t occupies rows [t*2cp, (t+1)*2cp):
        #   first cp rows = real channels, next cp rows = imag channels
        # (matches the packed block-weight column layout below).
        for kd in range(ksize):
            for kh in range(ksize):
                for kw in range(ksize):
                    dd, dh, dw = kd - half, kh - half, kw - half
                    t = (kd * ksize + kh) * ksize + kw
                    off = dd * H * W + dh * W + dw
                    start = pad_lanes + off
                    sh = src_ref[:, start:start + N]         # sliced vld, (2cp, N)
                    if dh == 0 and dw == 0:
                        # D boundary is handled by the zero lane padding.
                        v = sh
                    else:
                        v = sh * masks[kh * ksize + kw:kh * ksize + kw + 1, :]
                    patch_ref[t * two_cp:(t + 1) * two_cp, :] = v

    def conv(w_ref):
        # (rows, N) = W_block (rows, 2*K^3*cp) @ patch (2*K^3*cp, N).
        # Single full-depth MXU dot; Mosaic picks the pass depth per chip.
        return jnp.dot(w_ref[...], patch_ref[...],
                       preferred_element_type=jnp.float32)

    # ---- conv1 + complex ReLU ----
    build_patch(x_ref)
    act_ref[:, pad_lanes:pad_lanes + N] = jnp.maximum(conv(w1_ref), 0.0)

    # ---- conv2 + complex ReLU ----
    build_patch(act_ref)
    act_ref[:, pad_lanes:pad_lanes + N] = jnp.maximum(conv(w2_ref), 0.0)

    # ---- conv8 + residual ----
    build_patch(act_ref)
    out_ref[...] = conv(w8_ref) + res_ref[...]


# ----------------------------------------------------------------------------
# Wrapper helpers
# ----------------------------------------------------------------------------
def _pack_block_weight(wr, wi, cp):
    """torch-layout (Cout, Cin, K, K, K) real/imag pair -> block weight of shape
    (2*Cout, K^3*2*cp).  Column index = tap*2*cp + ci (real input channels) and
    tap*2*cp + cp + ci (imag input channels), matching the in-kernel patch row
    layout; rows = [real outputs ; imag outputs] with blocks [[Wr,-Wi],[Wi,Wr]].
    Input channels are zero-padded to cp."""
    cout, cin, k, _, _ = wr.shape
    if cin < cp:
        padw = ((0, 0), (0, cp - cin), (0, 0), (0, 0), (0, 0))
        wr = jnp.pad(wr, padw)
        wi = jnp.pad(wi, padw)
    wr_f = jnp.transpose(wr, (0, 2, 3, 4, 1)).reshape(cout, k ** 3, cp)
    wi_f = jnp.transpose(wi, (0, 2, 3, 4, 1)).reshape(cout, k ** 3, cp)
    top = jnp.concatenate([wr_f, -wi_f], axis=2).reshape(cout, k ** 3 * 2 * cp)
    bot = jnp.concatenate([wi_f, wr_f], axis=2).reshape(cout, k ** 3 * 2 * cp)
    return jnp.concatenate([top, bot], axis=0).astype(jnp.float32)


def _build_hw_masks(ksize, dim_h, dim_w, n):
    """(ksize*ksize, n) f32 masks: mask[kh*K+kw, pos] == 1 iff the (dh,dw)-shifted
    position stays inside the H/W extents (D boundary is handled by lane padding)."""
    half = ksize // 2
    n_idx = jnp.arange(n, dtype=jnp.int32)
    h_pos = (n_idx // dim_w) % dim_h
    w_pos = n_idx % dim_w
    rows = []
    for kh in range(ksize):
        for kw in range(ksize):
            dh, dw = kh - half, kw - half
            ok = ((h_pos + dh >= 0) & (h_pos + dh < dim_h)
                  & (w_pos + dw >= 0) & (w_pos + dw < dim_w))
            rows.append(ok.astype(jnp.float32))
    return jnp.stack(rows, axis=0)


# ----------------------------------------------------------------------------
# Forward wrapper
# ----------------------------------------------------------------------------
def resblock_forward(x_bcdhw, params):
    """x_bcdhw: (B, Cin, D, H, W) complex64.
    Returns squeeze(conv8(relu(conv2(relu(conv1(x)))))) + squeeze(x)."""
    B, cin, D, H, W = x_bcdhw.shape
    fmaps = params["w1_r"].shape[0]
    cout = params["w8_r"].shape[0]
    ksize = params["w1_r"].shape[2]
    N = D * H * W
    KKK = ksize ** 3
    PAD = 128                                              # lane padding for shifts
    depth = KKK * 2 * fmaps                                # GEMM contraction depth

    assert cin == cout, "residual add requires in_channels == out_channels"
    assert fmaps % 8 == 0 and cin <= fmaps and cout <= fmaps
    assert (ksize // 2) * (H * W + W + 1) < PAD, "spatial shift exceeds lane padding"
    cp = fmaps                                             # padded channel count

    xr = jnp.real(x_bcdhw).astype(jnp.float32).reshape(B, cin, N)
    xi = jnp.imag(x_bcdhw).astype(jnp.float32).reshape(B, cin, N)
    res = jnp.concatenate([xr, xi], axis=1)                # (B, 2*cout, N)
    x2 = jnp.concatenate(
        [jnp.pad(xr, ((0, 0), (0, cp - cin), (0, 0))),
         jnp.pad(xi, ((0, 0), (0, cp - cin), (0, 0)))], axis=1)
    x2 = jnp.pad(x2, ((0, 0), (0, 0), (PAD, PAD)))         # (B, 2*cp, N + 2*PAD)

    w1 = _pack_block_weight(params["w1_r"], params["w1_i"], cp)   # (2*fmaps, depth)
    w2 = _pack_block_weight(params["w2_r"], params["w2_i"], cp)
    w8 = _pack_block_weight(params["w8_r"], params["w8_i"], cp)   # (2*cout,  depth)
    hw_masks = _build_hw_masks(ksize, H, W, N)                     # (K*K, N)

    kernel = functools.partial(
        _resblock_kernel, ksize=ksize, cp=cp,
        dim_d=D, dim_h=H, dim_w=W, pad_lanes=PAD)

    out2 = pl.pallas_call(
        kernel,
        out_shape=jax.ShapeDtypeStruct((B, 2 * cout, N), jnp.float32),
        grid=(B,),
        in_specs=[
            pl.BlockSpec((None, 2 * cp, N + 2 * PAD), lambda b: (b, 0, 0)),
            pl.BlockSpec((None, 2 * cout, N), lambda b: (b, 0, 0)),
            pl.BlockSpec((2 * fmaps, depth), lambda b: (0, 0)),
            pl.BlockSpec((2 * fmaps, depth), lambda b: (0, 0)),
            pl.BlockSpec((2 * cout, depth), lambda b: (0, 0)),
            pl.BlockSpec((ksize * ksize, N), lambda b: (0, 0)),
        ],
        out_specs=pl.BlockSpec((None, 2 * cout, N), lambda b: (b, 0, 0)),
        scratch_shapes=[
            pltpu.VMEM((depth, N), jnp.float32),               # im2col patch matrix
            pltpu.VMEM((2 * cp, N + 2 * PAD), jnp.float32),    # lane-padded activations
        ],
        compiler_params=pltpu.CompilerParams(
            dimension_semantics=("parallel",)),
    )(x2, res, w1, w2, w8, hw_masks)

    out = (out2[:, :cout] + 1j * out2[:, cout:]).reshape(B, cout, D, H, W)
    return jnp.squeeze(out)                                 # mirrors torch.squeeze


# ----------------------------------------------------------------------------
# Pure-JAX reference (lax.conv) for correctness check
# ----------------------------------------------------------------------------
def _ref_real_conv3d(x, w):                                # x:(B,Cin,D,H,W) w:(O,I,K,K,K)
    return jax.lax.conv_general_dilated(
        x, w, window_strides=(1, 1, 1), padding="SAME",
        dimension_numbers=("NCDHW", "OIDHW", "NCDHW"))


def _ref_complex_conv3d(zr, zi, wr, wi):
    out_r = _ref_real_conv3d(zr, wr) - _ref_real_conv3d(zi, wi)
    out_i = _ref_real_conv3d(zi, wr) + _ref_real_conv3d(zr, wi)
    return out_r, out_i


def resblock_reference(x_bcdhw, params):
    zr = jnp.real(x_bcdhw).astype(jnp.float32)
    zi = jnp.imag(x_bcdhw).astype(jnp.float32)
    hr, hi = _ref_complex_conv3d(zr, zi, params["w1_r"], params["w1_i"])
    hr, hi = jnp.maximum(hr, 0.0), jnp.maximum(hi, 0.0)
    hr, hi = _ref_complex_conv3d(hr, hi, params["w2_r"], params["w2_i"])
    hr, hi = jnp.maximum(hr, 0.0), jnp.maximum(hi, 0.0)
    hr, hi = _ref_complex_conv3d(hr, hi, params["w8_r"], params["w8_i"])
    out = hr + 1j * hi
    return jnp.squeeze(out) + jnp.squeeze(x_bcdhw)


# ----------------------------------------------------------------------------
if __name__ == "__main__":
    # ResBlock(in_channels=4, out_channels=4, fmaps=8, kernel_size=3, padding=1)
    in_ch, out_ch, fmaps, K = 4, 4, 8, 3
    B, D, H, W = 2, 8, 8, 8          # batch of 2 -> exercises the "parallel" grid

    key = jax.random.PRNGKey(0)
    ks = jax.random.split(key, 8)
    # conv0 of the PyTorch module is unused in forward(), so it is not built.
    params = {
        "w1_r": 0.1 * jax.random.normal(ks[0], (fmaps, in_ch, K, K, K), jnp.float32),
        "w1_i": 0.1 * jax.random.normal(ks[1], (fmaps, in_ch, K, K, K), jnp.float32),
        "w2_r": 0.1 * jax.random.normal(ks[2], (fmaps, fmaps, K, K, K), jnp.float32),
        "w2_i": 0.1 * jax.random.normal(ks[3], (fmaps, fmaps, K, K, K), jnp.float32),
        "w8_r": 0.1 * jax.random.normal(ks[4], (out_ch, fmaps, K, K, K), jnp.float32),
        "w8_i": 0.1 * jax.random.normal(ks[5], (out_ch, fmaps, K, K, K), jnp.float32),
    }
    x = (jax.random.normal(ks[6], (B, in_ch, D, H, W), jnp.float32)
         + 1j * jax.random.normal(ks[7], (B, in_ch, D, H, W), jnp.float32)
         ).astype(jnp.complex64)

    out = jax.block_until_ready(resblock_forward(x, params))
    ref = jax.block_until_ready(resblock_reference(x, params))

    assert out.shape == ref.shape == (B, out_ch, D, H, W), (out.shape, ref.shape)
    err = jnp.max(jnp.abs(out - ref))
    if not bool(err < 1e-3):
        raise AssertionError(f"mismatch vs reference, max |err| = {err}")

    print("KERNEL_OK")
</pallas_src>

<mosaic_0001>
module attributes {stable_mosaic.version = 11 : i64} {
  func.func @_resblock_kernel(%arg0: i32, %arg1: memref<1x16x768xf32, #tpu.memory_space<vmem>>, %arg2: memref<1x8x512xf32, #tpu.memory_space<vmem>>, %arg3: memref<16x432xf32, #tpu.memory_space<vmem>>, %arg4: memref<16x432xf32, #tpu.memory_space<vmem>>, %arg5: memref<8x432xf32, #tpu.memory_space<vmem>>, %arg6: memref<9x512xf32, #tpu.memory_space<vmem>>, %arg7: memref<1x8x512xf32, #tpu.memory_space<vmem>>, %arg8: memref<432x512xf32, #tpu.memory_space<vmem>>, %arg9: memref<16x768xf32, #tpu.memory_space<vmem>>) attributes {dimension_semantics = [#tpu.dimension_semantics<parallel>], iteration_bounds = array<i64: 2>, scalar_prefetch = 0 : i64, scratch_operands = 2 : i64, tpu.core_type = #tpu.core_type<tc>, window_params = [{transform_indices = @transform_0, window_bounds = array<i64: 1, 16, 768>}, {transform_indices = @transform_1, window_bounds = array<i64: 1, 8, 512>}, {pipeline_mode = #tpu.pipeline_mode<synchronous>, transform_indices = @transform_2, window_bounds = array<i64: 16, 432>}, {pipeline_mode = #tpu.pipeline_mode<synchronous>, transform_indices = @transform_3, window_bounds = array<i64: 16, 432>}, {pipeline_mode = #tpu.pipeline_mode<synchronous>, transform_indices = @transform_4, window_bounds = array<i64: 8, 432>}, {pipeline_mode = #tpu.pipeline_mode<synchronous>, transform_indices = @transform_5, window_bounds = array<i64: 9, 512>}, {transform_indices = @transform_6, window_bounds = array<i64: 1, 8, 512>}]} {
    %cst = arith.constant 0.000000e+00 : f32
    %0 = vector.broadcast %cst : f32 to vector<16x128xf32>
    %c0 = arith.constant 0 : index
    %c0_0 = arith.constant 0 : index
    %1 = vector.load %arg9[%c0, %c0_0] : memref<16x768xf32, #tpu.memory_space<vmem>>, vector<16x128xf32>
    tpu.vector_store %arg9[%c0, %c0_0], %0 {strides = array<i32>} : memref<16x768xf32, #tpu.memory_space<vmem>>, vector<16x128xf32>,
    %cst_1 = arith.constant 0.000000e+00 : f32
    %2 = vector.broadcast %cst_1 : f32 to vector<16x128xf32>
    %c0_2 = arith.constant 0 : index
    %c640 = arith.constant 640 : index
    %3 = vector.load %arg9[%c0_2, %c640] : memref<16x768xf32, #tpu.memory_space<vmem>>, vector<16x128xf32>
    tpu.vector_store %arg9[%c0_2, %c640], %2 {strides = array<i32>} : memref<16x768xf32, #tpu.memory_space<vmem>>, vector<16x128xf32>,
    %c0_3 = arith.constant 0 : index
    %c0_4 = arith.constant 0 : index
    %4 = vector.load %arg6[%c0_3, %c0_4] : memref<9x512xf32, #tpu.memory_space<vmem>>, vector<9x512xf32>
    %c0_5 = arith.constant 0 : index
    %c0_6 = arith.constant 0 : index
    %c55 = arith.constant 55 : index
    %5 = vector.load %arg1[%c0_5, %c0_6, %c55] : memref<1x16x768xf32, #tpu.memory_space<vmem>>, vector<1x16x512xf32>
    %6 = vector.shape_cast %5 : vector<1x16x512xf32> to vector<16x512xf32>
    %7 = vector.extract_strided_slice %4 {offsets = [0, 0], sizes = [1, 512], strides = [1, 1]} : vector<9x512xf32> to vector<1x512xf32>
    %8 = vector.broadcast %7 : vector<1x512xf32> to vector<16x512xf32>
    %9 = arith.mulf %6, %8 : vector<16x512xf32>
    %c0_7 = arith.constant 0 : index
    %c0_8 = arith.constant 0 : index
    %10 = vector.load %arg8[%c0_7, %c0_8] : memref<432x512xf32, #tpu.memory_space<vmem>>, vector<16x512xf32>
    tpu.vector_store %arg8[%c0_7, %c0_8], %9 {strides = array<i32>} : memref<432x512xf32, #tpu.memory_space<vmem>>, vector<16x512xf32>,
    %c0_9 = arith.constant 0 : index
    %c0_10 = arith.constant 0 : index
    %c56 = arith.constant 56 : index
    %11 = vector.load %arg1[%c0_9, %c0_10, %c56] : memref<1x16x768xf32, #tpu.memory_space<vmem>>, vector<1x16x512xf32>
    %12 = vector.shape_cast %11 : vector<1x16x512xf32> to vector<16x512xf32>
    %13 = vector.extract_strided_slice %4 {offsets = [1, 0], sizes = [1, 512], strides = [1, 1]} : vector<9x512xf32> to vector<1x512xf32>
    %14 = vector.broadcast %13 : vector<1x512xf32> to vector<16x512xf32>
    %15 = arith.mulf %12, %14 : vector<16x512xf32>
    %c16 = arith.constant 16 : index
    %c0_11 = arith.constant 0 : index
    %16 = vector.load %arg8[%c16, %c0_11] : memref<432x512xf32, #tpu.memory_space<vmem>>, vector<16x512xf32>
    tpu.vector_store %arg8[%c16, %c0_11], %15 {strides = array<i32>} : memref<432x512xf32, #tpu.memory_space<vmem>>, vector<16x512xf32>,
    %c0_12 = arith.constant 0 : index
    %c0_13 = arith.constant 0 : index
    %c57 = arith.constant 57 : index
    %17 = vector.load %arg1[%c0_12, %c0_13, %c57] : memref<1x16x768xf32, #tpu.memory_space<vmem>>, vector<1x16x512xf32>
    %18 = vector.shape_cast %17 : vector<1x16x512xf32> to vector<16x512xf32>
    %19 = vector.extract_strided_slice %4 {offsets = [2, 0], sizes = [1, 512], strides = [1, 1]} : vector<9x512xf32> to vector<1x512xf32>
    %20 = vector.broadcast %19 : vector<1x512xf32> to vector<16x512xf32>
    %21 = arith.mulf %18, %20 : vector<16x512xf32>
    %c32 = arith.constant 32 : index
    %c0_14 = arith.constant 0 : index
    %22 = vector.load %arg8[%c32, %c0_14] : memref<432x512xf32, #tpu.memory_space<vmem>>, vector<16x512xf32>
    tpu.vector_store %arg8[%c32, %c0_14], %21 {strides = array<i32>} : memref<432x512xf32, #tpu.memory_space<vmem>>, vector<16x512xf32>,
    %c0_15 = arith.constant 0 : index
    %c0_16 = arith.constant 0 : index
    %c63 = arith.constant 63 : index
    %23 = vector.load %arg1[%c0_15, %c0_16, %c63] : memref<1x16x768xf32, #tpu.memory_space<vmem>>, vector<1x16x512xf32>
    %24 = vector.shape_cast %23 : vector<1x16x512xf32> to vector<16x512xf32>
    %25 = vector.extract_strided_slice %4 {offsets = [3, 0], sizes = [1, 512], strides = [1, 1]} : vector<9x512xf32> to vector<1x512xf32>
    %26 = vector.broadcast %25 : vector<1x512xf32> to vector<16x512xf32>
    %27 = arith.mulf %24, %26 : vector<16x512xf32>
    %c48 = arith.constant 48 : index
    %c0_17 = arith.constant 0 : index
    %28 = vector.load %arg8[%c48, %c0_17] : memref<432x512xf32, #tpu.memory_space<vmem>>, vector<16x512xf32>
    tpu.vector_store %arg8[%c48, %c0_17], %27 {strides = array<i32>} : memref<432x512xf32, #tpu.memory_space<vmem>>, vector<16x512xf32>,
    %c0_18 = arith.constant 0 : index
    %c0_19 = arith.constant 0 : index
    %c64 = arith.constant 64 : index
    %29 = vector.load %arg1[%c0_18, %c0_19, %c64] : memref<1x16x768xf32, #tpu.memory_space<vmem>>, vector<1x16x512xf32>
    %30 = vector.shape_cast %29 : vector<1x16x512xf32> to vector<16x512xf32>
    %c64_20 = arith.constant 64 : index
    %c0_21 = arith.constant 0 : index
    %31 = vector.load %arg8[%c64_20, %c0_21] : memref<432x512xf32, #tpu.memory_space<vmem>>, vector<16x512xf32>
    tpu.vector_store %arg8[%c64_20, %c0_21], %30 {strides = array<i32>} : memref<432x512xf32, #tpu.memory_space<vmem>>, vector<16x512xf32>,
    %c0_22 = arith.constant 0 : index
    %c0_23 = arith.constant 0 : index
    %c65 = arith.constant 65 : index
    %32 = vector.load %arg1[%c0_22, %c0_23, %c65] : memref<1x16x768xf32, #tpu.memory_space<vmem>>, vector<1x16x512xf32>
    %33 = vector.shape_cast %32 : vector<1x16x512xf32> to vector<16x512xf32>
    %34 = vector.extract_strided_slice %4 {offsets = [5, 0], sizes = [1, 512], strides = [1, 1]} : vector<9x512xf32> to vector<1x512xf32>
    %35 = vector.broadcast %34 : vector<1x512xf32> to vector<16x512xf32>
    %36 = arith.mulf %33, %35 : vector<16x512xf32>
    %c80 = arith.constant 80 : index
    %c0_24 = arith.constant 0 : index
    %37 = vector.load %arg8[%c80, %c0_24] : memref<432x512xf32, #tpu.memory_space<vmem>>, vector<16x512xf32>
    tpu.vector_store %arg8[%c80, %c0_24], %36 {strides = array<i32>} : memref<432x512xf32, #tpu.memory_space<vmem>>, vector<16x512xf32>,
    %c0_25 = arith.constant 0 : index
    %c0_26 = arith.constant 0 : index
    %c71 = arith.constant 71 : index
    %38 = vector.load %arg1[%c0_25, %c0_26, %c71] : memref<1x16x768xf32, #tpu.memory_space<vmem>>, vector<1x16x512xf32>
    %39 = vector.shape_cast %38 : vector<1x16x512xf32> to vector<16x512xf32>
    %40 = vector.extract_strided_slice %4 {offsets = [6, 0], sizes = [1, 512], strides = [1, 1]} : vector<9x512xf32> to vector<1x512xf32>
    %41 = vector.broadcast %40 : vector<1x512xf32> to vector<16x512xf32>
    %42 = arith.mulf %39, %41 : vector<16x512xf32>
    %c96 = arith.constant 96 : index
    %c0_27 = arith.constant 0 : index
    %43 = vector.load %arg8[%c96, %c0_27] : memref<432x512xf32, #tpu.memory_space<vmem>>, vector<16x512xf32>
    tpu.vector_store %arg8[%c96, %c0_27], %42 {strides = array<i32>} : memref<432x512xf32, #tpu.memory_space<vmem>>, vector<16x512xf32>,
    %c0_28 = arith.constant 0 : index
    %c0_29 = arith.constant 0 : index
    %c72 = arith.constant 72 : index
    %44 = vector.load %arg1[%c0_28, %c0_29, %c72] : memref<1x16x768xf32, #tpu.memory_space<vmem>>, vector<1x16x512xf32>
    %45 = vector.shape_cast %44 : vector<1x16x512xf32> to vector<16x512xf32>
    %46 = vector.extract_strided_slice %4 {offsets = [7, 0], sizes = [1, 512], strides = [1, 1]} : vector<9x512xf32> to vector<1x512xf32>
    %47 = vector.broadcast %46 : vector<1x512xf32> to vector<16x512xf32>
    %48 = arith.mulf %45, %47 : vector<16x512xf32>
    %c112 = arith.constant 112 : index
    %c0_30 = arith.constant 0 : index
    %49 = vector.load %arg8[%c112, %c0_30] : memref<432x512xf32, #tpu.memory_space<vmem>>, vector<16x512xf32>
    tpu.vector_store %arg8[%c112, %c0_30], %48 {strides = array<i32>} : memref<432x512xf32, #tpu.memory_space<vmem>>, vector<16x512xf32>,
    %c0_31 = arith.constant 0 : index
    %c0_32 = arith.constant 0 : index
    %c73 = arith.constant 73 : index
    %50 = vector.load %arg1[%c0_31, %c0_32, %c73] : memref<1x16x768xf32, #tpu.memory_space<vmem>>, vector<1x16x512xf32>
    %51 = vector.shape_cast %50 : vector<1x16x512xf32> to vector<16x512xf32>
    %52 = vector.extract_strided_slice %4 {offsets = [8, 0], sizes = [1, 512], strides = [1, 1]} : vector<9x512xf32> to vector<1x512xf32>
    %53 = vector.broadcast %52 : vector<1x512xf32> to vector<16x512xf32>
    %54 = arith.mulf %51, %53 : vector<16x512xf32>
    %c128 = arith.constant 128 : index
    %c0_33 = arith.constant 0 : index
    %55 = vector.load %arg8[%c128, %c0_33] : memref<432x512xf32, #tpu.memory_space<vmem>>, vector<16x512xf32>
    tpu.vector_store %arg8[%c128, %c0_33], %54 {strides = array<i32>} : memref<432x512xf32, #tpu.memory_space<vmem>>, vector<16x512xf32>,
    %c0_34 = arith.constant 0 : index
    %c0_35 = arith.constant 0 : index
    %c119 = arith.constant 119 : index
    %56 = vector.load %arg1[%c0_34, %c0_35, %c119] : memref<1x16x768xf32, #tpu.memory_space<vmem>>, vector<1x16x512xf32>
    %57 = vector.shape_cast %56 : vector<1x16x512xf32> to vector<16x512xf32>
    %58 = vector.extract_strided_slice %4 {offsets = [0, 0], sizes = [1, 512], strides = [1, 1]} : vector<9x512xf32> to vector<1x512xf32>
    %59 = vector.broadcast %58 : vector<1x512xf32> to vector<16x512xf32>
    %60 = arith.mulf %57, %59 : vector<16x512xf32>
    %c144 = arith.constant 144 : index
    %c0_36 = arith.constant 0 : index
    %61 = vector.load %arg8[%c144, %c0_36] : memref<432x512xf32, #tpu.memory_space<vmem>>, vector<16x512xf32>
    tpu.vector_store %arg8[%c144, %c0_36], %60 {strides = array<i32>} : memref<432x512xf32, #tpu.memory_space<vmem>>, vector<16x512xf32>,
    %c0_37 = arith.constant 0 : index
    %c0_38 = arith.constant 0 : index
    %c120 = arith.constant 120 : index
    %62 = vector.load %arg1[%c0_37, %c0_38, %c120] : memref<1x16x768xf32, #tpu.memory_space<vmem>>, vector<1x16x512xf32>
    %63 = vector.shape_cast %62 : vector<1x16x512xf32> to vector<16x512xf32>
    %64 = vector.extract_strided_slice %4 {offsets = [1, 0], sizes = [1, 512], strides = [1, 1]} : vector<9x512xf32> to vector<1x512xf32>
    %65 = vector.broadcast %64 : vector<1x512xf32> to vector<16x512xf32>
    %66 = arith.mulf %63, %65 : vector<16x512xf32>
    %c160 = arith.constant 160 : index
    %c0_39 = arith.constant 0 : index
    %67 = vector.load %arg8[%c160, %c0_39] : memref<432x512xf32, #tpu.memory_space<vmem>>, vector<16x512xf32>
    tpu.vector_store %arg8[%c160, %c0_39], %66 {strides = array<i32>} : memref<432x512xf32, #tpu.memory_space<vmem>>, vector<16x512xf32>,
    %c0_40 = arith.constant 0 : index
    %c0_41 = arith.constant 0 : index
    %c121 = arith.constant 121 : index
    %68 = vector.load %arg1[%c0_40, %c0_41, %c121] : memref<1x16x768xf32, #tpu.memory_space<vmem>>, vector<1x16x512xf32>
    %69 = vector.shape_cast %68 : vector<1x16x512xf32> to vector<16x512xf32>
    %70 = vector.extract_strided_slice %4 {offsets = [2, 0], sizes = [1, 512], strides = [1, 1]} : vector<9x512xf32> to vector<1x512xf32>
    %71 = vector.broadcast %70 : vector<1x512xf32> to vector<16x512xf32>
    %72 = arith.mulf %69, %71 : vector<16x512xf32>
    %c176 = arith.constant 176 : index
    %c0_42 = arith.constant 0 : index
    %73 = vector.load %arg8[%c176, %c0_42] : memref<432x512xf32, #tpu.memory_space<vmem>>, vector<16x512xf32>
    tpu.vector_store %arg8[%c176, %c0_42], %72 {strides = array<i32>} : memref<432x512xf32, #tpu.memory_space<vmem>>, vector<16x512xf32>,
    %c0_43 = arith.constant 0 : index
    %c0_44 = arith.constant 0 : index
    %c127 = arith.constant 127 : index
    %74 = vector.load %arg1[%c0_43, %c0_44, %c127] : memref<1x16x768xf32, #tpu.memory_space<vmem>>, vector<1x16x512xf32>
    %75 = vector.shape_cast %74 : vector<1x16x512xf32> to vector<16x512xf32>
    %76 = vector.extract_strided_slice %4 {offsets = [3, 0], sizes = [1, 512], strides = [1, 1]} : vector<9x512xf32> to vector<1x512xf32>
    %77 = vector.broadcast %76 : vector<1x512xf32> to vector<16x512xf32>
    %78 = arith.mulf %75, %77 : vector<16x512xf32>
    %c192 = arith.constant 192 : index
    %c0_45 = arith.constant 0 : index
    %79 = vector.load %arg8[%c192, %c0_45] : memref<432x512xf32, #tpu.memory_space<vmem>>, vector<16x512xf32>
    tpu.vector_store %arg8[%c192, %c0_45], %78 {strides = array<i32>} : memref<432x512xf32, #tpu.memory_space<vmem>>, vector<16x512xf32>,
    %c0_46 = arith.constant 0 : index
    %c0_47 = arith.constant 0 : index
    %c128_48 = arith.constant 128 : index
    %80 = vector.load %arg1[%c0_46, %c0_47, %c128_48] : memref<1x16x768xf32, #tpu.memory_space<vmem>>, vector<1x16x512xf32>
    %81 = vector.shape_cast %80 : vector<1x16x512xf32> to vector<16x512xf32>
    %c208 = arith.constant 208 : index
    %c0_49 = arith.constant 0 : index
    %82 = vector.load %arg8[%c208, %c0_49] : memref<432x512xf32, #tpu.memory_space<vmem>>, vector<16x512xf32>
    tpu.vector_store %arg8[%c208, %c0_49], %81 {strides = array<i32>} : memref<432x512xf32, #tpu.memory_space<vmem>>, vector<16x512xf32>,
    %c0_50 = arith.constant 0 : index
    %c0_51 = arith.constant 0 : index
    %c129 = arith.constant 129 : index
    %83 = vector.load %arg1[%c0_50, %c0_51, %c129] : memref<1x16x768xf32, #tpu.memory_space<vmem>>, vector<1x16x512xf32>
    %84 = vector.shape_cast %83 : vector<1x16x512xf32> to vector<16x512xf32>
    %85 = vector.extract_strided_slice %4 {offsets = [5, 0], sizes = [1, 512], strides = [1, 1]} : vector<9x512xf32> to vector<1x512xf32>
    %86 = vector.broadcast %85 : vector<1x512xf32> to vector<16x512xf32>
    %87 = arith.mulf %84, %86 : vector<16x512xf32>
    %c224 = arith.constant 224 : index
    %c0_52 = arith.constant 0 : index
    %88 = vector.load %arg8[%c224, %c0_52] : memref<432x512xf32, #tpu.memory_space<vmem>>, vector<16x512xf32>
    tpu.vector_store %arg8[%c224, %c0_52], %87 {strides = array<i32>} : memref<432x512xf32, #tpu.memory_space<vmem>>, vector<16x512xf32>,
    %c0_53 = arith.constant 0 : index
    %c0_54 = arith.constant 0 : index
    %c135 = arith.constant 135 : index
    %89 = vector.load %arg1[%c0_53, %c0_54, %c135] : memref<1x16x768xf32, #tpu.memory_space<vmem>>, vector<1x16x512xf32>
    %90 = vector.shape_cast %89 : vector<1x16x512xf32> to vector<16x512xf32>
    %91 = vector.extract_strided_slice %4 {offsets = [6, 0], sizes = [1, 512], strides = [1, 1]} : vector<9x512xf32> to vector<1x512xf32>
    %92 = vector.broadcast %91 : vector<1x512xf32> to vector<16x512xf32>
    %93 = arith.mulf %90, %92 : vector<16x512xf32>
    %c240 = arith.constant 240 : index
    %c0_55 = arith.constant 0 : index
    %94 = vector.load %arg8[%c240, %c0_55] : memref<432x512xf32, #tpu.memory_space<vmem>>, vector<16x512xf32>
    tpu.vector_store %arg8[%c240, %c0_55], %93 {strides = array<i32>} : memref<432x512xf32, #tpu.memory_space<vmem>>, vector<16x512xf32>,
    %c0_56 = arith.constant 0 : index
    %c0_57 = arith.constant 0 : index
    %c136 = arith.constant 136 : index
    %95 = vector.load %arg1[%c0_56, %c0_57, %c136] : memref<1x16x768xf32, #tpu.memory_space<vmem>>, vector<1x16x512xf32>
    %96 = vector.shape_cast %95 : vector<1x16x512xf32> to vector<16x512xf32>
    %97 = vector.extract_strided_slice %4 {offsets = [7, 0], sizes = [1, 512], strides = [1, 1]} : vector<9x512xf32> to vector<1x512xf32>
    %98 = vector.broadcast %97 : vector<1x512xf32> to vector<16x512xf32>
    %99 = arith.mulf %96, %98 : vector<16x512xf32>
    %c256 = arith.constant 256 : index
    %c0_58 = arith.constant 0 : index
    %100 = vector.load %arg8[%c256, %c0_58] : memref<432x512xf32, #tpu.memory_space<vmem>>, vector<16x512xf32>
    tpu.vector_store %arg8[%c256, %c0_58], %99 {strides = array<i32>} : memref<432x512xf32, #tpu.memory_space<vmem>>, vector<16x512xf32>,
    %c0_59 = arith.constant 0 : index
    %c0_60 = arith.constant 0 : index
    %c137 = arith.constant 137 : index
    %101 = vector.load %arg1[%c0_59, %c0_60, %c137] : memref<1x16x768xf32, #tpu.memory_space<vmem>>, vector<1x16x512xf32>
    %102 = vector.shape_cast %101 : vector<1x16x512xf32> to vector<16x512xf32>
    %103 = vector.extract_strided_slice %4 {offsets = [8, 0], sizes = [1, 512], strides = [1, 1]} : vector<9x512xf32> to vector<1x512xf32>
    %104 = vector.broadcast %103 : vector<1x512xf32> to vector<16x512xf32>
    %105 = arith.mulf %102, %104 : vector<16x512xf32>
    %c272 = arith.constant 272 : index
    %c0_61 = arith.constant 0 : index
    %106 = vector.load %arg8[%c272, %c0_61] : memref<432x512xf32, #tpu.memory_space<vmem>>, vector<16x512xf32>
    tpu.vector_store %arg8[%c272, %c0_61], %105 {strides = array<i32>} : memref<432x512xf32, #tpu.memory_space<vmem>>, vector<16x512xf32>,
    %c0_62 = arith.constant 0 : index
    %c0_63 = arith.constant 0 : index
    %c183 = arith.constant 183 : index
    %107 = vector.load %arg1[%c0_62, %c0_63, %c183] : memref<1x16x768xf32, #tpu.memory_space<vmem>>, vector<1x16x512xf32>
    %108 = vector.shape_cast %107 : vector<1x16x512xf32> to vector<16x512xf32>
    %109 = vector.extract_strided_slice %4 {offsets = [0, 0], sizes = [1, 512], strides = [1, 1]} : vector<9x512xf32> to vector<1x512xf32>
    %110 = vector.broadcast %109 : vector<1x512xf32> to vector<16x512xf32>
    %111 = arith.mulf %108, %110 : vector<16x512xf32>
    %c288 = arith.constant 288 : index
    %c0_64 = arith.constant 0 : index
    %112 = vector.load %arg8[%c288, %c0_64] : memref<432x512xf32, #tpu.memory_space<vmem>>, vector<16x512xf32>
    tpu.vector_store %arg8[%c288, %c0_64], %111 {strides = array<i32>} : memref<432x512xf32, #tpu.memory_space<vmem>>, vector<16x512xf32>,
    %c0_65 = arith.constant 0 : index
    %c0_66 = arith.constant 0 : index
    %c184 = arith.constant 184 : index
    %113 = vector.load %arg1[%c0_65, %c0_66, %c184] : memref<1x16x768xf32, #tpu.memory_space<vmem>>, vector<1x16x512xf32>
    %114 = vector.shape_cast %113 : vector<1x16x512xf32> to vector<16x512xf32>
    %115 = vector.extract_strided_slice %4 {offsets = [1, 0], sizes = [1, 512], strides = [1, 1]} : vector<9x512xf32> to vector<1x512xf32>
    %116 = vector.broadcast %115 : vector<1x512xf32> to vector<16x512xf32>
    %117 = arith.mulf %114, %116 : vector<16x512xf32>
    %c304 = arith.constant 304 : index
    %c0_67 = arith.constant 0 : index
    %118 = vector.load %arg8[%c304, %c0_67] : memref<432x512xf32, #tpu.memory_space<vmem>>, vector<16x512xf32>
    tpu.vector_store %arg8[%c304, %c0_67], %117 {strides = array<i32>} : memref<432x512xf32, #tpu.memory_space<vmem>>, vector<16x512xf32>,
    %c0_68 = arith.constant 0 : index
    %c0_69 = arith.constant 0 : index
    %c185 = arith.constant 185 : index
    %119 = vector.load %arg1[%c0_68, %c0_69, %c185] : memref<1x16x768xf32, #tpu.memory_space<vmem>>, vector<1x16x512xf32>
    %120 = vector.shape_cast %119 : vector<1x16x512xf32> to vector<16x512xf32>
    %121 = vector.extract_strided_slice %4 {offsets = [2, 0], sizes = [1, 512], strides = [1, 1]} : vector<9x512xf32> to vector<1x512xf32>
    %122 = vector.broadcast %121 : vector<1x512xf32> to vector<16x512xf32>
    %123 = arith.mulf %120, %122 : vector<16x512xf32>
    %c320 = arith.constant 320 : index
    %c0_70 = arith.constant 0 : index
    %124 = vector.load %arg8[%c320, %c0_70] : memref<432x512xf32, #tpu.memory_space<vmem>>, vector<16x512xf32>
    tpu.vector_store %arg8[%c320, %c0_70], %123 {strides = array<i32>} : memref<432x512xf32, #tpu.memory_space<vmem>>, vector<16x512xf32>,
    %c0_71 = arith.constant 0 : index
    %c0_72 = arith.constant 0 : index
    %c191 = arith.constant 191 : index
    %125 = vector.load %arg1[%c0_71, %c0_72, %c191] : memref<1x16x768xf32, #tpu.memory_space<vmem>>, vector<1x16x512xf32>
    %126 = vector.shape_cast %125 : vector<1x16x512xf32> to vector<16x512xf32>
    %127 = vector.extract_strided_slice %4 {offsets = [3, 0], sizes = [1, 512], strides = [1, 1]} : vector<9x512xf32> to vector<1x512xf32>
    %128 = vector.broadcast %127 : vector<1x512xf32> to vector<16x512xf32>
    %129 = arith.mulf %126, %128 : vector<16x512xf32>
    %c336 = arith.constant 336 : index
    %c0_73 = arith.constant 0 : index
    %130 = vector.load %arg8[%c336, %c0_73] : memref<432x512xf32, #tpu.memory_space<vmem>>, vector<16x512xf32>
    tpu.vector_store %arg8[%c336, %c0_73], %129 {strides = array<i32>} : memref<432x512xf32, #tpu.memory_space<vmem>>, vector<16x512xf32>,
    %c0_74 = arith.constant 0 : index
    %c0_75 = arith.constant 0 : index
    %c192_76 = arith.constant 192 : index
    %131 = vector.load %arg1[%c0_74, %c0_75, %c192_76] : memref<1x16x768xf32, #tpu.memory_space<vmem>>, vector<1x16x512xf32>
    %132 = vector.shape_cast %131 : vector<1x16x512xf32> to vector<16x512xf32>
    %c352 = arith.constant 352 : index
    %c0_77 = arith.constant 0 : index
    %133 = vector.load %arg8[%c352, %c0_77] : memref<432x512xf32, #tpu.memory_space<vmem>>, vector<16x512xf32>
    tpu.vector_store %arg8[%c352, %c0_77], %132 {strides = array<i32>} : memref<432x512xf32, #tpu.memory_space<vmem>>, vector<16x512xf32>,
    %c0_78 = arith.constant 0 : index
    %c0_79 = arith.constant 0 : index
    %c193 = arith.constant 193 : index
    %134 = vector.load %arg1[%c0_78, %c0_79, %c193] : memref<1x16x768xf32, #tpu.memory_space<vmem>>, vector<1x16x512xf32>
    %135 = vector.shape_cast %134 : vector<1x16x512xf32> to vector<16x512xf32>
    %136 = vector.extract_strided_slice %4 {offsets = [5, 0], sizes = [1, 512], strides = [1, 1]} : vector<9x512xf32> to vector<1x512xf32>
    %137 = vector.broadcast %136 : vector<1x512xf32> to vector<16x512xf32>
    %138 = arith.mulf %135, %137 : vector<16x512xf32>
    %c368 = arith.constant 368 : index
    %c0_80 = arith.constant 0 : index
    %139 = vector.load %arg8[%c368, %c0_80] : memref<432x512xf32, #tpu.memory_space<vmem>>, vector<16x512xf32>
    tpu.vector_store %arg8[%c368, %c0_80], %138 {strides = array<i32>} : memref<432x512xf32, #tpu.memory_space<vmem>>, vector<16x512xf32>,
    %c0_81 = arith.constant 0 : index
    %c0_82 = arith.constant 0 : index
    %c199 = arith.constant 199 : index
    %140 = vector.load %arg1[%c0_81, %c0_82, %c199] : memref<1x16x768xf32, #tpu.memory_space<vmem>>, vector<1x16x512xf32>
    %141 = vector.shape_cast %140 : vector<1x16x512xf32> to vector<16x512xf32>
    %142 = vector.extract_strided_slice %4 {offsets = [6, 0], sizes = [1, 512], strides = [1, 1]} : vector<9x512xf32> to vector<1x512xf32>
    %143 = vector.broadcast %142 : vector<1x512xf32> to vector<16x512xf32>
    %144 = arith.mulf %141, %143 : vector<16x512xf32>
    %c384 = arith.constant 384 : index
    %c0_83 = arith.constant 0 : index
    %145 = vector.load %arg8[%c384, %c0_83] : memref<432x512xf32, #tpu.memory_space<vmem>>, vector<16x512xf32>
    tpu.vector_store %arg8[%c384, %c0_83], %144 {strides = array<i32>} : memref<432x512xf32, #tpu.memory_space<vmem>>, vector<16x512xf32>,
    %c0_84 = arith.constant 0 : index
    %c0_85 = arith.constant 0 : index
    %c200 = arith.constant 200 : index
    %146 = vector.load %arg1[%c0_84, %c0_85, %c200] : memref<1x16x768xf32, #tpu.memory_space<vmem>>, vector<1x16x512xf32>
    %147 = vector.shape_cast %146 : vector<1x16x512xf32> to vector<16x512xf32>
    %148 = vector.extract_strided_slice %4 {offsets = [7, 0], sizes = [1, 512], strides = [1, 1]} : vector<9x512xf32> to vector<1x512xf32>
    %149 = vector.broadcast %148 : vector<1x512xf32> to vector<16x512xf32>
    %150 = arith.mulf %147, %149 : vector<16x512xf32>
    %c400 = arith.constant 400 : index
    %c0_86 = arith.constant 0 : index
    %151 = vector.load %arg8[%c400, %c0_86] : memref<432x512xf32, #tpu.memory_space<vmem>>, vector<16x512xf32>
    tpu.vector_store %arg8[%c400, %c0_86], %150 {strides = array<i32>} : memref<432x512xf32, #tpu.memory_space<vmem>>, vector<16x512xf32>,
    %c0_87 = arith.constant 0 : index
    %c0_88 = arith.constant 0 : index
    %c201 = arith.constant 201 : index
    %152 = vector.load %arg1[%c0_87, %c0_88, %c201] : memref<1x16x768xf32, #tpu.memory_space<vmem>>, vector<1x16x512xf32>
    %153 = vector.shape_cast %152 : vector<1x16x512xf32> to vector<16x512xf32>
    %154 = vector.extract_strided_slice %4 {offsets = [8, 0], sizes = [1, 512], strides = [1, 1]} : vector<9x512xf32> to vector<1x512xf32>
    %155 = vector.broadcast %154 : vector<1x512xf32> to vector<16x512xf32>
    %156 = arith.mulf %153, %155 : vector<16x512xf32>
    %c416 = arith.constant 416 : index
    %c0_89 = arith.constant 0 : index
    %157 = vector.load %arg8[%c416, %c0_89] : memref<432x512xf32, #tpu.memory_space<vmem>>, vector<16x512xf32>
    tpu.vector_store %arg8[%c416, %c0_89], %156 {strides = array<i32>} : memref<432x512xf32, #tpu.memory_space<vmem>>, vector<16x512xf32>,
    %c0_90 = arith.constant 0 : index
    %c0_91 = arith.constant 0 : index
    %158 = vector.load %arg3[%c0_90, %c0_91] : memref<16x432xf32, #tpu.memory_space<vmem>>, vector<16x432xf32>
    %c0_92 = arith.constant 0 : index
    %c0_93 = arith.constant 0 : index
    %159 = vector.load %arg8[%c0_92, %c0_93] : memref<432x512xf32, #tpu.memory_space<vmem>>, vector<432x512xf32>
    %cst_94 = arith.constant dense<0.000000e+00> : vector<16x512xf32>
    %160 = tpu.matmul %158, %159, %cst_94 {dimension_numbers = #tpu.dot_dimension_numbers<[1], [0], [0], [1], [0, 0, 1, 1], [], []>} : vector<16x432xf32>, vector<432x512xf32>, vector<16x512xf32> -> vector<16x512xf32>
    %cst_95 = arith.constant 0.000000e+00 : f32
    %161 = vector.broadcast %cst_95 : f32 to vector<16x512xf32>
    %162 = arith.maximumf %160, %161 : vector<16x512xf32>
    %c0_96 = arith.constant 0 : index
    %c128_97 = arith.constant 128 : index
    %163 = vector.load %arg9[%c0_96, %c128_97] : memref<16x768xf32, #tpu.memory_space<vmem>>, vector<16x512xf32>
    tpu.vector_store %arg9[%c0_96, %c128_97], %162 {strides = array<i32>} : memref<16x768xf32, #tpu.memory_space<vmem>>, vector<16x512xf32>,
    %c0_98 = arith.constant 0 : index
    %c55_99 = arith.constant 55 : index
    %164 = vector.load %arg9[%c0_98, %c55_99] : memref<16x768xf32, #tpu.memory_space<vmem>>, vector<16x512xf32>
    %165 = vector.extract_strided_slice %4 {offsets = [0, 0], sizes = [1, 512], strides = [1, 1]} : vector<9x512xf32> to vector<1x512xf32>
    %166 = vector.broadcast %165 : vector<1x512xf32> to vector<16x512xf32>
    %167 = arith.mulf %164, %166 : vector<16x512xf32>
    %c0_100 = arith.constant 0 : index
    %c0_101 = arith.constant 0 : index
    %168 = vector.load %arg8[%c0_100, %c0_101] : memref<432x512xf32, #tpu.memory_space<vmem>>, vector<16x512xf32>
    tpu.vector_store %arg8[%c0_100, %c0_101], %167 {strides = array<i32>} : memref<432x512xf32, #tpu.memory_space<vmem>>, vector<16x512xf32>,
    %c0_102 = arith.constant 0 : index
    %c56_103 = arith.constant 56 : index
    %169 = vector.load %arg9[%c0_102, %c56_103] : memref<16x768xf32, #tpu.memory_space<vmem>>, vector<16x512xf32>
    %170 = vector.extract_strided_slice %4 {offsets = [1, 0], sizes = [1, 512], strides = [1, 1]} : vector<9x512xf32> to vector<1x512xf32>
    %171 = vector.broadcast %170 : vector<1x512xf32> to vector<16x512xf32>
    %172 = arith.mulf %169, %171 : vector<16x512xf32>
    %c16_104 = arith.constant 16 : index
    %c0_105 = arith.constant 0 : index
    %173 = vector.load %arg8[%c16_104, %c0_105] : memref<432x512xf32, #tpu.memory_space<vmem>>, vector<16x512xf32>
    tpu.vector_store %arg8[%c16_104, %c0_105], %172 {strides = array<i32>} : memref<432x512xf32, #tpu.memory_space<vmem>>, vector<16x512xf32>,
    %c0_106 = arith.constant 0 : index
    %c57_107 = arith.constant 57 : index
    %174 = vector.load %arg9[%c0_106, %c57_107] : memref<16x768xf32, #tpu.memory_space<vmem>>, vector<16x512xf32>
    %175 = vector.extract_strided_slice %4 {offsets = [2, 0], sizes = [1, 512], strides = [1, 1]} : vector<9x512xf32> to vector<1x512xf32>
    %176 = vector.broadcast %175 : vector<1x512xf32> to vector<16x512xf32>
    %177 = arith.mulf %174, %176 : vector<16x512xf32>
    %c32_108 = arith.constant 32 : index
    %c0_109 = arith.constant 0 : index
    %178 = vector.load %arg8[%c32_108, %c0_109] : memref<432x512xf32, #tpu.memory_space<vmem>>, vector<16x512xf32>
    tpu.vector_store %arg8[%c32_108, %c0_109], %177 {strides = array<i32>} : memref<432x512xf32, #tpu.memory_space<vmem>>, vector<16x512xf32>,
    %c0_110 = arith.constant 0 : index
    %c63_111 = arith.constant 63 : index
    %179 = vector.load %arg9[%c0_110, %c63_111] : memref<16x768xf32, #tpu.memory_space<vmem>>, vector<16x512xf32>
    %180 = vector.extract_strided_slice %4 {offsets = [3, 0], sizes = [1, 512], strides = [1, 1]} : vector<9x512xf32> to vector<1x512xf32>
    %181 = vector.broadcast %180 : vector<1x512xf32> to vector<16x512xf32>
    %182 = arith.mulf %179, %181 : vector<16x512xf32>
    %c48_112 = arith.constant 48 : index
    %c0_113 = arith.constant 0 : index
    %183 = vector.load %arg8[%c48_112, %c0_113] : memref<432x512xf32, #tpu.memory_space<vmem>>, vector<16x512xf32>
    tpu.vector_store %arg8[%c48_112, %c0_113], %182 {strides = array<i32>} : memref<432x512xf32, #tpu.memory_space<vmem>>, vector<16x512xf32>,
    %c0_114 = arith.constant 0 : index
    %c64_115 = arith.constant 64 : index
    %184 = vector.load %arg9[%c0_114, %c64_115] : memref<16x768xf32, #tpu.memory_space<vmem>>, vector<16x512xf32>
    %c64_116 = arith.constant 64 : index
    %c0_117 = arith.constant 0 : index
    %185 = vector.load %arg8[%c64_116, %c0_117] : memref<432x512xf32, #tpu.memory_space<vmem>>, vector<16x512xf32>
    tpu.vector_store %arg8[%c64_116, %c0_117], %184 {strides = array<i32>} : memref<432x512xf32, #tpu.memory_space<vmem>>, vector<16x512xf32>,
    %c0_118 = arith.constant 0 : index
    %c65_119 = arith.constant 65 : index
    %186 = vector.load %arg9[%c0_118, %c65_119] : memref<16x768xf32, #tpu.memory_space<vmem>>, vector<16x512xf32>
    %187 = vector.extract_strided_slice %4 {offsets = [5, 0], sizes = [1, 512], strides = [1, 1]} : vector<9x512xf32> to vector<1x512xf32>
    %188 = vector.broadcast %187 : vector<1x512xf32> to vector<16x512xf32>
    %189 = arith.mulf %186, %188 : vector<16x512xf32>
    %c80_120 = arith.constant 80 : index
    %c0_121 = arith.constant 0 : index
    %190 = vector.load %arg8[%c80_120, %c0_121] : memref<432x512xf32, #tpu.memory_space<vmem>>, vector<16x512xf32>
    tpu.vector_store %arg8[%c80_120, %c0_121], %189 {strides = array<i32>} : memref<432x512xf32, #tpu.memory_space<vmem>>, vector<16x512xf32>,
    %c0_122 = arith.constant 0 : index
    %c71_123 = arith.constant 71 : index
    %191 = vector.load %arg9[%c0_122, %c71_123] : memref<16x768xf32, #tpu.memory_space<vmem>>, vector<16x512xf32>
    %192 = vector.extract_strided_slice %4 {offsets = [6, 0], sizes = [1, 512], strides = [1, 1]} : vector<9x512xf32> to vector<1x512xf32>
    %193 = vector.broadcast %192 : vector<1x512xf32> to vector<16x512xf32>
    %194 = arith.mulf %191, %193 : vector<16x512xf32>
    %c96_124 = arith.constant 96 : index
    %c0_125 = arith.constant 0 : index
    %195 = vector.load %arg8[%c96_124, %c0_125] : memref<432x512xf32, #tpu.memory_space<vmem>>, vector<16x512xf32>
    tpu.vector_store %arg8[%c96_124, %c0_125], %194 {strides = array<i32>} : memref<432x512xf32, #tpu.memory_space<vmem>>, vector<16x512xf32>,
    %c0_126 = arith.constant 0 : index
    %c72_127 = arith.constant 72 : index
    %196 = vector.load %arg9[%c0_126, %c72_127] : memref<16x768xf32, #tpu.memory_space<vmem>>, vector<16x512xf32>
    %197 = vector.extract_strided_slice %4 {offsets = [7, 0], sizes = [1, 512], strides = [1, 1]} : vector<9x512xf32> to vector<1x512xf32>
    %198 = vector.broadcast %197 : vector<1x512xf32> to vector<16x512xf32>
    %199 = arith.mulf %196, %198 : vector<16x512xf32>
    %c112_128 = arith.constant 112 : index
    %c0_129 = arith.constant 0 : index
    %200 = vector.load %arg8[%c112_128, %c0_129] : memref<432x512xf32, #tpu.memory_space<vmem>>, vector<16x512xf32>
    tpu.vector_store %arg8[%c112_128, %c0_129], %199 {strides = array<i32>} : memref<432x512xf32, #tpu.memory_space<vmem>>, vector<16x512xf32>,
    %c0_130 = arith.constant 0 : index
    %c73_131 = arith.constant 73 : index
    %201 = vector.load %arg9[%c0_130, %c73_131] : memref<16x768xf32, #tpu.memory_space<vmem>>, vector<16x512xf32>
    %202 = vector.extract_strided_slice %4 {offsets = [8, 0], sizes = [1, 512], strides = [1, 1]} : vector<9x512xf32> to vector<1x512xf32>
    %203 = vector.broadcast %202 : vector<1x512xf32> to vector<16x512xf32>
    %204 = arith.mulf %201, %203 : vector<16x512xf32>
    %c128_132 = arith.constant 128 : index
    %c0_133 = arith.constant 0 : index
    %205 = vector.load %arg8[%c128_132, %c0_133] : memref<432x512xf32, #tpu.memory_space<vmem>>, vector<16x512xf32>
    tpu.vector_store %arg8[%c128_132, %c0_133], %204 {strides = array<i32>} : memref<432x512xf32, #tpu.memory_space<vmem>>, vector<16x512xf32>,
    %c0_134 = arith.constant 0 : index
    %c119_135 = arith.constant 119 : index
    %206 = vector.load %arg9[%c0_134, %c119_135] : memref<16x768xf32, #tpu.memory_space<vmem>>, vector<16x512xf32>
    %207 = vector.extract_strided_slice %4 {offsets = [0, 0], sizes = [1, 512], strides = [1, 1]} : vector<9x512xf32> to vector<1x512xf32>
    %208 = vector.broadcast %207 : vector<1x512xf32> to vector<16x512xf32>
    %209 = arith.mulf %206, %208 : vector<16x512xf32>
    %c144_136 = arith.constant 144 : index
    %c0_137 = arith.constant 0 : index
    %210 = vector.load %arg8[%c144_136, %c0_137] : memref<432x512xf32, #tpu.memory_space<vmem>>, vector<16x512xf32>
    tpu.vector_store %arg8[%c144_136, %c0_137], %209 {strides = array<i32>} : memref<432x512xf32, #tpu.memory_space<vmem>>, vector<16x512xf32>,
    %c0_138 = arith.constant 0 : index
    %c120_139 = arith.constant 120 : index
    %211 = vector.load %arg9[%c0_138, %c120_139] : memref<16x768xf32, #tpu.memory_space<vmem>>, vector<16x512xf32>
    %212 = vector.extract_strided_slice %4 {offsets = [1, 0], sizes = [1, 512], strides = [1, 1]} : vector<9x512xf32> to vector<1x512xf32>
    %213 = vector.broadcast %212 : vector<1x512xf32> to vector<16x512xf32>
    %214 = arith.mulf %211, %213 : vector<16x512xf32>
    %c160_140 = arith.constant 160 : index
    %c0_141 = arith.constant 0 : index
    %215 = vector.load %arg8[%c160_140, %c0_141] : memref<432x512xf32, #tpu.memory_space<vmem>>, vector<16x512xf32>
    tpu.vector_store %arg8[%c160_140, %c0_141], %214 {strides = array<i32>} : memref<432x512xf32, #tpu.memory_space<vmem>>, vector<16x512xf32>,
    %c0_142 = arith.constant 0 : index
    %c121_143 = arith.constant 121 : index
    %216 = vector.load %arg9[%c0_142, %c121_143] : memref<16x768xf32, #tpu.memory_space<vmem>>, vector<16x512xf32>
    %217 = vector.extract_strided_slice %4 {offsets = [2, 0], sizes = [1, 512], strides = [1, 1]} : vector<9x512xf32> to vector<1x512xf32>
    %218 = vector.broadcast %217 : vector<1x512xf32> to vector<16x512xf32>
    %219 = arith.mulf %216, %218 : vector<16x512xf32>
    %c176_144 = arith.constant 176 : index
    %c0_145 = arith.constant 0 : index
    %220 = vector.load %arg8[%c176_144, %c0_145] : memref<432x512xf32, #tpu.memory_space<vmem>>, vector<16x512xf32>
    tpu.vector_store %arg8[%c176_144, %c0_145], %219 {strides = array<i32>} : memref<432x512xf32, #tpu.memory_space<vmem>>, vector<16x512xf32>,
    %c0_146 = arith.constant 0 : index
    %c127_147 = arith.constant 127 : index
    %221 = vector.load %arg9[%c0_146, %c127_147] : memref<16x768xf32, #tpu.memory_space<vmem>>, vector<16x512xf32>
    %222 = vector.extract_strided_slice %4 {offsets = [3, 0], sizes = [1, 512], strides = [1, 1]} : vector<9x512xf32> to vector<1x512xf32>
    %223 = vector.broadcast %222 : vector<1x512xf32> to vector<16x512xf32>
    %224 = arith.mulf %221, %223 : vector<16x512xf32>
    %c192_148 = arith.constant 192 : index
    %c0_149 = arith.constant 0 : index
    %225 = vector.load %arg8[%c192_148, %c0_149] : memref<432x512xf32, #tpu.memory_space<vmem>>, vector<16x512xf32>
    tpu.vector_store %arg8[%c192_148, %c0_149], %224 {strides = array<i32>} : memref<432x512xf32, #tpu.memory_space<vmem>>, vector<16x512xf32>,
    %c0_150 = arith.constant 0 : index
    %c128_151 = arith.constant 128 : index
    %226 = vector.load %arg9[%c0_150, %c128_151] : memref<16x768xf32, #tpu.memory_space<vmem>>, vector<16x512xf32>
    %c208_152 = arith.constant 208 : index
    %c0_153 = arith.constant 0 : index
    %227 = vector.load %arg8[%c208_152, %c0_153] : memref<432x512xf32, #tpu.memory_space<vmem>>, vector<16x512xf32>
    tpu.vector_store %arg8[%c208_152, %c0_153], %226 {strides = array<i32>} : memref<432x512xf32, #tpu.memory_space<vmem>>, vector<16x512xf32>,
    %c0_154 = arith.constant 0 : index
    %c129_155 = arith.constant 129 : index
    %228 = vector.load %arg9[%c0_154, %c129_155] : memref<16x768xf32, #tpu.memory_space<vmem>>, vector<16x512xf32>
    %229 = vector.extract_strided_slice %4 {offsets = [5, 0], sizes = [1, 512], strides = [1, 1]} : vector<9x512xf32> to vector<1x512xf32>
    %230 = vector.broadcast %229 : vector<1x512xf32> to vector<16x512xf32>
    %231 = arith.mulf %228, %230 : vector<16x512xf32>
    %c224_156 = arith.constant 224 : index
    %c0_157 = arith.constant 0 : index
    %232 = vector.load %arg8[%c224_156, %c0_157] : memref<432x512xf32, #tpu.memory_space<vmem>>, vector<16x512xf32>
    tpu.vector_store %arg8[%c224_156, %c0_157], %231 {strides = array<i32>} : memref<432x512xf32, #tpu.memory_space<vmem>>, vector<16x512xf32>,
    %c0_158 = arith.constant 0 : index
    %c135_159 = arith.constant 135 : index
    %233 = vector.load %arg9[%c0_158, %c135_159] : memref<16x768xf32, #tpu.memory_space<vmem>>, vector<16x512xf32>
    %234 = vector.extract_strided_slice %4 {offsets = [6, 0], sizes = [1, 512], strides = [1, 1]} : vector<9x512xf32> to vector<1x512xf32>
    %235 = vector.broadcast %234 : vector<1x512xf32> to vector<16x512xf32>
    %236 = arith.mulf %233, %235 : vector<16x512xf32>
    %c240_160 = arith.constant 240 : index
    %c0_161 = arith.constant 0 : index
    %237 = vector.load %arg8[%c240_160, %c0_161] : memref<432x512xf32, #tpu.memory_space<vmem>>, vector<16x512xf32>
    tpu.vector_store %arg8[%c240_160, %c0_161], %236 {strides = array<i32>} : memref<432x512xf32, #tpu.memory_space<vmem>>, vector<16x512xf32>,
    %c0_162 = arith.constant 0 : index
    %c136_163 = arith.constant 136 : index
    %238 = vector.load %arg9[%c0_162, %c136_163] : memref<16x768xf32, #tpu.memory_space<vmem>>, vector<16x512xf32>
    %239 = vector.extract_strided_slice %4 {offsets = [7, 0], sizes = [1, 512], strides = [1, 1]} : vector<9x512xf32> to vector<1x512xf32>
    %240 = vector.broadcast %239 : vector<1x512xf32> to vector<16x512xf32>
    %241 = arith.mulf %238, %240 : vector<16x512xf32>
    %c256_164 = arith.constant 256 : index
    %c0_165 = arith.constant 0 : index
    %242 = vector.load %arg8[%c256_164, %c0_165] : memref<432x512xf32, #tpu.memory_space<vmem>>, vector<16x512xf32>
    tpu.vector_store %arg8[%c256_164, %c0_165], %241 {strides = array<i32>} : memref<432x512xf32, #tpu.memory_space<vmem>>, vector<16x512xf32>,
    %c0_166 = arith.constant 0 : index
    %c137_167 = arith.constant 137 : index
    %243 = vector.load %arg9[%c0_166, %c137_167] : memref<16x768xf32, #tpu.memory_space<vmem>>, vector<16x512xf32>
    %244 = vector.extract_strided_slice %4 {offsets = [8, 0], sizes = [1, 512], strides = [1, 1]} : vector<9x512xf32> to vector<1x512xf32>
    %245 = vector.broadcast %244 : vector<1x512xf32> to vector<16x512xf32>
    %246 = arith.mulf %243, %245 : vector<16x512xf32>
    %c272_168 = arith.constant 272 : index
    %c0_169 = arith.constant 0 : index
    %247 = vector.load %arg8[%c272_168, %c0_169] : memref<432x512xf32, #tpu.memory_space<vmem>>, vector<16x512xf32>
    tpu.vector_store %arg8[%c272_168, %c0_169], %246 {strides = array<i32>} : memref<432x512xf32, #tpu.memory_space<vmem>>, vector<16x512xf32>,
    %c0_170 = arith.constant 0 : index
    %c183_171 = arith.constant 183 : index
    %248 = vector.load %arg9[%c0_170, %c183_171] : memref<16x768xf32, #tpu.memory_space<vmem>>, vector<16x512xf32>
    %249 = vector.extract_strided_slice %4 {offsets = [0, 0], sizes = [1, 512], strides = [1, 1]} : vector<9x512xf32> to vector<1x512xf32>
    %250 = vector.broadcast %249 : vector<1x512xf32> to vector<16x512xf32>
    %251 = arith.mulf %248, %250 : vector<16x512xf32>
    %c288_172 = arith.constant 288 : index
    %c0_173 = arith.constant 0 : index
    %252 = vector.load %arg8[%c288_172, %c0_173] : memref<432x512xf32, #tpu.memory_space<vmem>>, vector<16x512xf32>
    tpu.vector_store %arg8[%c288_172, %c0_173], %251 {strides = array<i32>} : memref<432x512xf32, #tpu.memory_space<vmem>>, vector<16x512xf32>,
    %c0_174 = arith.constant 0 : index
    %c184_175 = arith.constant 184 : index
    %253 = vector.load %arg9[%c0_174, %c184_175] : memref<16x768xf32, #tpu.memory_space<vmem>>, vector<16x512xf32>
    %254 = vector.extract_strided_slice %4 {offsets = [1, 0], sizes = [1, 512], strides = [1, 1]} : vector<9x512xf32> to vector<1x512xf32>
    %255 = vector.broadcast %254 : vector<1x512xf32> to vector<16x512xf32>
    %256 = arith.mulf %253, %255 : vector<16x512xf32>
    %c304_176 = arith.constant 304 : index
    %c0_177 = arith.constant 0 : index
    %257 = vector.load %arg8[%c304_176, %c0_177] : memref<432x512xf32, #tpu.memory_space<vmem>>, vector<16x512xf32>
    tpu.vector_store %arg8[%c304_176, %c0_177], %256 {strides = array<i32>} : memref<432x512xf32, #tpu.memory_space<vmem>>, vector<16x512xf32>,
    %c0_178 = arith.constant 0 : index
    %c185_179 = arith.constant 185 : index
    %258 = vector.load %arg9[%c0_178, %c185_179] : memref<16x768xf32, #tpu.memory_space<vmem>>, vector<16x512xf32>
    %259 = vector.extract_strided_slice %4 {offsets = [2, 0], sizes = [1, 512], strides = [1, 1]} : vector<9x512xf32> to vector<1x512xf32>
    %260 = vector.broadcast %259 : vector<1x512xf32> to vector<16x512xf32>
    %261 = arith.mulf %258, %260 : vector<16x512xf32>
    %c320_180 = arith.constant 320 : index
    %c0_181 = arith.constant 0 : index
    %262 = vector.load %arg8[%c320_180, %c0_181] : memref<432x512xf32, #tpu.memory_space<vmem>>, vector<16x512xf32>
    tpu.vector_store %arg8[%c320_180, %c0_181], %261 {strides = array<i32>} : memref<432x512xf32, #tpu.memory_space<vmem>>, vector<16x512xf32>,
    %c0_182 = arith.constant 0 : index
    %c191_183 = arith.constant 191 : index
    %263 = vector.load %arg9[%c0_182, %c191_183] : memref<16x768xf32, #tpu.memory_space<vmem>>, vector<16x512xf32>
    %264 = vector.extract_strided_slice %4 {offsets = [3, 0], sizes = [1, 512], strides = [1, 1]} : vector<9x512xf32> to vector<1x512xf32>
    %265 = vector.broadcast %264 : vector<1x512xf32> to vector<16x512xf32>
    %266 = arith.mulf %263, %265 : vector<16x512xf32>
    %c336_184 = arith.constant 336 : index
    %c0_185 = arith.constant 0 : index
    %267 = vector.load %arg8[%c336_184, %c0_185] : memref<432x512xf32, #tpu.memory_space<vmem>>, vector<16x512xf32>
    tpu.vector_store %arg8[%c336_184, %c0_185], %266 {strides = array<i32>} : memref<432x512xf32, #tpu.memory_space<vmem>>, vector<16x512xf32>,
    %c0_186 = arith.constant 0 : index
    %c192_187 = arith.constant 192 : index
    %268 = vector.load %arg9[%c0_186, %c192_187] : memref<16x768xf32, #tpu.memory_space<vmem>>, vector<16x512xf32>
    %c352_188 = arith.constant 352 : index
    %c0_189 = arith.constant 0 : index
    %269 = vector.load %arg8[%c352_188, %c0_189] : memref<432x512xf32, #tpu.memory_space<vmem>>, vector<16x512xf32>
    tpu.vector_store %arg8[%c352_188, %c0_189], %268 {strides = array<i32>} : memref<432x512xf32, #tpu.memory_space<vmem>>, vector<16x512xf32>,
    %c0_190 = arith.constant 0 : index
    %c193_191 = arith.constant 193 : index
    %270 = vector.load %arg9[%c0_190, %c193_191] : memref<16x768xf32, #tpu.memory_space<vmem>>, vector<16x512xf32>
    %271 = vector.extract_strided_slice %4 {offsets = [5, 0], sizes = [1, 512], strides = [1, 1]} : vector<9x512xf32> to vector<1x512xf32>
    %272 = vector.broadcast %271 : vector<1x512xf32> to vector<16x512xf32>
    %273 = arith.mulf %270, %272 : vector<16x512xf32>
    %c368_192 = arith.constant 368 : index
    %c0_193 = arith.constant 0 : index
    %274 = vector.load %arg8[%c368_192, %c0_193] : memref<432x512xf32, #tpu.memory_space<vmem>>, vector<16x512xf32>
    tpu.vector_store %arg8[%c368_192, %c0_193], %273 {strides = array<i32>} : memref<432x512xf32, #tpu.memory_space<vmem>>, vector<16x512xf32>,
    %c0_194 = arith.constant 0 : index
    %c199_195 = arith.constant 199 : index
    %275 = vector.load %arg9[%c0_194, %c199_195] : memref<16x768xf32, #tpu.memory_space<vmem>>, vector<16x512xf32>
    %276 = vector.extract_strided_slice %4 {offsets = [6, 0], sizes = [1, 512], strides = [1, 1]} : vector<9x512xf32> to vector<1x512xf32>
    %277 = vector.broadcast %276 : vector<1x512xf32> to vector<16x512xf32>
    %278 = arith.mulf %275, %277 : vector<16x512xf32>
    %c384_196 = arith.constant 384 : index
    %c0_197 = arith.constant 0 : index
    %279 = vector.load %arg8[%c384_196, %c0_197] : memref<432x512xf32, #tpu.memory_space<vmem>>, vector<16x512xf32>
    tpu.vector_store %arg8[%c384_196, %c0_197], %278 {strides = array<i32>} : memref<432x512xf32, #tpu.memory_space<vmem>>, vector<16x512xf32>,
    %c0_198 = arith.constant 0 : index
    %c200_199 = arith.constant 200 : index
    %280 = vector.load %arg9[%c0_198, %c200_199] : memref<16x768xf32, #tpu.memory_space<vmem>>, vector<16x512xf32>
    %281 = vector.extract_strided_slice %4 {offsets = [7, 0], sizes = [1, 512], strides = [1, 1]} : vector<9x512xf32> to vector<1x512xf32>
    %282 = vector.broadcast %281 : vector<1x512xf32> to vector<16x512xf32>
    %283 = arith.mulf %280, %282 : vector<16x512xf32>
    %c400_200 = arith.constant 400 : index
    %c0_201 = arith.constant 0 : index
    %284 = vector.load %arg8[%c400_200, %c0_201] : memref<432x512xf32, #tpu.memory_space<vmem>>, vector<16x512xf32>
    tpu.vector_store %arg8[%c400_200, %c0_201], %283 {strides = array<i32>} : memref<432x512xf32, #tpu.memory_space<vmem>>, vector<16x512xf32>,
    %c0_202 = arith.constant 0 : index
    %c201_203 = arith.constant 201 : index
    %285 = vector.load %arg9[%c0_202, %c201_203] : memref<16x768xf32, #tpu.memory_space<vmem>>, vector<16x512xf32>
    %286 = vector.extract_strided_slice %4 {offsets = [8, 0], sizes = [1, 512], strides = [1, 1]} : vector<9x512xf32> to vector<1x512xf32>
    %287 = vector.broadcast %286 : vector<1x512xf32> to vector<16x512xf32>
    %288 = arith.mulf %285, %287 : vector<16x512xf32>
    %c416_204 = arith.constant 416 : index
    %c0_205 = arith.constant 0 : index
    %289 = vector.load %arg8[%c416_204, %c0_205] : memref<432x512xf32, #tpu.memory_space<vmem>>, vector<16x512xf32>
    tpu.vector_store %arg8[%c416_204, %c0_205], %288 {strides = array<i32>} : memref<432x512xf32, #tpu.memory_space<vmem>>, vector<16x512xf32>,
    %c0_206 = arith.constant 0 : index
    %c0_207 = arith.constant 0 : index
    %290 = vector.load %arg4[%c0_206, %c0_207] : memref<16x432xf32, #tpu.memory_space<vmem>>, vector<16x432xf32>
    %c0_208 = arith.constant 0 : index
    %c0_209 = arith.constant 0 : index
    %291 = vector.load %arg8[%c0_208, %c0_209] : memref<432x512xf32, #tpu.memory_space<vmem>>, vector<432x512xf32>
    %cst_210 = arith.constant dense<0.000000e+00> : vector<16x512xf32>
    %292 = tpu.matmul %290, %291, %cst_210 {dimension_numbers = #tpu.dot_dimension_numbers<[1], [0], [0], [1], [0, 0, 1, 1], [], []>} : vector<16x432xf32>, vector<432x512xf32>, vector<16x512xf32> -> vector<16x512xf32>
    %cst_211 = arith.constant 0.000000e+00 : f32
    %293 = vector.broadcast %cst_211 : f32 to vector<16x512xf32>
    %294 = arith.maximumf %292, %293 : vector<16x512xf32>
    %c0_212 = arith.constant 0 : index
    %c128_213 = arith.constant 128 : index
    %295 = vector.load %arg9[%c0_212, %c128_213] : memref<16x768xf32, #tpu.memory_space<vmem>>, vector<16x512xf32>
    tpu.vector_store %arg9[%c0_212, %c128_213], %294 {strides = array<i32>} : memref<16x768xf32, #tpu.memory_space<vmem>>, vector<16x512xf32>,
    %c0_214 = arith.constant 0 : index
    %c55_215 = arith.constant 55 : index
    %296 = vector.load %arg9[%c0_214, %c55_215] : memref<16x768xf32, #tpu.memory_space<vmem>>, vector<16x512xf32>
    %297 = vector.extract_strided_slice %4 {offsets = [0, 0], sizes = [1, 512], strides = [1, 1]} : vector<9x512xf32> to vector<1x512xf32>
    %298 = vector.broadcast %297 : vector<1x512xf32> to vector<16x512xf32>
    %299 = arith.mulf %296, %298 : vector<16x512xf32>
    %c0_216 = arith.constant 0 : index
    %c0_217 = arith.constant 0 : index
    %300 = vector.load %arg8[%c0_216, %c0_217] : memref<432x512xf32, #tpu.memory_space<vmem>>, vector<16x512xf32>
    tpu.vector_store %arg8[%c0_216, %c0_217], %299 {strides = array<i32>} : memref<432x512xf32, #tpu.memory_space<vmem>>, vector<16x512xf32>,
    %c0_218 = arith.constant 0 : index
    %c56_219 = arith.constant 56 : index
    %301 = vector.load %arg9[%c0_218, %c56_219] : memref<16x768xf32, #tpu.memory_space<vmem>>, vector<16x512xf32>
    %302 = vector.extract_strided_slice %4 {offsets = [1, 0], sizes = [1, 512], strides = [1, 1]} : vector<9x512xf32> to vector<1x512xf32>
    %303 = vector.broadcast %302 : vector<1x512xf32> to vector<16x512xf32>
    %304 = arith.mulf %301, %303 : vector<16x512xf32>
    %c16_220 = arith.constant 16 : index
    %c0_221 = arith.constant 0 : index
    %305 = vector.load %arg8[%c16_220, %c0_221] : memref<432x512xf32, #tpu.memory_space<vmem>>, vector<16x512xf32>
    tpu.vector_store %arg8[%c16_220, %c0_221], %304 {strides = array<i32>} : memref<432x512xf32, #tpu.memory_space<vmem>>, vector<16x512xf32>,
    %c0_222 = arith.constant 0 : index
    %c57_223 = arith.constant 57 : index
    %306 = vector.load %arg9[%c0_222, %c57_223] : memref<16x768xf32, #tpu.memory_space<vmem>>, vector<16x512xf32>
    %307 = vector.extract_strided_slice %4 {offsets = [2, 0], sizes = [1, 512], strides = [1, 1]} : vector<9x512xf32> to vector<1x512xf32>
    %308 = vector.broadcast %307 : vector<1x512xf32> to vector<16x512xf32>
    %309 = arith.mulf %306, %308 : vector<16x512xf32>
    %c32_224 = arith.constant 32 : index
    %c0_225 = arith.constant 0 : index
    %310 = vector.load %arg8[%c32_224, %c0_225] : memref<432x512xf32, #tpu.memory_space<vmem>>, vector<16x512xf32>
    tpu.vector_store %arg8[%c32_224, %c0_225], %309 {strides = array<i32>} : memref<432x512xf32, #tpu.memory_space<vmem>>, vector<16x512xf32>,
    %c0_226 = arith.constant 0 : index
    %c63_227 = arith.constant 63 : index
    %311 = vector.load %arg9[%c0_226, %c63_227] : memref<16x768xf32, #tpu.memory_space<vmem>>, vector<16x512xf32>
    %312 = vector.extract_strided_slice %4 {offsets = [3, 0], sizes = [1, 512], strides = [1, 1]} : vector<9x512xf32> to vector<1x512xf32>
    %313 = vector.broadcast %312 : vector<1x512xf32> to vector<16x512xf32>
    %314 = arith.mulf %311, %313 : vector<16x512xf32>
    %c48_228 = arith.constant 48 : index
    %c0_229 = arith.constant 0 : index
    %315 = vector.load %arg8[%c48_228, %c0_229] : memref<432x512xf32, #tpu.memory_space<vmem>>, vector<16x512xf32>
    tpu.vector_store %arg8[%c48_228, %c0_229], %314 {strides = array<i32>} : memref<432x512xf32, #tpu.memory_space<vmem>>, vector<16x512xf32>,
    %c0_230 = arith.constant 0 : index
    %c64_231 = arith.constant 64 : index
    %316 = vector.load %arg9[%c0_230, %c64_231] : memref<16x768xf32, #tpu.memory_space<vmem>>, vector<16x512xf32>
    %c64_232 = arith.constant 64 : index
    %c0_233 = arith.constant 0 : index
    %317 = vector.load %arg8[%c64_232, %c0_233] : memref<432x512xf32, #tpu.memory_space<vmem>>, vector<16x512xf32>
    tpu.vector_store %arg8[%c64_232, %c0_233], %316 {strides = array<i32>} : memref<432x512xf32, #tpu.memory_space<vmem>>, vector<16x512xf32>,
    %c0_234 = arith.constant 0 : index
    %c65_235 = arith.constant 65 : index
    %318 = vector.load %arg9[%c0_234, %c65_235] : memref<16x768xf32, #tpu.memory_space<vmem>>, vector<16x512xf32>
    %319 = vector.extract_strided_slice %4 {offsets = [5, 0], sizes = [1, 512], strides = [1, 1]} : vector<9x512xf32> to vector<1x512xf32>
    %320 = vector.broadcast %319 : vector<1x512xf32> to vector<16x512xf32>
    %321 = arith.mulf %318, %320 : vector<16x512xf32>
    %c80_236 = arith.constant 80 : index
    %c0_237 = arith.constant 0 : index
    %322 = vector.load %arg8[%c80_236, %c0_237] : memref<432x512xf32, #tpu.memory_space<vmem>>, vector<16x512xf32>
    tpu.vector_store %arg8[%c80_236, %c0_237], %321 {strides = array<i32>} : memref<432x512xf32, #tpu.memory_space<vmem>>, vector<16x512xf32>,
    %c0_238 = arith.constant 0 : index
    %c71_239 = arith.constant 71 : index
    %323 = vector.load %arg9[%c0_238, %c71_239] : memref<16x768xf32, #tpu.memory_space<vmem>>, vector<16x512xf32>
    %324 = vector.extract_strided_slice %4 {offsets = [6, 0], sizes = [1, 512], strides = [1, 1]} : vector<9x512xf32> to vector<1x512xf32>
    %325 = vector.broadcast %324 : vector<1x512xf32> to vector<16x512xf32>
    %326 = arith.mulf %323, %325 : vector<16x512xf32>
    %c96_240 = arith.constant 96 : index
    %c0_241 = arith.constant 0 : index
    %327 = vector.load %arg8[%c96_240, %c0_241] : memref<432x512xf32, #tpu.memory_space<vmem>>, vector<16x512xf32>
    tpu.vector_store %arg8[%c96_240, %c0_241], %326 {strides = array<i32>} : memref<432x512xf32, #tpu.memory_space<vmem>>, vector<16x512xf32>,
    %c0_242 = arith.constant 0 : index
    %c72_243 = arith.constant 72 : index
    %328 = vector.load %arg9[%c0_242, %c72_243] : memref<16x768xf32, #tpu.memory_space<vmem>>, vector<16x512xf32>
    %329 = vector.extract_strided_slice %4 {offsets = [7, 0], sizes = [1, 512], strides = [1, 1]} : vector<9x512xf32> to vector<1x512xf32>
    %330 = vector.broadcast %329 : vector<1x512xf32> to vector<16x512xf32>
    %331 = arith.mulf %328, %330 : vector<16x512xf32>
    %c112_244 = arith.constant 112 : index
    %c0_245 = arith.constant 0 : index
    %332 = vector.load %arg8[%c112_244, %c0_245] : memref<432x512xf32, #tpu.memory_space<vmem>>, vector<16x512xf32>
    tpu.vector_store %arg8[%c112_244, %c0_245], %331 {strides = array<i32>} : memref<432x512xf32, #tpu.memory_space<vmem>>, vector<16x512xf32>,
    %c0_246 = arith.constant 0 : index
    %c73_247 = arith.constant 73 : index
    %333 = vector.load %arg9[%c0_246, %c73_247] : memref<16x768xf32, #tpu.memory_space<vmem>>, vector<16x512xf32>
    %334 = vector.extract_strided_slice %4 {offsets = [8, 0], sizes = [1, 512], strides = [1, 1]} : vector<9x512xf32> to vector<1x512xf32>
    %335 = vector.broadcast %334 : vector<1x512xf32> to vector<16x512xf32>
    %336 = arith.mulf %333, %335 : vector<16x512xf32>
    %c128_248 = arith.constant 128 : index
    %c0_249 = arith.constant 0 : index
    %337 = vector.load %arg8[%c128_248, %c0_249] : memref<432x512xf32, #tpu.memory_space<vmem>>, vector<16x512xf32>
    tpu.vector_store %arg8[%c128_248, %c0_249], %336 {strides = array<i32>} : memref<432x512xf32, #tpu.memory_space<vmem>>, vector<16x512xf32>,
    %c0_250 = arith.constant 0 : index
    %c119_251 = arith.constant 119 : index
    %338 = vector.load %arg9[%c0_250, %c119_251] : memref<16x768xf32, #tpu.memory_space<vmem>>, vector<16x512xf32>
    %339 = vector.extract_strided_slice %4 {offsets = [0, 0], sizes = [1, 512], strides = [1, 1]} : vector<9x512xf32> to vector<1x512xf32>
    %340 = vector.broadcast %339 : vector<1x512xf32> to vector<16x512xf32>
    %341 = arith.mulf %338, %340 : vector<16x512xf32>
    %c144_252 = arith.constant 144 : index
    %c0_253 = arith.constant 0 : index
    %342 = vector.load %arg8[%c144_252, %c0_253] : memref<432x512xf32, #tpu.memory_space<vmem>>, vector<16x512xf32>
    tpu.vector_store %arg8[%c144_252, %c0_253], %341 {strides = array<i32>} : memref<432x512xf32, #tpu.memory_space<vmem>>, vector<16x512xf32>,
    %c0_254 = arith.constant 0 : index
    %c120_255 = arith.constant 120 : index
    %343 = vector.load %arg9[%c0_254, %c120_255] : memref<16x768xf32, #tpu.memory_space<vmem>>, vector<16x512xf32>
    %344 = vector.extract_strided_slice %4 {offsets = [1, 0], sizes = [1, 512], strides = [1, 1]} : vector<9x512xf32> to vector<1x512xf32>
    %345 = vector.broadcast %344 : vector<1x512xf32> to vector<16x512xf32>
    %346 = arith.mulf %343, %345 : vector<16x512xf32>
    %c160_256 = arith.constant 160 : index
    %c0_257 = arith.constant 0 : index
    %347 = vector.load %arg8[%c160_256, %c0_257] : memref<432x512xf32, #tpu.memory_space<vmem>>, vector<16x512xf32>
    tpu.vector_store %arg8[%c160_256, %c0_257], %346 {strides = array<i32>} : memref<432x512xf32, #tpu.memory_space<vmem>>, vector<16x512xf32>,
    %c0_258 = arith.constant 0 : index
    %c121_259 = arith.constant 121 : index
    %348 = vector.load %arg9[%c0_258, %c121_259] : memref<16x768xf32, #tpu.memory_space<vmem>>, vector<16x512xf32>
    %349 = vector.extract_strided_slice %4 {offsets = [2, 0], sizes = [1, 512], strides = [1, 1]} : vector<9x512xf32> to vector<1x512xf32>
    %350 = vector.broadcast %349 : vector<1x512xf32> to vector<16x512xf32>
    %351 = arith.mulf %348, %350 : vector<16x512xf32>
    %c176_260 = arith.constant 176 : index
    %c0_261 = arith.constant 0 : index
    %352 = vector.load %arg8[%c176_260, %c0_261] : memref<432x512xf32, #tpu.memory_space<vmem>>, vector<16x512xf32>
    tpu.vector_store %arg8[%c176_260, %c0_261], %351 {strides = array<i32>} : memref<432x512xf32, #tpu.memory_space<vmem>>, vector<16x512xf32>,
    %c0_262 = arith.constant 0 : index
    %c127_263 = arith.constant 127 : index
    %353 = vector.load %arg9[%c0_262, %c127_263] : memref<16x768xf32, #tpu.memory_space<vmem>>, vector<16x512xf32>
    %354 = vector.extract_strided_slice %4 {offsets = [3, 0], sizes = [1, 512], strides = [1, 1]} : vector<9x512xf32> to vector<1x512xf32>
    %355 = vector.broadcast %354 : vector<1x512xf32> to vector<16x512xf32>
    %356 = arith.mulf %353, %355 : vector<16x512xf32>
    %c192_264 = arith.constant 192 : index
    %c0_265 = arith.constant 0 : index
    %357 = vector.load %arg8[%c192_264, %c0_265] : memref<432x512xf32, #tpu.memory_space<vmem>>, vector<16x512xf32>
    tpu.vector_store %arg8[%c192_264, %c0_265], %356 {strides = array<i32>} : memref<432x512xf32, #tpu.memory_space<vmem>>, vector<16x512xf32>,
    %c0_266 = arith.constant 0 : index
    %c128_267 = arith.constant 128 : index
    %358 = vector.load %arg9[%c0_266, %c128_267] : memref<16x768xf32, #tpu.memory_space<vmem>>, vector<16x512xf32>
    %c208_268 = arith.constant 208 : index
    %c0_269 = arith.constant 0 : index
    %359 = vector.load %arg8[%c208_268, %c0_269] : memref<432x512xf32, #tpu.memory_space<vmem>>, vector<16x512xf32>
    tpu.vector_store %arg8[%c208_268, %c0_269], %358 {strides = array<i32>} : memref<432x512xf32, #tpu.memory_space<vmem>>, vector<16x512xf32>,
    %c0_270 = arith.constant 0 : index
    %c129_271 = arith.constant 129 : index
    %360 = vector.load %arg9[%c0_270, %c129_271] : memref<16x768xf32, #tpu.memory_space<vmem>>, vector<16x512xf32>
    %361 = vector.extract_strided_slice %4 {offsets = [5, 0], sizes = [1, 512], strides = [1, 1]} : vector<9x512xf32> to vector<1x512xf32>
    %362 = vector.broadcast %361 : vector<1x512xf32> to vector<16x512xf32>
    %363 = arith.mulf %360, %362 : vector<16x512xf32>
    %c224_272 = arith.constant 224 : index
    %c0_273 = arith.constant 0 : index
    %364 = vector.load %arg8[%c224_272, %c0_273] : memref<432x512xf32, #tpu.memory_space<vmem>>, vector<16x512xf32>
    tpu.vector_store %arg8[%c224_272, %c0_273], %363 {strides = array<i32>} : memref<432x512xf32, #tpu.memory_space<vmem>>, vector<16x512xf32>,
    %c0_274 = arith.constant 0 : index
    %c135_275 = arith.constant 135 : index
    %365 = vector.load %arg9[%c0_274, %c135_275] : memref<16x768xf32, #tpu.memory_space<vmem>>, vector<16x512xf32>
    %366 = vector.extract_strided_slice %4 {offsets = [6, 0], sizes = [1, 512], strides = [1, 1]} : vector<9x512xf32> to vector<1x512xf32>
    %367 = vector.broadcast %366 : vector<1x512xf32> to vector<16x512xf32>
    %368 = arith.mulf %365, %367 : vector<16x512xf32>
    %c240_276 = arith.constant 240 : index
    %c0_277 = arith.constant 0 : index
    %369 = vector.load %arg8[%c240_276, %c0_277] : memref<432x512xf32, #tpu.memory_space<vmem>>, vector<16x512xf32>
    tpu.vector_store %arg8[%c240_276, %c0_277], %368 {strides = array<i32>} : memref<432x512xf32, #tpu.memory_space<vmem>>, vector<16x512xf32>,
    %c0_278 = arith.constant 0 : index
    %c136_279 = arith.constant 136 : index
    %370 = vector.load %arg9[%c0_278, %c136_279] : memref<16x768xf32, #tpu.memory_space<vmem>>, vector<16x512xf32>
    %371 = vector.extract_strided_slice %4 {offsets = [7, 0], sizes = [1, 512], strides = [1, 1]} : vector<9x512xf32> to vector<1x512xf32>
    %372 = vector.broadcast %371 : vector<1x512xf32> to vector<16x512xf32>
    %373 = arith.mulf %370, %372 : vector<16x512xf32>
    %c256_280 = arith.constant 256 : index
    %c0_281 = arith.constant 0 : index
    %374 = vector.load %arg8[%c256_280, %c0_281] : memref<432x512xf32, #tpu.memory_space<vmem>>, vector<16x512xf32>
    tpu.vector_store %arg8[%c256_280, %c0_281], %373 {strides = array<i32>} : memref<432x512xf32, #tpu.memory_space<vmem>>, vector<16x512xf32>,
    %c0_282 = arith.constant 0 : index
    %c137_283 = arith.constant 137 : index
    %375 = vector.load %arg9[%c0_282, %c137_283] : memref<16x768xf32, #tpu.memory_space<vmem>>, vector<16x512xf32>
    %376 = vector.extract_strided_slice %4 {offsets = [8, 0], sizes = [1, 512], strides = [1, 1]} : vector<9x512xf32> to vector<1x512xf32>
    %377 = vector.broadcast %376 : vector<1x512xf32> to vector<16x512xf32>
    %378 = arith.mulf %375, %377 : vector<16x512xf32>
    %c272_284 = arith.constant 272 : index
    %c0_285 = arith.constant 0 : index
    %379 = vector.load %arg8[%c272_284, %c0_285] : memref<432x512xf32, #tpu.memory_space<vmem>>, vector<16x512xf32>
    tpu.vector_store %arg8[%c272_284, %c0_285], %378 {strides = array<i32>} : memref<432x512xf32, #tpu.memory_space<vmem>>, vector<16x512xf32>,
    %c0_286 = arith.constant 0 : index
    %c183_287 = arith.constant 183 : index
    %380 = vector.load %arg9[%c0_286, %c183_287] : memref<16x768xf32, #tpu.memory_space<vmem>>, vector<16x512xf32>
    %381 = vector.extract_strided_slice %4 {offsets = [0, 0], sizes = [1, 512], strides = [1, 1]} : vector<9x512xf32> to vector<1x512xf32>
    %382 = vector.broadcast %381 : vector<1x512xf32> to vector<16x512xf32>
    %383 = arith.mulf %380, %382 : vector<16x512xf32>
    %c288_288 = arith.constant 288 : index
    %c0_289 = arith.constant 0 : index
    %384 = vector.load %arg8[%c288_288, %c0_289] : memref<432x512xf32, #tpu.memory_space<vmem>>, vector<16x512xf32>
    tpu.vector_store %arg8[%c288_288, %c0_289], %383 {strides = array<i32>} : memref<432x512xf32, #tpu.memory_space<vmem>>, vector<16x512xf32>,
    %c0_290 = arith.constant 0 : index
    %c184_291 = arith.constant 184 : index
    %385 = vector.load %arg9[%c0_290, %c184_291] : memref<16x768xf32, #tpu.memory_space<vmem>>, vector<16x512xf32>
    %386 = vector.extract_strided_slice %4 {offsets = [1, 0], sizes = [1, 512], strides = [1, 1]} : vector<9x512xf32> to vector<1x512xf32>
    %387 = vector.broadcast %386 : vector<1x512xf32> to vector<16x512xf32>
    %388 = arith.mulf %385, %387 : vector<16x512xf32>
    %c304_292 = arith.constant 304 : index
    %c0_293 = arith.constant 0 : index
    %389 = vector.load %arg8[%c304_292, %c0_293] : memref<432x512xf32, #tpu.memory_space<vmem>>, vector<16x512xf32>
    tpu.vector_store %arg8[%c304_292, %c0_293], %388 {strides = array<i32>} : memref<432x512xf32, #tpu.memory_space<vmem>>, vector<16x512xf32>,
    %c0_294 = arith.constant 0 : index
    %c185_295 = arith.constant 185 : index
    %390 = vector.load %arg9[%c0_294, %c185_295] : memref<16x768xf32, #tpu.memory_space<vmem>>, vector<16x512xf32>
    %391 = vector.extract_strided_slice %4 {offsets = [2, 0], sizes = [1, 512], strides = [1, 1]} : vector<9x512xf32> to vector<1x512xf32>
    %392 = vector.broadcast %391 : vector<1x512xf32> to vector<16x512xf32>
    %393 = arith.mulf %390, %392 : vector<16x512xf32>
    %c320_296 = arith.constant 320 : index
    %c0_297 = arith.constant 0 : index
    %394 = vector.load %arg8[%c320_296, %c0_297] : memref<432x512xf32, #tpu.memory_space<vmem>>, vector<16x512xf32>
    tpu.vector_store %arg8[%c320_296, %c0_297], %393 {strides = array<i32>} : memref<432x512xf32, #tpu.memory_space<vmem>>, vector<16x512xf32>,
    %c0_298 = arith.constant 0 : index
    %c191_299 = arith.constant 191 : index
    %395 = vector.load %arg9[%c0_298, %c191_299] : memref<16x768xf32, #tpu.memory_space<vmem>>, vector<16x512xf32>
    %396 = vector.extract_strided_slice %4 {offsets = [3, 0], sizes = [1, 512], strides = [1, 1]} : vector<9x512xf32> to vector<1x512xf32>
    %397 = vector.broadcast %396 : vector<1x512xf32> to vector<16x512xf32>
    %398 = arith.mulf %395, %397 : vector<16x512xf32>
    %c336_300 = arith.constant 336 : index
    %c0_301 = arith.constant 0 : index
    %399 = vector.load %arg8[%c336_300, %c0_301] : memref<432x512xf32, #tpu.memory_space<vmem>>, vector<16x512xf32>
    tpu.vector_store %arg8[%c336_300, %c0_301], %398 {strides = array<i32>} : memref<432x512xf32, #tpu.memory_space<vmem>>, vector<16x512xf32>,
    %c0_302 = arith.constant 0 : index
    %c192_303 = arith.constant 192 : index
    %400 = vector.load %arg9[%c0_302, %c192_303] : memref<16x768xf32, #tpu.memory_space<vmem>>, vector<16x512xf32>
    %c352_304 = arith.constant 352 : index
    %c0_305 = arith.constant 0 : index
    %401 = vector.load %arg8[%c352_304, %c0_305] : memref<432x512xf32, #tpu.memory_space<vmem>>, vector<16x512xf32>
    tpu.vector_store %arg8[%c352_304, %c0_305], %400 {strides = array<i32>} : memref<432x512xf32, #tpu.memory_space<vmem>>, vector<16x512xf32>,
    %c0_306 = arith.constant 0 : index
    %c193_307 = arith.constant 193 : index
    %402 = vector.load %arg9[%c0_306, %c193_307] : memref<16x768xf32, #tpu.memory_space<vmem>>, vector<16x512xf32>
    %403 = vector.extract_strided_slice %4 {offsets = [5, 0], sizes = [1, 512], strides = [1, 1]} : vector<9x512xf32> to vector<1x512xf32>
    %404 = vector.broadcast %403 : vector<1x512xf32> to vector<16x512xf32>
    %405 = arith.mulf %402, %404 : vector<16x512xf32>
    %c368_308 = arith.constant 368 : index
    %c0_309 = arith.constant 0 : index
    %406 = vector.load %arg8[%c368_308, %c0_309] : memref<432x512xf32, #tpu.memory_space<vmem>>, vector<16x512xf32>
    tpu.vector_store %arg8[%c368_308, %c0_309], %405 {strides = array<i32>} : memref<432x512xf32, #tpu.memory_space<vmem>>, vector<16x512xf32>,
    %c0_310 = arith.constant 0 : index
    %c199_311 = arith.constant 199 : index
    %407 = vector.load %arg9[%c0_310, %c199_311] : memref<16x768xf32, #tpu.memory_space<vmem>>, vector<16x512xf32>
    %408 = vector.extract_strided_slice %4 {offsets = [6, 0], sizes = [1, 512], strides = [1, 1]} : vector<9x512xf32> to vector<1x512xf32>
    %409 = vector.broadcast %408 : vector<1x512xf32> to vector<16x512xf32>
    %410 = arith.mulf %407, %409 : vector<16x512xf32>
    %c384_312 = arith.constant 384 : index
    %c0_313 = arith.constant 0 : index
    %411 = vector.load %arg8[%c384_312, %c0_313] : memref<432x512xf32, #tpu.memory_space<vmem>>, vector<16x512xf32>
    tpu.vector_store %arg8[%c384_312, %c0_313], %410 {strides = array<i32>} : memref<432x512xf32, #tpu.memory_space<vmem>>, vector<16x512xf32>,
    %c0_314 = arith.constant 0 : index
    %c200_315 = arith.constant 200 : index
    %412 = vector.load %arg9[%c0_314, %c200_315] : memref<16x768xf32, #tpu.memory_space<vmem>>, vector<16x512xf32>
    %413 = vector.extract_strided_slice %4 {offsets = [7, 0], sizes = [1, 512], strides = [1, 1]} : vector<9x512xf32> to vector<1x512xf32>
    %414 = vector.broadcast %413 : vector<1x512xf32> to vector<16x512xf32>
    %415 = arith.mulf %412, %414 : vector<16x512xf32>
    %c400_316 = arith.constant 400 : index
    %c0_317 = arith.constant 0 : index
    %416 = vector.load %arg8[%c400_316, %c0_317] : memref<432x512xf32, #tpu.memory_space<vmem>>, vector<16x512xf32>
    tpu.vector_store %arg8[%c400_316, %c0_317], %415 {strides = array<i32>} : memref<432x512xf32, #tpu.memory_space<vmem>>, vector<16x512xf32>,
    %c0_318 = arith.constant 0 : index
    %c201_319 = arith.constant 201 : index
    %417 = vector.load %arg9[%c0_318, %c201_319] : memref<16x768xf32, #tpu.memory_space<vmem>>, vector<16x512xf32>
    %418 = vector.extract_strided_slice %4 {offsets = [8, 0], sizes = [1, 512], strides = [1, 1]} : vector<9x512xf32> to vector<1x512xf32>
    %419 = vector.broadcast %418 : vector<1x512xf32> to vector<16x512xf32>
    %420 = arith.mulf %417, %419 : vector<16x512xf32>
    %c416_320 = arith.constant 416 : index
    %c0_321 = arith.constant 0 : index
    %421 = vector.load %arg8[%c416_320, %c0_321] : memref<432x512xf32, #tpu.memory_space<vmem>>, vector<16x512xf32>
    tpu.vector_store %arg8[%c416_320, %c0_321], %420 {strides = array<i32>} : memref<432x512xf32, #tpu.memory_space<vmem>>, vector<16x512xf32>,
    %c0_322 = arith.constant 0 : index
    %c0_323 = arith.constant 0 : index
    %422 = vector.load %arg5[%c0_322, %c0_323] : memref<8x432xf32, #tpu.memory_space<vmem>>, vector<8x432xf32>
    %c0_324 = arith.constant 0 : index
    %c0_325 = arith.constant 0 : index
    %423 = vector.load %arg8[%c0_324, %c0_325] : memref<432x512xf32, #tpu.memory_space<vmem>>, vector<432x512xf32>
    %cst_326 = arith.constant dense<0.000000e+00> : vector<8x512xf32>
    %424 = tpu.matmul %422, %423, %cst_326 {dimension_numbers = #tpu.dot_dimension_numbers<[1], [0], [0], [1], [0, 0, 1, 1], [], []>} : vector<8x432xf32>, vector<432x512xf32>, vector<8x512xf32> -> vector<8x512xf32>
    %c0_327 = arith.constant 0 : index
    %c0_328 = arith.constant 0 : index
    %c0_329 = arith.constant 0 : index
    %425 = vector.load %arg2[%c0_327, %c0_328, %c0_329] : memref<1x8x512xf32, #tpu.memory_space<vmem>>, vector<1x8x512xf32>
    %426 = vector.shape_cast %425 : vector<1x8x512xf32> to vector<8x512xf32>
    %427 = arith.addf %424, %426 : vector<8x512xf32>
    %c0_330 = arith.constant 0 : index
    %c0_331 = arith.constant 0 : index
    %c0_332 = arith.constant 0 : index
    %428 = vector.load %arg7[%c0_330, %c0_331, %c0_332] : memref<1x8x512xf32, #tpu.memory_space<vmem>>, vector<1x8x512xf32>
    %429 = vector.shape_cast %428 : vector<1x8x512xf32> to vector<8x512xf32>
    %430 = vector.shape_cast %427 : vector<8x512xf32> to vector<1x8x512xf32>
    tpu.vector_store %arg7[%c0_330, %c0_331, %c0_332], %430 {strides = array<i32>} : memref<1x8x512xf32, #tpu.memory_space<vmem>>, vector<1x8x512xf32>,
    return
  }
  func.func @transform_0(%arg0: i32) -> (i32, i32, i32) {
    %c0_i32 = arith.constant 0 : i32
    %c0_i32_0 = arith.constant 0 : i32
    %c0_i32_1 = arith.constant 0 : i32
    return %arg0, %c0_i32, %c0_i32_0 : i32, i32, i32
  }
  func.func @transform_1(%arg0: i32) -> (i32, i32, i32) {
    %c0_i32 = arith.constant 0 : i32
    %c0_i32_0 = arith.constant 0 : i32
    %c0_i32_1 = arith.constant 0 : i32
    return %arg0, %c0_i32, %c0_i32_0 : i32, i32, i32
  }
  func.func @transform_2(%arg0: i32) -> (i32, i32) {
    %c0_i32 = arith.constant 0 : i32
    %c0_i32_0 = arith.constant 0 : i32
    %c0_i32_1 = arith.constant 0 : i32
    return %c0_i32, %c0_i32_0 : i32, i32
  }
  func.func @transform_3(%arg0: i32) -> (i32, i32) {
    %c0_i32 = arith.constant 0 : i32
    %c0_i32_0 = arith.constant 0 : i32
    %c0_i32_1 = arith.constant 0 : i32
    return %c0_i32, %c0_i32_0 : i32, i32
  }
  func.func @transform_4(%arg0: i32) -> (i32, i32) {
    %c0_i32 = arith.constant 0 : i32
    %c0_i32_0 = arith.constant 0 : i32
    %c0_i32_1 = arith.constant 0 : i32
    return %c0_i32, %c0_i32_0 : i32, i32
  }
  func.func @transform_5(%arg0: i32) -> (i32, i32) {
    %c0_i32 = arith.constant 0 : i32
    %c0_i32_0 = arith.constant 0 : i32
    %c0_i32_1 = arith.constant 0 : i32
    return %c0_i32, %c0_i32_0 : i32, i32
  }
  func.func @transform_6(%arg0: i32) -> (i32, i32, i32) {
    %c0_i32 = arith.constant 0 : i32
    %c0_i32_0 = arith.constant 0 : i32
    %c0_i32_1 = arith.constant 0 : i32
    return %arg0, %c0_i32, %c0_i32_0 : i32, i32, i32
  }
}

</mosaic_0001>

<bundles_post_ra>
// kernel: tpu_custom_call.1
= control target key start
LH: loop header
LB: loop body
LE: loop exit
PB: predicated region body
PF: predicated region fallthrough
CT: control target
= control target key end

     0   :  { %s17307_s0 = inlined_call_operand.hbm [shape: f32[2,16,768], index: 0, kind: input, shape index: {}]   ;;  %s17308_s1 = inlined_call_operand.hbm [shape: f32[2,8,512], index: 1, kind: input, shape index: {}]   ;;  %s17309_s2 = inlined_call_operand.hbm [shape: f32[16,432], index: 2, kind: input, shape index: {}]   ;;  %s17310_s3 = inlined_call_operand.hbm [shape: f32[16,432], index: 3, kind: input, shape index: {}]   ;;  %s17311_s4 = inlined_call_operand.hbm [shape: f32[8,432], index: 4, kind: input, shape index: {}]   ;;  %s17312_s5 = inlined_call_operand.hbm [shape: f32[9,512], index: 5, kind: input, shape index: {}]   ;;  %s17313_s6 = inlined_call_operand.hbm [shape: f32[2,8,512], index: 6, kind: output, shape index: {}]  }
   0x1   :  { %17942 = sst [smem:[#allocation185_spill]] %s17307_s0 }
   0x2   :  { %17943 = sst [smem:[#allocation186_spill]] %s17309_s2 }
   0x3   :  { %17944 = sst [smem:[#allocation187_spill]] %s17310_s3 }
   0x4   :  { %17945 = sst [smem:[#allocation188_spill]] %s17311_s4 }
   0x5   :  { %11 = vsyncpa [#allocation5], 0 }
   0x6   :  { %13 = vsyncpa [#allocation5 + $0x1], 0 }
   0x7   :  { %14 = vsyncpa [#allocation8], 0 }
   0x8   :  { %16 = vsyncpa [#allocation8 + $0x1], 0 }
   0x9   :  { %17 = vsyncpa [#allocation11], 0 }
   0xa   :  { %18 = vsyncpa [#allocation14], 0 }
   0xb   :  { %19 = vsyncpa [#allocation6], 0 }
   0xc   :  { %21 = vsyncpa [#allocation6 + $0x1], 0  ;;  %s11441_s21 = smov 0   ;;  %s11443_s22 = smov 0  }
   0xd   :  { %s11445_s23 = smov 0   ;;  %s11447_s24 = smov 0  }
   0xe LB: > { %s11462_s25 = sadd.s32 4294967295, %s11375_s24   ;;  %s8339_s26 = sadd.s32 4294967294, %s11375_s24   ;;  %s11375_s24 = sphi %s11447_s24, %s19287_s24   ;;  %s11371_s23 = sphi %s11445_s23, %s19286_s23   ;;  %s11367_s22 = sphi %s11443_s22, %s19285_s22   ;;  %s11363_s21 = sphi %s11441_s21, %s19284_s21  }
   0xf   : > { %p47_p0 = scmp.ne.s32.totalorder %s11367_s22, %s11363_s21  ;;  %p17314_p1 = scmp.eq.s32.totalorder %s11462_s25, 0 }
  0x10   : > { %p187_p3 = scmp.eq.s32.totalorder %s8339_s26, 1  ;;  %p8340_p5 = scmp.ge.s32.totalorder %s11375_s24, 1 }
  0x11   : > { %p11471_p4 = por %p17314_p1, %p47_p0  ;;  %p194_p7 = scmp.lt.s32.totalorder %s11375_s24, 3 }
  0x12   : > { %p11476_p6 = por %p187_p3, %p47_p0  ;;  %s11377_s30 = smov [#allocation9]  }
  0x13   : > { %s17946_s27 = scalar_select %p11471_p4, 1, 0 }
  0x14   : > { %s17947_s28 = scalar_select %p11476_p6, 1, 0 }
  0x15   : > { %p11481_p8 = pnand %p8340_p5, %p194_p7  ;;  %s206_s7 = sshll.u32 %s11377_s30, 4  ;;  %s11485_s7 = int_to_ptr.vmem [resolvable:$true] %s206_s7 }
  0x16   : > { %s11378_s9 = smov [#allocation10]   ;;  %s11379_s11 = smov [#allocation12]  }
  0x17   : > { %s17948_s29 = scalar_select %p11481_p8, 1, 0 }
  0x18   : > { %p9075_p9 = pneg %p11481_p8  ;;  %s219_s10 = sshll.u32 %s11378_s9, 4  ;;  %s11496_s10 = int_to_ptr.vmem [resolvable:$true] %s219_s10 }
  0x19   : > { %s11498_s12 = sshll.u32 %s11379_s11, 4  ;;  %s17950_s2 = sld [smem:[#allocation186_spill]]  ;;  %s234_s12 = int_to_ptr.vmem [resolvable:$true] %s11498_s12 }
  0x1a   : > { %p11492_p11 = pnand %p9075_p9, %p17314_p1 }
  0x1c   : > { %p11508_p13 = pneg %p11492_p11 }
  0x1f   : > { %s11121_s15 = scalar_lea.hbm %s17950_s2, 1024 }
  0x20   : > { %p11122_p12 = scmp.ne.s32.totalorder %s17950_s2, %s11121_s15  ;;  %p11128_p5 = scmp.lt.u32.totalorder %s11121_s15, %s17950_s2 }
  0x22   : > { %p11124_p0 = pnand %p11508_p13, %p11122_p12 }
  0x24   : > { %p11125_p3 = pneg %p11124_p0 }
  0x26   : > { %p11130_p7 = pnand %p11128_p5, %p11125_p3 }
  0x28   : > { %11133 = shalt.err (!%p11130_p7)
}
  0x29   : > { %s11134_s26 = scalar_lea.vmem %s11485_s7, 1024  ;;  %p11142_p2 = scmp.lt.s32.totalorder %s11485_s7, %s11485_s7 }
  0x2a   : > { %p11135_p9 = scmp.ne.s32.totalorder %s11485_s7, %s11134_s26  ;;  %p11143_p6 = scmp.lt.s32.totalorder %s11134_s26, %s11134_s26 }
  0x2c   : > { %p11137_p10 = pnand %p11135_p9, %p11508_p13  ;;  %p11144_p12 = por %p11143_p6, %p11142_p2 }
  0x2e   : > { %p11138_p1 = pneg %p11137_p10 }
  0x30   : > { %p11145_p0 = pnand %p11144_p12, %p11138_p1 }
  0x32   : > { %11148 = shalt.err (!%p11145_p0)
}
  0x33   : > { %s11380_s30 = smov 512   ;;  %s11381_s9 = smov 32  }
  0x34   : > { %9078 = dma.hbm_to_vmem [thread:$0]  (!%p11492_p11), %s17950_s2, 1024, %s11485_s7, [#allocation8], %s11380_s30, %s11380_s30, %s11381_s9  }
  0x35   : > { %s17952_s3 = sld [smem:[#allocation187_spill]] }
  0x3b   : > { %s11149_s16 = scalar_lea.hbm %s17952_s3, 1024 }
  0x3c   : > { %p11150_p1 = scmp.ne.s32.totalorder %s17952_s3, %s11149_s16  ;;  %p11156_p10 = scmp.lt.u32.totalorder %s11149_s16, %s17952_s3 }
  0x3e   : > { %p11152_p2 = pnand %p11150_p1, %p11508_p13 }
  0x40   : > { %p11153_p6 = pneg %p11152_p2 }
  0x42   : > { %p11158_p3 = pnand %p11156_p10, %p11153_p6 }
  0x44   : > { %11161 = shalt.err (!%p11158_p3)
}
  0x45   : > { %s11162_s7 = scalar_lea.vmem %s11496_s10, 1024  ;;  %p11170_p12 = scmp.lt.s32.totalorder %s11496_s10, %s11496_s10 }
  0x46   : > { %p11163_p5 = scmp.ne.s32.totalorder %s11496_s10, %s11162_s7  ;;  %p11171_p0 = scmp.lt.s32.totalorder %s11162_s7, %s11162_s7 }
  0x48   : > { %p11165_p7 = pnand %p11163_p5, %p11508_p13  ;;  %p11172_p1 = por %p11171_p0, %p11170_p12 }
  0x4a   : > { %p11166_p9 = pneg %p11165_p7 }
  0x4c   : > { %p11173_p2 = pnand %p11172_p1, %p11166_p9 }
  0x4e   : > { %11176 = shalt.err (!%p11173_p2)
}
  0x4f   : > { %9081 = dma.hbm_to_vmem [thread:$0]  (!%p11492_p11), %s17952_s3, 1024, %s11496_s10, [#allocation11], %s11380_s30, %s11380_s30, %s11381_s9  }
  0x50   : > { %s17953_s4 = sld [smem:[#allocation188_spill]] }
  0x56   : > { %s11177_s16 = scalar_lea.hbm %s17953_s4, 512 }
  0x57   : > { %p11178_p6 = scmp.ne.s32.totalorder %s17953_s4, %s11177_s16  ;;  %p11184_p5 = scmp.lt.u32.totalorder %s11177_s16, %s17953_s4 }
  0x59   : > { %p11180_p10 = pnand %p11178_p6, %p11508_p13 }
  0x5b   : > { %p11181_p3 = pneg %p11180_p10 }
  0x5d   : > { %p11186_p7 = pnand %p11184_p5, %p11181_p3 }
  0x5f   : > { %11189 = shalt.err (!%p11186_p7)
}
  0x60   : > { %s11190_s7 = scalar_lea.vmem %s234_s12, 512  ;;  %p11198_p1 = scmp.lt.s32.totalorder %s234_s12, %s234_s12 }
  0x61   : > { %p11191_p9 = scmp.ne.s32.totalorder %s234_s12, %s11190_s7  ;;  %p11199_p2 = scmp.lt.s32.totalorder %s11190_s7, %s11190_s7 }
  0x63   : > { %p11193_p12 = pnand %p11191_p9, %p11508_p13  ;;  %p11200_p4 = por %p11199_p2, %p11198_p1 }
  0x65   : > { %p11194_p0 = pneg %p11193_p12 }
  0x67   : > { %p11201_p8 = pnand %p11200_p4, %p11194_p0 }
  0x69   : > { %11204 = shalt.err (!%p11201_p8)
}
  0x6a   : > { %9084 = dma.hbm_to_vmem [thread:$0]  (!%p11492_p11), %s17953_s4, 512, %s234_s12, [#allocation11]  }
  0x6b   : > { %s11382_s13 = smov [#allocation13]   ;;  %s11205_s17 = scalar_lea.hbm %s17312_s5, 1024 }
  0x6c   : > { %s243_s14 = sshll.u32 %s11382_s13, 4  ;;  %p11206_p6 = scmp.ne.s32.totalorder %s17312_s5, %s11205_s17  ;;  %s244_s14 = int_to_ptr.vmem [resolvable:$true] %s243_s14 }
  0x6d   : > { %p11212_p10 = scmp.lt.u32.totalorder %s11205_s17, %s17312_s5 }
  0x6e   : > { %p11208_p4 = pnand %p11206_p6, %p11508_p13 }
  0x70   : > { %p11209_p8 = pneg %p11208_p4 }
  0x72   : > { %p11214_p3 = pnand %p11212_p10, %p11209_p8 }
  0x74   : > { %11217 = shalt.err (!%p11214_p3)
}
  0x75   : > { %s11218_s12 = scalar_lea.vmem %s244_s14, 1024  ;;  %p11226_p12 = scmp.lt.s32.totalorder %s244_s14, %s244_s14 }
  0x76   : > { %p11219_p5 = scmp.ne.s32.totalorder %s244_s14, %s11218_s12  ;;  %p11227_p0 = scmp.lt.s32.totalorder %s11218_s12, %s11218_s12 }
  0x78   : > { %p11221_p7 = pnand %p11219_p5, %p11508_p13  ;;  %p11228_p1 = por %p11227_p0, %p11226_p12 }
  0x7a   : > { %p11222_p9 = pneg %p11221_p7 }
  0x7c   : > { %p11229_p2 = pnand %p11228_p1, %p11222_p9 }
  0x7e   : > { %11232 = shalt.err (!%p11229_p2)
}
  0x7f   : > { %9087 = dma.hbm_to_vmem [thread:$0]  (!%p11492_p11), %s17312_s5, 1024, %s244_s14, [#allocation14], %s11380_s30, %s11380_s30, %s11381_s9  }
  0x80   : > { %s11599_s18 = sadd.s32 1, %s11375_s24   ;;  %s34_s8 = sadd.s32 1, %s11371_s23 }
  0x81   : > { %s31_s13 = ssub.s32 %s11375_s24, %s11599_s18  ;;  %p41_p13 = scmp.ne.s32.totalorder %s11371_s23, %s11367_s22 }
  0x82   : > { %p32_p6 = scmp.eq.s32.totalorder %s31_s13, 0  ;;  %p42_p4 = scmp.eq.s32.totalorder %s11375_s24, 0 }
  0x83   : > { %p17954_p8 = scmp.eq.s32.totalorder %s11462_s25, 1  ;;  %p9103_p3 = scmp.lt.s32.totalorder %s11375_s24, 2 }
  0x84   : > { %s11615_s16 = scalar_select %p32_p6, %s11371_s23, %s34_s8  }
  0x85   : > { %p11609_p10 = por %p17954_p8, %p41_p13  ;;  %p43_p5 = por %p42_p4, %p41_p13 }
  0x86   : > { %s11618_s17 = sand.u32 1, %s11371_s23   ;;  %s9051_s9 = smul.u32 1536, %s11375_s24 }
  0x87   : > { %s17955_s15 = scalar_select %p11609_p10, 1, 0 }
  0x88   : > { %s9050_s30 = smul.u32 96, %s11618_s17  ;;  %p11622_p11 = pnand %p9103_p3, %p43_p5 }
  0x89   : > { %s17957_s0 = sld [smem:[#allocation185_spill]]  ;;  %s258_s11 = scalar_lea.sflag [#allocation5], %s11618_s17 }
  0x8a   : > { %s261_s7 = scalar_lea.vmem [#allocation4], %s9050_s30  ;;  %p11235_p9 = pneg %p11622_p11 }
  0x8b   : > { %s268_s12 = sshll.u32 %s261_s7, 4  ;;  %s11631_s12 = int_to_ptr.vmem [resolvable:$true] %s268_s12 }
  0x8f   : > { %s11629_s26 = scalar_lea.hbm %s17957_s0, %s9051_s9  ;;  %s11238_s19 = scalar_lea.hbm %s17957_s0, 3072 }
  0x90   : > { %s11233_s8 = scalar_lea.hbm %s11629_s26, 1536  ;;  %p11239_p1 = scmp.lt.u32.totalorder %s11629_s26, %s17957_s0 }
  0x91   : > { %p11234_p7 = scmp.ne.s32.totalorder %s11629_s26, %s11233_s8  ;;  %p11240_p2 = scmp.lt.u32.totalorder %s11238_s19, %s11233_s8 }
  0x92   : > { %p11242_p6 = scmp.lt.u32.totalorder %s11233_s8, %s11629_s26 }
  0x93   : > { %p11236_p12 = pnand %p11235_p9, %p11234_p7  ;;  %p11241_p13 = por %p11240_p2, %p11239_p1 }
  0x95   : > { %p11237_p0 = pneg %p11236_p12  ;;  %p11243_p4 = por %p11242_p6, %p11241_p13 }
  0x97   : > { %p11244_p8 = pnand %p11243_p4, %p11237_p0 }
  0x99   : > { %11247 = shalt.err (!%p11244_p8)
}
  0x9a   : > { %s11248_s30 = scalar_lea.vmem %s11631_s12, 1536  ;;  %s11383_s7 = smov [#allocation4]  }
  0x9b   : > { %p11249_p3 = scmp.ne.s32.totalorder %s11631_s12, %s11248_s30  ;;  %s11253_s13 = sshll.u32 %s11383_s7, 4  ;;  %s11254_s13 = int_to_ptr.vmem [resolvable:$false] %s11253_s13 }
  0x9c   : > { %s11255_s2 = scalar_lea.vmem %s11254_s13, 3072  ;;  %p11256_p12 = scmp.lt.s32.totalorder %s11631_s12, %s11254_s13 }
  0x9d   : > { %p11251_p5 = pnand %p11249_p3, %p11235_p9  ;;  %p11257_p1 = scmp.lt.s32.totalorder %s11255_s2, %s11248_s30 }
  0x9f   : > { %p11252_p7 = pneg %p11251_p5  ;;  %p11258_p2 = por %p11257_p1, %p11256_p12 }
  0xa1   : > { %p11259_p13 = pnand %p11258_p2, %p11252_p7 }
  0xa3   : > { %11262 = shalt.err (!%p11259_p13)
}
  0xa4   : > { %s11384_s8 = smov 768   ;;  %s11385_s9 = smov 48  }
  0xa5   : > { %9091 = dma.hbm_to_vmem [thread:$0]  (!%p11622_p11), %s11629_s26, 1536, %s11631_s12, %s258_s11, %s11384_s8, %s11384_s8, %s11385_s9  }
  0xa6   : > { %s8347_s19 = sshll.u32 %s11618_s17, 5  ;;  %s8376_s20 = sshll.u32 %s11375_s24, 9 }
  0xa7   : > { %s11667_s13 = scalar_lea.hbm %s17308_s1, %s8376_s20  ;;  %s282_s2 = scalar_lea.vmem [#allocation7], %s8347_s19 }
  0xa8   : > { %s290_s10 = sshll.u32 %s282_s2, 4  ;;  %s17958_s0 = sand.u32 1, %s11375_s24   ;;  %s291_s10 = int_to_ptr.vmem [resolvable:$true] %s290_s10 }
  0xa9   : > { %s279_s3 = scalar_lea.sflag [#allocation8], %s17958_s0  ;;  %s11263_s4 = scalar_lea.hbm %s11667_s13, 512 }
  0xaa   : > { %p11264_p0 = scmp.ne.s32.totalorder %s11667_s13, %s11263_s4  ;;  %s11268_s12 = scalar_lea.hbm %s17308_s1, 1024 }
  0xab   : > { %p11269_p8 = scmp.lt.u32.totalorder %s11667_s13, %s17308_s1  ;;  %p11270_p3 = scmp.lt.u32.totalorder %s11268_s12, %s11263_s4 }
  0xac   : > { %p11266_p6 = pnand %p11264_p0, %p11235_p9  ;;  %p11272_p7 = scmp.lt.u32.totalorder %s11263_s4, %s11667_s13 }
  0xad   : > { %p11271_p5 = por %p11270_p3, %p11269_p8 }
  0xae   : > { %p11267_p4 = pneg %p11266_p6 }
  0xaf   : > { %p11273_p12 = por %p11272_p7, %p11271_p5 }
  0xb1   : > { %p11274_p1 = pnand %p11273_p12, %p11267_p4 }
  0xb3   : > { %11277 = shalt.err (!%p11274_p1)
}
  0xb4   : > { %s11278_s0 = scalar_lea.vmem %s291_s10, 512  ;;  %s11386_s9 = smov [#allocation7]  }
  0xb5   : > { %p11279_p2 = scmp.ne.s32.totalorder %s291_s10, %s11278_s0  ;;  %s11283_s19 = sshll.u32 %s11386_s9, 4  ;;  %s11284_s19 = int_to_ptr.vmem [resolvable:$false] %s11283_s19 }
  0xb6   : > { %s11285_s20 = scalar_lea.vmem %s11284_s19, 1024  ;;  %p11286_p6 = scmp.lt.s32.totalorder %s291_s10, %s11284_s19 }
  0xb7   : > { %p11281_p13 = pnand %p11279_p2, %p11235_p9  ;;  %p11287_p10 = scmp.lt.s32.totalorder %s11285_s20, %s11278_s0 }
  0xb9   : > { %p11282_p0 = pneg %p11281_p13  ;;  %p11288_p3 = por %p11287_p10, %p11286_p6 }
  0xbb   : > { %p11289_p8 = pnand %p11288_p3, %p11282_p0 }
  0xbd   : > { %11292 = shalt.err (!%p11289_p8)
}
  0xbe   : > { %9094 = dma.hbm_to_vmem [thread:$0]  (!%p11622_p11), %s11667_s13, 512, %s291_s10, %s279_s3  }
  0xbf   : > { %p17959_p4 = scmp.ne.s32.totalorder %s17948_s29, 0 }
  0xc1   : > { %299 = sbr.rel (%p17959_p4) target bundleno = 3312 (0xcf0), region = 44 }
  0xc8   : > { %s11693_s4 = sand.u32 1, %s11367_s22   ;;  %p17960_p10 = scmp.ne.s32.totalorder %s17946_s27, 0 }
  0xc9   : > { %s9052_s7 = smul.u32 96, %s11693_s4  ;;  %s302_s30 = scalar_lea.sflag [#allocation5], %s11693_s4 }
  0xcb   : > { %s11697_s2 = scalar_lea.vmem [#allocation4], %s9052_s7 }
  0xcc   : > { %11338 = dma.done.wait (%p17960_p10), %s302_s30, 1536  }
  0xcd   : > { %11340 = vsyncadd (%p17960_p10), %s302_s30, 4294965760  ;;  %s310_s3 = sand.u32 1, %s11462_s25   ;;  %s17378_s29 = sshll.u32 %s11693_s4, 5 }
  0xce   : > { %s311_s14 = scalar_lea.sflag [#allocation8], %s310_s3  ;;  %s11707_s10 = scalar_lea.vmem [#allocation7], %s17378_s29 }
  0xcf   : > { %11342 = dma.done.wait (%p17960_p10), %s311_s14, 512  }
  0xd0   : > { %11344 = vsyncadd (%p17960_p10), %s311_s14, 4294966784  ;;  %p17961_p11 = scmp.eq.s32.totalorder %s11462_s25, 0 }
  0xd2   : > { %11346 = dma.done.wait (%p17961_p11), [#allocation8], 1024   ;;  %p17962_p9 = pmov %p17961_p11 }
  0xd4   : > { %11348 = vsyncadd (%p17962_p9), [#allocation8], 4294966272  ;;  %p17963_p5 = pmov %p17962_p9 }
  0xd6   : > { %11350 = dma.done.wait (%p17963_p5), [#allocation11], 1536   ;;  %p17964_p7 = pmov %p17963_p5 }
  0xd7   : > { %p17965_p12 = pmov %p17963_p5 }
  0xd8   : > { %11352 = vsyncadd (%p17964_p7), [#allocation11], 4294965760 }
  0xd9   : > { %11354 = dma.done.wait (%p17965_p12), [#allocation14], 1024   ;;  %p17966_p1 = pmov %p17963_p5 }
  0xda   : > { %v386_v0 = vlaneseq  ;;  %v11728_v3 = vld [vmem:[#allocation13 + $0x10] sm:$0xff]  ;;  %v11730_v4 = vld [vmem:[#allocation13] sm:$0xff]  ;;  %v11732_v5 = vld [vmem:[#allocation13 + $0x18] sm:$0xff]  ;;  %s17387_s27 = smov 55   ;;  %s11388_s13 = smov 56   ;;  %vm17389_vm0 = vcmask 449536  }
  0xdb   : > { %11356 = vsyncadd (%p17966_p1), [#allocation14], 4294966272  ;;  %v11740_v8 = vld [vmem:[#allocation13 + $0x8] sm:$0xff]  ;;  %s11389_s17 = smov 57   ;;  %s11390_s26 = smov 63   ;;  %v11816_v26 = vld [vmem:[%s11697_s2 + $0x10] sm:$0xff] }
  0xdc   : > { %v11725_v1 = vshrl.u32 %v386_v0, 7  ;;  %v11819_v27 = vld [vmem:[%s11697_s2 + $0x18] sm:$0xff]  ;;  %v11822_v28 = vld [vmem:[%s11697_s2] sm:$0xff]  ;;  %v11825_v29 = vld [vmem:[%s11697_s2 + $0x8] sm:$0xff]  ;;  %s11391_s12 = smov 64   ;;  %s11392_s11 = smov 65  }
  0xdd   : > { %v9172_v30 = vpack.i.bf16 %v11819_v27, %v11816_v26  ;;  %v9167_v31 = vpack.i.bf16 %v11825_v29, %v11822_v28  ;;  %v11836_v32 = vld [vmem:[%s11697_s2 + $0x38] sm:$0xff]  ;;  %v11839_v33 = vld [vmem:[%s11697_s2 + $0x40] sm:$0xff]  ;;  %v11845_v35 = vld [vmem:[%s11697_s2 + $0x30] sm:$0xff]  ;;  %s11393_s8 = smov 71   ;;  %s11394_s0 = smov 72   ;;  %vm17752_vm1 = vcmask 457728  }
  0xde   : > { %v388_v2 = vsub.s32 0, %v11725_v1  ;;  %v500_v11 = vsub.s32 1, %v11725_v1  ;;  %v612_v16 = vsub.s32 2, %v11725_v1  ;;  %v724_v21 = vsub.s32 3, %v11725_v1  ;;  %v11842_v34 = vld [vmem:[%s11697_s2 + $0x20] sm:$0xff]  ;;  %v11855_v39 = vld [vmem:[%s11697_s2 + $0x48] sm:$0xff] }
  0xdf   : > { %v9182_v36 = vpack.i.bf16 %v11839_v33, %v11836_v32  ;;  %v9177_v37 = vpack.i.bf16 %v11845_v35, %v11842_v34  ;;  %v901_v38 = vsub.s32 5, %v11725_v1  ;;  %v11858_v40 = vld [vmem:[%s11697_s2 + $0x50] sm:$0xff]  ;;  %v1011_v45 = vsub.s32 6, %v11725_v1  ;;  %s11395_s9 = smov 73   ;;  %s11396_s19 = smov 119  }
  0xe0   : > { %v11735_v6 = vrot.slane %v11728_v3, %v388_v2  ;;  %v11738_v7 = vrot.slane %v11730_v4, %v388_v2  ;;  %v11747_v9 = vrot.slane %v11732_v5, %v388_v2  ;;  %v11750_v10 = vrot.slane %v11740_v8, %v388_v2  ;;  %s11397_s20 = smov 9   ;;  %s11398_s7 = smov 120  }
  0xe1   : > { %v11758_v12 = vrot.slane %v11730_v4, %v500_v11  ;;  %v11761_v13 = vrot.slane %v11740_v8, %v500_v11  ;;  %v11768_v14 = vrot.slane %v11728_v3, %v500_v11  ;;  %v11771_v15 = vrot.slane %v11732_v5, %v500_v11  ;;  %s11399_s30 = smov 8   ;;  %s11400_s3 = smov 121  }
  0xe2   : > { %410 = vrot.lane.b32.xlu1 %v11735_v6, %s17387_s27  ;;  %406 = vrot.lane.b32.xlu0 %v11738_v7, %s17387_s27  ;;  %v11779_v17 = vrot.slane %v11740_v8, %v612_v16  ;;  %v11782_v18 = vrot.slane %v11730_v4, %v612_v16  ;;  %v11789_v19 = vrot.slane %v11732_v5, %v612_v16  ;;  %v1121_v50 = vsub.s32 7, %v11725_v1  ;;  %s11401_s14 = smov 7   ;;  %s11402_s29 = smov 127  }
  0xe3   : > { %v11792_v20 = vrot.slane %v11728_v3, %v612_v16  ;;  %v11800_v22 = vrot.slane %v11730_v4, %v724_v21  ;;  %v11803_v23 = vrot.slane %v11740_v8, %v724_v21  ;;  %v11810_v24 = vrot.slane %v11728_v3, %v724_v21  ;;  %p19281_p13 = scmp.ne.s32.totalorder %s17955_s15, 0 }
  0xe4   : > { %v11813_v25 = vrot.slane %v11732_v5, %v724_v21  ;;  %v11863_v41 = vrot.slane %v11730_v4, %v901_v38  ;;  %v9187_v42 = vpack.i.bf16 %v11858_v40, %v11855_v39  ;;  %v11871_v43 = vrot.slane %v11728_v3, %v901_v38 }
  0xe5   : > { %17967 = vst [vmem:[#allocation22_spill] sm:$0xff] %v11800_v22  ;;  %17968 = vst [vmem:[#allocation23_spill] sm:$0xff] %v11803_v23  ;;  %v11874_v44 = vrot.slane %v11740_v8, %v901_v38  ;;  %v11882_v46 = vrot.slane %v11740_v8, %v1011_v45  ;;  %v11885_v47 = vrot.slane %v11732_v5, %v901_v38  ;;  %vm638_vm2 = vcmask 465920  }
  0xe6   : > { %412 = vrot.lane.b32.xlu1 %v11747_v9, %s17387_s27  ;;  %408 = vrot.lane.b32.xlu0 %v11750_v10, %s17387_s27  ;;  %17969 = vst [vmem:[#allocation24_spill] sm:$0xff] %v11810_v24  ;;  %17970 = vst [vmem:[#allocation25_spill] sm:$0xff] %v11813_v25  ;;  %v11892_v48 = vrot.slane %v11732_v5, %v1011_v45  ;;  %v11895_v49 = vrot.slane %v11730_v4, %v1011_v45  ;;  %vm750_vm3 = vcmask 515072   ;;  %vm799_vm4 = vcmask 531456  }
  0xe7   : > { %17971 = vst [vmem:[#allocation26_spill] sm:$0xff] %v11863_v41  ;;  %17972 = vst [vmem:[#allocation27_spill] sm:$0xff] %v11871_v43  ;;  %v11903_v51 = vrot.slane %v11730_v4, %v1121_v50  ;;  %v11906_v52 = vrot.slane %v11728_v3, %v1011_v45  ;;  %v11913_v53 = vrot.slane %v11728_v3, %v1121_v50  ;;  %vm687_vm5 = vcmask 580608  }
  0xe8   : > { %17973 = vst [vmem:[#allocation28_spill] sm:$0xff] %v11874_v44  ;;  %17974 = vst [vmem:[#allocation29_spill] sm:$0xff] %v11882_v46  ;;  %v11916_v54 = vrot.slane %v11740_v8, %v1121_v50  ;;  %v11923_v55 = vrot.slane %v11732_v5, %v1121_v50  ;;  %vm575_vm6 = vcmask 588800   ;;  %vm463_vm7 = vcmask 596992  }
  0xe9   : > { %17975 = vst [vmem:[#allocation30_spill] sm:$0xff] %v11885_v47  ;;  %17976 = vst [vmem:[#allocation31_spill] sm:$0xff] %v11892_v48  ;;  %vm864_vm8 = vcmask 523264   ;;  %vm17458_vm9 = vcmask 973824   ;;  %vm1396_vm10 = vcmask 72704   ;;  %vm17450_vm11 = vcmask 982016  }
  0xea   : > { %518 = vrot.lane.b32.xlu1 %v11758_v12, %s11388_s13  ;;  %520 = vrot.lane.b32.xlu0 %v11761_v13, %s11388_s13  ;;  %17977 = vst [vmem:[#allocation32_spill] sm:$0xff] %v11895_v49  ;;  %17978 = vst [vmem:[#allocation33_spill] sm:$0xff] %v11903_v51  ;;  %vm17463_vm12 = vcmask 64512   ;;  %vm17459_vm13 = vcmask 990208   ;;  %vm17462_vm14 = vcmask 56320   ;;  %vm17460_vm15 = vcmask 1039360  }
  0xeb   : > { %17979 = vst [vmem:[#allocation34_spill] sm:$0xff] %v11906_v52  ;;  %17980 = vst [vmem:[#allocation35_spill] sm:$0xff] %v11913_v53 }
  0xec   : > { %17981 = vst [vmem:[#allocation36_spill] sm:$0xff] %v11916_v54  ;;  %17982 = vst [vmem:[#allocation37_spill] sm:$0xff] %v11923_v55 }
  0xee   : > { %522 = vrot.lane.b32.xlu1 %v11768_v14, %s11388_s13  ;;  %524 = vrot.lane.b32.xlu0 %v11771_v15, %s11388_s13 }
  0xf2   : > { %632 = vrot.lane.b32.xlu1 %v11779_v17, %s11389_s17  ;;  %630 = vrot.lane.b32.xlu0 %v11782_v18, %s11389_s17 }
  0xf6   : > { %636 = vrot.lane.b32.xlu1 %v11789_v19, %s11389_s17  ;;  %634 = vrot.lane.b32.xlu0 %v11792_v20, %s11389_s17 }
  0xfa   : > { %742 = vrot.lane.b32.xlu1 %v11800_v22, %s11390_s26  ;;  %744 = vrot.lane.b32.xlu0 %v11803_v23, %s11390_s26 }
  0xfe   : > { %746 = vrot.lane.b32.xlu1 %v11810_v24, %s11390_s26  ;;  %748 = vrot.lane.b32.xlu0 %v11813_v25, %s11390_s26 }
 0x102   : > { %9173 = vrot.lane.b32.xlu1 %v9172_v30, %s11391_s12  ;;  %9168 = vrot.lane.b32.xlu0 %v9167_v31, %s11391_s12 }
 0x106   : > { %9183 = vrot.lane.b32.xlu1 %v9182_v36, %s11391_s12  ;;  %9178 = vrot.lane.b32.xlu0 %v9177_v37, %s11391_s12 }
 0x10a   : > { %919 = vrot.lane.b32.xlu1 %v11863_v41, %s11392_s11  ;;  %9188 = vrot.lane.b32.xlu0 %v9187_v42, %s11391_s12 }
 0x10e   : > { %923 = vrot.lane.b32.xlu1 %v11871_v43, %s11392_s11  ;;  %921 = vrot.lane.b32.xlu0 %v11874_v44, %s11392_s11 }
 0x112   : > { %1031 = vrot.lane.b32.xlu1 %v11882_v46, %s11393_s8  ;;  %925 = vrot.lane.b32.xlu0 %v11885_v47, %s11392_s11 }
 0x116   : > { %1035 = vrot.lane.b32.xlu1 %v11892_v48, %s11393_s8  ;;  %1029 = vrot.lane.b32.xlu0 %v11895_v49, %s11393_s8 }
 0x11a   : > { %1139 = vrot.lane.b32.xlu1 %v11903_v51, %s11394_s0  ;;  %1033 = vrot.lane.b32.xlu0 %v11906_v52, %s11393_s8 }
 0x11e   : > { %1143 = vrot.lane.b32.xlu1 %v11913_v53, %s11394_s0  ;;  %1141 = vrot.lane.b32.xlu0 %v11916_v54, %s11394_s0 }
 0x122   : > { %1145 = vrot.lane.b32.xlu0 %v11923_v55, %s11394_s0 }
 0x154   : > { %v11927_v56 = vpop.permute.xlu1 %410  ;;  %v11929_v57 = vpop.permute.xlu0 %406 }
 0x155   : > { %17983 = vst [vmem:[#allocation38_spill] sm:$0xff] %v11929_v57  ;;  %v428_v61 = vmul.f32 %v11845_v35, %v11929_v57  ;;  %v423_v47 = vmul.f32 %v11822_v28, %v11929_v57 }
 0x158   : > { %v11931_v58 = vpop.permute.xlu1 %412  ;;  %v11933_v59 = vpop.permute.xlu0 %408 }
 0x159   : > { %17984 = vst [vmem:[#allocation39_spill] sm:$0xff] %v11931_v58  ;;  %v427_v60 = vmul.f32 %v11842_v34, %v11931_v58  ;;  %v12004_v54 = vsel %vm17389_vm0, %v11929_v57, %v11933_v59 }
 0x15a   : > { %17993 = vst [vmem:[#allocation48_spill] sm:$0xff] %v12004_v54 }
 0x15b   : > { %v9192_v62 = vpack.i.bf16 %v428_v61, %v427_v60 }
 0x15c   : > { %v11939_v63 = vpop.permute.xlu1 %518  ;;  %v11941_v0 = vpop.permute.xlu0 %520 }
 0x15d   : > { %17985 = vst [vmem:[#allocation40_spill] sm:$0xff] %v11939_v63  ;;  %9193 = vrot.lane.b32.xlu0 %v9192_v62, %s11395_s9  ;;  %v540_v1 = vmul.f32 %v11845_v35, %v11939_v63 }
 0x160   : > { %v523_v2 = vpop.permute.xlu1 %522  ;;  %v11946_v3 = vpop.permute.xlu0 %524 }
 0x161   : > { %17986 = vst [vmem:[#allocation41_spill] sm:$0xff] %v11946_v3  ;;  %v539_v4 = vmul.f32 %v11842_v34, %v11946_v3  ;;  %v12033_v44 = vsel %vm17752_vm1, %v11941_v0, %v523_v2 }
 0x162   : > { %17997 = vst [vmem:[#allocation52_spill] sm:$0xff] %v12033_v44  ;;  %v537_v24 = vmul.f32 %v11816_v26, %v12033_v44 }
 0x163   : > { %v9197_v5 = vpack.i.bf16 %v540_v1, %v539_v4 }
 0x164   : > { %v11950_v8 = vpop.permute.xlu1 %632  ;;  %v11952_v11 = vpop.permute.xlu0 %630 }
 0x165   : > { %17987 = vst [vmem:[#allocation42_spill] sm:$0xff] %v11952_v11  ;;  %9198 = vrot.lane.b32.xlu1 %v9197_v5, %s11394_s0  ;;  %v652_v31 = vmul.f32 %v11845_v35, %v11952_v11 }
 0x168   : > { %v11955_v16 = vpop.permute.xlu1 %636  ;;  %v11957_v21 = vpop.permute.xlu0 %634 }
 0x169   : > { %17988 = vst [vmem:[#allocation43_spill] sm:$0xff] %v11955_v16  ;;  %v651_v30 = vmul.f32 %v11842_v34, %v11955_v16 }
 0x16b   : > { %v9202_v36 = vpack.i.bf16 %v652_v31, %v651_v30 }
 0x16c   : > { %v11963_v37 = vpop.permute.xlu1 %742  ;;  %v11965_v38 = vpop.permute.xlu0 %744 }
 0x16d   : > { %17989 = vst [vmem:[#allocation44_spill] sm:$0xff] %v11963_v37  ;;  %9203 = vrot.lane.b32.xlu0 %v9202_v36, %s11393_s8  ;;  %v764_v42 = vmul.f32 %v11845_v35, %v11963_v37 }
 0x170   : > { %v11970_v45 = vpop.permute.xlu1 %746  ;;  %v11972_v50 = vpop.permute.xlu0 %748 }
 0x171   : > { %17990 = vst [vmem:[#allocation45_spill] sm:$0xff] %v11972_v50  ;;  %v763_v60 = vmul.f32 %v11842_v34, %v11972_v50 }
 0x173   : > { %v9207_v61 = vpack.i.bf16 %v764_v42, %v763_v60 }
 0x174   : > { %v11976_v62 = vpop.permute.xlu1 %9173  ;;  %v11978_v1 = vpop.permute.xlu0 %9168 }
 0x175   : > { %9208 = vrot.lane.b32.xlu1 %v9207_v61, %s11392_s11 }
 0x178   : > { %v11981_v4 = vpop.permute.xlu1 %9183  ;;  %v11983_v5 = vpop.permute.xlu0 %9178 }
 0x17c   : > { %v11985_v30 = vpop.permute.xlu1 %919  ;;  %v11987_v31 = vpop.permute.xlu0 %9188 }
 0x17d   : > { %17991 = vst [vmem:[#allocation46_spill] sm:$0xff] %v11985_v30  ;;  %v940_v42 = vmul.f32 %v11985_v30, %v11845_v35 }
 0x180   : > { %v11989_v36 = vpop.permute.xlu1 %923  ;;  %v11991_v53 = vpop.permute.xlu0 %921 }
 0x184   : > { %v11995_v60 = vpop.permute.xlu1 %1031  ;;  %v11997_v55 = vpop.permute.xlu0 %925 }
 0x185   : > { %17992 = vst [vmem:[#allocation47_spill] sm:$0xff] %v11997_v55  ;;  %v939_v61 = vmul.f32 %v11997_v55, %v11842_v34 }
 0x187   : > { %v9212_v51 = vpack.i.bf16 %v940_v42, %v939_v61  ;;  %v424_v42 = vmul.f32 %v11825_v29, %v12004_v54 }
 0x188   : > { %v12006_v52 = vpop.permute.xlu1 %1035  ;;  %v12008_v48 = vpop.permute.xlu0 %1029 }
 0x189   : > { %17994 = vst [vmem:[#allocation49_spill] sm:$0xff] %v12006_v52  ;;  %17995 = vst [vmem:[#allocation50_spill] sm:$0xff] %v12008_v48  ;;  %9213 = vrot.lane.b32.xlu1 %v9212_v51, %s11390_s26  ;;  %v1049_v49 = vmul.f32 %v12006_v52, %v11842_v34  ;;  %v1050_v46 = vmul.f32 %v12008_v48, %v11845_v35  ;;  %v12025_v51 = vsel %vm17389_vm0, %v11927_v56, %v11931_v58 }
 0x18a   : > { %17996 = vst [vmem:[#allocation51_spill] sm:$0xff] %v12025_v51  ;;  %v9227_v41 = vpack.i.bf16 %v424_v42, %v423_v47  ;;  %v12045_v47 = vsel %vm17389_vm0, %v11933_v59, %v11927_v56  ;;  %v12063_v56 = vsel %vm17752_vm1, %v11939_v63, %v11941_v0  ;;  %v426_v23 = vmul.f32 %v11819_v27, %v12025_v51 }
 0x18b   : > { %v9217_v43 = vpack.i.bf16 %v1050_v46, %v1049_v49  ;;  %v431_v46 = vmul.f32 %v11855_v39, %v12025_v51  ;;  %v432_v49 = vmul.f32 %v11858_v40, %v11931_v58  ;;  %17999 = vst [vmem:[#allocation54_spill] sm:$0xff] %v12045_v47  ;;  %18002 = vst [vmem:[#allocation57_spill] sm:$0xff] %v12063_v56 }
 0x18c   : > { %v12017_v61 = vpop.permute.xlu0 %1033  ;;  %v12047_v42 = vpop.permute.xlu1 %1139  ;;  %v425_v59 = vmul.f32 %v11816_v26, %v12045_v47 }
 0x18d   : > { %9218 = vrot.lane.b32.xlu0 %v9217_v43, %s11389_s17  ;;  %v12037_v43 = vsel %vm17752_vm1, %v523_v2, %v11946_v3  ;;  %18000 = vst [vmem:[#allocation55_spill] sm:$0xff] %v12047_v42  ;;  %v9242_v58 = vpack.i.bf16 %v432_v49, %v431_v46  ;;  %v1160_v2 = vmul.f32 %v12047_v42, %v11845_v35 }
 0x18e   : > { %17998 = vst [vmem:[#allocation53_spill] sm:$0xff] %v12037_v43  ;;  %v538_v25 = vmul.f32 %v11819_v27, %v12037_v43  ;;  %v542_v35 = vmul.f32 %v11839_v33, %v12033_v44 }
 0x190   : > { %v12039_v57 = vpop.permute.xlu0 %1141  ;;  %v9252_v46 = vpack.i.bf16 %v538_v25, %v537_v24  ;;  %v429_v24 = vmul.f32 %v11836_v32, %v12004_v54  ;;  %v430_v25 = vmul.f32 %v11839_v33, %v12045_v47 }
 0x191   : > { %9228 = vrot.lane.b32.xlu0 %v9227_v41, %s11395_s9 }
 0x194   : > { %v12055_v22 = vpop.permute.xlu0 %1145 }
 0x195   : > { %18001 = vst [vmem:[#allocation56_spill] sm:$0xff] %v12055_v22  ;;  %9243 = vrot.lane.b32.xlu0 %v9242_v58, %s11395_s9  ;;  %v1159_v41 = vmul.f32 %v12055_v22, %v11842_v34  ;;  %v12074_v34 = vsel %vm638_vm2, %v11952_v11, %v11950_v8  ;;  %v541_v58 = vmul.f32 %v11836_v32, %v12063_v56 }
 0x196   : > { %18003 = vst [vmem:[#allocation58_spill] sm:$0xff] %v12074_v34  ;;  %v648_v44 = vmul.f32 %v11825_v29, %v12074_v34 }
 0x197   : > { %v9222_v49 = vpack.i.bf16 %v1160_v2, %v1159_v41  ;;  %v9257_v0 = vpack.i.bf16 %v542_v35, %v541_v58  ;;  %v9232_v2 = vpack.i.bf16 %v426_v23, %v425_v59  ;;  %v647_v41 = vmul.f32 %v11822_v28, %v11952_v11 }
 0x198   : > { %v535_v23 = vmul.f32 %v11822_v28, %v11939_v63  ;;  %v656_v58 = vmul.f32 %v11858_v40, %v11955_v16  ;;  %v536_v11 = vmul.f32 %v11825_v29, %v12063_v56 }
 0x199   : > { %9253 = vrot.lane.b32.xlu0 %v9252_v46, %s11394_s0  ;;  %9223 = vrot.lane.b32.xlu1 %v9222_v49, %s11388_s13  ;;  %v12091_v46 = vsel %vm638_vm2, %v11957_v21, %v11955_v16  ;;  %v9237_v49 = vpack.i.bf16 %v430_v25, %v429_v24  ;;  %v9267_v59 = vpack.i.bf16 %v648_v44, %v647_v41 }
 0x19a   : > { %18004 = vst [vmem:[#allocation59_spill] sm:$0xff] %v12091_v46  ;;  %v655_v35 = vmul.f32 %v11855_v39, %v12091_v46  ;;  %v12111_v24 = vsel %vm750_vm3, %v11970_v45, %v11972_v50  ;;  %v543_v44 = vmul.f32 %v11855_v39, %v12037_v43  ;;  %v544_v25 = vmul.f32 %v11858_v40, %v11946_v3 }
 0x19b   : > { %18006 = vst [vmem:[#allocation61_spill] sm:$0xff] %v12111_v24  ;;  %v9247_v41 = vpack.i.bf16 %v536_v11, %v535_v23  ;;  %v762_v56 = vmul.f32 %v11819_v27, %v12111_v24 }
 0x19c   : > { %v9262_v11 = vpack.i.bf16 %v544_v25, %v543_v44 }
 0x19d   : > { %9258 = vrot.lane.b32.xlu0 %v9257_v0, %s11394_s0  ;;  %9233 = vrot.lane.b32.xlu1 %v9232_v2, %s11395_s9  ;;  %v12106_v0 = vsel %vm750_vm3, %v11965_v38, %v11970_v45  ;;  %v9282_v2 = vpack.i.bf16 %v656_v58, %v655_v35  ;;  %v12126_v45 = vsel %vm638_vm2, %v11950_v8, %v11957_v21 }
 0x19e   : > { %18005 = vst [vmem:[#allocation60_spill] sm:$0xff] %v12106_v0  ;;  %v761_v16 = vmul.f32 %v11816_v26, %v12106_v0  ;;  %18007 = vst [vmem:[#allocation62_spill] sm:$0xff] %v12126_v45  ;;  %v649_v35 = vmul.f32 %v11816_v26, %v12126_v45  ;;  %v650_v8 = vmul.f32 %v11819_v27, %v12091_v46 }
 0x19f   : > { %v12144_v21 = vsel %vm799_vm4, %v11989_v36, %v11997_v55 }
 0x1a0   : > { %v9292_v23 = vpack.i.bf16 %v762_v56, %v761_v16  ;;  %18009 = vst [vmem:[#allocation64_spill] sm:$0xff] %v12144_v21  ;;  %v654_v56 = vmul.f32 %v11839_v33, %v12126_v45  ;;  %v9272_v44 = vpack.i.bf16 %v650_v8, %v649_v35  ;;  %v938_v25 = vmul.f32 %v12144_v21, %v11819_v27 }
 0x1a1   : > { %9268 = vrot.lane.b32.xlu0 %v9267_v59, %s11393_s8  ;;  %9238 = vrot.lane.b32.xlu1 %v9237_v49, %s11395_s9  ;;  %v12133_v49 = vsel %vm750_vm3, %v11963_v37, %v11965_v38  ;;  %v766_v59 = vmul.f32 %v11839_v33, %v12106_v0  ;;  %v12153_v38 = vsel %vm799_vm4, %v11991_v53, %v11989_v36 }
 0x1a2   : > { %18008 = vst [vmem:[#allocation63_spill] sm:$0xff] %v12133_v49  ;;  %v765_v16 = vmul.f32 %v11836_v32, %v12133_v49  ;;  %18010 = vst [vmem:[#allocation65_spill] sm:$0xff] %v12153_v38  ;;  %v937_v36 = vmul.f32 %v12153_v38, %v11816_v26  ;;  %v942_v35 = vmul.f32 %v12153_v38, %v11839_v33 }
 0x1a3   : > { %v760_v8 = vmul.f32 %v11825_v29, %v12133_v49 }
 0x1a4   : > { %v9297_v58 = vpack.i.bf16 %v766_v59, %v765_v16  ;;  %v9312_v59 = vpack.i.bf16 %v938_v25, %v937_v36  ;;  %v12181_v16 = vsel %vm687_vm5, %v12008_v48, %v11995_v60 }
 0x1a5   : > { %9283 = vrot.lane.b32.xlu0 %v9282_v2, %s11393_s8  ;;  %9248 = vrot.lane.b32.xlu1 %v9247_v41, %s11394_s0  ;;  %v12162_v2 = vsel %vm799_vm4, %v11985_v30, %v11991_v53  ;;  %v653_v41 = vmul.f32 %v11836_v32, %v12074_v34  ;;  %18012 = vst [vmem:[#allocation67_spill] sm:$0xff] %v12181_v16 }
 0x1a6   : > { %18011 = vst [vmem:[#allocation66_spill] sm:$0xff] %v12162_v2  ;;  %v941_v53 = vmul.f32 %v12162_v2, %v11836_v32  ;;  %v1046_v36 = vmul.f32 %v12181_v16, %v11825_v29  ;;  %v936_v38 = vmul.f32 %v12162_v2, %v11825_v29 }
 0x1a9   : > { %9293 = vrot.lane.b32.xlu0 %v9292_v23, %s11392_s11  ;;  %9263 = vrot.lane.b32.xlu1 %v9262_v11, %s11394_s0  ;;  %v9277_v11 = vpack.i.bf16 %v654_v56, %v653_v41  ;;  %v759_v23 = vmul.f32 %v11822_v28, %v11963_v37  ;;  %v767_v56 = vmul.f32 %v11855_v39, %v12111_v24 }
 0x1aa   : > { %v1045_v41 = vmul.f32 %v12008_v48, %v11822_v28  ;;  %v1054_v48 = vmul.f32 %v12006_v52, %v11858_v40 }
 0x1ab   : > { %v9287_v25 = vpack.i.bf16 %v760_v8, %v759_v23  ;;  %v935_v23 = vmul.f32 %v11985_v30, %v11822_v28 }
 0x1ad   : > { %9298 = vrot.lane.b32.xlu0 %v9297_v58, %s11392_s11  ;;  %9273 = vrot.lane.b32.xlu1 %v9272_v44, %s11393_s8  ;;  %v768_v58 = vmul.f32 %v11858_v40, %v11972_v50  ;;  %v9317_v44 = vpack.i.bf16 %v942_v35, %v941_v53  ;;  %v1144_v53 = vpop.permute.xlu1 %1143  ;;  %v9327_v35 = vpack.i.bf16 %v1046_v36, %v1045_v41 }
 0x1ae   : > { %v12225_v41 = vsel %vm687_vm5, %v11995_v60, %v12017_v61 }
 0x1af   : > { %18016 = vst [vmem:[#allocation71_spill] sm:$0xff] %v12225_v41 }
 0x1b1   : > { %9313 = vrot.lane.b32.xlu0 %v9312_v59, %s11390_s26  ;;  %9278 = vrot.lane.b32.xlu1 %v9277_v11, %s11393_s8  ;;  %v12196_v59 = vsel %vm687_vm5, %v12017_v61, %v12006_v52  ;;  %v9302_v11 = vpack.i.bf16 %v768_v58, %v767_v56  ;;  %v12216_v56 = vsel %vm575_vm6, %v12039_v57, %v1144_v53 }
 0x1b2   : > { %18013 = vst [vmem:[#allocation68_spill] sm:$0xff] %v12196_v59  ;;  %v1053_v8 = vmul.f32 %v12196_v59, %v11855_v39  ;;  %18015 = vst [vmem:[#allocation70_spill] sm:$0xff] %v12216_v56  ;;  %v943_v58 = vmul.f32 %v12144_v21, %v11855_v39  ;;  %v9307_v52 = vpack.i.bf16 %v936_v38, %v935_v23 }
 0x1b3   : > { %v1048_v61 = vmul.f32 %v12196_v59, %v11819_v27 }
 0x1b4   : > { %v9342_v36 = vpack.i.bf16 %v1054_v48, %v1053_v8  ;;  %v1047_v48 = vmul.f32 %v12225_v41, %v11816_v26  ;;  %v1052_v8 = vmul.f32 %v12225_v41, %v11839_v33 }
 0x1b5   : > { %9318 = vrot.lane.b32.xlu0 %v9317_v44, %s11390_s26  ;;  %9288 = vrot.lane.b32.xlu1 %v9287_v25, %s11392_s11  ;;  %v12210_v44 = vsel %vm575_vm6, %v1144_v53, %v12055_v22  ;;  %v944_v25 = vmul.f32 %v11997_v55, %v11858_v40  ;;  %v12232_v53 = vsel %vm575_vm6, %v12047_v42, %v12039_v57 }
 0x1b6   : > { %18014 = vst [vmem:[#allocation69_spill] sm:$0xff] %v12210_v44  ;;  %18017 = vst [vmem:[#allocation72_spill] sm:$0xff] %v12232_v53  ;;  %v1161_v38 = vmul.f32 %v12232_v53, %v11836_v32  ;;  %v1162_v57 = vmul.f32 %v12216_v56, %v11839_v33  ;;  %v8359_v33 = vld [vmem:[#allocation13 + $0x30] ss:$0 sm:$0xff] }
 0x1b7   : > { %v9322_v21 = vpack.i.bf16 %v944_v25, %v943_v58  ;;  %v1155_v25 = vmul.f32 %v12047_v42, %v11822_v28 }
 0x1b8   : > { %v9357_v23 = vpack.i.bf16 %v1162_v57, %v1161_v38 }
 0x1b9   : > { %9328 = vrot.lane.b32.xlu0 %v9327_v35, %s11389_s17  ;;  %9303 = vrot.lane.b32.xlu1 %v9302_v11, %s11392_s11  ;;  %v1158_v11 = vmul.f32 %v12210_v44, %v11819_v27  ;;  %v1157_v35 = vmul.f32 %v12216_v56, %v11816_v26  ;;  %v1051_v26 = vmul.f32 %v12181_v16, %v11836_v32  ;;  %v8357_v27 = vld [vmem:[#allocation13 + $0x20] ss:$0 sm:$0xff] }
 0x1ba   : > { %v1164_v32 = vmul.f32 %v12055_v22, %v11858_v40 }
 0x1bb   : > { %v9352_v60 = vpack.i.bf16 %v1158_v11, %v1157_v35  ;;  %v9337_v58 = vpack.i.bf16 %v1052_v8, %v1051_v26  ;;  %v1163_v11 = vmul.f32 %v12210_v44, %v11855_v39  ;;  %v8360_v35 = vld [vmem:[#allocation13 + $0x38] ss:$0 sm:$0xff] }
 0x1bd   : > { %9343 = vrot.lane.b32.xlu0 %v9342_v36, %s11389_s17  ;;  %9308 = vrot.lane.b32.xlu1 %v9307_v52, %s11390_s26  ;;  %v9332_v52 = vpack.i.bf16 %v1048_v61, %v1047_v48  ;;  %v9362_v28 = vpack.i.bf16 %v1164_v32, %v1163_v11 }
 0x1c1   : > { %9323 = vrot.lane.b32.xlu1 %v9322_v21, %s11390_s26  ;;  %9353 = vrot.lane.b32.xlu0 %v9352_v60, %s11388_s13  ;;  %v1156_v21 = vmul.f32 %v12232_v53, %v11825_v29  ;;  %v8358_v29 = vld [vmem:[#allocation13 + $0x28] ss:$0 sm:$0xff] }
 0x1c3   : > { %v9347_v36 = vpack.i.bf16 %v1156_v21, %v1155_v25 }
 0x1c5   : > { %9333 = vrot.lane.b32.xlu1 %v9332_v52, %s11389_s17  ;;  %9358 = vrot.lane.b32.xlu0 %v9357_v23, %s11388_s13 }
 0x1c9   : > { %9338 = vrot.lane.b32.xlu1 %v9337_v58, %s11389_s17  ;;  %1249 = vrot.lane.b32.xlu0 %v8357_v27, %s11395_s9 }
 0x1cd   : > { %9348 = vrot.lane.b32.xlu1 %v9347_v36, %s11388_s13  ;;  %1253 = vrot.lane.b32.xlu0 %v8359_v33, %s11395_s9 }
 0x1cf   : > { %v9194_v48 = vpop.permute.xlu0 %9193 }
 0x1d0   : > { %v9195_v21 = vunpack.i.l.bf16 %v9194_v48  ;;  %v9196_v22 = vunpack.i.h.bf16 %v9194_v48 }
 0x1d1   : > { %9363 = vrot.lane.b32.xlu1 %v9362_v28, %s11388_s13 }
 0x1d5   : > { %1251 = vrot.lane.b32.xlu1 %v8358_v29, %s11395_s9 }
 0x1d7   : > { %v12271_v39 = vpop.permute.xlu1 %9198 }
 0x1d9   : > { %1255 = vrot.lane.b32.xlu1 %v8360_v35, %s11395_s9 }
 0x1df   : > { %v12269_v60 = vpop.permute.xlu0 %9203 }
 0x1e7   : > { %v12275_v40 = vpop.permute.xlu1 %9208 }
 0x1fb   : > { %v12277_v57 = vpop.permute.xlu1 %9213 }
 0x1ff   : > { %v12273_v61 = vpop.permute.xlu0 %9218 }
 0x203   : > { %v9229_v38 = vpop.permute.xlu0 %9228 }
 0x204   : > { %v9231_v36 = vunpack.i.h.bf16 %v9229_v38  ;;  %v9230_v11 = vunpack.i.l.bf16 %v9229_v38 }
 0x206   : > { %v464_v38 = vsel %vm463_vm7, %v9230_v11, %v9231_v36 }
 0x207   : > { %v9244_v52 = vpop.permute.xlu0 %9243 }
 0x208   : > { %v9246_v26 = vunpack.i.h.bf16 %v9244_v52  ;;  %v9245_v27 = vunpack.i.l.bf16 %v9244_v52 }
 0x20a   : > { %v471_v29 = vsel %vm463_vm7, %v9245_v27, %v9246_v26 }
 0x20b   : > { %v12279_v23 = vpop.permute.xlu1 %9223  ;;  %v9254_v8 = vpop.permute.xlu0 %9253 }
 0x20f   : > { %v9234_v58 = vpop.permute.xlu1 %9233  ;;  %v9259_v25 = vpop.permute.xlu0 %9258 }
 0x210   : > { %v9236_v33 = vunpack.i.h.bf16 %v9234_v58  ;;  %v9235_v32 = vunpack.i.l.bf16 %v9234_v58  ;;  %v9261_v52 = vunpack.i.h.bf16 %v9259_v25  ;;  %v9260_v16 = vunpack.i.l.bf16 %v9259_v25 }
 0x211   : > { %v9255_v25 = vunpack.i.l.bf16 %v9254_v8 }
 0x212   : > { %v467_v28 = vsel %vm463_vm7, %v9236_v33, %v9195_v21  ;;  %v465_v59 = vsel %vm463_vm7, %v9231_v36, %v9235_v32  ;;  %v466_v21 = vsel %vm463_vm7, %v9235_v32, %v9236_v33  ;;  %v9256_v36 = vunpack.i.h.bf16 %v9254_v8 }
 0x213   : > { %v9239_v35 = vpop.permute.xlu1 %9238  ;;  %v12283_v56 = vpop.permute.xlu0 %9268  ;;  %v8486_v44 = vpack.c.bf16 %v471_v29, %v467_v28 }
 0x214   : > { %v9241_v53 = vunpack.i.h.bf16 %v9239_v35  ;;  %v9240_v42 = vunpack.i.l.bf16 %v9239_v35 }
 0x215   : > { %8487 = vmatprep.subr.bf16.mxu1 %v8486_v44  ;;  %v9201_v44 = vunpack.i.h.bf16 %v12271_v39 }
 0x216   : > { %v469_v58 = vsel %vm463_vm7, %v9240_v42, %v9241_v53  ;;  %v470_v26 = vsel %vm463_vm7, %v9241_v53, %v9245_v27  ;;  %v468_v41 = vsel %vm463_vm7, %v9196_v22, %v9240_v42  ;;  %v581_v53 = vsel %vm575_vm6, %v9260_v16, %v9261_v52 }
 0x217   : > { %v9249_v55 = vpop.permute.xlu1 %9248  ;;  %v12291_v28 = vpop.permute.xlu0 %9283  ;;  %v8378_v48 = vpack.c.bf16 %v469_v58, %v465_v59  ;;  %v8488_v29 = vpack.c.bf16 %v470_v26, %v466_v21  ;;  %v8380_v35 = vpack.c.bf16 %v468_v41, %v464_v38  ;;  %v580_v42 = vsel %vm575_vm6, %v9201_v44, %v9260_v16 }
 0x218   : > { %v9251_v2 = vunpack.i.h.bf16 %v9249_v55  ;;  %v9250_v30 = vunpack.i.l.bf16 %v9249_v55  ;;  %v9200_v59 = vunpack.i.l.bf16 %v12271_v39  ;;  %v17376_v38 = vunpack.i.l.bf16 %v11976_v62 }
 0x219   : > { %8379 = vmatprep.subr.bf16.mxu0 %v8378_v48  ;;  %8489 = vmatpush1.bf16.msra.mxu1 %v8488_v29  ;;  %v578_v21 = vsel %vm575_vm6, %v9255_v25, %v9256_v36  ;;  %v9171_v26 = vunpack.i.h.bf16 %v11978_v1  ;;  %v9170_v48 = vunpack.i.l.bf16 %v11978_v1 }
 0x21a   : > { %8381 = vmatpush1.bf16.msra.mxu0 %v8380_v35  ;;  %v577_v33 = vsel %vm575_vm6, %v9251_v2, %v9255_v25  ;;  %v576_v22 = vsel %vm575_vm6, %v9250_v30, %v9251_v2  ;;  %v579_v58 = vsel %vm575_vm6, %v9256_v36, %v9200_v59  ;;  %v9286_v30 = vunpack.i.h.bf16 %v12291_v28 }
 0x21b   : > { %v9264_v41 = vpop.permute.xlu1 %9263  ;;  %v12299_v27 = vpop.permute.xlu0 %9293  ;;  %v8382_v11 = vpack.c.bf16 %v581_v53, %v577_v33  ;;  %v8384_v32 = vpack.c.bf16 %v580_v42, %v576_v22  ;;  %v9285_v2 = vunpack.i.l.bf16 %v12291_v28  ;;  %v9205_v25 = vunpack.i.l.bf16 %v12269_v60 }
 0x21c   : > { %v9266_v55 = vunpack.i.h.bf16 %v9264_v41  ;;  %v9265_v8 = vunpack.i.l.bf16 %v9264_v41  ;;  %v9271_v28 = vunpack.i.h.bf16 %v12283_v56  ;;  %v9270_v53 = vunpack.i.l.bf16 %v12283_v56 }
 0x21d   : > { %8383 = vmatprep.subr.bf16.mxu0 %v8382_v11  ;;  %v695_v42 = vsel %vm687_vm5, %v9285_v2, %v9286_v30  ;;  %v17377_v59 = vunpack.i.h.bf16 %v11981_v4  ;;  %v12325_v56 = vsel %vm864_vm8, %v9170_v48, %v9171_v26 }
 0x21e   : > { %8385 = vmatpush1.bf16.msra.mxu0 %v8384_v32  ;;  %v583_v16 = vsel %vm575_vm6, %v9265_v8, %v9266_v55  ;;  %v582_v39 = vsel %vm575_vm6, %v9261_v52, %v9265_v8  ;;  %v866_v55 = vsel %vm864_vm8, %v9171_v26, %v17376_v38  ;;  %v9185_v8 = vunpack.i.l.bf16 %v11981_v4 }
 0x21f   : > { %v9274_v29 = vpop.permute.xlu1 %9273  ;;  %v12310_v35 = vpop.permute.xlu0 %9298  ;;  %v8490_v44 = vpack.c.bf16 %v583_v16, %v579_v58  ;;  %v8492_v33 = vpack.c.bf16 %v582_v39, %v578_v21  ;;  %v9206_v58 = vunpack.i.h.bf16 %v12269_v60  ;;  %v9181_v60 = vunpack.i.h.bf16 %v11983_v5 }
 0x220   : > { %v9276_v36 = vunpack.i.h.bf16 %v9274_v29  ;;  %v9275_v22 = vunpack.i.l.bf16 %v9274_v29  ;;  %v9301_v30 = vunpack.i.h.bf16 %v12310_v35  ;;  %v9300_v39 = vunpack.i.l.bf16 %v12310_v35 }
 0x221   : > { %8491 = vmatprep.subr.bf16.mxu1 %v8490_v44  ;;  %v688_v44 = vsel %vm687_vm5, %v9270_v53, %v9271_v28  ;;  %v9211_v38 = vunpack.i.h.bf16 %v12275_v40 }
 0x222   : > { %8493 = vmatpush1.bf16.msra.mxu1 %v8492_v33  ;;  %v691_v1 = vsel %vm687_vm5, %v9276_v36, %v9205_v25  ;;  %v689_v29 = vsel %vm687_vm5, %v9271_v28, %v9275_v22  ;;  %v690_v26 = vsel %vm687_vm5, %v9275_v22, %v9276_v36  ;;  %v9295_v28 = vunpack.i.l.bf16 %v12299_v27 }
 0x223   : > { %v9279_v41 = vpop.permute.xlu1 %9278  ;;  %v12319_v11 = vpop.permute.xlu0 %9313  ;;  %v8494_v32 = vpack.c.bf16 %v695_v42, %v691_v1  ;;  %v9191_v36 = vunpack.i.h.bf16 %v11987_v31  ;;  %v9296_v22 = vunpack.i.h.bf16 %v12299_v27 }
 0x224   : > { %v9281_v21 = vunpack.i.h.bf16 %v9279_v41  ;;  %v9280_v16 = vunpack.i.l.bf16 %v9279_v41 }
 0x225   : > { %8495 = vmatprep.subr.bf16.mxu1 %v8494_v32 }
 0x226   : > { %v693_v33 = vsel %vm687_vm5, %v9280_v16, %v9281_v21  ;;  %v694_v48 = vsel %vm687_vm5, %v9281_v21, %v9285_v2  ;;  %v692_v25 = vsel %vm687_vm5, %v9206_v58, %v9280_v16  ;;  %v9190_v2 = vunpack.i.l.bf16 %v11987_v31 }
 0x227   : > { %v9289_v1 = vpop.permute.xlu1 %9288  ;;  %v12338_v42 = vpop.permute.xlu0 %9318  ;;  %v8386_v41 = vpack.c.bf16 %v693_v33, %v689_v29  ;;  %v8496_v35 = vpack.c.bf16 %v694_v48, %v690_v26  ;;  %v8388_v32 = vpack.c.bf16 %v692_v25, %v688_v44  ;;  %v870_v58 = vsel %vm864_vm8, %v9185_v8, %v17377_v59 }
 0x228   : > { %v9291_v53 = vunpack.i.h.bf16 %v9289_v1  ;;  %v9290_v52 = vunpack.i.l.bf16 %v9289_v1  ;;  %v805_v16 = vsel %vm799_vm4, %v9300_v39, %v9301_v30  ;;  %v804_v44 = vsel %vm799_vm4, %v9211_v38, %v9300_v39 }
 0x229   : > { %8387 = vmatprep.subr.bf16.mxu0 %v8386_v41  ;;  %8497 = vmatpush1.bf16.msra.mxu1 %v8496_v35  ;;  %v9180_v33 = vunpack.i.l.bf16 %v11983_v5  ;;  %v18018_v25 = vunpack.i.h.bf16 %v11976_v62  ;;  %v18019_v1 = vunpack.i.l.bf16 %v11976_v62  ;;  %v9210_v35 = vunpack.i.l.bf16 %v12275_v40 }
 0x22a   : > { %8389 = vmatpush1.bf16.msra.mxu0 %v8388_v32  ;;  %v801_v21 = vsel %vm799_vm4, %v9291_v53, %v9295_v28  ;;  %v800_v29 = vsel %vm799_vm4, %v9290_v52, %v9291_v53  ;;  %v869_v52 = vsel %vm864_vm8, %v9181_v60, %v9185_v8  ;;  %v9321_v38 = vunpack.i.h.bf16 %v12338_v42 }
 0x22b   : > { %v9304_v31 = vpop.permute.xlu1 %9303  ;;  %v12353_v26 = vpop.permute.xlu0 %9328  ;;  %v8390_v27 = vpack.c.bf16 %v805_v16, %v801_v21  ;;  %v8392_v48 = vpack.c.bf16 %v804_v44, %v800_v29  ;;  %v867_v41 = vsel %vm864_vm8, %v18019_v1, %v18018_v25  ;;  %v9320_v5 = vunpack.i.l.bf16 %v12338_v42 }
 0x22c   : > { %v9306_v32 = vunpack.i.h.bf16 %v9304_v31  ;;  %v9305_v59 = vunpack.i.l.bf16 %v9304_v31  ;;  %v8394_v39 = vpack.c.bf16 %v870_v58, %v866_v55  ;;  %v872_v53 = vsel %vm864_vm8, %v9190_v2, %v9191_v36 }
 0x22d   : > { %8391 = vmatprep.subr.bf16.mxu0 %v8390_v27  ;;  %v803_v21 = vsel %vm799_vm4, %v9296_v22, %v9210_v35  ;;  %v802_v29 = vsel %vm799_vm4, %v9295_v28, %v9296_v22  ;;  %v8396_v60 = vpack.c.bf16 %v869_v52, %v12325_v56  ;;  %v18020_v55 = vmov %v18018_v25 }
 0x22e   : > { %8393 = vmatpush1.bf16.msra.mxu0 %v8392_v48  ;;  %v807_v16 = vsel %vm799_vm4, %v9305_v59, %v9306_v32  ;;  %v806_v40 = vsel %vm799_vm4, %v9301_v30, %v9305_v59  ;;  %v868_v36 = vsel %vm864_vm8, %v18020_v55, %v9180_v33  ;;  %v9216_v58 = vunpack.i.h.bf16 %v12277_v57 }
 0x22f   : > { %v9309_v44 = vpop.permute.xlu1 %9308  ;;  %v12369_v31 = vpop.permute.xlu0 %9343  ;;  %8395 = vmatprep.subr.bf16.mxu0 %v8394_v39  ;;  %v8498_v8 = vpack.c.bf16 %v807_v16, %v803_v21  ;;  %v8500_v42 = vpack.c.bf16 %v806_v40, %v802_v29  ;;  %v9315_v27 = vunpack.i.l.bf16 %v12319_v11  ;;  %v9316_v59 = vunpack.i.h.bf16 %v12319_v11 }
 0x230   : > { %v9311_v48 = vunpack.i.h.bf16 %v9309_v44  ;;  %v9310_v28 = vunpack.i.l.bf16 %v9309_v44  ;;  %v8502_v30 = vpack.c.bf16 %v872_v53, %v868_v36  ;;  %v980_v22 = vsel %vm750_vm3, %v9320_v5, %v9321_v38 }
 0x231   : > { %8499 = vmatprep.subr.bf16.mxu1 %v8498_v8  ;;  %v18021_v25 = vunpack.i.h.bf16 %v11981_v4  ;;  %v979_v1 = vsel %vm750_vm3, %v9216_v58, %v9320_v5  ;;  %v9215_v35 = vunpack.i.l.bf16 %v12277_v57  ;;  %v977_v16 = vsel %vm750_vm3, %v9315_v27, %v9316_v59 }
 0x232   : > { %8397 = vmatpush1.bf16.msra.mxu0 %v8396_v60  ;;  %8501 = vmatpush1.bf16.msra.mxu1 %v8500_v42  ;;  %v976_v62 = vsel %vm750_vm3, %v9311_v48, %v9315_v27  ;;  %v975_v33 = vsel %vm750_vm3, %v9310_v28, %v9311_v48  ;;  %v9346_v29 = vunpack.i.h.bf16 %v12369_v31  ;;  %v9345_v5 = vunpack.i.l.bf16 %v12369_v31 }
 0x233   : > { %v871_v56 = vsel %vm864_vm8, %v18021_v25, %v9190_v2  ;;  %v9324_v32 = vpop.permute.xlu1 %9323  ;;  %8503 = vmatprep.subr.bf16.mxu1 %v8502_v30  ;;  %v8398_v11 = vpack.c.bf16 %v980_v22, %v976_v62  ;;  %v8400_v52 = vpack.c.bf16 %v979_v1, %v975_v33  ;;  %v12386_v21 = vpop.permute.xlu0 %9353  ;;  %v978_v2 = vsel %vm750_vm3, %v9316_v59, %v9215_v35 }
 0x234   : > { %v9326_v39 = vunpack.i.h.bf16 %v9324_v32  ;;  %v9325_v53 = vunpack.i.l.bf16 %v9324_v32  ;;  %v8504_v4 = vpack.c.bf16 %v871_v56, %v867_v41  ;;  %v9220_v41 = vunpack.i.l.bf16 %v12273_v61 }
 0x235   : > { %8399 = vmatprep.subr.bf16.mxu0 %v8398_v11  ;;  %v9331_v55 = vunpack.i.h.bf16 %v12353_v26  ;;  %v9330_v36 = vunpack.i.l.bf16 %v12353_v26  ;;  %v1092_v48 = vsel %vm638_vm2, %v9345_v5, %v9346_v29  ;;  %v9221_v59 = vunpack.i.h.bf16 %v12273_v61 }
 0x236   : > { %8401 = vmatpush1.bf16.msra.mxu0 %v8400_v52  ;;  %8505 = vmatpush1.bf16.msra.mxu1 %v8504_v4  ;;  %v982_v57 = vsel %vm750_vm3, %v9325_v53, %v9326_v39  ;;  %v981_v40 = vsel %vm750_vm3, %v9321_v38, %v9325_v53  ;;  %v9226_v53 = vunpack.i.h.bf16 %v12279_v23  ;;  %v9355_v4 = vunpack.i.l.bf16 %v12386_v21 }
 0x237   : > { %v9334_v44 = vpop.permute.xlu1 %9333  ;;  %v8506_v8 = vpack.c.bf16 %v982_v57, %v978_v2  ;;  %v8508_v60 = vpack.c.bf16 %v981_v40, %v977_v16  ;;  %v9359_v27 = vpop.permute.xlu0 %9358  ;;  %v1085_v26 = vsel %vm638_vm2, %v9330_v36, %v9331_v55  ;;  %v9356_v29 = vunpack.i.h.bf16 %v12386_v21 }
 0x238   : > { %v9336_v42 = vunpack.i.h.bf16 %v9334_v44  ;;  %v9335_v58 = vunpack.i.l.bf16 %v9334_v44  ;;  %v9361_v25 = vunpack.i.h.bf16 %v9359_v27  ;;  %v9360_v56 = vunpack.i.l.bf16 %v9359_v27 }
 0x239   : > { %8507 = vmatprep.subr.bf16.mxu1 %v8506_v8 }
 0x23a   : > { %8509 = vmatpush1.bf16.msra.mxu1 %v8508_v60  ;;  %v1088_v31 = vsel %vm638_vm2, %v9336_v42, %v9220_v41  ;;  %v1086_v62 = vsel %vm638_vm2, %v9331_v55, %v9335_v58  ;;  %v1087_v1 = vsel %vm638_vm2, %v9335_v58, %v9336_v42  ;;  %v1200_v40 = vsel %vm17752_vm1, %v9360_v56, %v9361_v25  ;;  %v12417_v58 = vld [vmem:[%s11697_s2] sm:$0xff] }
 0x23b   : > { %v9339_v28 = vpop.permute.xlu1 %9338  ;;  %v8510_v38 = vpack.c.bf16 %v1092_v48, %v1088_v31  ;;  %v12409_v57 = vpop.permute.xlu0 %1249  ;;  %v1199_v8 = vsel %vm17752_vm1, %v9226_v53, %v9360_v56  ;;  %v9225_v55 = vunpack.i.l.bf16 %v12279_v23  ;;  %v1197_v48 = vsel %vm17752_vm1, %v9355_v4, %v9356_v29 }
 0x23c   : > { %v9341_v30 = vunpack.i.h.bf16 %v9339_v28  ;;  %v9340_v22 = vunpack.i.l.bf16 %v9339_v28  ;;  %18022 = vst [vmem:[#allocation73_spill] sm:$0xff] %v12409_v57  ;;  %v1265_v56 = vmul.f32 %v12409_v57, %v12417_v58 }
 0x23d   : > { %8511 = vmatprep.subr.bf16.mxu1 %v8510_v38  ;;  %v1198_v27 = vsel %vm17752_vm1, %v9356_v29, %v9225_v55  ;;  %v12424_v38 = vld [vmem:[%s11697_s2 + $0x8] sm:$0xff]  ;;  %v12469_v29 = vld [vmem:[%s11697_s2 + $0x40] sm:$0xff] }
 0x23e   : > { %v1090_v33 = vsel %vm638_vm2, %v9340_v22, %v9341_v30  ;;  %v1091_v35 = vsel %vm638_vm2, %v9341_v30, %v9345_v5  ;;  %v1089_v32 = vsel %vm638_vm2, %v9221_v59, %v9340_v22 }
 0x23f   : > { %v9349_v11 = vpop.permute.xlu1 %9348  ;;  %v8402_v52 = vpack.c.bf16 %v1090_v33, %v1086_v62  ;;  %v8512_v61 = vpack.c.bf16 %v1091_v35, %v1087_v1  ;;  %v8404_v39 = vpack.c.bf16 %v1089_v32, %v1085_v26  ;;  %v1254_v59 = vpop.permute.xlu0 %1253  ;;  %v12435_v26 = vld [vmem:[%s11697_s2 + $0x20] sm:$0xff]  ;;  %v12438_v33 = vld [vmem:[%s11697_s2 + $0x30] sm:$0xff]  ;;  %v12447_v32 = vld [vmem:[%s11697_s2 + $0x18] sm:$0xff] }
 0x240   : > { %v9351_v2 = vunpack.i.h.bf16 %v9349_v11  ;;  %v9350_v16 = vunpack.i.l.bf16 %v9349_v11  ;;  %v12444_v35 = vld [vmem:[%s11697_s2 + $0x10] sm:$0xff] }
 0x241   : > { %8403 = vmatprep.subr.bf16.mxu0 %v8402_v52  ;;  %8513 = vmatpush1.bf16.msra.mxu1 %v8512_v61  ;;  %v12452_v61 = vld [vmem:[%s11697_s2 + $0x38] sm:$0xff] }
 0x242   : > { %8405 = vmatpush1.bf16.msra.mxu0 %v8404_v39  ;;  %v1196_v5 = vsel %vm17752_vm1, %v9351_v2, %v9355_v4  ;;  %v1195_v44 = vsel %vm17752_vm1, %v9350_v16, %v9351_v2  ;;  %v1270_v4 = vmul.f32 %v12409_v57, %v12438_v33  ;;  %v12463_v2 = vld [vmem:[%s11697_s2 + $0x48] sm:$0xff]  ;;  %v12466_v16 = vld [vmem:[%s11697_s2 + $0x50] sm:$0xff] }
 0x243   : > { %v9364_v60 = vpop.permute.xlu1 %9363  ;;  %v8406_v41 = vpack.c.bf16 %v1200_v40, %v1196_v5  ;;  %v8408_v42 = vpack.c.bf16 %v1199_v8, %v1195_v44 }
 0x244   : > { %v9366_v21 = vunpack.i.h.bf16 %v9364_v60  ;;  %v9365_v36 = vunpack.i.l.bf16 %v9364_v60 }
 0x245   : > { %8407 = vmatprep.subr.bf16.mxu0 %v8406_v41 }
 0x246   : > { %8409 = vmatpush1.bf16.msra.mxu0 %v8408_v42  ;;  %v1202_v31 = vsel %vm17752_vm1, %v9365_v36, %v9366_v21  ;;  %v1201_v28 = vsel %vm17752_vm1, %v9361_v25, %v9365_v36 }
 0x247   : > { %v1252_v23 = vpop.permute.xlu1 %1251  ;;  %v8514_v30 = vpack.c.bf16 %v1202_v31, %v1198_v27  ;;  %v8516_v22 = vpack.c.bf16 %v1201_v28, %v1197_v48 }
 0x248   : > { %v12430_v62 = vsel %vm463_vm7, %v12409_v57, %v1252_v23  ;;  %v12441_v1 = vsel %vm463_vm7, %v1252_v23, %v1254_v59 }
 0x249   : > { %18023 = vst [vmem:[#allocation74_spill] sm:$0xff] %v12430_v62  ;;  %8515 = vmatprep.subr.bf16.mxu1 %v8514_v30  ;;  %v1266_v25 = vmul.f32 %v12430_v62, %v12424_v38  ;;  %18024 = vst [vmem:[#allocation75_spill] sm:$0xff] %v12441_v1  ;;  %v1267_v5 = vmul.f32 %v12441_v1, %v12444_v35  ;;  %v1271_v8 = vmul.f32 %v12430_v62, %v12452_v61 }
 0x24a   : > { %8517 = vmatpush1.bf16.msra.mxu1 %v8516_v22  ;;  %v1272_v55 = vmul.f32 %v12441_v1, %v12469_v29 }
 0x24b   : > { %v12449_v11 = vpop.permute.xlu1 %1255  ;;  %v9367_v52 = vpack.i.bf16 %v1266_v25, %v1265_v56 }
 0x24c   : > { %18025 = vst [vmem:[#allocation76_spill] sm:$0xff] %v12449_v11  ;;  %v12456_v39 = vsel %vm463_vm7, %v1254_v59, %v12449_v11  ;;  %v1269_v53 = vmul.f32 %v12449_v11, %v12435_v26  ;;  %v1274_v42 = vmul.f32 %v12449_v11, %v12466_v16  ;;  %v9382_v36 = vpack.i.bf16 %v1272_v55, %v1271_v8 }
 0x24d   : > { %18026 = vst [vmem:[#allocation77_spill] sm:$0xff] %v12456_v39  ;;  %9368 = vrot.lane.b32.xlu0 %v9367_v52, %s17387_s27  ;;  %v1268_v40 = vmul.f32 %v12456_v39, %v12447_v32  ;;  %v1273_v41 = vmul.f32 %v12456_v39, %v12463_v2 }
 0x24e   : > { %v9377_v44 = vpack.i.bf16 %v1270_v4, %v1269_v53 }
 0x24f   : > { %v9372_v60 = vpack.i.bf16 %v1268_v40, %v1267_v5  ;;  %v9387_v21 = vpack.i.bf16 %v1274_v42, %v1273_v41 }
 0x251   : > { %9378 = vrot.lane.b32.xlu0 %v9377_v44, %s17387_s27  ;;  %9373 = vrot.lane.b32.xlu1 %v9372_v60, %s17387_s27 }
 0x255   : > { %9388 = vrot.lane.b32.xlu0 %v9387_v21, %s17387_s27  ;;  %9383 = vrot.lane.b32.xlu1 %v9382_v36, %s17387_s27  ;;  %s11403_s27 = smov 1  }
 0x259   : > { %1341 = vrot.lane.b32.xlu0 %v11750_v10, %s11396_s19  ;;  %1339 = vrot.lane.b32.xlu1 %v11738_v7, %s11396_s19 }
 0x25d   : > { %1345 = vrot.lane.b32.xlu0 %v11747_v9, %s11396_s19  ;;  %1343 = vrot.lane.b32.xlu1 %v11735_v6, %s11396_s19 }
 0x2bf   : > { %v9369_v27 = vpop.permute.xlu0 %9368 }
 0x2c0   : > { %v9371_v28 = vunpack.i.h.bf16 %v9369_v27  ;;  %v9370_v23 = vunpack.i.l.bf16 %v9369_v27 }
 0x2c2   : > { %v1305_v5 = vsel %vm17389_vm0, %v9370_v23, %v9371_v28 }
 0x2c3   : > { %v9374_v31 = vpop.permute.xlu1 %9373  ;;  %v9379_v48 = vpop.permute.xlu0 %9378 }
 0x2c4   : > { %v9376_v59 = vunpack.i.h.bf16 %v9374_v31  ;;  %v9375_v30 = vunpack.i.l.bf16 %v9374_v31  ;;  %v9380_v22 = vunpack.i.l.bf16 %v9379_v48  ;;  %v9381_v56 = vunpack.i.h.bf16 %v9379_v48 }
 0x2c6   : > { %v1306_v9 = vsel %vm17389_vm0, %v9371_v28, %v9375_v30  ;;  %v1308_v6 = vsel %vm17389_vm0, %v9376_v59, %v9380_v22  ;;  %v1307_v40 = vsel %vm17389_vm0, %v9375_v30, %v9376_v59 }
 0x2c7   : > { %v9384_v25 = vpop.permute.xlu1 %9383  ;;  %v9389_v10 = vpop.permute.xlu0 %9388 }
 0x2c8   : > { %v9386_v52 = vunpack.i.h.bf16 %v9384_v25  ;;  %v9385_v7 = vunpack.i.l.bf16 %v9384_v25  ;;  %v9391_v53 = vunpack.i.h.bf16 %v9389_v10  ;;  %v9390_v4 = vunpack.i.l.bf16 %v9389_v10 }
 0x2ca   : > { %v1310_v44 = vsel %vm17389_vm0, %v9385_v7, %v9386_v52  ;;  %v1312_v8 = vsel %vm17389_vm0, %v9390_v4, %v9391_v53  ;;  %v1309_v60 = vsel %vm17389_vm0, %v9381_v56, %v9385_v7  ;;  %v1311_v41 = vsel %vm17389_vm0, %v9386_v52, %v9390_v4 }
 0x2cb   : > { %v12504_v42 = vpop.permute.xlu1 %1339  ;;  %v1342_v55 = vpop.permute.xlu0 %1341  ;;  %v8410_v21 = vpack.c.bf16 %v1310_v44, %v1306_v9  ;;  %v8518_v36 = vpack.c.bf16 %v1312_v8, %v1308_v6  ;;  %v8412_v27 = vpack.c.bf16 %v1309_v60, %v1305_v5  ;;  %v8520_v31 = vpack.c.bf16 %v1311_v41, %v1307_v40 }
 0x2cc   : > { %v12508_v48 = vsel %vm17458_vm9, %v12504_v42, %v1342_v55  ;;  %v1356_v28 = vmul.f32 %v12504_v42, %v12417_v58  ;;  %v1361_v10 = vmul.f32 %v12504_v42, %v12438_v33  ;;  %vm17461_vm0 = vcmask 7168  }
 0x2cd   : > { %18027 = vst [vmem:[#allocation78_spill] sm:$0xff] %v12508_v48  ;;  %8411 = vmatprep.subr.bf16.mxu0 %v8410_v21  ;;  %8519 = vmatprep.subr.bf16.mxu1 %v8518_v36  ;;  %v1357_v23 = vmul.f32 %v12508_v48, %v12424_v38  ;;  %v1362_v44 = vmul.f32 %v12508_v48, %v12452_v61 }
 0x2ce   : > { %8413 = vmatpush1.bf16.msra.mxu0 %v8412_v27  ;;  %8521 = vmatpush1.bf16.msra.mxu1 %v8520_v31 }
 0x2cf   : > { %v1344_v59 = vpop.permute.xlu1 %1343  ;;  %v12514_v30 = vpop.permute.xlu0 %1345  ;;  %v9392_v22 = vpack.i.bf16 %v1357_v23, %v1356_v28 }
 0x2d0   : > { %18028 = vst [vmem:[#allocation79_spill] sm:$0xff] %v12514_v30  ;;  %v12517_v56 = vsel %vm17458_vm9, %v1342_v55, %v1344_v59  ;;  %v1360_v25 = vmul.f32 %v12514_v30, %v12435_v26  ;;  %v12525_v52 = vsel %vm17458_vm9, %v1344_v59, %v12514_v30  ;;  %v1365_v5 = vmul.f32 %v12514_v30, %v12466_v16 }
 0x2d1   : > { %18029 = vst [vmem:[#allocation80_spill] sm:$0xff] %v12517_v56  ;;  %18030 = vst [vmem:[#allocation81_spill] sm:$0xff] %v12525_v52  ;;  %9393 = vrot.lane.b32.xlu1 %v9392_v22, %s11397_s20  ;;  %v1358_v7 = vmul.f32 %v12517_v56, %v12444_v35  ;;  %v1359_v53 = vmul.f32 %v12525_v52, %v12447_v32  ;;  %v1364_v6 = vmul.f32 %v12525_v52, %v12463_v2  ;;  %v18092_v52 = vld [vmem:[#allocation50_spill] sm:$0xff] }
 0x2d2   : > { %v9402_v4 = vpack.i.bf16 %v1361_v10, %v1360_v25  ;;  %v1363_v40 = vmul.f32 %v12517_v56, %v12469_v29 }
 0x2d3   : > { %v9397_v9 = vpack.i.bf16 %v1359_v53, %v1358_v7  ;;  %v9412_v8 = vpack.i.bf16 %v1365_v5, %v1364_v6 }
 0x2d4   : > { %v9407_v60 = vpack.i.bf16 %v1363_v40, %v1362_v44 }
 0x2d5   : > { %9403 = vrot.lane.b32.xlu1 %v9402_v4, %s11397_s20  ;;  %9398 = vrot.lane.b32.xlu0 %v9397_v9, %s11397_s20 }
 0x2d9   : > { %9413 = vrot.lane.b32.xlu1 %v9412_v8, %s11397_s20  ;;  %9408 = vrot.lane.b32.xlu0 %v9407_v60, %s11397_s20 }
 0x2dd   : > { %1433 = vrot.lane.b32.xlu1 %v11761_v13, %s11398_s7  ;;  %1431 = vrot.lane.b32.xlu0 %v11758_v12, %s11398_s7 }
 0x2e1   : > { %1437 = vrot.lane.b32.xlu1 %v11771_v15, %s11398_s7  ;;  %1435 = vrot.lane.b32.xlu0 %v11768_v14, %s11398_s7 }
 0x343   : > { %v9394_v41 = vpop.permute.xlu1 %9393 }
 0x344   : > { %v9396_v36 = vunpack.i.h.bf16 %v9394_v41  ;;  %v9395_v27 = vunpack.i.l.bf16 %v9394_v41 }
 0x346   : > { %v1397_v53 = vsel %vm1396_vm10, %v9395_v27, %v9396_v36 }
 0x347   : > { %v9404_v55 = vpop.permute.xlu1 %9403  ;;  %v9399_v21 = vpop.permute.xlu0 %9398 }
 0x348   : > { %v9405_v31 = vunpack.i.l.bf16 %v9404_v55  ;;  %v9401_v28 = vunpack.i.h.bf16 %v9399_v21  ;;  %v9400_v23 = vunpack.i.l.bf16 %v9399_v21  ;;  %v9406_v59 = vunpack.i.h.bf16 %v9404_v55 }
 0x34a   : > { %v1398_v7 = vsel %vm1396_vm10, %v9396_v36, %v9400_v23  ;;  %v1400_v14 = vsel %vm1396_vm10, %v9401_v28, %v9405_v31  ;;  %v1399_v4 = vsel %vm1396_vm10, %v9400_v23, %v9401_v28 }
 0x34b   : > { %v9414_v13 = vpop.permute.xlu1 %9413  ;;  %v9409_v22 = vpop.permute.xlu0 %9408 }
 0x34c   : > { %v9416_v12 = vunpack.i.h.bf16 %v9414_v13  ;;  %v9415_v25 = vunpack.i.l.bf16 %v9414_v13  ;;  %v9411_v10 = vunpack.i.h.bf16 %v9409_v22  ;;  %v9410_v15 = vunpack.i.l.bf16 %v9409_v22 }
 0x34e   : > { %v1402_v9 = vsel %vm1396_vm10, %v9410_v15, %v9411_v10  ;;  %v1404_v6 = vsel %vm1396_vm10, %v9415_v25, %v9416_v12  ;;  %v1401_v5 = vsel %vm1396_vm10, %v9406_v59, %v9410_v15  ;;  %v1403_v40 = vsel %vm1396_vm10, %v9411_v10, %v9415_v25 }
 0x34f   : > { %v1434_v44 = vpop.permute.xlu1 %1433  ;;  %v12560_v8 = vpop.permute.xlu0 %1431  ;;  %v8414_v60 = vpack.c.bf16 %v1402_v9, %v1398_v7  ;;  %v8522_v41 = vpack.c.bf16 %v1404_v6, %v1400_v14  ;;  %v8416_v55 = vpack.c.bf16 %v1401_v5, %v1397_v53  ;;  %v8524_v21 = vpack.c.bf16 %v1403_v40, %v1399_v4 }
 0x350   : > { %v12564_v36 = vsel %vm17450_vm11, %v12560_v8, %v1434_v44  ;;  %v1448_v27 = vmul.f32 %v12560_v8, %v12417_v58  ;;  %v1453_v25 = vmul.f32 %v12560_v8, %v12438_v33 }
 0x351   : > { %18031 = vst [vmem:[#allocation82_spill] sm:$0xff] %v12564_v36  ;;  %8415 = vmatprep.subr.bf16.mxu0 %v8414_v60  ;;  %8523 = vmatprep.subr.bf16.mxu1 %v8522_v41  ;;  %v1449_v31 = vmul.f32 %v12564_v36, %v12424_v38  ;;  %v1454_v6 = vmul.f32 %v12564_v36, %v12452_v61 }
 0x352   : > { %8417 = vmatpush1.bf16.msra.mxu0 %v8416_v55  ;;  %8525 = vmatpush1.bf16.msra.mxu1 %v8524_v21 }
 0x353   : > { %v12570_v28 = vpop.permute.xlu1 %1437  ;;  %v1436_v23 = vpop.permute.xlu0 %1435  ;;  %v9417_v59 = vpack.i.bf16 %v1449_v31, %v1448_v27 }
 0x354   : > { %18032 = vst [vmem:[#allocation83_spill] sm:$0xff] %v12570_v28  ;;  %v12573_v13 = vsel %vm17450_vm11, %v1434_v44, %v1436_v23  ;;  %v12577_v22 = vsel %vm17450_vm11, %v1436_v23, %v12570_v28  ;;  %v1452_v12 = vmul.f32 %v12570_v28, %v12435_v26  ;;  %v1457_v4 = vmul.f32 %v12570_v28, %v12466_v16 }
 0x355   : > { %18033 = vst [vmem:[#allocation84_spill] sm:$0xff] %v12573_v13  ;;  %18034 = vst [vmem:[#allocation85_spill] sm:$0xff] %v12577_v22  ;;  %9418 = vrot.lane.b32.xlu0 %v9417_v59, %s11399_s30  ;;  %v1450_v10 = vmul.f32 %v12573_v13, %v12444_v35  ;;  %v1451_v15 = vmul.f32 %v12577_v22, %v12447_v32  ;;  %v1456_v53 = vmul.f32 %v12577_v22, %v12463_v2 }
 0x356   : > { %v9427_v7 = vpack.i.bf16 %v1453_v25, %v1452_v12  ;;  %v1455_v9 = vmul.f32 %v12573_v13, %v12469_v29 }
 0x357   : > { %v9422_v14 = vpack.i.bf16 %v1451_v15, %v1450_v10  ;;  %v9437_v5 = vpack.i.bf16 %v1457_v4, %v1456_v53 }
 0x358   : > { %v9432_v40 = vpack.i.bf16 %v1455_v9, %v1454_v6 }
 0x359   : > { %9428 = vrot.lane.b32.xlu0 %v9427_v7, %s11399_s30  ;;  %9423 = vrot.lane.b32.xlu1 %v9422_v14, %s11399_s30 }
 0x35d   : > { %9438 = vrot.lane.b32.xlu0 %v9437_v5, %s11399_s30  ;;  %9433 = vrot.lane.b32.xlu1 %v9432_v40, %s11399_s30 }
 0x361   : > { %1525 = vrot.lane.b32.xlu0 %v11779_v17, %s11400_s3  ;;  %1523 = vrot.lane.b32.xlu1 %v11782_v18, %s11400_s3 }
 0x365   : > { %1529 = vrot.lane.b32.xlu0 %v11789_v19, %s11400_s3  ;;  %1527 = vrot.lane.b32.xlu1 %v11792_v20, %s11400_s3 }
 0x3c7   : > { %v9419_v44 = vpop.permute.xlu0 %9418 }
 0x3c8   : > { %v9421_v55 = vunpack.i.h.bf16 %v9419_v44  ;;  %v9420_v21 = vunpack.i.l.bf16 %v9419_v44 }
 0x3ca   : > { %v1489_v7 = vsel %vm17463_vm12, %v9420_v21, %v9421_v55 }
 0x3cb   : > { %v9424_v60 = vpop.permute.xlu1 %9423  ;;  %v9429_v41 = vpop.permute.xlu0 %9428 }
 0x3cc   : > { %v9426_v27 = vunpack.i.h.bf16 %v9424_v60  ;;  %v9425_v31 = vunpack.i.l.bf16 %v9424_v60  ;;  %v9430_v23 = vunpack.i.l.bf16 %v9429_v41  ;;  %v9431_v59 = vunpack.i.h.bf16 %v9429_v41 }
 0x3ce   : > { %v1490_v15 = vsel %vm17463_vm12, %v9421_v55, %v9425_v31  ;;  %v1492_v20 = vsel %vm17463_vm12, %v9426_v27, %v9430_v23  ;;  %v1491_v14 = vsel %vm17463_vm12, %v9425_v31, %v9426_v27 }
 0x3cf   : > { %v9434_v17 = vpop.permute.xlu1 %9433  ;;  %v9439_v12 = vpop.permute.xlu0 %9438 }
 0x3d0   : > { %v9436_v18 = vunpack.i.h.bf16 %v9434_v17  ;;  %v9435_v25 = vunpack.i.l.bf16 %v9434_v17  ;;  %v9441_v10 = vunpack.i.h.bf16 %v9439_v12  ;;  %v9440_v19 = vunpack.i.l.bf16 %v9439_v12 }
 0x3d2   : > { %v1494_v53 = vsel %vm17463_vm12, %v9435_v25, %v9436_v18  ;;  %v1496_v4 = vsel %vm17463_vm12, %v9440_v19, %v9441_v10  ;;  %v1493_v9 = vsel %vm17463_vm12, %v9431_v59, %v9435_v25  ;;  %v1495_v6 = vsel %vm17463_vm12, %v9436_v18, %v9440_v19 }
 0x3d3   : > { %v12616_v5 = vpop.permute.xlu1 %1523  ;;  %v1526_v40 = vpop.permute.xlu0 %1525  ;;  %v8418_v44 = vpack.c.bf16 %v1494_v53, %v1490_v15  ;;  %v8526_v60 = vpack.c.bf16 %v1496_v4, %v1492_v20  ;;  %v8420_v41 = vpack.c.bf16 %v1493_v9, %v1489_v7  ;;  %v8528_v17 = vpack.c.bf16 %v1495_v6, %v1491_v14 }
 0x3d4   : > { %v1540_v55 = vmul.f32 %v12616_v5, %v12417_v58  ;;  %v12622_v21 = vsel %vm17459_vm13, %v12616_v5, %v1526_v40  ;;  %v1545_v12 = vmul.f32 %v12616_v5, %v12438_v33 }
 0x3d5   : > { %18035 = vst [vmem:[#allocation86_spill] sm:$0xff] %v12622_v21  ;;  %8419 = vmatprep.subr.bf16.mxu0 %v8418_v44  ;;  %8527 = vmatprep.subr.bf16.mxu1 %v8526_v60  ;;  %v1541_v27 = vmul.f32 %v12622_v21, %v12424_v38  ;;  %v1546_v9 = vmul.f32 %v12622_v21, %v12452_v61  ;;  %v18039_v44 = vld [vmem:[#allocation23_spill] sm:$0xff]  ;;  %v18040_v60 = vld [vmem:[#allocation22_spill] sm:$0xff] }
 0x3d6   : > { %8421 = vmatpush1.bf16.msra.mxu0 %v8420_v41  ;;  %8529 = vmatpush1.bf16.msra.mxu1 %v8528_v17  ;;  %v18041_v41 = vld [vmem:[#allocation25_spill] sm:$0xff]  ;;  %v18042_v17 = vld [vmem:[#allocation24_spill] sm:$0xff] }
 0x3d7   : > { %v1528_v31 = vpop.permute.xlu1 %1527  ;;  %v12626_v23 = vpop.permute.xlu0 %1529  ;;  %v9442_v59 = vpack.i.bf16 %v1541_v27, %v1540_v55 }
 0x3d8   : > { %18036 = vst [vmem:[#allocation87_spill] sm:$0xff] %v12626_v23  ;;  %v12631_v18 = vsel %vm17459_vm13, %v1526_v40, %v1528_v31  ;;  %v1544_v25 = vmul.f32 %v12626_v23, %v12435_v26  ;;  %v12637_v10 = vsel %vm17459_vm13, %v1528_v31, %v12626_v23  ;;  %v1549_v53 = vmul.f32 %v12626_v23, %v12466_v16 }
 0x3d9   : > { %18037 = vst [vmem:[#allocation88_spill] sm:$0xff] %v12631_v18  ;;  %18038 = vst [vmem:[#allocation89_spill] sm:$0xff] %v12637_v10  ;;  %9443 = vrot.lane.b32.xlu1 %v9442_v59, %s11401_s14  ;;  %v1542_v19 = vmul.f32 %v12631_v18, %v12444_v35  ;;  %v1543_v15 = vmul.f32 %v12637_v10, %v12447_v32  ;;  %v1548_v14 = vmul.f32 %v12637_v10, %v12463_v2 }
 0x3da   : > { %v9452_v20 = vpack.i.bf16 %v1545_v12, %v1544_v25  ;;  %v1547_v4 = vmul.f32 %v12631_v18, %v12469_v29 }
 0x3db   : > { %v9447_v7 = vpack.i.bf16 %v1543_v15, %v1542_v19  ;;  %v9462_v6 = vpack.i.bf16 %v1549_v53, %v1548_v14 }
 0x3dc   : > { %v9457_v40 = vpack.i.bf16 %v1547_v4, %v1546_v9 }
 0x3dd   : > { %9453 = vrot.lane.b32.xlu1 %v9452_v20, %s11401_s14  ;;  %9448 = vrot.lane.b32.xlu0 %v9447_v7, %s11401_s14 }
 0x3e1   : > { %9463 = vrot.lane.b32.xlu1 %v9462_v6, %s11401_s14  ;;  %9458 = vrot.lane.b32.xlu0 %v9457_v40, %s11401_s14 }
 0x3e5   : > { %1617 = vrot.lane.b32.xlu1 %v18039_v44, %s11402_s29  ;;  %1615 = vrot.lane.b32.xlu0 %v18040_v60, %s11402_s29 }
 0x3e9   : > { %1621 = vrot.lane.b32.xlu1 %v18041_v41, %s11402_s29  ;;  %1619 = vrot.lane.b32.xlu0 %v18042_v17, %s11402_s29 }
 0x44b   : > { %v9444_v55 = vpop.permute.xlu1 %9443 }
 0x44c   : > { %v9446_v59 = vunpack.i.h.bf16 %v9444_v55  ;;  %v9445_v12 = vunpack.i.l.bf16 %v9444_v55 }
 0x44e   : > { %v1581_v60 = vsel %vm17462_vm14, %v9445_v12, %v9446_v59 }
 0x44f   : > { %v9454_v27 = vpop.permute.xlu1 %9453  ;;  %v9449_v31 = vpop.permute.xlu0 %9448 }
 0x450   : > { %v9455_v25 = vunpack.i.l.bf16 %v9454_v27  ;;  %v9451_v19 = vunpack.i.h.bf16 %v9449_v31  ;;  %v9450_v15 = vunpack.i.l.bf16 %v9449_v31  ;;  %v9456_v20 = vunpack.i.h.bf16 %v9454_v27 }
 0x452   : > { %v1582_v40 = vsel %vm17462_vm14, %v9446_v59, %v9450_v15  ;;  %v1584_v44 = vsel %vm17462_vm14, %v9451_v19, %v9455_v25  ;;  %v1583_v41 = vsel %vm17462_vm14, %v9450_v15, %v9451_v19 }
 0x453   : > { %v9464_v7 = vpop.permute.xlu1 %9463  ;;  %v9459_v14 = vpop.permute.xlu0 %9458 }
 0x454   : > { %v9466_v53 = vunpack.i.h.bf16 %v9464_v7  ;;  %v9465_v4 = vunpack.i.l.bf16 %v9464_v7  ;;  %v9461_v9 = vunpack.i.h.bf16 %v9459_v14  ;;  %v9460_v6 = vunpack.i.l.bf16 %v9459_v14 }
 0x456   : > { %v1586_v17 = vsel %vm17462_vm14, %v9460_v6, %v9461_v9  ;;  %v1588_v55 = vsel %vm17462_vm14, %v9465_v4, %v9466_v53  ;;  %v1585_v27 = vsel %vm17462_vm14, %v9456_v20, %v9460_v6  ;;  %v1587_v31 = vsel %vm17462_vm14, %v9461_v9, %v9465_v4 }
 0x457   : > { %v1618_v23 = vpop.permute.xlu1 %1617  ;;  %v12672_v7 = vpop.permute.xlu0 %1615  ;;  %v8422_v14 = vpack.c.bf16 %v1586_v17, %v1582_v40  ;;  %v8530_v10 = vpack.c.bf16 %v1588_v55, %v1584_v44  ;;  %v8424_v18 = vpack.c.bf16 %v1585_v27, %v1581_v60  ;;  %v8532_v13 = vpack.c.bf16 %v1587_v31, %v1583_v41  ;;  %v18047_v17 = vld [vmem:[#allocation28_spill] sm:$0xff]  ;;  %v18048_v55 = vld [vmem:[#allocation26_spill] sm:$0xff]  ;;  %v18050_v31 = vld [vmem:[#allocation27_spill] sm:$0xff] }
 0x458   : > { %v12676_v59 = vsel %vm17460_vm15, %v12672_v7, %v1618_v23  ;;  %v1632_v12 = vmul.f32 %v12672_v7, %v12417_v58  ;;  %v1637_v53 = vmul.f32 %v12672_v7, %v12438_v33  ;;  %v18049_v27 = vld [vmem:[#allocation30_spill] sm:$0xff] }
 0x459   : > { %18043 = vst [vmem:[#allocation23_spill] sm:$0xff] %v12676_v59  ;;  %8423 = vmatprep.subr.bf16.mxu0 %v8422_v14  ;;  %8531 = vmatprep.subr.bf16.mxu1 %v8530_v10  ;;  %v1633_v25 = vmul.f32 %v12676_v59, %v12424_v38  ;;  %v1638_v44 = vmul.f32 %v12676_v59, %v12452_v61 }
 0x45a   : > { %8425 = vmatpush1.bf16.msra.mxu0 %v8424_v18  ;;  %8533 = vmatpush1.bf16.msra.mxu1 %v8532_v13 }
 0x45b   : > { %v12682_v19 = vpop.permute.xlu1 %1621  ;;  %v1620_v15 = vpop.permute.xlu0 %1619  ;;  %v9467_v20 = vpack.i.bf16 %v1633_v25, %v1632_v12 }
 0x45c   : > { %18044 = vst [vmem:[#allocation22_spill] sm:$0xff] %v12682_v19  ;;  %v12687_v4 = vsel %vm17460_vm15, %v1618_v23, %v1620_v15  ;;  %v12691_v58 = vsel %vm17460_vm15, %v1620_v15, %v12682_v19  ;;  %v1636_v10 = vmul.f32 %v12682_v19, %v12435_v26  ;;  %v1641_v6 = vmul.f32 %v12682_v19, %v12466_v16 }
 0x45d   : > { %18045 = vst [vmem:[#allocation25_spill] sm:$0xff] %v12687_v4  ;;  %18046 = vst [vmem:[#allocation24_spill] sm:$0xff] %v12691_v58  ;;  %9468 = vrot.lane.b32.xlu0 %v9467_v20, %s11403_s27  ;;  %v1634_v13 = vmul.f32 %v12687_v4, %v12444_v35  ;;  %v1635_v18 = vmul.f32 %v12691_v58, %v12447_v32  ;;  %v1640_v23 = vmul.f32 %v12691_v58, %v12463_v2 }
 0x45e   : > { %v9477_v33 = vpack.i.bf16 %v1637_v53, %v1636_v10  ;;  %v1639_v40 = vmul.f32 %v12687_v4, %v12469_v29 }
 0x45f   : > { %v9472_v9 = vpack.i.bf16 %v1635_v18, %v1634_v13  ;;  %v9487_v60 = vpack.i.bf16 %v1641_v6, %v1640_v23 }
 0x460   : > { %v9482_v41 = vpack.i.bf16 %v1639_v40, %v1638_v44 }
 0x461   : > { %9478 = vrot.lane.b32.xlu0 %v9477_v33, %s11403_s27  ;;  %9473 = vrot.lane.b32.xlu1 %v9472_v9, %s11403_s27 }
 0x465   : > { %9488 = vrot.lane.b32.xlu0 %v9487_v60, %s11403_s27  ;;  %9483 = vrot.lane.b32.xlu1 %v9482_v41, %s11403_s27 }
 0x469   : > { %1725 = vrot.lane.b32.xlu0 %v18047_v17, %s11403_s27  ;;  %1723 = vrot.lane.b32.xlu1 %v18048_v55, %s11403_s27 }
 0x46d   : > { %1729 = vrot.lane.b32.xlu0 %v18049_v27, %s11403_s27  ;;  %1727 = vrot.lane.b32.xlu1 %v18050_v31, %s11403_s27 }
 0x4cf   : > { %v9469_v14 = vpop.permute.xlu0 %9468 }
 0x4d0   : > { %v9471_v15 = vunpack.i.h.bf16 %v9469_v14  ;;  %v9470_v20 = vunpack.i.l.bf16 %v9469_v14 }
 0x4d2   : > { %v1673_v17 = vsel %vm17461_vm0, %v9470_v20, %v9471_v15 }
 0x4d3   : > { %v9474_v12 = vpop.permute.xlu1 %9473  ;;  %v9479_v25 = vpop.permute.xlu0 %9478 }
 0x4d4   : > { %v9476_v53 = vunpack.i.h.bf16 %v9474_v12  ;;  %v9475_v10 = vunpack.i.l.bf16 %v9474_v12  ;;  %v9480_v13 = vunpack.i.l.bf16 %v9479_v25  ;;  %v9481_v18 = vunpack.i.h.bf16 %v9479_v25 }
 0x4d6   : > { %v1674_v60 = vsel %vm17461_vm0, %v9471_v15, %v9475_v10  ;;  %v1676_v41 = vsel %vm17461_vm0, %v9476_v53, %v9480_v13  ;;  %v1675_v55 = vsel %vm17461_vm0, %v9475_v10, %v9476_v53  ;;  %v8430_v53 = vpack.c.bf16 %v12469_v29, %v12444_v35 }
 0x4d7   : > { %v9484_v33 = vpop.permute.xlu1 %9483  ;;  %v9489_v9 = vpop.permute.xlu0 %9488 }
 0x4d8   : > { %v9486_v23 = vunpack.i.h.bf16 %v9484_v33  ;;  %v9485_v6 = vunpack.i.l.bf16 %v9484_v33  ;;  %v9491_v40 = vunpack.i.h.bf16 %v9489_v9  ;;  %v9490_v44 = vunpack.i.l.bf16 %v9489_v9 }
 0x4da   : > { %v1678_v27 = vsel %vm17461_vm0, %v9485_v6, %v9486_v23  ;;  %v1680_v31 = vsel %vm17461_vm0, %v9490_v44, %v9491_v40  ;;  %v1677_v14 = vsel %vm17461_vm0, %v9481_v18, %v9485_v6  ;;  %v1679_v12 = vsel %vm17461_vm0, %v9486_v23, %v9490_v44  ;;  %v12747_v44 = vld [vmem:[%s11697_s2 + $0x28] sm:$0xff] }
 0x4db   : > { %v12728_v25 = vpop.permute.xlu1 %1723  ;;  %v1726_v33 = vpop.permute.xlu0 %1725  ;;  %v8426_v9 = vpack.c.bf16 %v1678_v27, %v1674_v60  ;;  %v8534_v4 = vpack.c.bf16 %v1680_v31, %v1676_v41  ;;  %v8428_v19 = vpack.c.bf16 %v1677_v14, %v1673_v17  ;;  %v8536_v13 = vpack.c.bf16 %v1679_v12, %v1675_v55  ;;  %v12768_v14 = vld [vmem:[%s11697_s2 + $0x58] sm:$0xff] }
 0x4dc   : > { %18051 = vst [vmem:[#allocation28_spill] sm:$0xff] %v12728_v25  ;;  %v12732_v15 = vsel %vm17461_vm0, %v12728_v25, %v1726_v33  ;;  %v1739_v20 = vmul.f32 %v12728_v25, %v12424_v38  ;;  %v8538_v18 = vpack.c.bf16 %v12466_v16, %v12435_v26  ;;  %v8432_v23 = vpack.c.bf16 %v12452_v61, %v12424_v38 }
 0x4dd   : > { %18052 = vst [vmem:[#allocation26_spill] sm:$0xff] %v12732_v15  ;;  %8427 = vmatprep.subr.bf16.mxu0 %v8426_v9  ;;  %8535 = vmatprep.subr.bf16.mxu1 %v8534_v4  ;;  %v1740_v10 = vmul.f32 %v12732_v15, %v12444_v35  ;;  %v8540_v6 = vpack.c.bf16 %v12463_v2, %v12447_v32 }
 0x4de   : > { %8429 = vmatpush1.bf16.msra.mxu0 %v8428_v19  ;;  %8537 = vmatpush1.bf16.msra.mxu1 %v8536_v13  ;;  %v1744_v55 = vmul.f32 %v12728_v25, %v12452_v61 }
 0x4df   : > { %v1728_v40 = vpop.permute.xlu1 %1727  ;;  %v12749_v60 = vpop.permute.xlu0 %1729  ;;  %v9492_v4 = vpack.i.bf16 %v1740_v10, %v1739_v20  ;;  %8431 = vmatprep.subr.bf16.mxu0 %v8430_v53  ;;  %8539 = vmatprep.subr.bf16.mxu1 %v8538_v18  ;;  %v1745_v53 = vmul.f32 %v12732_v15, %v12469_v29 }
 0x4e0   : > { %18053 = vst [vmem:[#allocation30_spill] sm:$0xff] %v12749_v60  ;;  %v12752_v41 = vsel %vm17461_vm0, %v1726_v33, %v1728_v40  ;;  %v12756_v19 = vsel %vm17461_vm0, %v1728_v40, %v12749_v60  ;;  %v1743_v17 = vmul.f32 %v12749_v60, %v12747_v44  ;;  %v1748_v33 = vmul.f32 %v12749_v60, %v12768_v14  ;;  %v18058_v40 = vld [vmem:[#allocation31_spill] sm:$0xff] }
 0x4e1   : > { %18054 = vst [vmem:[#allocation27_spill] sm:$0xff] %v12752_v41  ;;  %18055 = vst [vmem:[#allocation90_spill] sm:$0xff] %v12756_v19  ;;  %9493 = vrot.lane.b32.xlu1 %v9492_v4, %s11402_s29  ;;  %v1741_v27 = vmul.f32 %v12752_v41, %v12447_v32  ;;  %v1742_v31 = vmul.f32 %v12756_v19, %v12435_v26  ;;  %v1747_v13 = vmul.f32 %v12756_v19, %v12466_v16  ;;  %v18059_v4 = vld [vmem:[#allocation34_spill] sm:$0xff] }
 0x4e2   : > { %v9502_v12 = vpack.i.bf16 %v1744_v55, %v1743_v17  ;;  %8433 = vmatpush1.bf16.msra.mxu0 %v8432_v23  ;;  %8541 = vmatpush1.bf16.msra.mxu1 %v8540_v6  ;;  %v1746_v20 = vmul.f32 %v12752_v41, %v12463_v2  ;;  %v18056_v23 = vld [vmem:[#allocation29_spill] sm:$0xff]  ;;  %v18057_v6 = vld [vmem:[#allocation32_spill] sm:$0xff] }
 0x4e3   : > { %v9497_v9 = vpack.i.bf16 %v1742_v31, %v1741_v27  ;;  %v9512_v10 = vpack.i.bf16 %v1748_v33, %v1747_v13 }
 0x4e4   : > { %v9507_v18 = vpack.i.bf16 %v1746_v20, %v1745_v53 }
 0x4e5   : > { %9503 = vrot.lane.b32.xlu1 %v9502_v12, %s11402_s29  ;;  %9498 = vrot.lane.b32.xlu0 %v9497_v9, %s11402_s29 }
 0x4e9   : > { %9513 = vrot.lane.b32.xlu1 %v9512_v10, %s11402_s29  ;;  %9508 = vrot.lane.b32.xlu0 %v9507_v18, %s11402_s29 }
 0x4ed   : > { %1815 = vrot.lane.b32.xlu1 %v18056_v23, %s11401_s14  ;;  %1813 = vrot.lane.b32.xlu0 %v18057_v6, %s11401_s14 }
 0x4f1   : > { %1819 = vrot.lane.b32.xlu1 %v18058_v40, %s11401_s14  ;;  %1817 = vrot.lane.b32.xlu0 %v18059_v4, %s11401_s14 }
 0x553   : > { %v9494_v17 = vpop.permute.xlu1 %9493 }
 0x554   : > { %v9496_v31 = vunpack.i.h.bf16 %v9494_v17  ;;  %v9495_v12 = vunpack.i.l.bf16 %v9494_v17 }
 0x556   : > { %v1779_v4 = vsel %vm17460_vm15, %v9495_v12, %v9496_v31 }
 0x557   : > { %v9504_v55 = vpop.permute.xlu1 %9503  ;;  %v9499_v27 = vpop.permute.xlu0 %9498 }
 0x558   : > { %v9505_v33 = vunpack.i.l.bf16 %v9504_v55  ;;  %v9501_v9 = vunpack.i.h.bf16 %v9499_v27  ;;  %v9500_v13 = vunpack.i.l.bf16 %v9499_v27  ;;  %v9506_v20 = vunpack.i.h.bf16 %v9504_v55 }
 0x55a   : > { %v1780_v40 = vsel %vm17460_vm15, %v9496_v31, %v9500_v13  ;;  %v1782_v19 = vsel %vm17460_vm15, %v9501_v9, %v9505_v33  ;;  %v1781_v25 = vsel %vm17460_vm15, %v9500_v13, %v9501_v9 }
 0x55b   : > { %v9514_v53 = vpop.permute.xlu1 %9513  ;;  %v9509_v10 = vpop.permute.xlu0 %9508 }
 0x55c   : > { %v9516_v18 = vunpack.i.h.bf16 %v9514_v53  ;;  %v9515_v23 = vunpack.i.l.bf16 %v9514_v53  ;;  %v9511_v6 = vunpack.i.h.bf16 %v9509_v10  ;;  %v9510_v60 = vunpack.i.l.bf16 %v9509_v10 }
 0x55e   : > { %v1784_v17 = vsel %vm17460_vm15, %v9510_v60, %v9511_v6  ;;  %v1786_v41 = vsel %vm17460_vm15, %v9515_v23, %v9516_v18  ;;  %v1783_v55 = vsel %vm17460_vm15, %v9506_v20, %v9510_v60  ;;  %v1785_v27 = vsel %vm17460_vm15, %v9511_v6, %v9515_v23  ;;  %v18068_v6 = vld [vmem:[#allocation35_spill] sm:$0xff] }
 0x55f   : > { %v1816_v15 = vpop.permute.xlu1 %1815  ;;  %v12798_v53 = vpop.permute.xlu0 %1813  ;;  %v8434_v10 = vpack.c.bf16 %v1784_v17, %v1780_v40  ;;  %v8542_v58 = vpack.c.bf16 %v1786_v41, %v1782_v19  ;;  %v8436_v28 = vpack.c.bf16 %v1783_v55, %v1779_v4  ;;  %v8544_v22 = vpack.c.bf16 %v1785_v27, %v1781_v25 }
 0x560   : > { %18060 = vst [vmem:[#allocation29_spill] sm:$0xff] %v12798_v53  ;;  %v12802_v31 = vsel %vm17462_vm14, %v12798_v53, %v1816_v15  ;;  %v1829_v12 = vmul.f32 %v12798_v53, %v12424_v38  ;;  %v1834_v38 = vmul.f32 %v12798_v53, %v12452_v61 }
 0x561   : > { %18061 = vst [vmem:[#allocation32_spill] sm:$0xff] %v12802_v31  ;;  %8435 = vmatprep.subr.bf16.mxu0 %v8434_v10  ;;  %8543 = vmatprep.subr.bf16.mxu1 %v8542_v58  ;;  %v1830_v60 = vmul.f32 %v12802_v31, %v12444_v35 }
 0x562   : > { %8437 = vmatpush1.bf16.msra.mxu0 %v8436_v28  ;;  %8545 = vmatpush1.bf16.msra.mxu1 %v8544_v22 }
 0x563   : > { %v12808_v33 = vpop.permute.xlu1 %1819  ;;  %v1818_v9 = vpop.permute.xlu0 %1817  ;;  %v9517_v41 = vpack.i.bf16 %v1830_v60, %v1829_v12 }
 0x564   : > { %18062 = vst [vmem:[#allocation31_spill] sm:$0xff] %v12808_v33  ;;  %v1833_v25 = vmul.f32 %v12808_v33, %v12747_v44  ;;  %v12813_v19 = vsel %vm17462_vm14, %v1816_v15, %v1818_v9  ;;  %v12819_v58 = vsel %vm17462_vm14, %v1818_v9, %v12808_v33  ;;  %v1838_v15 = vmul.f32 %v12808_v33, %v12768_v14 }
 0x565   : > { %18063 = vst [vmem:[#allocation34_spill] sm:$0xff] %v12813_v19  ;;  %18064 = vst [vmem:[#allocation91_spill] sm:$0xff] %v12819_v58  ;;  %9518 = vrot.lane.b32.xlu0 %v9517_v41, %s11400_s3  ;;  %v1831_v35 = vmul.f32 %v12813_v19, %v12447_v32  ;;  %v1832_v22 = vmul.f32 %v12819_v58, %v12435_v26  ;;  %v1837_v13 = vmul.f32 %v12819_v58, %v12466_v16  ;;  %v18065_v26 = vld [vmem:[#allocation36_spill] sm:$0xff]  ;;  %v18066_v16 = vld [vmem:[#allocation33_spill] sm:$0xff] }
 0x566   : > { %v9527_v28 = vpack.i.bf16 %v1834_v38, %v1833_v25  ;;  %v1836_v20 = vmul.f32 %v12813_v19, %v12463_v2  ;;  %v1835_v32 = vmul.f32 %v12802_v31, %v12469_v29  ;;  %v18067_v2 = vld [vmem:[#allocation37_spill] sm:$0xff] }
 0x567   : > { %v9522_v61 = vpack.i.bf16 %v1832_v22, %v1831_v35  ;;  %v9537_v18 = vpack.i.bf16 %v1838_v15, %v1837_v13 }
 0x568   : > { %v9532_v23 = vpack.i.bf16 %v1836_v20, %v1835_v32 }
 0x569   : > { %9528 = vrot.lane.b32.xlu0 %v9527_v28, %s11400_s3  ;;  %9523 = vrot.lane.b32.xlu1 %v9522_v61, %s11400_s3 }
 0x56d   : > { %9538 = vrot.lane.b32.xlu0 %v9537_v18, %s11400_s3  ;;  %9533 = vrot.lane.b32.xlu1 %v9532_v23, %s11400_s3 }
 0x571   : > { %1905 = vrot.lane.b32.xlu0 %v18065_v26, %s11399_s30  ;;  %1903 = vrot.lane.b32.xlu1 %v18066_v16, %s11399_s30 }
 0x575   : > { %1909 = vrot.lane.b32.xlu0 %v18067_v2, %s11399_s30  ;;  %1907 = vrot.lane.b32.xlu1 %v18068_v6, %s11399_s30 }
 0x5d7   : > { %v9519_v40 = vpop.permute.xlu0 %9518 }
 0x5d8   : > { %v9521_v17 = vunpack.i.h.bf16 %v9519_v40  ;;  %v9520_v55 = vunpack.i.l.bf16 %v9519_v40 }
 0x5da   : > { %v1869_v22 = vsel %vm17459_vm13, %v9520_v55, %v9521_v17  ;;  %v12864_v55 = vld [vmem:[%s11697_s2 + $0x10] sm:$0xff] }
 0x5db   : > { %v9529_v29 = vpop.permute.xlu0 %9528  ;;  %v9524_v4 = vpop.permute.xlu1 %9523 }
 0x5dc   : > { %v9526_v27 = vunpack.i.h.bf16 %v9524_v4  ;;  %v9525_v10 = vunpack.i.l.bf16 %v9524_v4  ;;  %v9530_v12 = vunpack.i.l.bf16 %v9529_v29  ;;  %v9531_v38 = vunpack.i.h.bf16 %v9529_v29  ;;  %v12857_v4 = vld [vmem:[%s11697_s2 + $0x8] sm:$0xff] }
 0x5de   : > { %v1870_v15 = vsel %vm17459_vm13, %v9521_v17, %v9525_v10  ;;  %v1872_v13 = vsel %vm17459_vm13, %v9526_v27, %v9530_v12  ;;  %v1871_v20 = vsel %vm17459_vm13, %v9525_v10, %v9526_v27 }
 0x5df   : > { %v9539_v60 = vpop.permute.xlu0 %9538  ;;  %v9534_v9 = vpop.permute.xlu1 %9533 }
 0x5e0   : > { %v9541_v41 = vunpack.i.h.bf16 %v9539_v60  ;;  %v9540_v25 = vunpack.i.l.bf16 %v9539_v60  ;;  %v9536_v35 = vunpack.i.h.bf16 %v9534_v9  ;;  %v9535_v28 = vunpack.i.l.bf16 %v9534_v9  ;;  %v12873_v60 = vld [vmem:[%s11697_s2 + $0x38] sm:$0xff] }
 0x5e2   : > { %v1876_v61 = vsel %vm17459_vm13, %v9540_v25, %v9541_v41  ;;  %v1874_v18 = vsel %vm17459_vm13, %v9535_v28, %v9536_v35  ;;  %v1873_v26 = vsel %vm17459_vm13, %v9531_v38, %v9535_v28  ;;  %v1875_v16 = vsel %vm17459_vm13, %v9536_v35, %v9540_v25  ;;  %v2730_v35 = vld [vmem:[#allocation9 + $0x8] sm:$0xff] }
 0x5e3   : > { %v1906_v32 = vpop.permute.xlu0 %1905  ;;  %v8546_v23 = vpack.c.bf16 %v1876_v61, %v1872_v13  ;;  %v12854_v2 = vpop.permute.xlu1 %1903  ;;  %v8438_v6 = vpack.c.bf16 %v1874_v18, %v1870_v15  ;;  %v8440_v40 = vpack.c.bf16 %v1873_v26, %v1869_v22  ;;  %v8548_v29 = vpack.c.bf16 %v1875_v16, %v1871_v20  ;;  %v12887_v15 = vld [vmem:[%s11697_s2 + $0x18] sm:$0xff]  ;;  %v12890_v13 = vld [vmem:[%s11697_s2 + $0x20] sm:$0xff]  ;;  %3024 = vmatprep.mubr.f32.mxu0 %v2730_v35  ;;  %v12901_v26 = vld [vmem:[%s11697_s2 + $0x48] sm:$0xff] }
 0x5e4   : > { %18069 = vst [vmem:[#allocation36_spill] sm:$0xff] %v12854_v2  ;;  %v12861_v17 = vsel %vm17463_vm12, %v12854_v2, %v1906_v32  ;;  %v1919_v27 = vmul.f32 %v12854_v2, %v12857_v4  ;;  %v1924_v38 = vmul.f32 %v12854_v2, %v12873_v60  ;;  %3178 = vmatprep.mubr.f32.mxu1 %v2730_v35  ;;  %v2729_v18 = vld [vmem:[#allocation9] sm:$0xff]  ;;  %v11119_v35 = vld [vmem:[#allocation13 + $0x38] ss:$0 sm:$0xff] }
 0x5e5   : > { %18070 = vst [vmem:[#allocation33_spill] sm:$0xff] %v12861_v17  ;;  %8547 = vmatprep.subr.bf16.mxu1 %v8546_v23  ;;  %8439 = vmatprep.subr.bf16.mxu0 %v8438_v6  ;;  %v1920_v10 = vmul.f32 %v12861_v17, %v12864_v55  ;;  %v12898_v23 = vld [vmem:[%s11697_s2 + $0x50] sm:$0xff] }
 0x5e6   : > { %8549 = vmatpush1.bf16.msra.mxu1 %v8548_v29  ;;  %8441 = vmatpush1.bf16.msra.mxu0 %v8440_v40 }
 0x5e7   : > { %v12870_v12 = vpop.permute.xlu0 %1909  ;;  %v1908_v9 = vpop.permute.xlu1 %1907  ;;  %v9542_v25 = vpack.i.bf16 %v1920_v10, %v1919_v27  ;;  %v12910_v27 = vld [vmem:[%s11697_s2 + $0x40] sm:$0xff] }
 0x5e8   : > { %18071 = vst [vmem:[#allocation37_spill] sm:$0xff] %v12870_v12  ;;  %v1923_v41 = vmul.f32 %v12870_v12, %v12747_v44  ;;  %v12880_v28 = vsel %vm17463_vm12, %v1906_v32, %v1908_v9  ;;  %v12884_v22 = vsel %vm17463_vm12, %v1908_v9, %v12870_v12  ;;  %v1928_v16 = vmul.f32 %v12870_v12, %v12768_v14 }
 0x5e9   : > { %18072 = vst [vmem:[#allocation35_spill] sm:$0xff] %v12880_v28  ;;  %18073 = vst [vmem:[#allocation92_spill] sm:$0xff] %v12884_v22  ;;  %9543 = vrot.lane.b32.xlu1 %v9542_v25, %s11398_s7  ;;  %v1921_v20 = vmul.f32 %v12880_v28, %v12887_v15  ;;  %v1922_v32 = vmul.f32 %v12884_v22, %v12890_v13  ;;  %3025 = vmatmul.mubr.f32.vlgmr.msra.gmra.mrb[0].mxu0 %v2729_v18  ;;  %v11117_v25 = vld [vmem:[#allocation13 + $0x28] ss:$0 sm:$0xff] }
 0x5ea   : > { %v9552_v61 = vpack.i.bf16 %v1924_v38, %v1923_v41  ;;  %3179 = vmatmul.mubr.f32.vlgmr.msra.gmra.mrb[0].mxu1 %v2729_v18  ;;  %v1927_v40 = vmul.f32 %v12884_v22, %v12898_v23  ;;  %v1926_v29 = vmul.f32 %v12880_v28, %v12901_v26  ;;  %v1925_v10 = vmul.f32 %v12861_v17, %v12910_v27  ;;  %v11118_v38 = vld [vmem:[#allocation13 + $0x20] ss:$0 sm:$0xff] }
 0x5eb   : > { %v9547_v6 = vpack.i.bf16 %v1922_v32, %v1921_v20 }
 0x5ec   : > { %v9562_v9 = vpack.i.bf16 %v1928_v16, %v1927_v40  ;;  %v9557_v41 = vpack.i.bf16 %v1926_v29, %v1925_v10 }
 0x5ed   : > { %9553 = vrot.lane.b32.xlu1 %v9552_v61, %s11398_s7  ;;  %9548 = vrot.lane.b32.xlu0 %v9547_v6, %s11398_s7  ;;  %v11120_v61 = vld [vmem:[#allocation13 + $0x30] ss:$0 sm:$0xff] }
 0x5f1   : > { %9563 = vrot.lane.b32.xlu1 %v9562_v9, %s11398_s7  ;;  %9558 = vrot.lane.b32.xlu0 %v9557_v41, %s11398_s7 }
 0x5f5   : > { %1995 = vrot.lane.b32.xlu1 %v11117_v25, %s11397_s20  ;;  %1993 = vrot.lane.b32.xlu0 %v11118_v38, %s11397_s20 }
 0x5f9   : > { %1999 = vrot.lane.b32.xlu1 %v11119_v35, %s11397_s20  ;;  %1997 = vrot.lane.b32.xlu0 %v11120_v61, %s11397_s20 }
 0x65b   : > { %v9544_v20 = vpop.permute.xlu1 %9543 }
 0x65c   : > { %v9546_v16 = vunpack.i.h.bf16 %v9544_v20  ;;  %v9545_v6 = vunpack.i.l.bf16 %v9544_v20 }
 0x65e   : > { %v1959_v35 = vsel %vm17450_vm11, %v9545_v6, %v9546_v16 }
 0x65f   : > { %v9554_v32 = vpop.permute.xlu1 %9553  ;;  %v9549_v18 = vpop.permute.xlu0 %9548 }
 0x660   : > { %v9555_v40 = vunpack.i.l.bf16 %v9554_v32  ;;  %v9551_v29 = vunpack.i.h.bf16 %v9549_v18  ;;  %v9550_v10 = vunpack.i.l.bf16 %v9549_v18  ;;  %v9556_v9 = vunpack.i.h.bf16 %v9554_v32 }
 0x662   : > { %v1961_v2 = vsel %vm17450_vm11, %v9550_v10, %v9551_v29  ;;  %v1960_v61 = vsel %vm17450_vm11, %v9546_v16, %v9550_v10  ;;  %v1962_v53 = vsel %vm17450_vm11, %v9551_v29, %v9555_v40 }
 0x663   : > { %v9564_v41 = vpop.permute.xlu1 %9563  ;;  %v9559_v25 = vpop.permute.xlu0 %9558 }
 0x664   : > { %v9566_v12 = vunpack.i.h.bf16 %v9564_v41  ;;  %v9565_v33 = vunpack.i.l.bf16 %v9564_v41  ;;  %v9561_v38 = vunpack.i.h.bf16 %v9559_v25  ;;  %v9560_v22 = vunpack.i.l.bf16 %v9559_v25 }
 0x666   : > { %v1965_v20 = vsel %vm17450_vm11, %v9561_v38, %v9565_v33  ;;  %v1963_v58 = vsel %vm17450_vm11, %v9556_v9, %v9560_v22  ;;  %v1964_v32 = vsel %vm17450_vm11, %v9560_v22, %v9561_v38  ;;  %v1966_v18 = vsel %vm17450_vm11, %v9565_v33, %v9566_v12 }
 0x667   : > { %v1996_v28 = vpop.permute.xlu1 %1995  ;;  %v12930_v41 = vpop.permute.xlu0 %1993  ;;  %v8442_v25 = vpack.c.bf16 %v1964_v32, %v1960_v61  ;;  %v8550_v17 = vpack.c.bf16 %v1966_v18, %v1962_v53  ;;  %v8444_v6 = vpack.c.bf16 %v1963_v58, %v1959_v35  ;;  %v8552_v19 = vpack.c.bf16 %v1965_v20, %v1961_v2 }
 0x668   : > { %18074 = vst [vmem:[#allocation93_spill] sm:$0xff] %v12930_v41  ;;  %v12934_v16 = vsel %vm1396_vm10, %v12930_v41, %v1996_v28  ;;  %v2009_v40 = vmul.f32 %v12930_v41, %v12857_v4  ;;  %v2014_v29 = vmul.f32 %v12930_v41, %v12873_v60  ;;  %v2085_v18 = vmul.f32 %v12887_v15, %v12045_v47 }
 0x669   : > { %18075 = vst [vmem:[#allocation94_spill] sm:$0xff] %v12934_v16  ;;  %8443 = vmatprep.subr.bf16.mxu0 %v8442_v25  ;;  %8551 = vmatprep.subr.bf16.mxu1 %v8550_v17  ;;  %v2010_v22 = vmul.f32 %v12934_v16, %v12864_v55  ;;  %v2015_v20 = vmul.f32 %v12934_v16, %v12910_v27  ;;  %vm2953_vm11 = vcmask 392192  }
 0x66a   : > { %8445 = vmatpush1.bf16.msra.mxu0 %v8444_v6  ;;  %8553 = vmatpush1.bf16.msra.mxu1 %v8552_v19  ;;  %v2086_v25 = vmul.f32 %v12890_v13, %v12025_v51 }
 0x66b   : > { %v12940_v33 = vpop.permute.xlu1 %1999  ;;  %v1998_v12 = vpop.permute.xlu0 %1997  ;;  %v9567_v53 = vpack.i.bf16 %v2010_v22, %v2009_v40  ;;  %v2084_v40 = vmul.f32 %v12864_v55, %v12004_v54  ;;  %v18079_v22 = vld [vmem:[#allocation38_spill] sm:$0xff] }
 0x66c   : > { %18076 = vst [vmem:[#allocation95_spill] sm:$0xff] %v12940_v33  ;;  %v2013_v58 = vmul.f32 %v12940_v33, %v12747_v44  ;;  %v12945_v2 = vsel %vm1396_vm10, %v1996_v28, %v1998_v12  ;;  %v12951_v17 = vsel %vm1396_vm10, %v1998_v12, %v12940_v33  ;;  %v2018_v28 = vmul.f32 %v12940_v33, %v12768_v14 }
 0x66d   : > { %18077 = vst [vmem:[#allocation96_spill] sm:$0xff] %v12945_v2  ;;  %18078 = vst [vmem:[#allocation97_spill] sm:$0xff] %v12951_v17  ;;  %9568 = vrot.lane.b32.xlu0 %v9567_v53, %s11396_s19  ;;  %v2011_v19 = vmul.f32 %v12945_v2, %v12887_v15  ;;  %v2012_v9 = vmul.f32 %v12951_v17, %v12890_v13  ;;  %v2017_v38 = vmul.f32 %v12951_v17, %v12898_v23 }
 0x66e   : > { %v9577_v10 = vpack.i.bf16 %v2014_v29, %v2013_v58  ;;  %v2016_v61 = vmul.f32 %v12945_v2, %v12901_v26  ;;  %v2083_v12 = vmul.f32 %v12857_v4, %v18079_v22  ;;  %v9597_v53 = vpack.i.bf16 %v2086_v25, %v2085_v18 }
 0x66f   : > { %v9572_v35 = vpack.i.bf16 %v2012_v9, %v2011_v19  ;;  %v9587_v32 = vpack.i.bf16 %v2018_v28, %v2017_v38  ;;  %v2089_v58 = vmul.f32 %v12910_v27, %v12004_v54  ;;  %v2090_v29 = vmul.f32 %v12901_v26, %v12045_v47 }
 0x670   : > { %v9582_v6 = vpack.i.bf16 %v2016_v61, %v2015_v20  ;;  %v9592_v19 = vpack.i.bf16 %v2084_v40, %v2083_v12  ;;  %v2088_v28 = vmul.f32 %v12873_v60, %v18079_v22  ;;  %v18081_v61 = vld [vmem:[#allocation57_spill] sm:$0xff]  ;;  %v2091_v18 = vmul.f32 %v12898_v23, %v12025_v51 }
 0x671   : > { %9578 = vrot.lane.b32.xlu0 %v9577_v10, %s11396_s19  ;;  %9573 = vrot.lane.b32.xlu1 %v9572_v35, %s11396_s19  ;;  %v18080_v10 = vld [vmem:[#allocation39_spill] sm:$0xff]  ;;  %v9607_v38 = vpack.i.bf16 %v2090_v29, %v2089_v58  ;;  %v2157_v35 = vmul.f32 %v12857_v4, %v11939_v63  ;;  %v2158_v20 = vmul.f32 %v12864_v55, %v18081_v61  ;;  %v18082_v58 = vld [vmem:[#allocation52_spill] sm:$0xff] }
 0x672   : > { %v2087_v9 = vmul.f32 %v12747_v44, %v18080_v10  ;;  %v2092_v25 = vmul.f32 %v12768_v14, %v18080_v10  ;;  %v2161_v40 = vmul.f32 %v12747_v44, %v11946_v3  ;;  %v2162_v12 = vmul.f32 %v12873_v60, %v11939_v63 }
 0x673   : > { %v2159_v29 = vmul.f32 %v12887_v15, %v18082_v58 }
 0x675   : > { %9588 = vrot.lane.b32.xlu0 %v9587_v32, %s11396_s19  ;;  %9583 = vrot.lane.b32.xlu1 %v9582_v6, %s11396_s19  ;;  %v9602_v32 = vpack.i.bf16 %v2088_v28, %v2087_v9  ;;  %v9617_v6 = vpack.i.bf16 %v2158_v20, %v2157_v35  ;;  %v9627_v9 = vpack.i.bf16 %v2162_v12, %v2161_v40  ;;  %v18083_v12 = vld [vmem:[#allocation42_spill] sm:$0xff] }
 0x676   : > { %v2165_v28 = vmul.f32 %v12898_v23, %v12037_v43  ;;  %v2164_v20 = vmul.f32 %v12901_v26, %v18082_v58 }
 0x679   : > { %9598 = vrot.lane.b32.xlu0 %v9597_v53, %s11395_s9  ;;  %9593 = vrot.lane.b32.xlu1 %v9592_v19, %s11395_s9  ;;  %v9612_v53 = vpack.i.bf16 %v2092_v25, %v2091_v18  ;;  %v2160_v19 = vmul.f32 %v12890_v13, %v12037_v43  ;;  %v2233_v25 = vmul.f32 %v12887_v15, %v12126_v45 }
 0x67b   : > { %v9622_v35 = vpack.i.bf16 %v2160_v19, %v2159_v29  ;;  %v2232_v29 = vmul.f32 %v12864_v55, %v12074_v34 }
 0x67d   : > { %9608 = vrot.lane.b32.xlu0 %v9607_v38, %s11395_s9  ;;  %9603 = vrot.lane.b32.xlu1 %v9602_v32, %s11395_s9  ;;  %v2166_v38 = vmul.f32 %v12768_v14, %v11946_v3  ;;  %v2163_v32 = vmul.f32 %v12910_v27, %v18081_v61 }
 0x67f   : > { %v9637_v18 = vpack.i.bf16 %v2166_v38, %v2165_v28  ;;  %v9632_v40 = vpack.i.bf16 %v2164_v20, %v2163_v32  ;;  %v18084_v38 = vld [vmem:[#allocation43_spill] sm:$0xff]  ;;  %v2237_v20 = vmul.f32 %v12910_v27, %v12074_v34  ;;  %v2236_v32 = vmul.f32 %v12873_v60, %v18083_v12 }
 0x681   : > { %9618 = vrot.lane.b32.xlu0 %v9617_v6, %s11394_s0  ;;  %9613 = vrot.lane.b32.xlu1 %v9612_v53, %s11395_s9  ;;  %v2234_v6 = vmul.f32 %v12890_v13, %v12091_v46  ;;  %v2231_v53 = vmul.f32 %v12857_v4, %v18083_v12 }
 0x683   : > { %v9647_v19 = vpack.i.bf16 %v2234_v6, %v2233_v25  ;;  %v9642_v28 = vpack.i.bf16 %v2232_v29, %v2231_v53  ;;  %v2305_v25 = vmul.f32 %v12857_v4, %v11963_v37  ;;  %v2306_v6 = vmul.f32 %v12864_v55, %v12133_v49 }
 0x684   : > { %v2239_v53 = vmul.f32 %v12898_v23, %v12091_v46  ;;  %v2240_v29 = vmul.f32 %v12768_v14, %v18084_v38 }
 0x685   : > { %9628 = vrot.lane.b32.xlu0 %v9627_v9, %s11394_s0  ;;  %9623 = vrot.lane.b32.xlu1 %v9622_v35, %s11394_s0  ;;  %v2238_v9 = vmul.f32 %v12901_v26, %v12126_v45  ;;  %v2235_v35 = vmul.f32 %v12747_v44, %v18084_v38  ;;  %v18098_v45 = vld [vmem:[#allocation69_spill] sm:$0xff] }
 0x689   : > { %9638 = vrot.lane.b32.xlu0 %v9637_v18, %s11394_s0  ;;  %9633 = vrot.lane.b32.xlu1 %v9632_v40, %s11394_s0  ;;  %v9657_v18 = vpack.i.bf16 %v2238_v9, %v2237_v20  ;;  %v9652_v40 = vpack.i.bf16 %v2236_v32, %v2235_v35  ;;  %v2309_v9 = vmul.f32 %v12747_v44, %v11972_v50 }
 0x68a   : > { %v9662_v20 = vpack.i.bf16 %v2240_v29, %v2239_v53  ;;  %v2307_v35 = vmul.f32 %v12887_v15, %v12106_v0  ;;  %v2308_v32 = vmul.f32 %v12890_v13, %v12111_v24  ;;  %v2312_v53 = vmul.f32 %v12901_v26, %v12106_v0 }
 0x68b   : > { %v2311_v29 = vmul.f32 %v12910_v27, %v12133_v49 }
 0x68d   : > { %9648 = vrot.lane.b32.xlu0 %v9647_v19, %s11393_s8  ;;  %9643 = vrot.lane.b32.xlu1 %v9642_v28, %s11393_s8  ;;  %v9667_v19 = vpack.i.bf16 %v2306_v6, %v2305_v25  ;;  %v2310_v28 = vmul.f32 %v12873_v60, %v11963_v37  ;;  %v2313_v25 = vmul.f32 %v12898_v23, %v12111_v24 }
 0x68e   : > { %v2314_v6 = vmul.f32 %v12768_v14, %v11972_v50 }
 0x691   : > { %9658 = vrot.lane.b32.xlu0 %v9657_v18, %s11393_s8  ;;  %9653 = vrot.lane.b32.xlu1 %v9652_v40, %s11393_s8  ;;  %v9677_v18 = vpack.i.bf16 %v2310_v28, %v2309_v9  ;;  %v9672_v40 = vpack.i.bf16 %v2308_v32, %v2307_v35  ;;  %v9697_v9 = vpack.i.bf16 %v12890_v13, %v12887_v15 }
 0x692   : > { %v9692_v28 = vpack.i.bf16 %v12864_v55, %v12857_v4  ;;  %v9707_v35 = vpack.i.bf16 %v12901_v26, %v12910_v27  ;;  %v9702_v32 = vpack.i.bf16 %v12873_v60, %v12747_v44 }
 0x695   : > { %9668 = vrot.lane.b32.xlu0 %v9667_v19, %s11392_s11  ;;  %9663 = vrot.lane.b32.xlu1 %v9662_v20, %s11393_s8  ;;  %v9687_v19 = vpack.i.bf16 %v2314_v6, %v2313_v25  ;;  %v9682_v20 = vpack.i.bf16 %v2312_v53, %v2311_v29  ;;  %v18086_v6 = vld [vmem:[#allocation66_spill] sm:$0xff]  ;;  %v9712_v53 = vpack.i.bf16 %v12768_v14, %v12898_v23 }
 0x696   : > { %v2449_v2 = vmul.f32 %v12910_v27, %v18086_v6 }
 0x699   : > { %9678 = vrot.lane.b32.xlu0 %v9677_v18, %s11392_s11  ;;  %9673 = vrot.lane.b32.xlu1 %v9672_v40, %s11392_s11  ;;  %v18085_v18 = vld [vmem:[#allocation46_spill] sm:$0xff]  ;;  %v2444_v40 = vmul.f32 %v12864_v55, %v18086_v6 }
 0x69a   : > { %v2443_v25 = vmul.f32 %v12857_v4, %v18085_v18 }
 0x69c   : > { %v9717_v29 = vpack.i.bf16 %v2444_v40, %v2443_v25 }
 0x69d   : > { %9688 = vrot.lane.b32.xlu0 %v9687_v19, %s11392_s11  ;;  %9683 = vrot.lane.b32.xlu1 %v9682_v20, %s11392_s11  ;;  %v18087_v19 = vld [vmem:[#allocation47_spill] sm:$0xff] }
 0x69e   : > { %v2447_v20 = vmul.f32 %v12747_v44, %v18087_v19  ;;  %v2452_v40 = vmul.f32 %v12768_v14, %v18087_v19 }
 0x6a1   : > { %9698 = vrot.lane.b32.xlu0 %v9697_v9, %s11391_s12  ;;  %9693 = vrot.lane.b32.xlu1 %v9692_v28, %s11391_s12  ;;  %v2448_v9 = vmul.f32 %v12873_v60, %v18085_v18  ;;  %v18088_v28 = vld [vmem:[#allocation64_spill] sm:$0xff] }
 0x6a2   : > { %v2446_v33 = vmul.f32 %v12890_v13, %v18088_v28  ;;  %v2451_v25 = vmul.f32 %v12898_v23, %v18088_v28 }
 0x6a3   : > { %v9727_v41 = vpack.i.bf16 %v2448_v9, %v2447_v20  ;;  %v18091_v9 = vld [vmem:[#allocation68_spill] sm:$0xff] }
 0x6a4   : > { %v2520_v31 = vmul.f32 %v12890_v13, %v18091_v9 }
 0x6a5   : > { %9708 = vrot.lane.b32.xlu0 %v9707_v35, %s11391_s12  ;;  %9703 = vrot.lane.b32.xlu1 %v9702_v32, %s11391_s12  ;;  %v18089_v35 = vld [vmem:[#allocation65_spill] sm:$0xff] }
 0x6a6   : > { %v2445_v32 = vmul.f32 %v12887_v15, %v18089_v35  ;;  %v2450_v16 = vmul.f32 %v12901_v26, %v18089_v35 }
 0x6a8   : > { %v9722_v17 = vpack.i.bf16 %v2446_v33, %v2445_v32  ;;  %v9732_v30 = vpack.i.bf16 %v2450_v16, %v2449_v2  ;;  %v2517_v33 = vmul.f32 %v12857_v4, %v18092_v52  ;;  %v18093_v32 = vld [vmem:[#allocation67_spill] sm:$0xff]  ;;  %v2522_v16 = vmul.f32 %v12873_v60, %v18092_v52 }
 0x6a9   : > { %9718 = vrot.lane.b32.xlu0 %v9717_v29, %s11390_s26  ;;  %9713 = vrot.lane.b32.xlu1 %v9712_v53, %s11391_s12  ;;  %v9737_v53 = vpack.i.bf16 %v2452_v40, %v2451_v25  ;;  %v18090_v29 = vld [vmem:[#allocation71_spill] sm:$0xff]  ;;  %v2518_v56 = vmul.f32 %v12864_v55, %v18093_v32  ;;  %v18094_v40 = vld [vmem:[#allocation49_spill] sm:$0xff]  ;;  %v2523_v2 = vmul.f32 %v12910_v27, %v18093_v32 }
 0x6aa   : > { %v2519_v20 = vmul.f32 %v12887_v15, %v18090_v29  ;;  %v2521_v28 = vmul.f32 %v12747_v44, %v18094_v40  ;;  %v2526_v35 = vmul.f32 %v12768_v14, %v18094_v40 }
 0x6ab   : > { %v9742_v25 = vpack.i.bf16 %v2518_v56, %v2517_v33 }
 0x6ac   : > { %v9752_v33 = vpack.i.bf16 %v2522_v16, %v2521_v28  ;;  %v2594_v28 = vmul.f32 %v12890_v13, %v18098_v45  ;;  %v18099_v16 = vld [vmem:[#allocation70_spill] sm:$0xff] }
 0x6ad   : > { %9728 = vrot.lane.b32.xlu0 %v9727_v41, %s11390_s26  ;;  %9723 = vrot.lane.b32.xlu1 %v9722_v17, %s11390_s26  ;;  %v9747_v41 = vpack.i.bf16 %v2520_v31, %v2519_v20  ;;  %v2524_v17 = vmul.f32 %v12901_v26, %v18090_v29  ;;  %v18096_v20 = vld [vmem:[#allocation72_spill] sm:$0xff]  ;;  %v2525_v29 = vmul.f32 %v12898_v23, %v18091_v9 }
 0x6ae   : > { %v2592_v56 = vmul.f32 %v12864_v55, %v18096_v20 }
 0x6af   : > { %v9762_v0 = vpack.i.bf16 %v2526_v35, %v2525_v29  ;;  %v2597_v35 = vmul.f32 %v12910_v27, %v18096_v20  ;;  %v2598_v29 = vmul.f32 %v12901_v26, %v18099_v16 }
 0x6b1   : > { %9738 = vrot.lane.b32.xlu0 %v9737_v53, %s11390_s26  ;;  %9733 = vrot.lane.b32.xlu1 %v9732_v30, %s11390_s26  ;;  %v9757_v53 = vpack.i.bf16 %v2524_v17, %v2523_v2  ;;  %v18095_v30 = vld [vmem:[#allocation55_spill] sm:$0xff] }
 0x6b2   : > { %v2591_v31 = vmul.f32 %v12857_v4, %v18095_v30  ;;  %v2596_v2 = vmul.f32 %v12873_v60, %v18095_v30 }
 0x6b5   : > { %9748 = vrot.lane.b32.xlu0 %v9747_v41, %s11389_s17  ;;  %9743 = vrot.lane.b32.xlu1 %v9742_v25, %s11389_s17  ;;  %v9767_v41 = vpack.i.bf16 %v2592_v56, %v2591_v31  ;;  %v18097_v25 = vld [vmem:[#allocation56_spill] sm:$0xff]  ;;  %v2599_v31 = vmul.f32 %v12898_v23, %v18098_v45 }
 0x6b6   : > { %v2595_v17 = vmul.f32 %v12747_v44, %v18097_v25  ;;  %v2600_v56 = vmul.f32 %v12768_v14, %v18097_v25  ;;  %v2666_v14 = vmul.f32 %v12864_v55, %v12430_v62  ;;  %v2671_v55 = vmul.f32 %v12910_v27, %v12430_v62 }
 0x6b7   : > { %v2665_v27 = vmul.f32 %v12857_v4, %v12409_v57 }
 0x6b9   : > { %9758 = vrot.lane.b32.xlu0 %v9757_v53, %s11389_s17  ;;  %9753 = vrot.lane.b32.xlu1 %v9752_v33, %s11389_s17  ;;  %v2593_v53 = vmul.f32 %v12887_v15, %v18099_v16  ;;  %v9777_v33 = vpack.i.bf16 %v2596_v2, %v2595_v17  ;;  %v2669_v17 = vmul.f32 %v12747_v44, %v12449_v11  ;;  %v2733_v44 = vld [vmem:[#allocation9 + $0x20] sm:$0xff] }
 0x6ba   : > { %v9782_v2 = vpack.i.bf16 %v2598_v29, %v2597_v35  ;;  %v2732_v35 = vld [vmem:[#allocation9 + $0x18] sm:$0xff] }
 0x6bb   : > { %v9772_v40 = vpack.i.bf16 %v2594_v28, %v2593_v53  ;;  %v2667_v28 = vmul.f32 %v12887_v15, %v12441_v1  ;;  %v2664_v53 = vld [vmem:[%s11697_s2 + $0x58] sm:$0xff]  ;;  %v2672_v15 = vmul.f32 %v12901_v26, %v12441_v1  ;;  %s18100_s2 = smov 55   ;;  %v2670_v26 = vmul.f32 %v12873_v60, %v12409_v57 }
 0x6bd   : > { %9768 = vrot.lane.b32.xlu0 %v9767_v41, %s11388_s13  ;;  %9763 = vrot.lane.b32.xlu1 %v9762_v0, %s11389_s17  ;;  %v9787_v0 = vpack.i.bf16 %v2600_v56, %v2599_v31  ;;  %v2668_v41 = vmul.f32 %v12890_v13, %v12456_v39  ;;  %v2674_v13 = vmul.f32 %v2664_v53, %v12449_v11  ;;  %v2734_v31 = vld [vmem:[#allocation9 + $0x28] sm:$0xff] }
 0x6be   : > { %v9792_v56 = vpack.i.bf16 %v2667_v28, %v2666_v14  ;;  %3184 = vmatprep.mubr.f32.mxu1 %v2734_v31  ;;  %3030 = vmatprep.mubr.f32.mxu0 %v2734_v31  ;;  %v9802_v29 = vpack.i.bf16 %v2672_v15, %v2671_v55 }
 0x6bf   : > { %3185 = vmatmul.mubr.f32.gmra.mrb[2].mxu1 %v2733_v44  ;;  %3031 = vmatmul.mubr.f32.gmra.mrb[2].mxu0 %v2733_v44 }
 0x6c0   : > { %8363 = vmatprep.mubr.msk.f32.mxu1 %vm2953_vm11, %v2732_v35  ;;  %8361 = vmatprep.mubr.msk.f32.mxu0 %vm2953_vm11, %v2732_v35 }
 0x6c1   : > { %9778 = vrot.lane.b32.xlu0 %v9777_v33, %s11388_s13  ;;  %9773 = vrot.lane.b32.xlu1 %v9772_v40, %s11388_s13  ;;  %v9797_v40 = vpack.i.bf16 %v2669_v17, %v2668_v41  ;;  %v2673_v33 = vmul.f32 %v12898_v23, %v12456_v39 }
 0x6c3   : > { %v9807_v23 = vpack.i.bf16 %v2674_v13, %v2673_v33 }
 0x6c5   : > { %9788 = vrot.lane.b32.xlu0 %v9787_v0, %s11388_s13  ;;  %9783 = vrot.lane.b32.xlu1 %v9782_v2, %s11388_s13  ;;  %v9812_v0 = vpack.i.bf16 %v2670_v26, %v2665_v27 }
 0x6c9   : > { %9798 = vrot.lane.b32.xlu0 %v9797_v40, %s18100_s2  ;;  %9793 = vrot.lane.b32.xlu1 %v9792_v56, %s18100_s2 }
 0x6cd   : > { %9808 = vrot.lane.b32.xlu0 %v9807_v23, %s18100_s2  ;;  %9803 = vrot.lane.b32.xlu1 %v9802_v29, %s18100_s2 }
 0x6d1   : > { %9813 = vrot.lane.b32.xlu1 %v9812_v0, %s18100_s2 }
 0x6df   : > { %v9569_v41 = vpop.permute.xlu0 %9568 }
 0x6e0   : > { %v9571_v14 = vunpack.i.h.bf16 %v9569_v41  ;;  %v9570_v28 = vunpack.i.l.bf16 %v9569_v41 }
 0x6e2   : > { %v2049_v15 = vsel %vm17458_vm9, %v9570_v28, %v9571_v14 }
 0x6e3   : > { %v9579_v17 = vpop.permute.xlu0 %9578  ;;  %v9574_v2 = vpop.permute.xlu1 %9573 }
 0x6e4   : > { %v9576_v53 = vunpack.i.h.bf16 %v9574_v2  ;;  %v9575_v40 = vunpack.i.l.bf16 %v9574_v2  ;;  %v9580_v33 = vunpack.i.l.bf16 %v9579_v17  ;;  %v9581_v60 = vunpack.i.h.bf16 %v9579_v17 }
 0x6e6   : > { %v2050_v35 = vsel %vm17458_vm9, %v9571_v14, %v9575_v40  ;;  %v2052_v23 = vsel %vm17458_vm9, %v9576_v53, %v9580_v33  ;;  %v2051_v17 = vsel %vm17458_vm9, %v9575_v40, %v9576_v53 }
 0x6e7   : > { %v9589_v13 = vpop.permute.xlu0 %9588  ;;  %v9584_v4 = vpop.permute.xlu1 %9583 }
 0x6e8   : > { %v9591_v31 = vunpack.i.h.bf16 %v9589_v13  ;;  %v9590_v44 = vunpack.i.l.bf16 %v9589_v13  ;;  %v9586_v56 = vunpack.i.h.bf16 %v9584_v4  ;;  %v9585_v55 = vunpack.i.l.bf16 %v9584_v4 }
 0x6ea   : > { %v2056_v29 = vsel %vm17458_vm9, %v9590_v44, %v9591_v31  ;;  %v2053_v27 = vsel %vm17458_vm9, %v9581_v60, %v9585_v55  ;;  %v2055_v26 = vsel %vm17458_vm9, %v9586_v56, %v9590_v44  ;;  %v2054_v41 = vsel %vm17458_vm9, %v9585_v55, %v9586_v56 }
 0x6eb   : > { %v9599_v0 = vpop.permute.xlu0 %9598  ;;  %v8554_v2 = vpack.c.bf16 %v2056_v29, %v2052_v23  ;;  %v9594_v13 = vpop.permute.xlu1 %9593  ;;  %v8446_v4 = vpack.c.bf16 %v2054_v41, %v2050_v35  ;;  %v8448_v1 = vpack.c.bf16 %v2053_v27, %v2049_v15  ;;  %v8556_v28 = vpack.c.bf16 %v2055_v26, %v2051_v17 }
 0x6ec   : > { %v9596_v14 = vunpack.i.h.bf16 %v9594_v13  ;;  %v9600_v11 = vunpack.i.l.bf16 %v9599_v0  ;;  %v9595_v33 = vunpack.i.l.bf16 %v9594_v13  ;;  %v9601_v56 = vunpack.i.h.bf16 %v9599_v0 }
 0x6ed   : > { %8555 = vmatprep.subr.bf16.mxu1 %v8554_v2  ;;  %8447 = vmatprep.subr.bf16.mxu0 %v8446_v4  ;;  %vm18101_vm9 = vcmask 449536  }
 0x6ee   : > { %8449 = vmatpush1.bf16.msra.mxu0 %v8448_v1  ;;  %8557 = vmatpush1.bf16.msra.mxu1 %v8556_v28  ;;  %v2124_v55 = vsel %vm463_vm7, %v9596_v14, %v9600_v11  ;;  %v2123_v40 = vsel %vm463_vm7, %v9595_v33, %v9596_v14  ;;  %v2125_v2 = vsel %vm463_vm7, %v9600_v11, %v9601_v56  ;;  %vm18102_vm13 = vmmov %vm18101_vm9 }
 0x6ef   : > { %v9609_v31 = vpop.permute.xlu0 %9608  ;;  %v9604_v60 = vpop.permute.xlu1 %9603  ;;  %vm18103_vm15 = vmmov %vm18101_vm9 }
 0x6f0   : > { %v9611_v44 = vunpack.i.h.bf16 %v9609_v31  ;;  %v9610_v39 = vunpack.i.l.bf16 %v9609_v31  ;;  %v9606_v25 = vunpack.i.h.bf16 %v9604_v60  ;;  %v9605_v15 = vunpack.i.l.bf16 %v9604_v60  ;;  %vm18104_vm0 = vmmov %vm18101_vm9 }
 0x6f1   : > { %vm18105_vm14 = vmmov %vm18104_vm0 }
 0x6f2   : > { %v2128_v53 = vsel %vm463_vm7, %v9610_v39, %v9611_v44  ;;  %v2127_v35 = vsel %vm463_vm7, %v9606_v25, %v9610_v39  ;;  %v2126_v13 = vsel %vm463_vm7, %v9601_v56, %v9605_v15  ;;  %vm18106_vm12 = vmmov %vm18104_vm0 }
 0x6f3   : > { %v9619_v23 = vpop.permute.xlu0 %9618  ;;  %v8450_v29 = vpack.c.bf16 %v2128_v53, %v2124_v55  ;;  %v9614_v27 = vpop.permute.xlu1 %9613  ;;  %v8452_v1 = vpack.c.bf16 %v2127_v35, %v2123_v40 }
 0x6f4   : > { %v9616_v26 = vunpack.i.h.bf16 %v9614_v27  ;;  %v9615_v41 = vunpack.i.l.bf16 %v9614_v27  ;;  %v9621_v25 = vunpack.i.h.bf16 %v9619_v23  ;;  %v9620_v33 = vunpack.i.l.bf16 %v9619_v23 }
 0x6f5   : > { %8451 = vmatprep.subr.bf16.mxu0 %v8450_v29 }
 0x6f6   : > { %8453 = vmatpush1.bf16.msra.mxu0 %v8452_v1  ;;  %v2129_v0 = vsel %vm463_vm7, %v9611_v44, %v9615_v41  ;;  %v2130_v4 = vsel %vm463_vm7, %v9615_v41, %v9616_v26  ;;  %v2197_v56 = vsel %vm575_vm6, %v9620_v33, %v9621_v25 }
 0x6f7   : > { %v9629_v17 = vpop.permute.xlu0 %9628  ;;  %v9624_v28 = vpop.permute.xlu1 %9623  ;;  %v8558_v14 = vpack.c.bf16 %v2130_v4, %v2126_v13  ;;  %v8560_v39 = vpack.c.bf16 %v2129_v0, %v2125_v2 }
 0x6f8   : > { %v9626_v31 = vunpack.i.h.bf16 %v9624_v28  ;;  %v9625_v60 = vunpack.i.l.bf16 %v9624_v28  ;;  %v9630_v55 = vunpack.i.l.bf16 %v9629_v17  ;;  %v9631_v44 = vunpack.i.h.bf16 %v9629_v17 }
 0x6f9   : > { %8559 = vmatprep.subr.bf16.mxu1 %v8558_v14 }
 0x6fa   : > { %8561 = vmatpush1.bf16.msra.mxu1 %v8560_v39  ;;  %v2198_v15 = vsel %vm575_vm6, %v9621_v25, %v9625_v60  ;;  %v2200_v1 = vsel %vm575_vm6, %v9626_v31, %v9630_v55  ;;  %v2199_v17 = vsel %vm575_vm6, %v9625_v60, %v9626_v31 }
 0x6fb   : > { %v9639_v53 = vpop.permute.xlu0 %9638  ;;  %v9634_v40 = vpop.permute.xlu1 %9633 }
 0x6fc   : > { %v9641_v11 = vunpack.i.h.bf16 %v9639_v53  ;;  %v9640_v35 = vunpack.i.l.bf16 %v9639_v53  ;;  %v9636_v29 = vunpack.i.h.bf16 %v9634_v40  ;;  %v9635_v27 = vunpack.i.l.bf16 %v9634_v40 }
 0x6fe   : > { %v2204_v23 = vsel %vm575_vm6, %v9640_v35, %v9641_v11  ;;  %v2201_v26 = vsel %vm575_vm6, %v9631_v44, %v9635_v27  ;;  %v2203_v41 = vsel %vm575_vm6, %v9636_v29, %v9640_v35  ;;  %v2202_v0 = vsel %vm575_vm6, %v9635_v27, %v9636_v29 }
 0x6ff   : > { %v9649_v2 = vpop.permute.xlu0 %9648  ;;  %v8562_v13 = vpack.c.bf16 %v2204_v23, %v2200_v1  ;;  %v9644_v4 = vpop.permute.xlu1 %9643  ;;  %v8454_v28 = vpack.c.bf16 %v2202_v0, %v2198_v15  ;;  %v8456_v14 = vpack.c.bf16 %v2201_v26, %v2197_v56  ;;  %v8564_v39 = vpack.c.bf16 %v2203_v41, %v2199_v17 }
 0x700   : > { %v9646_v25 = vunpack.i.h.bf16 %v9644_v4  ;;  %v9650_v33 = vunpack.i.l.bf16 %v9649_v2  ;;  %v9645_v55 = vunpack.i.l.bf16 %v9644_v4  ;;  %v9651_v29 = vunpack.i.h.bf16 %v9649_v2 }
 0x701   : > { %8563 = vmatprep.subr.bf16.mxu1 %v8562_v13  ;;  %8455 = vmatprep.subr.bf16.mxu0 %v8454_v28 }
 0x702   : > { %8457 = vmatpush1.bf16.msra.mxu0 %v8456_v14  ;;  %8565 = vmatpush1.bf16.msra.mxu1 %v8564_v39  ;;  %v2272_v27 = vsel %vm687_vm5, %v9646_v25, %v9650_v33  ;;  %v2271_v60 = vsel %vm687_vm5, %v9645_v55, %v9646_v25  ;;  %v2273_v17 = vsel %vm687_vm5, %v9650_v33, %v9651_v29 }
 0x703   : > { %v9659_v53 = vpop.permute.xlu0 %9658  ;;  %v9654_v40 = vpop.permute.xlu1 %9653 }
 0x704   : > { %v9661_v11 = vunpack.i.h.bf16 %v9659_v53  ;;  %v9660_v35 = vunpack.i.l.bf16 %v9659_v53  ;;  %v9656_v44 = vunpack.i.h.bf16 %v9654_v40  ;;  %v9655_v56 = vunpack.i.l.bf16 %v9654_v40 }
 0x706   : > { %v2276_v31 = vsel %vm687_vm5, %v9660_v35, %v9661_v11  ;;  %v2275_v15 = vsel %vm687_vm5, %v9656_v44, %v9660_v35  ;;  %v2274_v28 = vsel %vm687_vm5, %v9651_v29, %v9655_v56 }
 0x707   : > { %v9669_v1 = vpop.permute.xlu0 %9668  ;;  %v8458_v23 = vpack.c.bf16 %v2276_v31, %v2272_v27  ;;  %v9664_v26 = vpop.permute.xlu1 %9663  ;;  %v8460_v41 = vpack.c.bf16 %v2275_v15, %v2271_v60 }
 0x708   : > { %v9666_v0 = vunpack.i.h.bf16 %v9664_v26  ;;  %v9665_v13 = vunpack.i.l.bf16 %v9664_v26  ;;  %v9671_v53 = vunpack.i.h.bf16 %v9669_v1  ;;  %v9670_v40 = vunpack.i.l.bf16 %v9669_v1 }
 0x709   : > { %8459 = vmatprep.subr.bf16.mxu0 %v8458_v23 }
 0x70a   : > { %8461 = vmatpush1.bf16.msra.mxu0 %v8460_v41  ;;  %v2277_v2 = vsel %vm687_vm5, %v9661_v11, %v9665_v13  ;;  %v2278_v14 = vsel %vm687_vm5, %v9665_v13, %v9666_v0  ;;  %v2345_v29 = vsel %vm799_vm4, %v9670_v40, %v9671_v53 }
 0x70b   : > { %v9679_v4 = vpop.permute.xlu0 %9678  ;;  %v9674_v39 = vpop.permute.xlu1 %9673  ;;  %v8566_v25 = vpack.c.bf16 %v2278_v14, %v2274_v28  ;;  %v8568_v55 = vpack.c.bf16 %v2277_v2, %v2273_v17 }
 0x70c   : > { %v9676_v35 = vunpack.i.h.bf16 %v9674_v39  ;;  %v9675_v44 = vunpack.i.l.bf16 %v9674_v39  ;;  %v9680_v27 = vunpack.i.l.bf16 %v9679_v4  ;;  %v9681_v11 = vunpack.i.h.bf16 %v9679_v4 }
 0x70d   : > { %8567 = vmatprep.subr.bf16.mxu1 %v8566_v25 }
 0x70e   : > { %8569 = vmatpush1.bf16.msra.mxu1 %v8568_v55  ;;  %v2346_v56 = vsel %vm799_vm4, %v9671_v53, %v9675_v44  ;;  %v2348_v41 = vsel %vm799_vm4, %v9676_v35, %v9680_v27  ;;  %v2347_v4 = vsel %vm799_vm4, %v9675_v44, %v9676_v35 }
 0x70f   : > { %v9689_v31 = vpop.permute.xlu0 %9688  ;;  %v9684_v60 = vpop.permute.xlu1 %9683 }
 0x710   : > { %v9691_v33 = vunpack.i.h.bf16 %v9689_v31  ;;  %v9690_v15 = vunpack.i.l.bf16 %v9689_v31  ;;  %v9686_v23 = vunpack.i.h.bf16 %v9684_v60  ;;  %v9685_v26 = vunpack.i.l.bf16 %v9684_v60 }
 0x712   : > { %v2352_v1 = vsel %vm799_vm4, %v9690_v15, %v9691_v33  ;;  %v2349_v0 = vsel %vm799_vm4, %v9681_v11, %v9685_v26  ;;  %v2351_v13 = vsel %vm799_vm4, %v9686_v23, %v9690_v15  ;;  %v2350_v2 = vsel %vm799_vm4, %v9685_v26, %v9686_v23 }
 0x713   : > { %v9699_v17 = vpop.permute.xlu0 %9698  ;;  %v8570_v28 = vpack.c.bf16 %v2352_v1, %v2348_v41  ;;  %v9694_v14 = vpop.permute.xlu1 %9693  ;;  %v8462_v39 = vpack.c.bf16 %v2350_v2, %v2346_v56  ;;  %v8464_v25 = vpack.c.bf16 %v2349_v0, %v2345_v29  ;;  %v8572_v55 = vpack.c.bf16 %v2351_v13, %v2347_v4 }
 0x714   : > { %v9696_v53 = vunpack.i.h.bf16 %v9694_v14  ;;  %v9700_v40 = vunpack.i.l.bf16 %v9699_v17  ;;  %v9695_v27 = vunpack.i.l.bf16 %v9694_v14  ;;  %v9701_v23 = vunpack.i.h.bf16 %v9699_v17 }
 0x715   : > { %8571 = vmatprep.subr.bf16.mxu1 %v8570_v28  ;;  %8463 = vmatprep.subr.bf16.mxu0 %v8462_v39 }
 0x716   : > { %8465 = vmatpush1.bf16.msra.mxu0 %v8464_v25  ;;  %8573 = vmatpush1.bf16.msra.mxu1 %v8572_v55  ;;  %v2410_v26 = vsel %vm864_vm8, %v9696_v53, %v9700_v40  ;;  %v2409_v44 = vsel %vm864_vm8, %v9695_v27, %v9696_v53  ;;  %v2411_v4 = vsel %vm864_vm8, %v9700_v40, %v9701_v23 }
 0x717   : > { %v9709_v31 = vpop.permute.xlu0 %9708  ;;  %v9704_v60 = vpop.permute.xlu1 %9703 }
 0x718   : > { %v9711_v33 = vunpack.i.h.bf16 %v9709_v31  ;;  %v9710_v15 = vunpack.i.l.bf16 %v9709_v31  ;;  %v9706_v11 = vunpack.i.h.bf16 %v9704_v60  ;;  %v9705_v29 = vunpack.i.l.bf16 %v9704_v60 }
 0x71a   : > { %v2414_v35 = vsel %vm864_vm8, %v9710_v15, %v9711_v33  ;;  %v2413_v56 = vsel %vm864_vm8, %v9706_v11, %v9710_v15  ;;  %v2412_v39 = vsel %vm864_vm8, %v9701_v23, %v9705_v29 }
 0x71b   : > { %v9719_v41 = vpop.permute.xlu0 %9718  ;;  %v8466_v1 = vpack.c.bf16 %v2414_v35, %v2410_v26  ;;  %v9714_v0 = vpop.permute.xlu1 %9713  ;;  %v8468_v13 = vpack.c.bf16 %v2413_v56, %v2409_v44 }
 0x71c   : > { %v9716_v2 = vunpack.i.h.bf16 %v9714_v0  ;;  %v9715_v28 = vunpack.i.l.bf16 %v9714_v0  ;;  %v9721_v31 = vunpack.i.h.bf16 %v9719_v41  ;;  %v9720_v60 = vunpack.i.l.bf16 %v9719_v41 }
 0x71d   : > { %8467 = vmatprep.subr.bf16.mxu0 %v8466_v1 }
 0x71e   : > { %8469 = vmatpush1.bf16.msra.mxu0 %v8468_v13  ;;  %v2415_v17 = vsel %vm864_vm8, %v9711_v33, %v9715_v28  ;;  %v2416_v25 = vsel %vm864_vm8, %v9715_v28, %v9716_v2  ;;  %v2483_v23 = vsel %vm750_vm3, %v9720_v60, %v9721_v31 }
 0x71f   : > { %v9729_v14 = vpop.permute.xlu0 %9728  ;;  %v9724_v55 = vpop.permute.xlu1 %9723  ;;  %v8574_v53 = vpack.c.bf16 %v2416_v25, %v2412_v39  ;;  %v8576_v27 = vpack.c.bf16 %v2415_v17, %v2411_v4 }
 0x720   : > { %v9726_v15 = vunpack.i.h.bf16 %v9724_v55  ;;  %v9725_v11 = vunpack.i.l.bf16 %v9724_v55  ;;  %v9730_v26 = vunpack.i.l.bf16 %v9729_v14  ;;  %v9731_v33 = vunpack.i.h.bf16 %v9729_v14 }
 0x721   : > { %8575 = vmatprep.subr.bf16.mxu1 %v8574_v53 }
 0x722   : > { %8577 = vmatpush1.bf16.msra.mxu1 %v8576_v27  ;;  %v2484_v29 = vsel %vm750_vm3, %v9721_v31, %v9725_v11  ;;  %v2486_v13 = vsel %vm750_vm3, %v9726_v15, %v9730_v26  ;;  %v2485_v14 = vsel %vm750_vm3, %v9725_v11, %v9726_v15 }
 0x723   : > { %v9739_v35 = vpop.permute.xlu0 %9738  ;;  %v9734_v44 = vpop.permute.xlu1 %9733 }
 0x724   : > { %v9741_v40 = vunpack.i.h.bf16 %v9739_v35  ;;  %v9740_v56 = vunpack.i.l.bf16 %v9739_v35  ;;  %v9736_v1 = vunpack.i.h.bf16 %v9734_v44  ;;  %v9735_v0 = vunpack.i.l.bf16 %v9734_v44 }
 0x726   : > { %v2490_v41 = vsel %vm750_vm3, %v9740_v56, %v9741_v40  ;;  %v2487_v2 = vsel %vm750_vm3, %v9731_v33, %v9735_v0  ;;  %v2489_v28 = vsel %vm750_vm3, %v9736_v1, %v9740_v56  ;;  %v2488_v17 = vsel %vm750_vm3, %v9735_v0, %v9736_v1 }
 0x727   : > { %v9749_v4 = vpop.permute.xlu0 %9748  ;;  %v8578_v39 = vpack.c.bf16 %v2490_v41, %v2486_v13  ;;  %v9744_v25 = vpop.permute.xlu1 %9743  ;;  %v8470_v55 = vpack.c.bf16 %v2488_v17, %v2484_v29  ;;  %v8472_v53 = vpack.c.bf16 %v2487_v2, %v2483_v23  ;;  %v8580_v27 = vpack.c.bf16 %v2489_v28, %v2485_v14 }
 0x728   : > { %v9746_v31 = vunpack.i.h.bf16 %v9744_v25  ;;  %v9750_v60 = vunpack.i.l.bf16 %v9749_v4  ;;  %v9745_v26 = vunpack.i.l.bf16 %v9744_v25  ;;  %v9751_v1 = vunpack.i.h.bf16 %v9749_v4 }
 0x729   : > { %8579 = vmatprep.subr.bf16.mxu1 %v8578_v39  ;;  %8471 = vmatprep.subr.bf16.mxu0 %v8470_v55 }
 0x72a   : > { %8473 = vmatpush1.bf16.msra.mxu0 %v8472_v53  ;;  %8581 = vmatpush1.bf16.msra.mxu1 %v8580_v27  ;;  %v2558_v0 = vsel %vm638_vm2, %v9746_v31, %v9750_v60  ;;  %v2557_v11 = vsel %vm638_vm2, %v9745_v26, %v9746_v31  ;;  %v2559_v14 = vsel %vm638_vm2, %v9750_v60, %v9751_v1 }
 0x72b   : > { %v9759_v35 = vpop.permute.xlu0 %9758  ;;  %v9754_v44 = vpop.permute.xlu1 %9753 }
 0x72c   : > { %v9761_v40 = vunpack.i.h.bf16 %v9759_v35  ;;  %v9760_v56 = vunpack.i.l.bf16 %v9759_v35  ;;  %v9756_v33 = vunpack.i.h.bf16 %v9754_v44  ;;  %v9755_v23 = vunpack.i.l.bf16 %v9754_v44 }
 0x72e   : > { %v2562_v15 = vsel %vm638_vm2, %v9760_v56, %v9761_v40  ;;  %v2561_v29 = vsel %vm638_vm2, %v9756_v33, %v9760_v56  ;;  %v2560_v55 = vsel %vm638_vm2, %v9751_v1, %v9755_v23 }
 0x72f   : > { %v9769_v13 = vpop.permute.xlu0 %9768  ;;  %v8474_v41 = vpack.c.bf16 %v2562_v15, %v2558_v0  ;;  %v9764_v2 = vpop.permute.xlu1 %9763  ;;  %v8476_v28 = vpack.c.bf16 %v2561_v29, %v2557_v11 }
 0x730   : > { %v9766_v17 = vunpack.i.h.bf16 %v9764_v2  ;;  %v9765_v39 = vunpack.i.l.bf16 %v9764_v2  ;;  %v9771_v35 = vunpack.i.h.bf16 %v9769_v13  ;;  %v9770_v44 = vunpack.i.l.bf16 %v9769_v13 }
 0x731   : > { %8475 = vmatprep.subr.bf16.mxu0 %v8474_v41 }
 0x732   : > { %8477 = vmatpush1.bf16.msra.mxu0 %v8476_v28  ;;  %v2563_v4 = vsel %vm638_vm2, %v9761_v40, %v9765_v39  ;;  %v2564_v53 = vsel %vm638_vm2, %v9765_v39, %v9766_v17  ;;  %v2631_v1 = vsel %vm17752_vm1, %v9770_v44, %v9771_v35 }
 0x733   : > { %v9779_v25 = vpop.permute.xlu0 %9778  ;;  %v9774_v27 = vpop.permute.xlu1 %9773  ;;  %v8582_v31 = vpack.c.bf16 %v2564_v53, %v2560_v55  ;;  %v8584_v26 = vpack.c.bf16 %v2563_v4, %v2559_v14 }
 0x734   : > { %v9776_v56 = vunpack.i.h.bf16 %v9774_v27  ;;  %v9775_v33 = vunpack.i.l.bf16 %v9774_v27  ;;  %v9780_v0 = vunpack.i.l.bf16 %v9779_v25  ;;  %v9781_v40 = vunpack.i.h.bf16 %v9779_v25 }
 0x735   : > { %8583 = vmatprep.subr.bf16.mxu1 %v8582_v31 }
 0x736   : > { %8585 = vmatpush1.bf16.msra.mxu1 %v8584_v26  ;;  %v2632_v23 = vsel %vm17752_vm1, %v9771_v35, %v9775_v33  ;;  %v2634_v28 = vsel %vm17752_vm1, %v9776_v56, %v9780_v0  ;;  %v2633_v25 = vsel %vm17752_vm1, %v9775_v33, %v9776_v56 }
 0x737   : > { %v9789_v15 = vpop.permute.xlu0 %9788  ;;  %v9784_v11 = vpop.permute.xlu1 %9783 }
 0x738   : > { %v9791_v60 = vunpack.i.h.bf16 %v9789_v15  ;;  %v9790_v29 = vunpack.i.l.bf16 %v9789_v15  ;;  %v9786_v41 = vunpack.i.h.bf16 %v9784_v11  ;;  %v9785_v2 = vunpack.i.l.bf16 %v9784_v11 }
 0x73a   : > { %v2638_v13 = vsel %vm17752_vm1, %v9790_v29, %v9791_v60  ;;  %v2635_v17 = vsel %vm17752_vm1, %v9781_v40, %v9785_v2  ;;  %v2637_v39 = vsel %vm17752_vm1, %v9786_v41, %v9790_v29  ;;  %v2636_v4 = vsel %vm17752_vm1, %v9785_v2, %v9786_v41 }
 0x73b   : > { %v9799_v14 = vpop.permute.xlu0 %9798  ;;  %v8586_v55 = vpack.c.bf16 %v2638_v13, %v2634_v28  ;;  %v9794_v53 = vpop.permute.xlu1 %9793  ;;  %v8478_v27 = vpack.c.bf16 %v2636_v4, %v2632_v23  ;;  %v8480_v31 = vpack.c.bf16 %v2635_v17, %v2631_v1  ;;  %v8588_v26 = vpack.c.bf16 %v2637_v39, %v2633_v25 }
 0x73c   : > { %v9796_v35 = vunpack.i.h.bf16 %v9794_v53  ;;  %v9801_v44 = vunpack.i.h.bf16 %v9799_v14  ;;  %v9800_v0 = vunpack.i.l.bf16 %v9799_v14  ;;  %v9795_v15 = vunpack.i.l.bf16 %v9794_v53  ;;  %v2731_v53 = vld [vmem:[#allocation9 + $0x10] sm:$0xff] }
 0x73d   : > { %8587 = vmatprep.subr.bf16.mxu1 %v8586_v55  ;;  %8479 = vmatprep.subr.bf16.mxu0 %v8478_v27 }
 0x73e   : > { %8481 = vmatpush1.bf16.msra.mxu0 %v8480_v31  ;;  %8589 = vmatpush1.bf16.msra.mxu1 %v8588_v26  ;;  %v2707_v56 = vsel %vm18101_vm9, %v9796_v35, %v9800_v0  ;;  %v2708_v33 = vsel %vm18102_vm13, %v9800_v0, %v9801_v44  ;;  %v2706_v28 = vsel %vm18105_vm14, %v9795_v15, %v9796_v35  ;;  %vm18107_vm9 = vmmov %vm18104_vm0  ;;  %v2736_v26 = vld [vmem:[#allocation9 + $0x38] sm:$0xff]  ;;  %v2735_v35 = vld [vmem:[#allocation9 + $0x30] sm:$0xff]  ;;  %vm18461_vm14 = vcmask 56320  }
 0x73f   : > { %v9809_v11 = vpop.permute.xlu0 %9808  ;;  %v9804_v60 = vpop.permute.xlu1 %9803  ;;  %vm18108_vm13 = vmmov %vm18104_vm0 }
 0x740   : > { %v9811_v29 = vunpack.i.h.bf16 %v9809_v11  ;;  %v9810_v40 = vunpack.i.l.bf16 %v9809_v11  ;;  %v9806_v41 = vunpack.i.h.bf16 %v9804_v60  ;;  %v9805_v2 = vunpack.i.l.bf16 %v9804_v60 }
 0x742   : > { %v2712_v1 = vsel %vm18103_vm15, %v9810_v40, %v9811_v29  ;;  %v2711_v23 = vsel %vm18104_vm0, %v9806_v41, %v9810_v40  ;;  %v2710_v13 = vsel %vm18106_vm12, %v9805_v2, %v9806_v41  ;;  %vm18458_vm12 = vcmask 64512  }
 0x743   : > { %v8590_v17 = vpack.c.bf16 %v2712_v1, %v2708_v33  ;;  %v9814_v39 = vpop.permute.xlu1 %9813  ;;  %v8482_v14 = vpack.c.bf16 %v2710_v13, %v2706_v28  ;;  %v8592_v4 = vpack.c.bf16 %v2711_v23, %v2707_v56  ;;  %v17464_v1 = vmov 0.0  }
 0x744   : > { %v9816_v55 = vunpack.i.h.bf16 %v9814_v39  ;;  %v9815_v25 = vunpack.i.l.bf16 %v9814_v39  ;;  %vm18465_vm15 = vcmask 7168  }
 0x745   : > { %8591 = vmatprep.subr.bf16.mxu1 %v8590_v17  ;;  %8483 = vmatprep.subr.bf16.mxu0 %v8482_v14  ;;  %v13289_v14 = vmul.f32 0.0, %v11939_v63  ;;  %v18131_v63 = vld [vmem:[#allocation62_spill] sm:$0xff] }
 0x746   : > { %8593 = vmatpush1.bf16.msra.mxu1 %v8592_v4  ;;  %v2705_v27 = vsel %vm18107_vm9, %v9815_v25, %v9795_v15  ;;  %v2709_v31 = vsel %vm18108_vm13, %v9816_v55, %v9805_v2  ;;  %vm18490_vm9 = vmmov %vm18104_vm0 }
 0x747   : > { %v8484_v44 = vpack.c.bf16 %v2709_v31, %v2705_v27  ;;  %18114 = vst [vmem:[#allocation103_spill] sm:$0xff] %v13289_v14  ;;  %v13303_v27 = vmul.f32 0.0, %v18079_v22  ;;  %v13307_v31 = vmul.f32 0.0, %v11963_v37  ;;  %vm18494_vm13 = vmmov %vm18104_vm0 }
 0x749   : > { %3256 = vmatmul.mubr.f32.vlgmr.msra.gmra.mrb[0].mxu1 %v2731_v53  ;;  %8485 = vmatpush1.bf16.msra.mxu0 %v8484_v44  ;;  %18116 = vst [vmem:[#allocation105_spill] sm:$0xff] %v13303_v27  ;;  %18117 = vst [vmem:[#allocation106_spill] sm:$0xff] %v13307_v31 }
 0x74a   : > { %8364 = vmatprep.mubr.msk.f32.mxu1 %vm2953_vm11, %v2736_v26 }
 0x74c   : > { %3102 = vmatmul.mubr.f32.vlgmr.msra.gmra.mrb[0].mxu0 %v2731_v53 }
 0x74d   : > { %3262 = vmatmul.mubr.f32.gmra.mrb[2].mxu1 %v2735_v35  ;;  %8362 = vmatprep.mubr.msk.f32.mxu0 %vm2953_vm11, %v2736_v26 }
 0x750   : > { %3108 = vmatmul.mubr.f32.gmra.mrb[2].mxu0 %v2735_v35 }
 0x81c   : > { %v3257_v0 = vpop.f32.mrb[0].mxu1 }
 0x81d   : > { %v3259_v11 = vpop.f32.mrb[1].mxu1  ;;  %v13271_v2 = vmax.f32 %v3257_v0, 0.0 }
 0x81e   : > { %v13275_v33 = vmax.f32 %v3259_v11, 0.0  ;;  %v13317_v11 = vmul.f32 0.0, %v18083_v12 }
 0x81f   : > { %v3103_v60 = vpop.f32.mrb[0].mxu0  ;;  %18110 = vst [vmem:[#allocation99_spill] sm:$0xff] %v13271_v2  ;;  %v13406_v37 = vmul.f32 %v13271_v2, %v12111_v24 }
 0x820   : > { %v3263_v29 = vpop.f32.mrb[2].mxu1  ;;  %v13269_v40 = vmax.f32 %v3103_v60, 0.0  ;;  %v3105_v15 = vpop.f32.mrb[1].mxu0  ;;  %18112 = vst [vmem:[#allocation101_spill] sm:$0xff] %v13275_v33  ;;  %v13293_v4 = vpack.i.bf16 %v17464_v1, %v13275_v33  ;;  %18118 = vst [vmem:[#allocation107_spill] sm:$0xff] %v13317_v11  ;;  %v13321_v60 = vmul.f32 0.0, %v18085_v18  ;;  %v3445_v18 = vmul.f32 %v13271_v2, %v12091_v46 }
 0x821   : > { %v3265_v41 = vpop.f32.mrb[3].mxu1  ;;  %v13273_v56 = vmax.f32 %v3105_v15, 0.0 }
 0x822   : > { %18109 = vst [vmem:[#allocation98_spill] sm:$0xff] %v13269_v40  ;;  %v9817_v23 = vpack.i.bf16 %v13269_v40, %v17464_v1  ;;  %v3369_v17 = vmul.f32 %v13269_v40, %v18081_v61  ;;  %18115 = vst [vmem:[#allocation104_spill] sm:$0xff] %v13293_v4  ;;  %v3295_v55 = vmul.f32 %v13269_v40, %v12004_v54  ;;  %v13351_v1 = vmul.f32 0.0, %v12560_v8 }
 0x823   : > { %18111 = vst [vmem:[#allocation100_spill] sm:$0xff] %v13273_v56  ;;  %v3109_v28 = vpop.f32.mrb[2].mxu0  ;;  %v13281_v13 = vpack.i.bf16 %v13271_v2, %v13273_v56  ;;  %v3517_v53 = vmul.f32 %v13269_v40, %v12133_v49  ;;  %v3443_v44 = vmul.f32 %v13269_v40, %v12074_v34  ;;  %v3655_v0 = vmul.f32 %v13269_v40, %v18086_v6 }
 0x824   : > { %9818 = vrot.lane.b32.xlu0 %v9817_v23, %s11391_s12  ;;  %v3111_v39 = vpop.f32.mrb[3].mxu0  ;;  %v9837_v25 = vpack.i.bf16 %v3369_v17, %v13289_v14  ;;  %v9832_v26 = vpack.i.bf16 %v3295_v55, %v13303_v27  ;;  %18119 = vst [vmem:[#allocation108_spill] sm:$0xff] %v13321_v60  ;;  %v3729_v23 = vmul.f32 %v13269_v40, %v18093_v32  ;;  %18124 = vst [vmem:[#allocation113_spill] sm:$0xff] %v13351_v1 }
 0x825   : > { %18113 = vst [vmem:[#allocation102_spill] sm:$0xff] %v13281_v13  ;;  %9823 = vrot.lane.b32.xlu1 %v13281_v13, %s11391_s12  ;;  %v9847_v35 = vpack.i.bf16 %v3517_v53, %v13307_v31  ;;  %v9842_v15 = vpack.i.bf16 %v3443_v44, %v13317_v11  ;;  %v9852_v17 = vpack.i.bf16 %v3655_v0, %v13321_v60  ;;  %v13335_v53 = vmul.f32 0.0, %v18095_v30 }
 0x826   : > { %v3803_v55 = vmul.f32 %v13269_v40, %v18096_v20  ;;  %v3877_v44 = vmul.f32 %v13269_v40, %v12430_v62  ;;  %v3951_v0 = vmul.f32 %v13269_v40, %v12508_v48  ;;  %v3297_v8 = vmul.f32 %v13271_v2, %v12025_v51 }
 0x827   : > { %18121 = vst [vmem:[#allocation110_spill] sm:$0xff] %v13335_v53  ;;  %v13383_v30 = vmax.f32 %v3265_v41, 0.0  ;;  %v13399_v41 = vmul.f32 %v13275_v33, %v11972_v50  ;;  %v3444_v22 = vmul.f32 %v13273_v56, %v18131_v63 }
 0x828   : > { %9828 = vrot.lane.b32.xlu0 %v13293_v4, %s11391_s12 }
 0x829   : > { %9838 = vrot.lane.b32.xlu1 %v9837_v25, %s11394_s0  ;;  %v13331_v25 = vmul.f32 0.0, %v18092_v52  ;;  %18130 = vst [vmem:[#allocation119_spill] sm:$0xff] %v13383_v30  ;;  %v3296_v52 = vmul.f32 %v13273_v56, %v12045_v47 }
 0x82b   : > { %18120 = vst [vmem:[#allocation109_spill] sm:$0xff] %v13331_v25 }
 0x82c   : > { %9833 = vrot.lane.b32.xlu0 %v9832_v26, %s11395_s9  ;;  %v9857_v26 = vpack.i.bf16 %v3729_v23, %v13331_v25  ;;  %v13355_v23 = vmul.f32 0.0, %v12616_v5  ;;  %v13370_v5 = vmul.f32 %v13271_v2, %v12037_v43 }
 0x82d   : > { %9848 = vrot.lane.b32.xlu1 %v9847_v35, %s11392_s11  ;;  %v9862_v35 = vpack.i.bf16 %v3803_v55, %v13335_v53  ;;  %v13358_v55 = vmul.f32 0.0, %v12672_v7  ;;  %v13374_v7 = vmax.f32 %v3111_v39, 0.0  ;;  %v13390_v39 = vmul.f32 %v13275_v33, %v18084_v38 }
 0x82e   : > { %18125 = vst [vmem:[#allocation114_spill] sm:$0xff] %v13355_v23 }
 0x82f   : > { %18126 = vst [vmem:[#allocation115_spill] sm:$0xff] %v13358_v55  ;;  %18128 = vst [vmem:[#allocation117_spill] sm:$0xff] %v13374_v7  ;;  %v9917_v25 = vpack.i.bf16 %v13317_v11, %v13390_v39  ;;  %v13455_v39 = vmul.f32 %v13271_v2, %v18091_v9 }
 0x830   : > { %9843 = vrot.lane.b32.xlu0 %v9842_v15, %s11393_s8  ;;  %v13345_v15 = vmul.f32 0.0, %v12409_v57  ;;  %v13381_v57 = vmax.f32 %v3263_v29, 0.0  ;;  %v3370_v29 = vmul.f32 %v13273_v56, %v18082_v58 }
 0x831   : > { %9853 = vrot.lane.b32.xlu1 %v9852_v17, %s11390_s26  ;;  %v13348_v17 = vmul.f32 0.0, %v12504_v42  ;;  %v4099_v42 = vmul.f32 %v13269_v40, %v12622_v21 }
 0x832   : > { %18122 = vst [vmem:[#allocation111_spill] sm:$0xff] %v13345_v15  ;;  %v9867_v4 = vpack.i.bf16 %v3877_v44, %v13345_v15  ;;  %v3298_v44 = vmul.f32 %v13275_v33, %v18080_v10  ;;  %18129 = vst [vmem:[#allocation118_spill] sm:$0xff] %v13381_v57  ;;  %v18133_v15 = vld [vmem:[#allocation65_spill] sm:$0xff]  ;;  %v9902_v53 = vpack.i.bf16 %v13370_v5, %v3370_v29 }
 0x833   : > { %18123 = vst [vmem:[#allocation112_spill] sm:$0xff] %v13348_v17  ;;  %v9872_v13 = vpack.i.bf16 %v3951_v0, %v13348_v17  ;;  %v3372_v0 = vmul.f32 %v13275_v33, %v11946_v3  ;;  %v13459_v29 = vmul.f32 %v13383_v30, %v18080_v10  ;;  %v13494_v10 = vmul.f32 %v13383_v30, %v11946_v3 }
 0x834   : > { %9858 = vrot.lane.b32.xlu0 %v9857_v26, %s11389_s17  ;;  %v4025_v26 = vmul.f32 %v13269_v40, %v12564_v36  ;;  %v9897_v12 = vpack.i.bf16 %v13303_v27, %v3298_v44  ;;  %v9892_v27 = vpack.i.bf16 %v3297_v8, %v3296_v52  ;;  %v13448_v52 = vmul.f32 %v13381_v57, %v12025_v51 }
 0x835   : > { %9863 = vrot.lane.b32.xlu1 %v9862_v35, %s11388_s13  ;;  %v13372_v35 = vmax.f32 %v3109_v28, 0.0  ;;  %v4173_v28 = vmul.f32 %v13269_v40, %v12676_v59  ;;  %v18132_v40 = vld [vmem:[#allocation60_spill] sm:$0xff]  ;;  %v9907_v17 = vpack.i.bf16 %v13289_v14, %v3372_v0  ;;  %v18135_v14 = vld [vmem:[#allocation71_spill] sm:$0xff]  ;;  %v9912_v8 = vpack.i.bf16 %v3445_v18, %v3444_v22  ;;  %18137 = vst [vmem:[#allocation121_spill] sm:$0xff] %v13459_v29 }
 0x836   : > { %v18134_v0 = vld [vmem:[#allocation64_spill] sm:$0xff]  ;;  %18136 = vst [vmem:[#allocation120_spill] sm:$0xff] %v13448_v52  ;;  %v13474_v18 = vmul.f32 %v13374_v7, %v12045_v47  ;;  %v13484_v44 = vmul.f32 %v13374_v7, %v18082_v58  ;;  %18144 = vst [vmem:[#allocation127_spill] sm:$0xff] %v13494_v10  ;;  %v13498_v5 = vmul.f32 %v13381_v57, %v12091_v46  ;;  %v18202_v10 = vld [vmem:[#allocation25_spill] sm:$0xff] }
 0x837   : > { %18127 = vst [vmem:[#allocation116_spill] sm:$0xff] %v13372_v35  ;;  %v13470_v22 = vmul.f32 %v13372_v35, %v12004_v54  ;;  %v13502_v52 = vmul.f32 %v13383_v30, %v18084_v38  ;;  %v13509_v11 = vmul.f32 %v13372_v35, %v12074_v34  ;;  %v13517_v46 = vmul.f32 %v13372_v35, %v12133_v49 }
 0x838   : > { %9868 = vrot.lane.b32.xlu0 %v9867_v4, %s18100_s2  ;;  %v9877_v4 = vpack.i.bf16 %v4025_v26, %v13351_v1  ;;  %v13410_v26 = vmul.f32 %v13275_v33, %v18087_v19  ;;  %v9887_v1 = vpack.i.bf16 %v4173_v28, %v13358_v55  ;;  %v13444_v55 = vmul.f32 %v13273_v56, %v18135_v14  ;;  %v18138_v28 = vld [vmem:[#allocation49_spill] sm:$0xff] }
 0x839   : > { %9873 = vrot.lane.b32.xlu1 %v9872_v13, %s11397_s20  ;;  %v9882_v13 = vpack.i.bf16 %v4099_v42, %v13355_v23  ;;  %v13418_v42 = vmul.f32 %v13273_v56, %v18132_v40  ;;  %v13440_v23 = vmul.f32 %v13271_v2, %v18134_v0  ;;  %18139 = vst [vmem:[#allocation122_spill] sm:$0xff] %v13470_v22  ;;  %18140 = vst [vmem:[#allocation123_spill] sm:$0xff] %v13474_v18 }
 0x83a   : > { %18142 = vst [vmem:[#allocation125_spill] sm:$0xff] %v13484_v44  ;;  %18145 = vst [vmem:[#allocation128_spill] sm:$0xff] %v13498_v5  ;;  %v13513_v22 = vmul.f32 %v13374_v7, %v18131_v63  ;;  %v13526_v38 = vmul.f32 %v13374_v7, %v18132_v40  ;;  %v13544_v29 = vmul.f32 %v13374_v7, %v18133_v15 }
 0x83b   : > { %18146 = vst [vmem:[#allocation129_spill] sm:$0xff] %v13502_v52  ;;  %18147 = vst [vmem:[#allocation130_spill] sm:$0xff] %v13509_v11  ;;  %v13554_v44 = vmul.f32 %v13383_v30, %v18087_v19  ;;  %v13571_v19 = vmul.f32 %v13372_v35, %v18093_v32  ;;  %v13582_v5 = vmul.f32 %v13372_v35, %v18096_v20 }
 0x83c   : > { %9878 = vrot.lane.b32.xlu0 %v9877_v4, %s11399_s30  ;;  %v13427_v4 = vmul.f32 %v13273_v56, %v18133_v15  ;;  %18148 = vst [vmem:[#allocation131_spill] sm:$0xff] %v13513_v22  ;;  %18149 = vst [vmem:[#allocation132_spill] sm:$0xff] %v13517_v46  ;;  %v13586_v11 = vmul.f32 %v13374_v7, %v18099_v16  ;;  %v18171_v46 = vld [vmem:[#allocation75_spill] sm:$0xff]  ;;  %v13667_v22 = vmul.f32 %v13372_v35, %v12622_v21 }
 0x83d   : > { %9883 = vrot.lane.b32.xlu1 %v9882_v13, %s11401_s14  ;;  %v13488_v13 = vmul.f32 %v13381_v57, %v12037_v43  ;;  %18150 = vst [vmem:[#allocation133_spill] sm:$0xff] %v13526_v38  ;;  %18154 = vst [vmem:[#allocation137_spill] sm:$0xff] %v13544_v29  ;;  %v13619_v38 = vmul.f32 %v13374_v7, %v18171_v46  ;;  %v18174_v29 = vld [vmem:[#allocation80_spill] sm:$0xff]  ;;  %v3878_v18 = vmul.f32 %v13273_v56, %v18171_v46 }
 0x83e   : > { %18156 = vst [vmem:[#allocation139_spill] sm:$0xff] %v13554_v44  ;;  %18159 = vst [vmem:[#allocation142_spill] sm:$0xff] %v13571_v19  ;;  %v18166_v44 = vld [vmem:[#allocation77_spill] sm:$0xff] }
 0x83f   : > { %18143 = vst [vmem:[#allocation126_spill] sm:$0xff] %v13488_v13  ;;  %18161 = vst [vmem:[#allocation144_spill] sm:$0xff] %v13582_v5  ;;  %v13627_v5 = vmul.f32 %v13374_v7, %v18174_v29  ;;  %v18181_v19 = vld [vmem:[#allocation85_spill] sm:$0xff] }
 0x840   : > { %9888 = vrot.lane.b32.xlu0 %v9887_v1, %s11403_s27  ;;  %v13466_v1 = vmul.f32 %v13275_v33, %v18138_v28  ;;  %18162 = vst [vmem:[#allocation145_spill] sm:$0xff] %v13586_v11  ;;  %18172 = vst [vmem:[#allocation151_spill] sm:$0xff] %v13619_v38  ;;  %v18176_v11 = vpack.i.bf16 %v13307_v31, %v13399_v41  ;;  %v18183_v41 = vld [vmem:[#allocation83_spill] sm:$0xff]  ;;  %v13657_v31 = vmul.f32 %v13372_v35, %v12564_v36  ;;  %v18211_v13 = vld [vmem:[#allocation33_spill] sm:$0xff] }
 0x841   : > { %9893 = vrot.lane.b32.xlu1 %v9892_v27, %s11395_s9  ;;  %v13480_v27 = vmul.f32 %v13372_v35, %v18081_v61  ;;  %18175 = vst [vmem:[#allocation153_spill] sm:$0xff] %v13627_v5  ;;  %18188 = vst [vmem:[#allocation160_spill] sm:$0xff] %v13667_v22  ;;  %v18191_v36 = vpack.i.bf16 %v13406_v37, %v13418_v42  ;;  %v18194_v5 = vld [vmem:[#allocation87_spill] sm:$0xff]  ;;  %v18198_v37 = vpack.i.bf16 %v13321_v60, %v13410_v26 }
 0x842   : > { %18185 = vst [vmem:[#allocation158_spill] sm:$0xff] %v13657_v31  ;;  %v13685_v21 = vmul.f32 %v13383_v30, %v18194_v5  ;;  %v13711_v26 = vmul.f32 %v13374_v7, %v18202_v10  ;;  %v18206_v42 = vld [vmem:[#allocation27_spill] sm:$0xff]  ;;  %v9942_v22 = vpack.i.bf16 %v13455_v39, %v13444_v55  ;;  %v18210_v39 = vld [vmem:[#allocation34_spill] sm:$0xff]  ;;  %v18214_v31 = vld [vmem:[#allocation109_spill] sm:$0xff] }
 0x843   : > { %18141 = vst [vmem:[#allocation124_spill] sm:$0xff] %v13480_v27  ;;  %v13530_v27 = vmul.f32 %v13381_v57, %v12111_v24  ;;  %v13550_v24 = vmul.f32 %v13381_v57, %v18134_v0  ;;  %v13567_v0 = vmul.f32 %v13383_v30, %v18138_v28  ;;  %v13719_v60 = vmul.f32 %v13381_v57, %v18206_v42 }
 0x844   : > { %9898 = vrot.lane.b32.xlu0 %v9897_v12, %s11395_s9  ;;  %v13540_v12 = vmul.f32 %v13372_v35, %v18086_v6  ;;  %18195 = vst [vmem:[#allocation163_spill] sm:$0xff] %v13685_v21  ;;  %18203 = vst [vmem:[#allocation167_spill] sm:$0xff] %v13711_v26  ;;  %v9947_v55 = vpack.i.bf16 %v18214_v31, %v13466_v1  ;;  %v18217_v26 = vld [vmem:[#allocation96_spill] sm:$0xff]  ;;  %v13773_v1 = vmul.f32 %v13374_v7, %v12004_v54 }
 0x845   : > { %9908 = vrot.lane.b32.xlu1 %v9907_v17, %s11394_s0  ;;  %18151 = vst [vmem:[#allocation134_spill] sm:$0xff] %v13530_v27  ;;  %v13536_v17 = vmul.f32 %v13383_v30, %v11972_v50  ;;  %18155 = vst [vmem:[#allocation138_spill] sm:$0xff] %v13550_v24  ;;  %v13558_v50 = vmul.f32 %v13381_v57, %v18091_v9  ;;  %v18164_v9 = vld [vmem:[#allocation56_spill] sm:$0xff]  ;;  %v13623_v27 = vmul.f32 %v13372_v35, %v12508_v48 }
 0x846   : > { %18153 = vst [vmem:[#allocation136_spill] sm:$0xff] %v13540_v12  ;;  %18158 = vst [vmem:[#allocation141_spill] sm:$0xff] %v13567_v0  ;;  %v13596_v24 = vmul.f32 %v13383_v30, %v18164_v9  ;;  %v13600_v12 = vmul.f32 %v13381_v57, %v18166_v44  ;;  %v18177_v0 = vld [vmem:[#allocation81_spill] sm:$0xff] }
 0x847   : > { %18152 = vst [vmem:[#allocation135_spill] sm:$0xff] %v13536_v17  ;;  %18157 = vst [vmem:[#allocation140_spill] sm:$0xff] %v13558_v50  ;;  %v18168_v17 = vld [vmem:[#allocation76_spill] sm:$0xff]  ;;  %v13612_v50 = vmul.f32 %v13372_v35, %v12430_v62 }
 0x848   : > { %9903 = vrot.lane.b32.xlu0 %v9902_v53, %s11394_s0  ;;  %v13578_v53 = vmul.f32 %v13374_v7, %v18135_v14  ;;  %18165 = vst [vmem:[#allocation147_spill] sm:$0xff] %v13596_v24  ;;  %18167 = vst [vmem:[#allocation148_spill] sm:$0xff] %v13600_v12  ;;  %v13608_v28 = vmul.f32 %v13383_v30, %v18168_v17  ;;  %v18179_v24 = vld [vmem:[#allocation79_spill] sm:$0xff]  ;;  %v18199_v12 = vld [vmem:[#allocation22_spill] sm:$0xff]  ;;  %v3880_v31 = vmul.f32 %v13275_v33, %v18168_v17 }
 0x849   : > { %9913 = vrot.lane.b32.xlu1 %v9912_v8, %s11393_s8  ;;  %v13592_v8 = vmul.f32 %v13381_v57, %v18098_v45  ;;  %18170 = vst [vmem:[#allocation150_spill] sm:$0xff] %v13612_v50  ;;  %18173 = vst [vmem:[#allocation152_spill] sm:$0xff] %v13623_v27  ;;  %v13641_v48 = vmul.f32 %v13383_v30, %v18179_v24  ;;  %v18196_v50 = vld [vmem:[#allocation24_spill] sm:$0xff] }
 0x84a   : > { %18160 = vst [vmem:[#allocation143_spill] sm:$0xff] %v13578_v53  ;;  %18169 = vst [vmem:[#allocation149_spill] sm:$0xff] %v13608_v28  ;;  %v13645_v53 = vmul.f32 %v13381_v57, %v18181_v19  ;;  %v18186_v28 = vld [vmem:[#allocation84_spill] sm:$0xff]  ;;  %v13689_v38 = vmul.f32 %v13381_v57, %v18196_v50 }
 0x84b   : > { %18163 = vst [vmem:[#allocation146_spill] sm:$0xff] %v13592_v8  ;;  %v13637_v8 = vmul.f32 %v13381_v57, %v18177_v0  ;;  %18180 = vst [vmem:[#allocation155_spill] sm:$0xff] %v13641_v48  ;;  %v13663_v52 = vmul.f32 %v13374_v7, %v18186_v28  ;;  %v4026_v17 = vmul.f32 %v13273_v56, %v18186_v28 }
 0x84c   : > { %9918 = vrot.lane.b32.xlu0 %v9917_v25, %s11393_s8  ;;  %18182 = vst [vmem:[#allocation156_spill] sm:$0xff] %v13645_v53  ;;  %v13653_v25 = vmul.f32 %v13383_v30, %v18183_v41  ;;  %18197 = vst [vmem:[#allocation164_spill] sm:$0xff] %v13689_v38  ;;  %v13701_v53 = vmul.f32 %v13383_v30, %v18199_v12  ;;  %v13745_v38 = vmul.f32 %v13374_v7, %v18211_v13 }
 0x84d   : > { %9928 = vrot.lane.b32.xlu1 %v18176_v11, %s11392_s11  ;;  %18178 = vst [vmem:[#allocation154_spill] sm:$0xff] %v13637_v8  ;;  %18187 = vst [vmem:[#allocation159_spill] sm:$0xff] %v13663_v52  ;;  %v18189_v11 = vld [vmem:[#allocation88_spill] sm:$0xff]  ;;  %v18192_v8 = vld [vmem:[#allocation89_spill] sm:$0xff]  ;;  %v3879_v30 = vmul.f32 %v13271_v2, %v18166_v44  ;;  %v13805_v44 = vmul.f32 %v13374_v7, %v12074_v34 }
 0x84e   : > { %18184 = vst [vmem:[#allocation157_spill] sm:$0xff] %v13653_v25  ;;  %v13671_v27 = vmul.f32 %v13374_v7, %v18189_v11  ;;  %v13681_v48 = vmul.f32 %v13381_v57, %v18192_v8  ;;  %18200 = vst [vmem:[#allocation165_spill] sm:$0xff] %v13701_v53  ;;  %v13705_v25 = vmul.f32 %v13372_v35, %v12676_v59  ;;  %v18219_v53 = vld [vmem:[#allocation110_spill] sm:$0xff] }
 0x84f   : > { %18207 = vst [vmem:[#allocation169_spill] sm:$0xff] %v13719_v60  ;;  %v3806_v59 = vmul.f32 %v13275_v33, %v18164_v9  ;;  %v13741_v9 = vmul.f32 %v13381_v57, %v18210_v39  ;;  %18212 = vst [vmem:[#allocation170_spill] sm:$0xff] %v13745_v38  ;;  %v18215_v60 = vld [vmem:[#allocation94_spill] sm:$0xff]  ;;  %v3954_v38 = vmul.f32 %v13275_v33, %v18179_v24 }
 0x850   : > { %18190 = vst [vmem:[#allocation161_spill] sm:$0xff] %v13671_v27  ;;  %9923 = vrot.lane.b32.xlu0 %v18191_v36, %s11392_s11  ;;  %18193 = vst [vmem:[#allocation162_spill] sm:$0xff] %v13681_v48  ;;  %v18208_v48 = vld [vmem:[#allocation32_spill] sm:$0xff]  ;;  %v18209_v27 = vpack.i.bf16 %v13440_v23, %v13427_v4  ;;  %v3804_v23 = vmul.f32 %v13273_v56, %v18099_v16  ;;  %v18213_v4 = vld [vmem:[#allocation35_spill] sm:$0xff] }
 0x851   : > { %9938 = vrot.lane.b32.xlu1 %v18198_v37, %s11390_s26  ;;  %18201 = vst [vmem:[#allocation166_spill] sm:$0xff] %v13705_v25  ;;  %v18204_v37 = vld [vmem:[#allocation26_spill] sm:$0xff]  ;;  %v13729_v21 = vmul.f32 %v13374_v7, %v18208_v48  ;;  %v13760_v25 = vmul.f32 %v13374_v7, %v18215_v60  ;;  %v9957_v52 = vpack.i.bf16 %v18219_v53, %v3806_v59  ;;  %18220 = vst [vmem:[#allocation173_spill] sm:$0xff] %v13805_v44 }
 0x852   : > { %v13715_v36 = vmul.f32 %v13374_v7, %v18204_v37  ;;  %v13782_v59 = vmul.f32 %v13381_v57, %v12045_v47  ;;  %v13786_v53 = vmul.f32 %v13374_v7, %v18081_v61 }
 0x853   : > { %18216 = vst [vmem:[#allocation171_spill] sm:$0xff] %v13760_v25  ;;  %v18222_v25 = vld [vmem:[#allocation112_spill] sm:$0xff] }
 0x854   : > { %18205 = vst [vmem:[#allocation168_spill] sm:$0xff] %v13715_v36  ;;  %9933 = vrot.lane.b32.xlu0 %v18209_v27, %s11390_s26  ;;  %v13752_v27 = vmul.f32 %v13381_v57, %v18213_v4  ;;  %v3805_v36 = vmul.f32 %v13271_v2, %v18098_v45  ;;  %v9977_v24 = vpack.i.bf16 %v18222_v25, %v3954_v38 }
 0x855   : > { %9943 = vrot.lane.b32.xlu1 %v9942_v22, %s11389_s17  ;;  %v13764_v22 = vmul.f32 %v13381_v57, %v18217_v26  ;;  %v4027_v38 = vmul.f32 %v13271_v2, %v18181_v19  ;;  %v13881_v19 = vmul.f32 %v13374_v7, %v18096_v20 }
 0x856   : > { %v9952_v45 = vpack.i.bf16 %v3805_v36, %v3804_v23  ;;  %v13810_v36 = vmul.f32 %v13381_v57, %v18131_v63  ;;  %v18221_v23 = vld [vmem:[#allocation111_spill] sm:$0xff] }
 0x857   : > { %18218 = vst [vmem:[#allocation172_spill] sm:$0xff] %v13764_v22  ;;  %v9962_v22 = vpack.i.bf16 %v3879_v30, %v3878_v18  ;;  %v9967_v30 = vpack.i.bf16 %v18221_v23, %v3880_v31  ;;  %v3952_v18 = vmul.f32 %v13273_v56, %v18174_v29  ;;  %v3953_v31 = vmul.f32 %v13271_v2, %v18177_v0  ;;  %v18227_v23 = vld [vmem:[#allocation114_spill] sm:$0xff] }
 0x858   : > { %9948 = vrot.lane.b32.xlu0 %v9947_v55, %s11389_s17  ;;  %v13793_v55 = vmul.f32 %v13381_v57, %v18082_v58  ;;  %v4028_v29 = vmul.f32 %v13275_v33, %v18183_v41  ;;  %v9982_v44 = vpack.i.bf16 %v4027_v38, %v4026_v17  ;;  %v4100_v17 = vmul.f32 %v13273_v56, %v18189_v11  ;;  %v18233_v0 = vld [vmem:[#allocation98_spill] sm:$0xff] }
 0x859   : > { %9958 = vrot.lane.b32.xlu1 %v9957_v52, %s11388_s13  ;;  %v9972_v28 = vpack.i.bf16 %v3953_v31, %v3952_v18  ;;  %v13850_v52 = vmul.f32 %v13381_v57, %v18133_v15  ;;  %v18226_v18 = vld [vmem:[#allocation113_spill] sm:$0xff]  ;;  %v4174_v41 = vmul.f32 %v13273_v56, %v18202_v10  ;;  %v4176_v11 = vmul.f32 %v13275_v33, %v18199_v12  ;;  %v18237_v12 = vld [vmem:[#allocation90_spill] sm:$0xff] }
 0x85a   : > { %v9987_v31 = vpack.i.bf16 %v18226_v18, %v4028_v29  ;;  %v4101_v29 = vmul.f32 %v13271_v2, %v18192_v8  ;;  %18230 = vst [vmem:[#allocation179_spill] sm:$0xff] %v13881_v19 }
 0x85b   : > { %18225 = vst [vmem:[#allocation176_spill] sm:$0xff] %v13850_v52  ;;  %v18240_v52 = vld [vmem:[#allocation36_spill] sm:$0xff] }
 0x85c   : > { %9953 = vrot.lane.b32.xlu0 %v9952_v45, %s11388_s13  ;;  %v13823_v45 = vmul.f32 %v13374_v7, %v12133_v49  ;;  %v9992_v10 = vpack.i.bf16 %v4101_v29, %v4100_v17  ;;  %v13897_v29 = vmul.f32 %v13374_v7, %v12430_v62  ;;  %v18238_v17 = vld [vmem:[#allocation91_spill] sm:$0xff] }
 0x85d   : > { %9963 = vrot.lane.b32.xlu1 %v9962_v22, %s18100_s2  ;;  %v13827_v22 = vmul.f32 %v13381_v57, %v18132_v40  ;;  %v4339_v19 = vmul.f32 %v13275_v33, %v18238_v17 }
 0x85e   : > { %18223 = vst [vmem:[#allocation174_spill] sm:$0xff] %v13823_v45  ;;  %18234 = vst [vmem:[#allocation181_spill] sm:$0xff] %v13897_v29  ;;  %v4411_v45 = vmul.f32 %v13273_v56, %v18211_v13  ;;  %v18257_v13 = vld [vmem:[#allocation95_spill] sm:$0xff] }
 0x860   : > { %9968 = vrot.lane.b32.xlu0 %v9967_v30, %s18100_s2  ;;  %v4102_v30 = vmul.f32 %v13275_v33, %v18194_v5 }
 0x861   : > { %9978 = vrot.lane.b32.xlu1 %v9977_v24, %s11397_s20  ;;  %v13845_v24 = vmul.f32 %v13374_v7, %v18086_v6 }
 0x862   : > { %v9997_v5 = vpack.i.bf16 %v18227_v23, %v4102_v30  ;;  %v4175_v30 = vmul.f32 %v13271_v2, %v18196_v50  ;;  %v4263_v50 = vmul.f32 %v13273_v56, %v18204_v37  ;;  %v4264_v37 = vmul.f32 %v13271_v2, %v18206_v42  ;;  %v18383_v23 = vld [vmem:[#allocation64_spill] sm:$0xff] }
 0x863   : > { %18224 = vst [vmem:[#allocation175_spill] sm:$0xff] %v13845_v24 }
 0x864   : > { %9973 = vrot.lane.b32.xlu0 %v9972_v28, %s11397_s20  ;;  %v13863_v28 = vmul.f32 %v13374_v7, %v18093_v32  ;;  %v10002_v8 = vpack.i.bf16 %v4175_v30, %v4174_v41  ;;  %v13901_v41 = vmul.f32 %v13381_v57, %v18171_v46  ;;  %v18236_v30 = vld [vmem:[#allocation115_spill] sm:$0xff] }
 0x865   : > { %9983 = vrot.lane.b32.xlu1 %v9982_v44, %s11399_s30  ;;  %v13867_v44 = vmul.f32 %v13381_v57, %v18135_v14  ;;  %v10007_v38 = vpack.i.bf16 %v18236_v30, %v4176_v11 }
 0x866   : > { %18228 = vst [vmem:[#allocation177_spill] sm:$0xff] %v13863_v28  ;;  %18235 = vst [vmem:[#allocation182_spill] sm:$0xff] %v13901_v41  ;;  %v18284_v41 = vld [vmem:[#allocation134_spill] sm:$0xff] }
 0x867   : > { %18229 = vst [vmem:[#allocation178_spill] sm:$0xff] %v13867_v44  ;;  %v18239_v44 = vld [vmem:[#allocation29_spill] sm:$0xff] }
 0x868   : > { %9988 = vrot.lane.b32.xlu0 %v9987_v31, %s11399_s30  ;;  %v13885_v31 = vmul.f32 %v13381_v57, %v18099_v16  ;;  %v4336_v42 = vmul.f32 %v18233_v0, %v18239_v44 }
 0x869   : > { %9998 = vrot.lane.b32.xlu1 %v9997_v5, %s11401_s14  ;;  %v18232_v5 = vld [vmem:[#allocation28_spill] sm:$0xff] }
 0x86a   : > { %18231 = vst [vmem:[#allocation180_spill] sm:$0xff] %v13885_v31  ;;  %v4262_v24 = vmul.f32 %v18233_v0, %v18232_v5 }
 0x86c   : > { %9993 = vrot.lane.b32.xlu0 %v9992_v10, %s11401_s14  ;;  %v4265_v10 = vmul.f32 %v13275_v33, %v18237_v12  ;;  %v10012_v28 = vpack.i.bf16 %v4263_v50, %v4262_v24  ;;  %v4337_v50 = vmul.f32 %v13273_v56, %v18208_v48 }
 0x86d   : > { %10003 = vrot.lane.b32.xlu1 %v10002_v8, %s11403_s27  ;;  %v4338_v8 = vmul.f32 %v13271_v2, %v18210_v39  ;;  %v4410_v39 = vmul.f32 %v18233_v0, %v18240_v52 }
 0x86e   : > { %v10017_v11 = vpack.i.bf16 %v4265_v10, %v4264_v37  ;;  %v4412_v37 = vmul.f32 %v13271_v2, %v18213_v4 }
 0x86f   : > { %v10027_v24 = vpack.i.bf16 %v4339_v19, %v4338_v8  ;;  %v10032_v31 = vpack.i.bf16 %v4411_v45, %v4410_v39  ;;  %v4486_v19 = vmul.f32 %v13271_v2, %v18217_v26  ;;  %v18242_v8 = vld [vmem:[#allocation97_spill] sm:$0xff]  ;;  %v4559_v39 = vmul.f32 %v13273_v56, %v12004_v54 }
 0x870   : > { %10008 = vrot.lane.b32.xlu0 %v10007_v38, %s11403_s27  ;;  %v10022_v38 = vpack.i.bf16 %v4337_v50, %v4336_v42  ;;  %v4487_v48 = vmul.f32 %v13275_v33, %v18242_v8  ;;  %v4485_v50 = vmul.f32 %v13273_v56, %v18215_v60  ;;  %v4560_v45 = vmul.f32 %v13271_v2, %v12045_v47  ;;  %v18270_v47 = vld [vmem:[#allocation126_spill] sm:$0xff] }
 0x871   : > { %10013 = vrot.lane.b32.xlu1 %v10012_v28, %s11402_s29  ;;  %v18241_v28 = vld [vmem:[#allocation92_spill] sm:$0xff] }
 0x872   : > { %v4413_v10 = vmul.f32 %v13275_v33, %v18241_v28  ;;  %v10047_v4 = vpack.i.bf16 %v4487_v48, %v4486_v19  ;;  %v18244_v48 = vld [vmem:[#allocation39_spill] sm:$0xff] }
 0x873   : > { %v13952_v19 = vmul.f32 0.0, %v18244_v48  ;;  %v18269_v48 = vld [vmem:[#allocation127_spill] sm:$0xff] }
 0x874   : > { %10018 = vrot.lane.b32.xlu0 %v10017_v11, %s11402_s29  ;;  %v10037_v11 = vpack.i.bf16 %v4413_v10, %v4412_v37  ;;  %v10052_v37 = vpack.i.bf16 %v4560_v45, %v4559_v39  ;;  %v4635_v10 = vmul.f32 %v13275_v33, %v12037_v43  ;;  %v4634_v39 = vmul.f32 %v13271_v2, %v18082_v58 }
 0x875   : > { %10028 = vrot.lane.b32.xlu1 %v10027_v24, %s11400_s3  ;;  %v18243_v24 = vld [vmem:[#allocation93_spill] sm:$0xff]  ;;  %18245 = vst [vmem:[#allocation183_spill] sm:$0xff] %v13952_v19  ;;  %v13999_v58 = vmul.f32 0.0, %v18257_v13  ;;  %v18271_v54 = vpack.i.bf16 %v18269_v48, %v18270_v47  ;;  %v18281_v47 = vld [vmem:[#allocation132_spill] sm:$0xff] }
 0x876   : > { %v4484_v42 = vmul.f32 %v18233_v0, %v18243_v24  ;;  %v18259_v13 = vld [vmem:[#allocation121_spill] sm:$0xff] }
 0x877   : > { %18258 = vst [vmem:[#allocation95_spill] sm:$0xff] %v13999_v58 }
 0x878   : > { %10023 = vrot.lane.b32.xlu0 %v10022_v38, %s11400_s3  ;;  %v10042_v38 = vpack.i.bf16 %v4485_v50, %v4484_v42  ;;  %v4633_v42 = vmul.f32 %v13273_v56, %v18081_v61  ;;  %v18276_v61 = vld [vmem:[#allocation130_spill] sm:$0xff] }
 0x879   : > { %10033 = vrot.lane.b32.xlu1 %v10032_v31, %s11398_s7  ;;  %v4561_v31 = vmul.f32 %v13275_v33, %v12025_v51 }
 0x87a   : > { %v10062_v45 = vpack.i.bf16 %v4634_v39, %v4633_v42  ;;  %v4415_v42 = vmul.f32 %v13372_v35, %v18240_v52 }
 0x87c   : > { %10038 = vrot.lane.b32.xlu0 %v10037_v11, %s11398_s7  ;;  %v10057_v11 = vpack.i.bf16 %v13952_v19, %v4561_v31 }
 0x87d   : > { %10048 = vrot.lane.b32.xlu1 %v10047_v4, %s11396_s19  ;;  %v13956_v4 = vmul.f32 0.0, %v11946_v3  ;;  %v18263_v3 = vld [vmem:[#allocation122_spill] sm:$0xff] }
 0x87f   : > { %18246 = vst [vmem:[#allocation184_spill] sm:$0xff] %v13956_v4  ;;  %v10067_v50 = vpack.i.bf16 %v13956_v4, %v4635_v10  ;;  %v18249_v10 = vpack.i.bf16 %v13374_v7, %v13372_v35 }
 0x880   : > { %10043 = vrot.lane.b32.xlu0 %v10042_v38, %s11396_s19  ;;  %v4267_v38 = vmul.f32 %v13372_v35, %v18232_v5  ;;  %v18254_v5 = vld [vmem:[#allocation37_spill] sm:$0xff] }
 0x881   : > { %10053 = vrot.lane.b32.xlu1 %v10052_v37, %s11395_s9  ;;  %v18247_v37 = vld [vmem:[#allocation30_spill] sm:$0xff]  ;;  %v13989_v60 = vmul.f32 0.0, %v18254_v5 }
 0x882   : > { %v13970_v31 = vmul.f32 0.0, %v18247_v37 }
 0x883   : > { %18255 = vst [vmem:[#allocation37_spill] sm:$0xff] %v13989_v60  ;;  %v10092_v52 = vpack.i.bf16 %v4415_v42, %v13989_v60 }
 0x884   : > { %10058 = vrot.lane.b32.xlu0 %v10057_v11, %s11395_s9  ;;  %18248 = vst [vmem:[#allocation30_spill] sm:$0xff] %v13970_v31  ;;  %v4341_v11 = vmul.f32 %v13372_v35, %v18239_v44  ;;  %v10082_v26 = vpack.i.bf16 %v4267_v38, %v13970_v31  ;;  %v4489_v38 = vmul.f32 %v13372_v35, %v18243_v24  ;;  %v18256_v44 = vld [vmem:[#allocation38_spill] sm:$0xff]  ;;  %v18260_v24 = vld [vmem:[#allocation120_spill] sm:$0xff] }
 0x885   : > { %10068 = vrot.lane.b32.xlu1 %v10067_v50, %s11394_s0  ;;  %v18250_v50 = vld [vmem:[#allocation31_spill] sm:$0xff] }
 0x886   : > { %v13982_v39 = vmul.f32 0.0, %v18250_v50  ;;  %v4563_v50 = vmul.f32 %v13372_v35, %v18256_v44  ;;  %v10097_v5 = vpack.i.bf16 %v4489_v38, %v13999_v58 }
 0x888   : > { %10063 = vrot.lane.b32.xlu0 %v10062_v45, %s11394_s0  ;;  %18251 = vst [vmem:[#allocation31_spill] sm:$0xff] %v13982_v39  ;;  %v18252_v45 = vld [vmem:[#allocation119_spill] sm:$0xff] }
 0x889   : > { %10073 = vrot.lane.b32.xlu1 %v18249_v10, %s11391_s12  ;;  %v18253_v37 = vpack.i.bf16 %v18252_v45, %v13381_v57  ;;  %v10087_v10 = vpack.i.bf16 %v4341_v11, %v13982_v39 }
 0x88c   : > { %10078 = vrot.lane.b32.xlu0 %v18253_v37, %s11391_s12 }
 0x88d   : > { %10083 = vrot.lane.b32.xlu1 %v10082_v26, %s11402_s29  ;;  %v4558_v26 = vmul.f32 %v18233_v0, %v18256_v44 }
 0x88f   : > { %v10102_v11 = vpack.i.bf16 %v4563_v50, %v4558_v26  ;;  %v18266_v26 = vld [vmem:[#allocation125_spill] sm:$0xff] }
 0x890   : > { %10088 = vrot.lane.b32.xlu0 %v10087_v10, %s11400_s3  ;;  %v18261_v10 = vpack.i.bf16 %v18259_v13, %v18260_v24 }
 0x891   : > { %10093 = vrot.lane.b32.xlu1 %v10092_v52, %s11398_s7  ;;  %v18262_v52 = vld [vmem:[#allocation123_spill] sm:$0xff] }
 0x892   : > { %v18264_v44 = vpack.i.bf16 %v18262_v52, %v18263_v3  ;;  %v18272_v3 = vld [vmem:[#allocation129_spill] sm:$0xff]  ;;  %v18275_v52 = vld [vmem:[#allocation131_spill] sm:$0xff] }
 0x893   : > { %v18277_v29 = vpack.i.bf16 %v18275_v52, %v18276_v61  ;;  %v18288_v61 = vld [vmem:[#allocation137_spill] sm:$0xff]  ;;  %v18291_v52 = vld [vmem:[#allocation139_spill] sm:$0xff] }
 0x894   : > { %10098 = vrot.lane.b32.xlu0 %v10097_v5, %s11396_s19  ;;  %v18267_v5 = vld [vmem:[#allocation124_spill] sm:$0xff] }
 0x895   : > { %10103 = vrot.lane.b32.xlu1 %v10102_v11, %s11395_s9  ;;  %v18268_v11 = vpack.i.bf16 %v18266_v26, %v18267_v5 }
 0x896   : > { %v14008_v42 = vpop.permute.xlu0 %9818 }
 0x897   : > { %v14010_v37 = vpop.permute.xlu1 %9823 }
 0x898   : > { %10113 = vrot.lane.b32.xlu0 %v18261_v10, %s11395_s9 }
 0x899   : > { %10108 = vrot.lane.b32.xlu1 %v18264_v44, %s11395_s9  ;;  %v18273_v44 = vld [vmem:[#allocation128_spill] sm:$0xff] }
 0x89a   : > { %v14020_v38 = vpop.permute.xlu0 %9828  ;;  %v18274_v10 = vpack.i.bf16 %v18272_v3, %v18273_v44 }
 0x89b   : > { %18265 = vst [vmem:[#allocation121_spill] sm:$0xff] %v14020_v38  ;;  %v14022_v50 = vpop.permute.xlu1 %9838 }
 0x89c   : > { %10118 = vrot.lane.b32.xlu0 %v18268_v11, %s11394_s0  ;;  %v18283_v11 = vld [vmem:[#allocation135_spill] sm:$0xff] }
 0x89d   : > { %10123 = vrot.lane.b32.xlu1 %v18271_v54, %s11394_s0  ;;  %v18280_v54 = vld [vmem:[#allocation133_spill] sm:$0xff]  ;;  %v18285_v57 = vpack.i.bf16 %v18283_v11, %v18284_v41  ;;  %v18297_v41 = vld [vmem:[#allocation140_spill] sm:$0xff]  ;;  %v18299_v11 = vld [vmem:[#allocation143_spill] sm:$0xff] }
 0x89e   : > { %v14032_v24 = vpop.permute.xlu0 %9833  ;;  %v18282_v48 = vpack.i.bf16 %v18280_v54, %v18281_v47 }
 0x89f   : > { %v14034_v13 = vpop.permute.xlu1 %9848 }
 0x8a0   : > { %10133 = vrot.lane.b32.xlu0 %v18274_v10, %s11393_s8 }
 0x8a1   : > { %10128 = vrot.lane.b32.xlu1 %v18277_v29, %s11393_s8  ;;  %v18289_v29 = vld [vmem:[#allocation136_spill] sm:$0xff] }
 0x8a2   : > { %v14044_v26 = vpop.permute.xlu0 %9843  ;;  %v18290_v10 = vpack.i.bf16 %v18288_v61, %v18289_v29 }
 0x8a3   : > { %18278 = vst [vmem:[#allocation120_spill] sm:$0xff] %v14044_v26  ;;  %v14046_v5 = vpop.permute.xlu1 %9853 }
 0x8a4   : > { %18279 = vst [vmem:[#allocation123_spill] sm:$0xff] %v14046_v5  ;;  %10138 = vrot.lane.b32.xlu0 %v18282_v48, %s11392_s11  ;;  %v18292_v5 = vld [vmem:[#allocation138_spill] sm:$0xff] }
 0x8a5   : > { %10143 = vrot.lane.b32.xlu1 %v18285_v57, %s11392_s11  ;;  %v18293_v26 = vpack.i.bf16 %v18291_v52, %v18292_v5  ;;  %v18296_v57 = vld [vmem:[#allocation141_spill] sm:$0xff]  ;;  %v18305_v5 = vld [vmem:[#allocation144_spill] sm:$0xff]  ;;  %v18307_v52 = vld [vmem:[#allocation147_spill] sm:$0xff] }
 0x8a6   : > { %v14056_v3 = vpop.permute.xlu0 %9858  ;;  %v18298_v48 = vpack.i.bf16 %v18296_v57, %v18297_v41 }
 0x8a7   : > { %18286 = vst [vmem:[#allocation122_spill] sm:$0xff] %v14056_v3  ;;  %v14058_v44 = vpop.permute.xlu1 %9863 }
 0x8a8   : > { %18287 = vst [vmem:[#allocation125_spill] sm:$0xff] %v14058_v44  ;;  %10148 = vrot.lane.b32.xlu0 %v18290_v10, %s11390_s26  ;;  %v18300_v44 = vld [vmem:[#allocation142_spill] sm:$0xff] }
 0x8a9   : > { %10153 = vrot.lane.b32.xlu1 %v18293_v26, %s11390_s26  ;;  %v18301_v3 = vpack.i.bf16 %v18299_v11, %v18300_v44  ;;  %v18304_v26 = vld [vmem:[#allocation145_spill] sm:$0xff]  ;;  %v18313_v44 = vld [vmem:[#allocation148_spill] sm:$0xff]  ;;  %v18315_v11 = vld [vmem:[#allocation151_spill] sm:$0xff] }
 0x8aa   : > { %v14068_v54 = vpop.permute.xlu0 %9868  ;;  %v18306_v10 = vpack.i.bf16 %v18304_v26, %v18305_v5 }
 0x8ab   : > { %18294 = vst [vmem:[#allocation124_spill] sm:$0xff] %v14068_v54  ;;  %v14070_v47 = vpop.permute.xlu1 %9873 }
 0x8ac   : > { %18295 = vst [vmem:[#allocation127_spill] sm:$0xff] %v14070_v47  ;;  %10163 = vrot.lane.b32.xlu0 %v18298_v48, %s11389_s17  ;;  %v18308_v47 = vld [vmem:[#allocation146_spill] sm:$0xff] }
 0x8ad   : > { %10158 = vrot.lane.b32.xlu1 %v18301_v3, %s11389_s17  ;;  %v18309_v54 = vpack.i.bf16 %v18307_v52, %v18308_v47  ;;  %v18312_v3 = vld [vmem:[#allocation149_spill] sm:$0xff]  ;;  %v18321_v47 = vld [vmem:[#allocation152_spill] sm:$0xff]  ;;  %v18323_v52 = vld [vmem:[#allocation155_spill] sm:$0xff] }
 0x8ae   : > { %v14080_v61 = vpop.permute.xlu0 %9878  ;;  %v18314_v48 = vpack.i.bf16 %v18312_v3, %v18313_v44 }
 0x8af   : > { %18302 = vst [vmem:[#allocation126_spill] sm:$0xff] %v14080_v61  ;;  %v14082_v29 = vpop.permute.xlu1 %9883 }
 0x8b0   : > { %18303 = vst [vmem:[#allocation129_spill] sm:$0xff] %v14082_v29  ;;  %10168 = vrot.lane.b32.xlu0 %v18306_v10, %s11388_s13  ;;  %v18316_v29 = vld [vmem:[#allocation150_spill] sm:$0xff] }
 0x8b1   : > { %10173 = vrot.lane.b32.xlu1 %v18309_v54, %s11388_s13  ;;  %v18317_v61 = vpack.i.bf16 %v18315_v11, %v18316_v29  ;;  %v18320_v54 = vld [vmem:[#allocation153_spill] sm:$0xff]  ;;  %v18329_v29 = vld [vmem:[#allocation156_spill] sm:$0xff]  ;;  %v18331_v11 = vld [vmem:[#allocation159_spill] sm:$0xff] }
 0x8b2   : > { %v14092_v57 = vpop.permute.xlu0 %9888  ;;  %v18322_v10 = vpack.i.bf16 %v18320_v54, %v18321_v47 }
 0x8b3   : > { %18310 = vst [vmem:[#allocation128_spill] sm:$0xff] %v14092_v57  ;;  %v14094_v41 = vpop.permute.xlu1 %9893 }
 0x8b4   : > { %18311 = vst [vmem:[#allocation131_spill] sm:$0xff] %v14094_v41  ;;  %10183 = vrot.lane.b32.xlu0 %v18314_v48, %s18100_s2  ;;  %v18324_v41 = vld [vmem:[#allocation154_spill] sm:$0xff] }
 0x8b5   : > { %10178 = vrot.lane.b32.xlu1 %v18317_v61, %s18100_s2  ;;  %v18325_v57 = vpack.i.bf16 %v18323_v52, %v18324_v41  ;;  %v18328_v61 = vld [vmem:[#allocation157_spill] sm:$0xff]  ;;  %v18336_v41 = vld [vmem:[#allocation160_spill] sm:$0xff]  ;;  %v18338_v52 = vld [vmem:[#allocation163_spill] sm:$0xff] }
 0x8b6   : > { %v14104_v26 = vpop.permute.xlu0 %9898  ;;  %v18330_v48 = vpack.i.bf16 %v18328_v61, %v18329_v29 }
 0x8b7   : > { %18318 = vst [vmem:[#allocation130_spill] sm:$0xff] %v14104_v26  ;;  %v14106_v5 = vpop.permute.xlu1 %9908 }
 0x8b8   : > { %18319 = vst [vmem:[#allocation133_spill] sm:$0xff] %v14106_v5  ;;  %10188 = vrot.lane.b32.xlu0 %v18322_v10, %s11397_s20  ;;  %v18332_v5 = vld [vmem:[#allocation158_spill] sm:$0xff] }
 0x8b9   : > { %10193 = vrot.lane.b32.xlu1 %v18325_v57, %s11397_s20  ;;  %v18333_v26 = vpack.i.bf16 %v18331_v11, %v18332_v5  ;;  %v18335_v57 = vld [vmem:[#allocation161_spill] sm:$0xff] }
 0x8ba   : > { %v14116_v3 = vpop.permute.xlu0 %9903  ;;  %v18337_v10 = vpack.i.bf16 %v18335_v57, %v18336_v41  ;;  %v18343_v5 = vld [vmem:[#allocation165_spill] sm:$0xff]  ;;  %v18346_v57 = vld [vmem:[#allocation167_spill] sm:$0xff]  ;;  %v18347_v41 = vld [vmem:[#allocation166_spill] sm:$0xff] }
 0x8bb   : > { %18326 = vst [vmem:[#allocation132_spill] sm:$0xff] %v14116_v3  ;;  %v14118_v44 = vpop.permute.xlu1 %9913 }
 0x8bc   : > { %18327 = vst [vmem:[#allocation135_spill] sm:$0xff] %v14118_v44  ;;  %10203 = vrot.lane.b32.xlu0 %v18330_v48, %s11399_s30  ;;  %v18339_v44 = vld [vmem:[#allocation162_spill] sm:$0xff]  ;;  %v18344_v48 = vld [vmem:[#allocation164_spill] sm:$0xff] }
 0x8bd   : > { %10198 = vrot.lane.b32.xlu1 %v18333_v26, %s11399_s30  ;;  %v18340_v3 = vpack.i.bf16 %v18338_v52, %v18339_v44  ;;  %v4270_v26 = vmul.f32 %v18252_v45, %v18237_v12  ;;  %v18345_v11 = vpack.i.bf16 %v18343_v5, %v18344_v48  ;;  %v18349_v12 = vld [vmem:[#allocation169_spill] sm:$0xff] }
 0x8be   : > { %v14128_v54 = vpop.permute.xlu0 %9918 }
 0x8bf   : > { %v14130_v47 = vpop.permute.xlu1 %9928  ;;  %v10232_v52 = vpack.i.bf16 %v13970_v31, %v4270_v26  ;;  %v18352_v26 = vpack.i.bf16 %v13741_v9, %v13729_v21  ;;  %v4566_v9 = vmul.f32 %v18252_v45, %v12025_v51  ;;  %v18374_v31 = vld [vmem:[#allocation59_spill] sm:$0xff] }
 0x8c0   : > { %18334 = vst [vmem:[#allocation134_spill] sm:$0xff] %v14130_v47  ;;  %10208 = vrot.lane.b32.xlu0 %v18337_v10, %s11401_s14  ;;  %v18348_v10 = vpack.i.bf16 %v18346_v57, %v18347_v41  ;;  %v4418_v57 = vmul.f32 %v18252_v45, %v18241_v28  ;;  %v18369_v28 = vld [vmem:[#allocation49_spill] sm:$0xff] }
 0x8c1   : > { %10213 = vrot.lane.b32.xlu1 %v18340_v3, %s11401_s14  ;;  %v4344_v3 = vmul.f32 %v18252_v45, %v18238_v17 }
 0x8c2   : > { %v14140_v61 = vpop.permute.xlu0 %9923  ;;  %v10252_v41 = vpack.i.bf16 %v13989_v60, %v4418_v57  ;;  %v18355_v57 = vld [vmem:[#allocation172_spill] sm:$0xff] }
 0x8c3   : > { %18341 = vst [vmem:[#allocation137_spill] sm:$0xff] %v14140_v61  ;;  %v14142_v29 = vpop.permute.xlu1 %9938  ;;  %v10242_v48 = vpack.i.bf16 %v13982_v39, %v4344_v3 }
 0x8c4   : > { %18342 = vst [vmem:[#allocation136_spill] sm:$0xff] %v14142_v29  ;;  %10223 = vrot.lane.b32.xlu0 %v18345_v11, %s11403_s27  ;;  %v18350_v29 = vld [vmem:[#allocation168_spill] sm:$0xff] }
 0x8c5   : > { %10218 = vrot.lane.b32.xlu1 %v18348_v10, %s11403_s27  ;;  %v18351_v61 = vpack.i.bf16 %v18349_v12, %v18350_v29  ;;  %v18353_v10 = vld [vmem:[#allocation170_spill] sm:$0xff] }
 0x8c6   : > { %v14154_v47 = vpop.permute.xlu0 %9933  ;;  %v18354_v3 = vpack.i.bf16 %v13752_v27, %v18353_v10  ;;  %v18356_v27 = vld [vmem:[#allocation171_spill] sm:$0xff] }
 0x8c7   : > { %v14158_v44 = vpop.permute.xlu1 %9943  ;;  %v18357_v10 = vpack.i.bf16 %v18355_v57, %v18356_v27  ;;  %v18360_v57 = vld [vmem:[#allocation40_spill] sm:$0xff] }
 0x8c8   : > { %10228 = vrot.lane.b32.xlu0 %v18351_v61, %s11402_s29  ;;  %v4492_v61 = vmul.f32 %v18252_v45, %v18242_v8  ;;  %v4637_v27 = vmul.f32 %v13372_v35, %v18360_v57  ;;  %v18365_v8 = vld [vmem:[#allocation45_spill] sm:$0xff] }
 0x8c9   : > { %10233 = vrot.lane.b32.xlu1 %v10232_v52, %s11402_s29  ;;  %v14233_v60 = vmul.f32 0.0, %v18365_v8  ;;  %v4709_v8 = vmul.f32 %v13275_v33, %v18374_v31 }
 0x8ca   : > { %v14166_v5 = vpop.permute.xlu0 %9948  ;;  %v10262_v21 = vpack.i.bf16 %v13999_v58, %v4492_v61  ;;  %v4640_v58 = vmul.f32 %v18252_v45, %v12037_v43 }
 0x8cb   : > { %v14169_v11 = vpop.permute.xlu1 %9958  ;;  %18366 = vst [vmem:[#allocation140_spill] sm:$0xff] %v14233_v60 }
 0x8cc   : > { %10243 = vrot.lane.b32.xlu0 %v10242_v48, %s11400_s3  ;;  %v5205_v48 = vld [vmem:[#allocation10 + $0x8] sm:$0xff] }
 0x8cd   : > { %10238 = vrot.lane.b32.xlu1 %v18352_v26, %s11400_s3  ;;  %5498 = vmatprep.mubr.f32.mxu0 %v5205_v48 }
 0x8ce   : > { %v14178_v12 = vpop.permute.xlu0 %9953  ;;  %5652 = vmatprep.mubr.f32.mxu1 %v5205_v48 }
 0x8cf   : > { %v14182_v29 = vpop.permute.xlu1 %9963 }
 0x8d0   : > { %10248 = vrot.lane.b32.xlu0 %v18354_v3, %s11398_s7  ;;  %v10272_v3 = vpack.i.bf16 %v13952_v19, %v4566_v9  ;;  %v10287_v9 = vpack.i.bf16 %v13956_v4, %v4640_v58  ;;  %v4707_v19 = vmul.f32 %v13273_v56, %v12074_v34  ;;  %v4708_v58 = vmul.f32 %v13271_v2, %v18131_v63  ;;  %v18367_v4 = vld [vmem:[#allocation47_spill] sm:$0xff] }
 0x8d1   : > { %10253 = vrot.lane.b32.xlu1 %v10252_v41, %s11398_s7  ;;  %v14239_v39 = vmul.f32 0.0, %v18367_v4 }
 0x8d2   : > { %v14190_v52 = vpop.permute.xlu0 %9968  ;;  %v10292_v43 = vpack.i.bf16 %v4708_v58, %v4707_v19 }
 0x8d3   : > { %v14195_v26 = vpop.permute.xlu1 %9978  ;;  %18368 = vst [vmem:[#allocation143_spill] sm:$0xff] %v14239_v39 }
 0x8d4   : > { %10263 = vrot.lane.b32.xlu0 %v10262_v21, %s11396_s19  ;;  %v18358_v21 = vpack.i.bf16 %v13782_v59, %v13773_v1  ;;  %v4632_v1 = vmul.f32 %v18233_v0, %v18360_v57  ;;  %v18363_v59 = vld [vmem:[#allocation43_spill] sm:$0xff] }
 0x8d5   : > { %10258 = vrot.lane.b32.xlu1 %v18357_v10, %s11396_s19 }
 0x8d6   : > { %v14202_v41 = vpop.permute.xlu0 %9973  ;;  %v10282_v17 = vpack.i.bf16 %v4637_v27, %v4632_v1  ;;  %v18378_v27 = vld [vmem:[#allocation76_spill] sm:$0xff] }
 0x8d7   : > { %v14205_v61 = vpop.permute.xlu1 %9983  ;;  %v14264_v1 = vmul.f32 0.0, %v18378_v27  ;;  %v4782_v27 = vmul.f32 %v13271_v2, %v18132_v40  ;;  %v14294_v40 = vmul.f32 %v13273_v56, %v18086_v6  ;;  %v14370_v6 = vmul.f32 %v13273_v56, %v18096_v20 }
 0x8d8   : > { %10273 = vrot.lane.b32.xlu0 %v10272_v3, %s11395_s9  ;;  %v18362_v3 = vpack.i.bf16 %v13793_v55, %v13786_v53  ;;  %v14242_v53 = vmul.f32 0.0, %v18369_v28  ;;  %v18371_v55 = vld [vmem:[#allocation56_spill] sm:$0xff]  ;;  %v4781_v28 = vmul.f32 %v13273_v56, %v12133_v49 }
 0x8d9   : > { %10268 = vrot.lane.b32.xlu1 %v18358_v21, %s11395_s9  ;;  %v14230_v21 = vmul.f32 0.0, %v18363_v59  ;;  %v18375_v59 = vld [vmem:[#allocation42_spill] sm:$0xff]  ;;  %18379 = vst [vmem:[#allocation146_spill] sm:$0xff] %v14264_v1  ;;  %v18380_v49 = vld [vmem:[#allocation44_spill] sm:$0xff]  ;;  %18392 = vst [vmem:[#allocation153_spill] sm:$0xff] %v14370_v6 }
 0x8da   : > { %v14214_v48 = vpop.permute.xlu0 %9988  ;;  %18370 = vst [vmem:[#allocation142_spill] sm:$0xff] %v14242_v53  ;;  %v4711_v63 = vmul.f32 %v13372_v35, %v18375_v59  ;;  %v10317_v18 = vpack.i.bf16 %v4782_v27, %v4781_v28  ;;  %v18386_v27 = vmov 0.0  }
 0x8db   : > { %18359 = vst [vmem:[#allocation139_spill] sm:$0xff] %v14214_v48  ;;  %v14218_v10 = vpop.permute.xlu1 %9998  ;;  %18364 = vst [vmem:[#allocation141_spill] sm:$0xff] %v14230_v21  ;;  %v10297_v19 = vpack.i.bf16 %v14230_v21, %v4709_v8  ;;  %v14306_v8 = vmul.f32 %v13275_v33, %v18383_v23 }
 0x8dc   : > { %18361 = vst [vmem:[#allocation138_spill] sm:$0xff] %v14218_v10  ;;  %10278 = vrot.lane.b32.xlu0 %v18362_v3, %s11394_s0  ;;  %v14245_v3 = vmul.f32 0.0, %v18371_v55  ;;  %v18377_v55 = vld [vmem:[#allocation61_spill] sm:$0xff] }
 0x8dd   : > { %10288 = vrot.lane.b32.xlu1 %v10287_v9, %s11394_s0  ;;  %v4714_v9 = vmul.f32 %v18252_v45, %v18374_v31  ;;  %v14261_v51 = vmul.f32 %v13275_v33, %v18377_v55  ;;  %v4706_v31 = vmul.f32 %v18233_v0, %v18375_v59  ;;  %v14271_v34 = vmul.f32 %v18252_v45, %v18377_v55 }
 0x8de   : > { %18372 = vst [vmem:[#allocation145_spill] sm:$0xff] %v14245_v3  ;;  %v14247_v57 = vpop.permute.xlu0 %9993  ;;  %v14302_v55 = vmul.f32 %v18233_v0, %v18380_v49  ;;  %v18420_v3 = vld [vmem:[#allocation118_spill] sm:$0xff] }
 0x8df   : > { %18373 = vst [vmem:[#allocation144_spill] sm:$0xff] %v14247_v57  ;;  %v14255_v4 = vpop.permute.xlu1 %10003  ;;  %v10307_v58 = vpack.i.bf16 %v14230_v21, %v4714_v9  ;;  %v10322_v59 = vpack.i.bf16 %v14233_v60, %v14261_v51  ;;  %v18384_v51 = vld [vmem:[#allocation173_spill] sm:$0xff]  ;;  %v14345_v9 = vmul.f32 %v13273_v56, %v18093_v32  ;;  %v18391_v32 = vld [vmem:[#allocation50_spill] sm:$0xff] }
 0x8e0   : > { %18376 = vst [vmem:[#allocation147_spill] sm:$0xff] %v14255_v4  ;;  %10283 = vrot.lane.b32.xlu0 %v10282_v17, %s11394_s0  ;;  %v14282_v17 = vmul.f32 %v13372_v35, %v18380_v49  ;;  %v18385_v28 = vpack.i.bf16 %v13810_v36, %v18384_v51  ;;  %v14323_v49 = vpack.i.bf16 %v18386_v27, %v18252_v45  ;;  %v18390_v36 = vld [vmem:[#allocation68_spill] sm:$0xff] }
 0x8e1   : > { %10293 = vrot.lane.b32.xlu1 %v10292_v43, %s11393_s8  ;;  %v10312_v43 = vpack.i.bf16 %v4711_v63, %v4706_v31  ;;  %v14313_v31 = vmul.f32 %v13271_v2, %v18133_v15  ;;  %v18387_v63 = vld [vmem:[#allocation46_spill] sm:$0xff]  ;;  %v14353_v27 = vmul.f32 %v13271_v2, %v18135_v14  ;;  %v14357_v51 = vmul.f32 %v13275_v33, %v18390_v36  ;;  %v18393_v14 = vld [vmem:[#allocation69_spill] sm:$0xff] }
 0x8e2   : > { %v14288_v4 = vpop.permute.xlu0 %10008  ;;  %v14331_v21 = vmul.f32 %v13372_v35, %v18387_v63  ;;  %v14366_v30 = vmul.f32 %v13372_v35, %v18391_v32 }
 0x8e3   : > { %18381 = vst [vmem:[#allocation149_spill] sm:$0xff] %v14288_v4  ;;  %v14296_v25 = vpop.permute.xlu1 %10013  ;;  %v14391_v4 = vmul.f32 %v13273_v56, %v12430_v62  ;;  %v9821_v62 = vunpack.i.h.bf16 %v14008_v42 }
 0x8e4   : > { %18382 = vst [vmem:[#allocation148_spill] sm:$0xff] %v14296_v25  ;;  %10298 = vrot.lane.b32.xlu0 %v10297_v19, %s11393_s8  ;;  %v14327_v19 = vmul.f32 %v18252_v45, %v18383_v23  ;;  %v18396_v25 = vld [vmem:[#allocation55_spill] sm:$0xff] }
 0x8e5   : > { %10303 = vrot.lane.b32.xlu1 %v18385_v28, %s11393_s8  ;;  %v14341_v28 = vmul.f32 %v18233_v0, %v18387_v63  ;;  %v14361_v63 = vmul.f32 %v18252_v45, %v18390_v36  ;;  %v14387_v20 = vmul.f32 %v13372_v35, %v18396_v25  ;;  %18398 = vst [vmem:[#allocation157_spill] sm:$0xff] %v14391_v4  ;;  %v9825_v4 = vunpack.i.l.bf16 %v14010_v37 }
 0x8e6   : > { %v14333_v15 = vpop.permute.xlu0 %10018  ;;  %v14403_v36 = vmul.f32 %v13271_v2, %v18099_v16  ;;  %v14421_v16 = vmul.f32 %v13271_v2, %v18171_v46  ;;  %v18406_v46 = vld [vmem:[#allocation73_spill] sm:$0xff] }
 0x8e7   : > { %18388 = vst [vmem:[#allocation151_spill] sm:$0xff] %v14333_v15  ;;  %v14347_v23 = vpop.permute.xlu1 %10028  ;;  %v14378_v15 = vmul.f32 %v18252_v45, %v18393_v14  ;;  %18397 = vst [vmem:[#allocation154_spill] sm:$0xff] %v14387_v20  ;;  %v18413_v20 = vld [vmem:[#allocation120_spill] sm:$0xff]  ;;  %v14497_v56 = vsel %vm864_vm8, %v9821_v62, %v9825_v4 }
 0x8e8   : > { %18389 = vst [vmem:[#allocation150_spill] sm:$0xff] %v14347_v23  ;;  %10308 = vrot.lane.b32.xlu0 %v10307_v58, %s11393_s8  ;;  %v14374_v23 = vmul.f32 %v13275_v33, %v18393_v14  ;;  %v18400_v58 = vld [vmem:[#allocation77_spill] sm:$0xff]  ;;  %18404 = vst [vmem:[#allocation160_spill] sm:$0xff] %v14421_v16  ;;  %v9820_v14 = vunpack.i.l.bf16 %v14008_v42  ;;  %v9830_v16 = vunpack.i.l.bf16 %v14020_v38 }
 0x8e9   : > { %18395 = vst [vmem:[#allocation155_spill] sm:$0xff] %v14378_v15  ;;  %10313 = vrot.lane.b32.xlu1 %v10312_v43, %s11393_s8  ;;  %v14399_v43 = vmul.f32 %v18233_v0, %v18391_v32  ;;  %v14407_v10 = vmul.f32 %v13275_v33, %v18400_v58  ;;  %v14417_v32 = vmul.f32 %v18233_v0, %v18396_v25  ;;  %18419 = vst [vmem:[#allocation172_spill] sm:$0xff] %v14497_v56 }
 0x8ea   : > { %18394 = vst [vmem:[#allocation152_spill] sm:$0xff] %v14374_v23  ;;  %v14393_v57 = vpop.permute.xlu0 %10023  ;;  %v14452_v25 = vmul.f32 %v13372_v35, %v18406_v46  ;;  %v14489_v15 = vsel %vm864_vm8, %v9820_v14, %v9821_v62  ;;  %v18423_v14 = vunpack.i.h.bf16 %v14032_v24  ;;  %v18424_v62 = vpack.i.bf16 %v14282_v17, %v14302_v55  ;;  %v18431_v55 = vld [vmem:[#allocation102_spill] sm:$0xff] }
 0x8eb   : > { %18399 = vst [vmem:[#allocation156_spill] sm:$0xff] %v14393_v57  ;;  %18401 = vst [vmem:[#allocation159_spill] sm:$0xff] %v14407_v10  ;;  %v14409_v48 = vpop.permute.xlu1 %10033  ;;  %v14439_v57 = vmul.f32 %v18252_v45, %v18400_v58  ;;  %v9826_v58 = vunpack.i.h.bf16 %v14010_v37  ;;  %v9835_v10 = vunpack.i.l.bf16 %v14032_v24  ;;  %v9850_v37 = vunpack.i.l.bf16 %v14034_v13  ;;  %v18432_v17 = vld [vmem:[#allocation122_spill] sm:$0xff] }
 0x8ec   : > { %18402 = vst [vmem:[#allocation158_spill] sm:$0xff] %v14409_v48  ;;  %18403 = vst [vmem:[#allocation161_spill] sm:$0xff] %v14417_v32  ;;  %10318 = vrot.lane.b32.xlu0 %v10317_v18, %s11392_s11  ;;  %v14443_v48 = vmul.f32 %v18233_v0, %v18406_v46  ;;  %v18411_v18 = vld [vmem:[#allocation174_spill] sm:$0xff] }
 0x8ed   : > { %10323 = vrot.lane.b32.xlu1 %v10322_v59, %s11392_s11  ;;  %18405 = vst [vmem:[#allocation163_spill] sm:$0xff] %v14439_v57  ;;  %18409 = vst [vmem:[#allocation164_spill] sm:$0xff] %v14452_v25  ;;  %v9840_v59 = vunpack.i.l.bf16 %v14022_v50  ;;  %v18412_v42 = vpack.i.bf16 %v13827_v22, %v18411_v18  ;;  %v18421_v18 = vunpack.i.h.bf16 %v14022_v50  ;;  %v14510_v33 = vsel %vm463_vm7, %v9835_v10, %v18423_v14  ;;  %v18430_v10 = vld [vmem:[#allocation123_spill] sm:$0xff] }
 0x8ee   : > { %18407 = vst [vmem:[#allocation162_spill] sm:$0xff] %v14443_v48  ;;  %v14446_v23 = vpop.permute.xlu0 %10038  ;;  %18416 = vst [vmem:[#allocation169_spill] sm:$0xff] %v14489_v15  ;;  %v18426_v22 = vunpack.i.h.bf16 %v14034_v13  ;;  %v9855_v2 = vunpack.i.l.bf16 %v18430_v10  ;;  %v18436_v14 = vld [vmem:[#allocation127_spill] sm:$0xff]  ;;  %v18439_v15 = vld [vmem:[#allocation129_spill] sm:$0xff]  ;;  %v18444_v45 = vunpack.i.h.bf16 %v18430_v10 }
 0x8ef   : > { %18408 = vst [vmem:[#allocation165_spill] sm:$0xff] %v14446_v23  ;;  %v14460_v32 = vpop.permute.xlu1 %10048  ;;  %v18414_v23 = vpack.i.bf16 %v14233_v60, %v14271_v34  ;;  %v14492_v34 = vsel %vm864_vm8, %v9825_v4, %v9826_v58  ;;  %v14517_v4 = vsel %vm864_vm8, %v9826_v58, %v9830_v16  ;;  %v9860_v58 = vunpack.i.l.bf16 %v18432_v17 }
 0x8f0   : > { %18410 = vst [vmem:[#allocation167_spill] sm:$0xff] %v14460_v32  ;;  %10328 = vrot.lane.b32.xlu0 %v18412_v42, %s11392_s11  ;;  %v9845_v32 = vunpack.i.l.bf16 %v18413_v20  ;;  %18417 = vst [vmem:[#allocation168_spill] sm:$0xff] %v14492_v34  ;;  %v14505_v42 = vsel %vm575_vm6, %v9840_v59, %v18421_v18  ;;  %v14522_v60 = vsel %vm799_vm4, %v9850_v37, %v18426_v22  ;;  %v18428_v59 = vunpack.i.h.bf16 %v18413_v20 }
 0x8f1   : > { %10333 = vrot.lane.b32.xlu1 %v18414_v23, %s11392_s11  ;;  %18422 = vst [vmem:[#allocation171_spill] sm:$0xff] %v14505_v42  ;;  %18425 = vst [vmem:[#allocation173_spill] sm:$0xff] %v14517_v4  ;;  %v9875_v48 = vunpack.i.l.bf16 %v18436_v14  ;;  %v9885_v34 = vunpack.i.l.bf16 %v18439_v15  ;;  %v18443_v16 = vpack.i.bf16 %v18420_v3, %v13374_v7 }
 0x8f2   : > { %v14478_v46 = vpop.permute.xlu0 %10043  ;;  %18427 = vst [vmem:[#allocation174_spill] sm:$0xff] %v14522_v60  ;;  %v14527_v18 = vsel %vm687_vm5, %v9845_v32, %v18428_v59  ;;  %v18441_v32 = vld [vmem:[#allocation128_spill] sm:$0xff] }
 0x8f3   : > { %18415 = vst [vmem:[#allocation166_spill] sm:$0xff] %v14478_v46  ;;  %v14494_v23 = vpop.permute.xlu1 %10053  ;;  %18429 = vst [vmem:[#allocation120_spill] sm:$0xff] %v14527_v18  ;;  %v9890_v56 = vunpack.i.l.bf16 %v18441_v32  ;;  %v18442_v46 = vld [vmem:[#allocation131_spill] sm:$0xff] }
 0x8f4   : > { %18418 = vst [vmem:[#allocation170_spill] sm:$0xff] %v14494_v23  ;;  %10338 = vrot.lane.b32.xlu0 %v18424_v62, %s11392_s11  ;;  %v18433_v62 = vld [vmem:[#allocation125_spill] sm:$0xff]  ;;  %v18435_v23 = vld [vmem:[#allocation124_spill] sm:$0xff]  ;;  %v9896_v38 = vunpack.i.h.bf16 %v18442_v46  ;;  %v9895_v4 = vunpack.i.l.bf16 %v18442_v46  ;;  %v18450_v46 = vld [vmem:[#allocation130_spill] sm:$0xff] }
 0x8f5   : > { %10343 = vrot.lane.b32.xlu1 %v18431_v55, %s11391_s12  ;;  %v9865_v37 = vunpack.i.l.bf16 %v18433_v62  ;;  %v9870_v59 = vunpack.i.l.bf16 %v18435_v23  ;;  %v18438_v55 = vld [vmem:[#allocation126_spill] sm:$0xff]  ;;  %v18448_v60 = vunpack.i.h.bf16 %v18433_v62  ;;  %v9900_v42 = vunpack.i.l.bf16 %v18450_v46 }
 0x8f6   : > { %v14537_v22 = vpop.permute.xlu0 %10058  ;;  %v9880_v57 = vunpack.i.l.bf16 %v18438_v55 }
 0x8f7   : > { %18434 = vst [vmem:[#allocation123_spill] sm:$0xff] %v14537_v22  ;;  %v14543_v25 = vpop.permute.xlu1 %10068  ;;  %v18440_v22 = vld [vmem:[#allocation104_spill] sm:$0xff]  ;;  %v14572_v18 = vsel %vm17752_vm1, %v9865_v37, %v18448_v60  ;;  %v18457_v37 = vunpack.i.h.bf16 %v18438_v55 }
 0x8f8   : > { %18437 = vst [vmem:[#allocation102_spill] sm:$0xff] %v14543_v25  ;;  %10348 = vrot.lane.b32.xlu0 %v18440_v22, %s11391_s12  ;;  %v14562_v25 = vsel %vm750_vm3, %v9855_v2, %v18444_v45  ;;  %v18446_v22 = vunpack.i.h.bf16 %v18432_v17  ;;  %18449 = vst [vmem:[#allocation124_spill] sm:$0xff] %v14572_v18  ;;  %v18454_v2 = vunpack.i.h.bf16 %v18436_v14  ;;  %v18460_v18 = vunpack.i.h.bf16 %v18439_v15 }
 0x8f9   : > { %10353 = vrot.lane.b32.xlu1 %v18443_v16, %s11391_s12  ;;  %18445 = vst [vmem:[#allocation122_spill] sm:$0xff] %v14562_v25  ;;  %v18452_v16 = vunpack.i.h.bf16 %v18435_v23 }
 0x8fa   : > { %v14567_v1 = vsel %vm638_vm2, %v9860_v58, %v18446_v22  ;;  %v14575_v6 = vpop.permute.xlu0 %10063  ;;  %v14585_v45 = vsel %vm1396_vm10, %v9875_v48, %v18454_v2  ;;  %v18456_v58 = vld [vmem:[#allocation132_spill] sm:$0xff]  ;;  %v18464_v2 = vunpack.i.h.bf16 %v18441_v32 }
 0x8fb   : > { %18447 = vst [vmem:[#allocation125_spill] sm:$0xff] %v14567_v1  ;;  %18451 = vst [vmem:[#allocation127_spill] sm:$0xff] %v14575_v6  ;;  %v14580_v3 = vsel %vm18104_vm0, %v9870_v59, %v18452_v16  ;;  %v9906_v22 = vunpack.i.h.bf16 %v18456_v58  ;;  %v9905_v7 = vunpack.i.l.bf16 %v18456_v58  ;;  %v14589_v60 = vpop.permute.xlu1 %10073  ;;  %v14594_v6 = vsel %vm18458_vm12, %v9880_v57, %v18457_v37  ;;  %v18463_v16 = vld [vmem:[#allocation135_spill] sm:$0xff] }
 0x8fc   : > { %18453 = vst [vmem:[#allocation126_spill] sm:$0xff] %v14580_v3  ;;  %18455 = vst [vmem:[#allocation129_spill] sm:$0xff] %v14585_v45  ;;  %v14599_v59 = vsel %vm18461_vm14, %v9885_v34, %v18460_v18  ;;  %v9916_v3 = vunpack.i.h.bf16 %v18463_v16  ;;  %v9915_v48 = vunpack.i.l.bf16 %v18463_v16  ;;  %10358 = vrot.lane.b32.xlu0 %v14323_v49, %s11391_s12  ;;  %v14608_v58 = vsel %vm18465_vm15, %v9890_v56, %v18464_v2  ;;  %v18469_v49 = vld [vmem:[#allocation133_spill] sm:$0xff] }
 0x8fd   : > { %18459 = vst [vmem:[#allocation104_spill] sm:$0xff] %v14594_v6  ;;  %18462 = vst [vmem:[#allocation128_spill] sm:$0xff] %v14599_v59  ;;  %v14611_v57 = vsel %vm463_vm7, %v9895_v4, %v9896_v38  ;;  %v18467_v34 = vpack.i.bf16 %v13372_v35, %v18233_v0  ;;  %v18468_v18 = vunpack.i.h.bf16 %v14032_v24  ;;  %v9910_v56 = vunpack.i.l.bf16 %v18469_v49 }
 0x8fe   : > { %18466 = vst [vmem:[#allocation131_spill] sm:$0xff] %v14608_v58  ;;  %v9920_v2 = vunpack.i.l.bf16 %v14128_v54  ;;  %v14626_v58 = vpop.permute.xlu0 %10078  ;;  %v14629_v37 = vsel %vm463_vm7, %v9896_v38, %v9900_v42  ;;  %v14632_v6 = vsel %vm575_vm6, %v9905_v7, %v9906_v22  ;;  %v14644_v35 = vsel %vm687_vm5, %v9915_v48, %v9916_v3  ;;  %vm18504_vm14 = vmmov %vm18458_vm12 }
 0x8ff   : > { %10363 = vrot.lane.b32.xlu1 %v18467_v34, %s11391_s12  ;;  %v14621_v16 = vsel %vm463_vm7, %v18468_v18, %v9895_v4  ;;  %v18470_v34 = vld [vmem:[#allocation137_spill] sm:$0xff]  ;;  %v14636_v4 = vpop.permute.xlu1 %10083  ;;  %v18472_v18 = vunpack.i.h.bf16 %v14022_v50  ;;  %v9936_v38 = vunpack.i.h.bf16 %v14154_v47  ;;  %v9935_v42 = vunpack.i.l.bf16 %v14154_v47  ;;  %vm18512_vm15 = vmmov %vm18458_vm12 }
 0x900   : > { %v9926_v0 = vunpack.i.h.bf16 %v18470_v34  ;;  %v9925_v24 = vunpack.i.l.bf16 %v18470_v34  ;;  %18471 = vst [vmem:[#allocation130_spill] sm:$0xff] %v14636_v4  ;;  %v18473_v45 = vpack.i.bf16 %v14313_v31, %v14294_v40  ;;  %v14653_v34 = vsel %vm575_vm6, %v9906_v22, %v9910_v56  ;;  %v18474_v4 = vld [vmem:[#allocation134_spill] sm:$0xff]  ;;  %v18477_v40 = vld [vmem:[#allocation136_spill] sm:$0xff] }
 0x901   : > { %v14641_v59 = vsel %vm575_vm6, %v18472_v18, %v9905_v7  ;;  %v9930_v18 = vunpack.i.l.bf16 %v18474_v4  ;;  %v18475_v1 = vpack.i.bf16 %v14239_v39, %v14306_v8  ;;  %v18476_v47 = vunpack.i.h.bf16 %v18413_v20 }
 0x902   : > { %10368 = vrot.lane.b32.xlu0 %v18473_v45, %s11390_s26  ;;  %v9946_v45 = vunpack.i.h.bf16 %v14158_v44  ;;  %v9945_v22 = vunpack.i.l.bf16 %v14158_v44  ;;  %v14670_v56 = vpop.permute.xlu0 %10088  ;;  %v14673_v7 = vsel %vm687_vm5, %v9916_v3, %v9920_v2  ;;  %v14676_v50 = vsel %vm799_vm4, %v9925_v24, %v9926_v0 }
 0x903   : > { %10373 = vrot.lane.b32.xlu1 %v18475_v1, %s11390_s26  ;;  %v14665_v25 = vsel %vm687_vm5, %v18476_v47, %v9915_v48  ;;  %18478 = vst [vmem:[#allocation132_spill] sm:$0xff] %v14670_v56  ;;  %v9940_v1 = vunpack.i.l.bf16 %v18477_v40  ;;  %v14679_v20 = vpop.permute.xlu1 %10093  ;;  %v18480_v8 = vunpack.i.h.bf16 %v14034_v13  ;;  %v14687_v47 = vsel %vm799_vm4, %v9926_v0, %v9930_v18  ;;  %v18481_v56 = vld [vmem:[#allocation176_spill] sm:$0xff] }
 0x904   : > { %18479 = vst [vmem:[#allocation135_spill] sm:$0xff] %v14679_v20  ;;  %v14690_v44 = vsel %vm750_vm3, %v9935_v42, %v9936_v38  ;;  %v9950_v3 = vunpack.i.l.bf16 %v14166_v5  ;;  %v9956_v2 = vunpack.i.h.bf16 %v14178_v12  ;;  %v9955_v31 = vunpack.i.l.bf16 %v14178_v12  ;;  %v18482_v20 = vld [vmem:[#allocation175_spill] sm:$0xff] }
 0x905   : > { %v14684_v48 = vsel %vm799_vm4, %v18480_v8, %v9925_v24  ;;  %v18483_v40 = vpack.i.bf16 %v18481_v56, %v18482_v20  ;;  %v9966_v13 = vunpack.i.h.bf16 %v14182_v29  ;;  %v9965_v24 = vunpack.i.l.bf16 %v14182_v29 }
 0x906   : > { %v18484_v0 = vpack.i.bf16 %v14239_v39, %v14327_v19  ;;  %v18485_v18 = vunpack.i.h.bf16 %v18430_v10  ;;  %v14711_v12 = vsel %vm750_vm3, %v9936_v38, %v9940_v1  ;;  %v14714_v56 = vsel %vm638_vm2, %v9945_v22, %v9946_v45  ;;  %v14718_v20 = vpop.permute.xlu0 %10098 }
 0x907   : > { %10378 = vrot.lane.b32.xlu0 %v18483_v40, %s11390_s26  ;;  %v9970_v29 = vunpack.i.l.bf16 %v14190_v52  ;;  %18486 = vst [vmem:[#allocation133_spill] sm:$0xff] %v14718_v20  ;;  %v18487_v19 = vunpack.i.h.bf16 %v18432_v17  ;;  %v9976_v38 = vunpack.i.h.bf16 %v14202_v41  ;;  %v9975_v1 = vunpack.i.l.bf16 %v14202_v41 }
 0x908   : > { %10383 = vrot.lane.b32.xlu1 %v18484_v0, %s11390_s26  ;;  %v14708_v8 = vsel %vm750_vm3, %v18485_v18, %v9935_v42  ;;  %v9960_v42 = vunpack.i.l.bf16 %v14169_v11  ;;  %v14729_v18 = vpop.permute.xlu1 %10103  ;;  %v14732_v40 = vsel %vm17752_vm1, %v9955_v31, %v9956_v2  ;;  %v9986_v39 = vunpack.i.h.bf16 %v14205_v61 }
 0x909   : > { %v14723_v0 = vsel %vm638_vm2, %v18487_v19, %v9945_v22  ;;  %18488 = vst [vmem:[#allocation137_spill] sm:$0xff] %v14729_v18  ;;  %v9985_v17 = vunpack.i.l.bf16 %v14205_v61  ;;  %v18489_v22 = vpack.i.bf16 %v14331_v21, %v14341_v28  ;;  %v14741_v19 = vsel %vm638_vm2, %v9946_v45, %v9950_v3 }
 0x90a   : > { %v14744_v10 = vsel %vm18490_vm9, %v9965_v24, %v9966_v13  ;;  %v18491_v41 = vpack.i.bf16 %v14353_v27, %v14345_v9  ;;  %v18492_v18 = vunpack.i.h.bf16 %v18433_v62  ;;  %v14756_v20 = vsel %vm17752_vm1, %v9956_v2, %v9960_v42  ;;  %v10114_v27 = vpop.permute.xlu0 %10113 }
 0x90b   : > { %10388 = vrot.lane.b32.xlu0 %v18489_v22, %s11390_s26  ;;  %v18493_v21 = vunpack.i.h.bf16 %v18435_v23  ;;  %v9980_v9 = vunpack.i.l.bf16 %v14195_v26  ;;  %v14767_v62 = vsel %vm18104_vm0, %v9966_v13, %v9970_v29  ;;  %v10116_v2 = vunpack.i.h.bf16 %v10114_v27 }
 0x90c   : > { %10393 = vrot.lane.b32.xlu1 %v18491_v41, %s11389_s17  ;;  %v14753_v61 = vsel %vm17752_vm1, %v18492_v18, %v9955_v31  ;;  %v14770_v31 = vsel %vm1396_vm10, %v9975_v1, %v9976_v38  ;;  %v10115_v42 = vunpack.i.l.bf16 %v10114_v27  ;;  %v10109_v18 = vpop.permute.xlu1 %10108  ;;  %v18496_v23 = vunpack.i.h.bf16 %v18436_v14  ;;  %v18499_v27 = vld [vmem:[#allocation139_spill] sm:$0xff] }
 0x90d   : > { %v14761_v28 = vsel %vm18494_vm13, %v18493_v21, %v9965_v24  ;;  %18495 = vst [vmem:[#allocation134_spill] sm:$0xff] %v14770_v31  ;;  %v14778_v22 = vsel %vm18458_vm12, %v9985_v17, %v9986_v39  ;;  %v10111_v41 = vunpack.i.h.bf16 %v10109_v18  ;;  %v10110_v21 = vunpack.i.l.bf16 %v10109_v18 }
 0x90e   : > { %v14775_v24 = vsel %vm1396_vm10, %v18496_v23, %v9975_v1  ;;  %18497 = vst [vmem:[#allocation176_spill] sm:$0xff] %v14778_v22  ;;  %v18498_v13 = vpack.i.bf16 %v14242_v53, %v14357_v51  ;;  %v14785_v29 = vsel %vm1396_vm10, %v9976_v38, %v9980_v9  ;;  %v9990_v14 = vunpack.i.l.bf16 %v18499_v27  ;;  %v18500_v1 = vld [vmem:[#allocation178_spill] sm:$0xff]  ;;  %v18501_v23 = vld [vmem:[#allocation177_spill] sm:$0xff] }
 0x90f   : > { %v18502_v45 = vpack.i.bf16 %v18500_v1, %v18501_v23  ;;  %v3341_v22 = vsel %vm463_vm7, %v10115_v42, %v10116_v2  ;;  %v18503_v18 = vunpack.i.h.bf16 %v18438_v55  ;;  %v3340_v51 = vsel %vm463_vm7, %v10111_v41, %v10115_v42 }
 0x910   : > { %10398 = vrot.lane.b32.xlu0 %v18498_v13, %s11389_s17  ;;  %v18506_v38 = vunpack.i.h.bf16 %v18450_v46  ;;  %v10119_v13 = vpop.permute.xlu0 %10118  ;;  %v8702_v3 = vpack.c.bf16 %v3341_v22, %v14629_v37  ;;  %v3339_v27 = vsel %vm463_vm7, %v10110_v21, %v10111_v41  ;;  %v10124_v23 = vpop.permute.xlu1 %10123  ;;  %v8704_v55 = vpack.c.bf16 %v3340_v51, %v14611_v57  ;;  %v18509_v22 = vld [vmem:[#allocation144_spill] sm:$0xff] }
 0x911   : > { %10403 = vrot.lane.b32.xlu1 %v18502_v45, %s11389_s17  ;;  %v14797_v31 = vsel %vm18504_vm14, %v18503_v18, %v9985_v17  ;;  %v10121_v1 = vunpack.i.h.bf16 %v10119_v13  ;;  %v10120_v45 = vunpack.i.l.bf16 %v10119_v13  ;;  %v8594_v2 = vpack.c.bf16 %v3339_v27, %v14621_v16  ;;  %v18507_v17 = vld [vmem:[#allocation138_spill] sm:$0xff] }
 0x912   : > { %18505 = vst [vmem:[#allocation175_spill] sm:$0xff] %v14797_v31  ;;  %v3338_v9 = vsel %vm463_vm7, %v18506_v38, %v10110_v21  ;;  %v10000_v18 = vunpack.i.l.bf16 %v18507_v17  ;;  %v10126_v31 = vunpack.i.h.bf16 %v10124_v23  ;;  %v10125_v42 = vunpack.i.l.bf16 %v10124_v23  ;;  %8703 = vmatprep.subr.bf16.mxu1 %v8702_v3 }
 0x913   : > { %v18508_v46 = vpack.i.bf16 %v14242_v53, %v14361_v63  ;;  %v8596_v37 = vpack.c.bf16 %v3338_v9, %v14510_v33  ;;  %v9996_v41 = vunpack.i.h.bf16 %v18509_v22  ;;  %v18510_v21 = vunpack.i.h.bf16 %v18469_v49  ;;  %8595 = vmatprep.subr.bf16.mxu0 %v8594_v2  ;;  %8705 = vmatpush1.bf16.msra.mxu1 %v8704_v55  ;;  %v18513_v9 = vld [vmem:[#allocation147_spill] sm:$0xff]  ;;  %v18514_v2 = vld [vmem:[#allocation153_spill] sm:$0xff] }
 0x914   : > { %v18511_v57 = vpack.i.bf16 %v14366_v30, %v14399_v43  ;;  %v3413_v3 = vsel %vm575_vm6, %v10120_v45, %v10121_v1  ;;  %v14823_v27 = vsel %vm18512_vm15, %v9986_v39, %v9990_v14  ;;  %v9995_v63 = vunpack.i.l.bf16 %v18509_v22  ;;  %v10134_v51 = vpop.permute.xlu0 %10133  ;;  %v10129_v23 = vpop.permute.xlu1 %10128  ;;  %v18516_v55 = vld [vmem:[#allocation171_spill] sm:$0xff]  ;;  %v18544_v22 = vld [vmem:[#allocation146_spill] sm:$0xff] }
 0x915   : > { %10408 = vrot.lane.b32.xlu0 %v18508_v46, %s11389_s17  ;;  %v3412_v16 = vsel %vm575_vm6, %v18510_v21, %v10120_v45  ;;  %v3414_v33 = vsel %vm575_vm6, %v10121_v1, %v10125_v42  ;;  %8597 = vmatpush1.bf16.msra.mxu0 %v8596_v37  ;;  %v8598_v49 = vpack.c.bf16 %v3413_v3, %v14641_v59  ;;  %v10006_v30 = vunpack.i.h.bf16 %v18513_v9  ;;  %v18518_v21 = vld [vmem:[#allocation152_spill] sm:$0xff] }
 0x916   : > { %10413 = vrot.lane.b32.xlu1 %v18511_v57, %s11389_s17  ;;  %v3415_v38 = vsel %vm575_vm6, %v10125_v42, %v10126_v31  ;;  %v10136_v43 = vunpack.i.h.bf16 %v10134_v51  ;;  %v10135_v13 = vunpack.i.l.bf16 %v10134_v51  ;;  %v10131_v39 = vunpack.i.h.bf16 %v10129_v23 }
 0x917   : > { %v8706_v45 = vpack.c.bf16 %v3415_v38, %v14653_v34  ;;  %v10130_v14 = vunpack.i.l.bf16 %v10129_v23  ;;  %v18515_v1 = vpack.i.bf16 %v14403_v36, %v18514_v2  ;;  %8599 = vmatprep.subr.bf16.mxu0 %v8598_v49  ;;  %v8600_v46 = vpack.c.bf16 %v3412_v16, %v18516_v55  ;;  %v18517_v34 = vld [vmem:[#allocation145_spill] sm:$0xff]  ;;  %v18521_v2 = vld [vmem:[#allocation120_spill] sm:$0xff]  ;;  %v18523_v55 = vld [vmem:[#allocation179_spill] sm:$0xff] }
 0x918   : > { %v8708_v59 = vpack.c.bf16 %v3414_v33, %v14632_v6  ;;  %v10076_v31 = vunpack.i.h.bf16 %v14589_v60  ;;  %v10081_v42 = vunpack.i.h.bf16 %v14626_v58  ;;  %v10080_v37 = vunpack.i.l.bf16 %v14626_v58  ;;  %v10139_v51 = vpop.permute.xlu0 %10138  ;;  %v10144_v23 = vpop.permute.xlu1 %10143 }
 0x919   : > { %10418 = vrot.lane.b32.xlu0 %v18515_v1, %s11388_s13  ;;  %v18519_v57 = vpack.i.bf16 %v18517_v34, %v18518_v21  ;;  %8707 = vmatprep.subr.bf16.mxu1 %v8706_v45  ;;  %v3489_v36 = vsel %vm687_vm5, %v10135_v13, %v10136_v43  ;;  %v10075_v3 = vunpack.i.l.bf16 %v14589_v60  ;;  %v3488_v16 = vsel %vm687_vm5, %v10131_v39, %v10135_v13  ;;  %v18522_v13 = vld [vmem:[#allocation180_spill] sm:$0xff]  ;;  %v18527_v21 = vld [vmem:[#allocation155_spill] sm:$0xff] }
 0x91a   : > { %v18520_v6 = vunpack.i.h.bf16 %v14128_v54  ;;  %8601 = vmatpush1.bf16.msra.mxu0 %v8600_v46  ;;  %8709 = vmatpush1.bf16.msra.mxu1 %v8708_v59  ;;  %v8710_v58 = vpack.c.bf16 %v3489_v36, %v14673_v7  ;;  %v10141_v49 = vunpack.i.h.bf16 %v10139_v51  ;;  %v10140_v38 = vunpack.i.l.bf16 %v10139_v51 }
 0x91b   : > { %10423 = vrot.lane.b32.xlu1 %v18519_v57, %s11388_s13  ;;  %v3487_v45 = vsel %vm687_vm5, %v10130_v14, %v10131_v39  ;;  %v10146_v1 = vunpack.i.h.bf16 %v10144_v23  ;;  %v10145_v60 = vunpack.i.l.bf16 %v10144_v23  ;;  %v18524_v54 = vpack.i.bf16 %v18522_v13, %v18523_v55  ;;  %v18529_v13 = vld [vmem:[#allocation154_spill] sm:$0xff] }
 0x91c   : > { %v3486_v33 = vsel %vm687_vm5, %v18520_v6, %v10130_v14  ;;  %8711 = vmatprep.subr.bf16.mxu1 %v8710_v58  ;;  %v8602_v46 = vpack.c.bf16 %v3487_v45, %v14665_v25  ;;  %v8712_v59 = vpack.c.bf16 %v3488_v16, %v14644_v35  ;;  %vm18525_vm9 = vcmask 56320   ;;  %v10149_v6 = vpop.permute.xlu0 %10148  ;;  %v10154_v23 = vpop.permute.xlu1 %10153 }
 0x91d   : > { %v8604_v43 = vpack.c.bf16 %v3486_v33, %v18521_v2  ;;  %10428 = vrot.lane.b32.xlu0 %v18524_v54, %s11388_s13  ;;  %v14864_v7 = vsel %vm18525_vm9, %v9995_v63, %v9996_v41  ;;  %v18526_v39 = vunpack.i.h.bf16 %v18474_v4  ;;  %v18528_v57 = vpack.i.bf16 %v18517_v34, %v18527_v21  ;;  %vm18533_vm13 = vmmov %vm18525_vm9  ;;  %v18534_v54 = vld [vmem:[#allocation160_spill] sm:$0xff]  ;;  %v18722_v34 = vld [vmem:[#allocation79_spill] sm:$0xff] }
 0x91e   : > { %v3561_v25 = vsel %vm799_vm4, %v10140_v38, %v10141_v49  ;;  %v3627_v35 = vsel %vm864_vm8, %v10080_v37, %v10081_v42  ;;  %v10005_v36 = vunpack.i.l.bf16 %v18513_v9  ;;  %v3562_v16 = vsel %vm799_vm4, %v10141_v49, %v10145_v60  ;;  %8603 = vmatprep.subr.bf16.mxu0 %v8602_v46  ;;  %8713 = vmatpush1.bf16.msra.mxu1 %v8712_v59  ;;  %v18530_v49 = vld [vmem:[#allocation161_spill] sm:$0xff]  ;;  %vm18542_vm0 = vmmov %vm18525_vm9 }
 0x91f   : > { %v3560_v14 = vsel %vm799_vm4, %v18526_v39, %v10140_v38  ;;  %10433 = vrot.lane.b32.xlu1 %v18528_v57, %s11388_s13  ;;  %v8606_v4 = vpack.c.bf16 %v3561_v25, %v14684_v48  ;;  %v3563_v33 = vsel %vm799_vm4, %v10145_v60, %v10146_v1  ;;  %v10151_v51 = vunpack.i.h.bf16 %v10149_v6  ;;  %8605 = vmatpush1.bf16.msra.mxu0 %v8604_v43  ;;  %v18535_v46 = vld [vmem:[#allocation157_spill] sm:$0xff]  ;;  %v18537_v39 = vld [vmem:[#allocation174_spill] sm:$0xff] }
 0x920   : > { %v10150_v58 = vunpack.i.l.bf16 %v10149_v6  ;;  %v8714_v45 = vpack.c.bf16 %v3563_v33, %v14687_v47  ;;  %v3625_v38 = vsel %vm864_vm8, %v10075_v3, %v10076_v31  ;;  %v10156_v42 = vunpack.i.h.bf16 %v10154_v23  ;;  %v18539_v25 = vld [vmem:[#allocation121_spill] sm:$0xff]  ;;  %v18541_v6 = vld [vmem:[#allocation172_spill] sm:$0xff]  ;;  %v10159_v33 = vpop.permute.xlu1 %10158 }
 0x921   : > { %v10155_v2 = vunpack.i.l.bf16 %v10154_v23  ;;  %v18531_v55 = vpack.i.bf16 %v18529_v13, %v18530_v49  ;;  %8607 = vmatprep.subr.bf16.mxu0 %v8606_v4  ;;  %v8716_v48 = vpack.c.bf16 %v3562_v16, %v14676_v50  ;;  %v18532_v1 = vunpack.i.h.bf16 %v18439_v15  ;;  %v18538_v50 = vld [vmem:[#allocation173_spill] sm:$0xff] }
 0x922   : > { %v10001_v47 = vunpack.i.h.bf16 %v18507_v17  ;;  %v3626_v60 = vsel %vm864_vm8, %v10076_v31, %v10080_v37  ;;  %v18536_v59 = vpack.i.bf16 %v18534_v54, %v18535_v46  ;;  %8715 = vmatprep.subr.bf16.mxu1 %v8714_v45  ;;  %v8608_v21 = vpack.c.bf16 %v3560_v14, %v18537_v39  ;;  %v18551_v46 = vld [vmem:[#allocation182_spill] sm:$0xff] }
 0x923   : > { %10438 = vrot.lane.b32.xlu0 %v18531_v55, %s11388_s13  ;;  %v14891_v43 = vsel %vm18533_vm13, %v18532_v1, %v9995_v63  ;;  %v8718_v57 = vpack.c.bf16 %v3627_v35, %v18538_v50  ;;  %v18540_v16 = vunpack.i.h.bf16 %v18539_v25  ;;  %v10164_v63 = vpop.permute.xlu0 %10163  ;;  %8717 = vmatpush1.bf16.msra.mxu1 %v8716_v48  ;;  %v8610_v4 = vpack.c.bf16 %v3625_v38, %v18541_v6  ;;  %v18550_v48 = vld [vmem:[#allocation149_spill] sm:$0xff]  ;;  %v18555_v25 = vld [vmem:[#allocation136_spill] sm:$0xff] }
 0x924   : > { %10443 = vrot.lane.b32.xlu1 %v18536_v59, %s18100_s2  ;;  %v3701_v31 = vsel %vm750_vm3, %v10155_v2, %v10156_v42  ;;  %v14911_v37 = vsel %vm18542_vm0, %v9996_v41, %v10000_v18  ;;  %vm18543_vm12 = vcmask 7168   ;;  %v10166_v35 = vunpack.i.h.bf16 %v10164_v63  ;;  %8609 = vmatpush1.bf16.msra.mxu0 %v8608_v21  ;;  %v18545_v42 = vld [vmem:[#allocation159_spill] sm:$0xff]  ;;  %v18547_v41 = vld [vmem:[#allocation168_spill] sm:$0xff]  ;;  %v18552_v59 = vld [vmem:[#allocation181_spill] sm:$0xff] }
 0x925   : > { %v3624_v15 = vsel %vm864_vm8, %v18540_v16, %v10075_v3  ;;  %v14916_v14 = vsel %vm18543_vm12, %v10005_v36, %v10006_v30  ;;  %v10165_v3 = vunpack.i.l.bf16 %v10164_v63  ;;  %8719 = vmatprep.subr.bf16.mxu1 %v8718_v57  ;;  %v3699_v23 = vsel %vm750_vm3, %v10150_v58, %v10151_v51  ;;  %8611 = vmatprep.subr.bf16.mxu0 %v8610_v4  ;;  %vm18549_vm14 = vmmov %vm18543_vm12  ;;  %v18554_v21 = vld [vmem:[#allocation169_spill] sm:$0xff] }
 0x926   : > { %v10161_v45 = vunpack.i.h.bf16 %v10159_v33  ;;  %v10160_v38 = vunpack.i.l.bf16 %v10159_v33  ;;  %v18546_v18 = vpack.i.bf16 %v18544_v22, %v18545_v42  ;;  %v8720_v13 = vpack.c.bf16 %v3626_v60, %v18547_v41  ;;  %v18560_v41 = vld [vmem:[#allocation164_spill] sm:$0xff]  ;;  %vm18564_vm15 = vmmov %vm18543_vm12 }
 0x927   : > { %v18548_v49 = vunpack.i.h.bf16 %v18441_v32  ;;  %v10010_v1 = vunpack.i.l.bf16 %v18550_v48  ;;  %v3700_v54 = vsel %vm750_vm3, %v10151_v51, %v10155_v2  ;;  %v18553_v39 = vpack.i.bf16 %v18551_v46, %v18552_v59  ;;  %v10169_v16 = vpop.permute.xlu0 %10168  ;;  %v18557_v2 = vld [vmem:[#allocation148_spill] sm:$0xff]  ;;  %v18563_v46 = vld [vmem:[#allocation122_spill] sm:$0xff] }
 0x928   : > { %10448 = vrot.lane.b32.xlu0 %v18546_v18, %s18100_s2  ;;  %v8612_v50 = vpack.c.bf16 %v3624_v15, %v18554_v21  ;;  %v8722_v57 = vpack.c.bf16 %v3701_v31, %v14711_v12  ;;  %v10011_v60 = vunpack.i.h.bf16 %v18550_v48  ;;  %v18556_v32 = vunpack.i.h.bf16 %v18555_v25  ;;  %8721 = vmatpush1.bf16.msra.mxu1 %v8720_v13  ;;  %v10174_v15 = vpop.permute.xlu1 %10173  ;;  %v18561_v13 = vld [vmem:[#allocation162_spill] sm:$0xff] }
 0x929   : > { %v14927_v55 = vsel %vm18549_vm14, %v18548_v49, %v10005_v36  ;;  %10453 = vrot.lane.b32.xlu1 %v18553_v39, %s18100_s2  ;;  %v8614_v63 = vpack.c.bf16 %v3699_v23, %v14708_v8  ;;  %v3775_v51 = vsel %vm638_vm2, %v10165_v3, %v10166_v35  ;;  %v10016_v6 = vunpack.i.h.bf16 %v18557_v2 }
 0x92a   : > { %v3698_v36 = vsel %vm750_vm3, %v18556_v32, %v10150_v58  ;;  %v10171_v4 = vunpack.i.h.bf16 %v10169_v16  ;;  %v10170_v33 = vunpack.i.l.bf16 %v10169_v16  ;;  %8613 = vmatpush1.bf16.msra.mxu0 %v8612_v50  ;;  %8723 = vmatprep.subr.bf16.mxu1 %v8722_v57  ;;  %v3773_v12 = vsel %vm638_vm2, %v10160_v38, %v10161_v45  ;;  %v18558_v58 = vld [vmem:[#allocation163_spill] sm:$0xff]  ;;  %v18568_v16 = vld [vmem:[#allocation113_spill] sm:$0xff] }
 0x92b   : > { %v10015_v31 = vunpack.i.l.bf16 %v18557_v2  ;;  %v10176_v42 = vunpack.i.h.bf16 %v10174_v15  ;;  %v10175_v18 = vunpack.i.l.bf16 %v10174_v15  ;;  %8615 = vmatprep.subr.bf16.mxu0 %v8614_v63  ;;  %v18559_v8 = vpack.i.bf16 %v18544_v22, %v18558_v58  ;;  %v18565_v50 = vld [vmem:[#allocation151_spill] sm:$0xff] }
 0x92c   : > { %v8724_v35 = vpack.c.bf16 %v3700_v54, %v14690_v44  ;;  %v3774_v23 = vsel %vm638_vm2, %v10161_v45, %v10165_v3  ;;  %v18562_v49 = vpack.i.bf16 %v18560_v41, %v18561_v13  ;;  %v8616_v59 = vpack.c.bf16 %v3698_v36, %v18563_v46  ;;  %v10184_v45 = vpop.permute.xlu0 %10183  ;;  %v10179_v9 = vpop.permute.xlu1 %10178 }
 0x92d   : > { %10458 = vrot.lane.b32.xlu0 %v18559_v8, %s18100_s2  ;;  %v8726_v39 = vpack.c.bf16 %v3775_v51, %v14741_v19  ;;  %v14961_v21 = vsel %vm18564_vm15, %v10006_v30, %v10010_v1  ;;  %v10021_v57 = vunpack.i.h.bf16 %v18565_v50  ;;  %v18566_v44 = vunpack.i.h.bf16 %v14166_v5  ;;  %v18570_v51 = vld [vmem:[#allocation150_spill] sm:$0xff] }
 0x92e   : > { %10463 = vrot.lane.b32.xlu1 %v18562_v49, %s18100_s2  ;;  %8725 = vmatpush1.bf16.msra.mxu1 %v8724_v35  ;;  %v8618_v54 = vpack.c.bf16 %v3773_v12, %v14723_v0  ;;  %v3849_v25 = vsel %vm17752_vm1, %v10175_v18, %v10176_v42  ;;  %v10020_v32 = vunpack.i.l.bf16 %v18565_v50  ;;  %v10186_v19 = vunpack.i.h.bf16 %v10184_v45  ;;  %v18571_v12 = vld [vmem:[#allocation112_spill] sm:$0xff] }
 0x92f   : > { %v3772_v3 = vsel %vm638_vm2, %v18566_v44, %v10160_v38  ;;  %v10185_v36 = vunpack.i.l.bf16 %v10184_v45  ;;  %8617 = vmatpush1.bf16.msra.mxu0 %v8616_v59  ;;  %8727 = vmatprep.subr.bf16.mxu1 %v8726_v39  ;;  %v3847_v30 = vsel %vm17752_vm1, %v10170_v33, %v10171_v4  ;;  %vm18567_vm9 = vcmask 1039360   ;;  %v18578_v39 = vld [vmem:[#allocation115_spill] sm:$0xff]  ;;  %v18581_v45 = vld [vmem:[#allocation156_spill] sm:$0xff] }
 0x930   : > { %v14972_v1 = vsel %vm18567_vm9, %v10015_v31, %v10016_v6  ;;  %v10181_v5 = vunpack.i.h.bf16 %v10179_v9  ;;  %v10180_v38 = vunpack.i.l.bf16 %v10179_v9  ;;  %8619 = vmatprep.subr.bf16.mxu0 %v8618_v54  ;;  %v18569_v0 = vpack.i.bf16 %v18568_v16, %v18568_v16  ;;  %v18573_v31 = vld [vmem:[#allocation125_spill] sm:$0xff]  ;;  %vm18576_vm0 = vmmov %vm18567_vm9 }
 0x931   : > { %v8728_v63 = vpack.c.bf16 %v3774_v23, %v14714_v56  ;;  %v10031_v2 = vunpack.i.h.bf16 %v18570_v51  ;;  %v3848_v15 = vsel %vm17752_vm1, %v10171_v4, %v10175_v18  ;;  %v18572_v42 = vpack.i.bf16 %v18571_v12, %v18571_v12  ;;  %v10189_v56 = vpop.permute.xlu0 %10188  ;;  %vm18580_vm14 = vmmov %vm18576_vm0 }
 0x932   : > { %10473 = vrot.lane.b32.xlu0 %v18569_v0, %s11399_s30  ;;  %v8620_v58 = vpack.c.bf16 %v3772_v3, %v18573_v31  ;;  %v8730_v8 = vpack.c.bf16 %v3849_v25, %v14756_v20  ;;  %v10030_v35 = vunpack.i.l.bf16 %v18570_v51  ;;  %v18574_v41 = vunpack.i.h.bf16 %v14169_v11  ;;  %v10194_v20 = vpop.permute.xlu1 %10193 }
 0x933   : > { %10468 = vrot.lane.b32.xlu1 %v18572_v42, %s11397_s20  ;;  %8729 = vmatpush1.bf16.msra.mxu1 %v8728_v63  ;;  %v8622_v23 = vpack.c.bf16 %v3847_v30, %v14753_v61  ;;  %vm18575_vm13 = vcmask 449536   ;;  %v14996_v18 = vsel %vm18576_vm0, %v10020_v32, %v10021_v57  ;;  %v10191_v49 = vunpack.i.h.bf16 %v10189_v56  ;;  %v18585_v30 = vld [vmem:[#allocation124_spill] sm:$0xff] }
 0x934   : > { %v3846_v13 = vsel %vm17752_vm1, %v18574_v41, %v10170_v33  ;;  %v3923_v4 = vsel %vm18575_vm13, %v10185_v36, %v10186_v19  ;;  %v10190_v46 = vunpack.i.l.bf16 %v10189_v56  ;;  %8621 = vmatpush1.bf16.msra.mxu0 %v8620_v58  ;;  %8731 = vmatprep.subr.bf16.mxu1 %v8730_v8  ;;  %vm18577_vm12 = vmmov %vm18575_vm13  ;;  %v10196_v59 = vunpack.i.h.bf16 %v10194_v20  ;;  %v18583_v19 = vld [vmem:[#allocation114_spill] sm:$0xff] }
 0x935   : > { %v3921_v11 = vsel %vm18577_vm12, %v10180_v38, %v10181_v5  ;;  %v10195_v33 = vunpack.i.l.bf16 %v10194_v20  ;;  %8623 = vmatprep.subr.bf16.mxu0 %v8622_v23  ;;  %v18579_v61 = vpack.i.bf16 %v18578_v39, %v18578_v39  ;;  %v8732_v44 = vpack.c.bf16 %v3848_v15, %v14732_v40  ;;  %vm18582_vm15 = vmmov %vm18577_vm12  ;;  %v18590_v56 = vld [vmem:[#allocation126_spill] sm:$0xff] }
 0x936   : > { %v15005_v3 = vsel %vm18580_vm14, %v10016_v6, %v10020_v32  ;;  %v10026_v54 = vunpack.i.h.bf16 %v18581_v45  ;;  %v3922_v25 = vsel %vm18582_vm15, %v10181_v5, %v10185_v36  ;;  %v18584_v9 = vpack.i.bf16 %v18583_v19, %v18583_v19  ;;  %vm18587_vm9 = vmmov %vm18577_vm12  ;;  %v10204_v32 = vpop.permute.xlu0 %10203  ;;  %v18588_v5 = vld [vmem:[#allocation158_spill] sm:$0xff]  ;;  %v10199_v58 = vpop.permute.xlu1 %10198 }
 0x937   : > { %10483 = vrot.lane.b32.xlu0 %v18579_v61, %s11403_s27  ;;  %v8624_v16 = vpack.c.bf16 %v3846_v13, %v18585_v30  ;;  %v8734_v0 = vpack.c.bf16 %v3923_v4, %v14767_v62  ;;  %v10025_v63 = vunpack.i.l.bf16 %v18581_v45  ;;  %v18586_v40 = vunpack.i.h.bf16 %v14190_v52  ;;  %8733 = vmatpush1.bf16.msra.mxu1 %v8732_v44 }
 0x938   : > { %10478 = vrot.lane.b32.xlu1 %v18584_v9, %s11401_s14  ;;  %v8626_v15 = vpack.c.bf16 %v3921_v11, %v14761_v28  ;;  %v3997_v36 = vsel %vm1396_vm10, %v10195_v33, %v10196_v59  ;;  %v10036_v12 = vunpack.i.h.bf16 %v18588_v5  ;;  %v10206_v42 = vunpack.i.h.bf16 %v10204_v32  ;;  %v18598_v9 = vld [vmem:[#allocation165_spill] sm:$0xff] }
 0x939   : > { %v3920_v6 = vsel %vm18587_vm9, %v18586_v40, %v10180_v38  ;;  %v10205_v31 = vunpack.i.l.bf16 %v10204_v32  ;;  %8625 = vmatpush1.bf16.msra.mxu0 %v8624_v16  ;;  %8735 = vmatprep.subr.bf16.mxu1 %v8734_v0  ;;  %v3995_v62 = vsel %vm1396_vm10, %v10190_v46, %v10191_v49  ;;  %v10035_v8 = vunpack.i.l.bf16 %v18588_v5  ;;  %v18600_v0 = vld [vmem:[#allocation129_spill] sm:$0xff] }
 0x93a   : > { %v10201_v52 = vunpack.i.h.bf16 %v10199_v58  ;;  %v10200_v41 = vunpack.i.l.bf16 %v10199_v58  ;;  %8627 = vmatprep.subr.bf16.mxu0 %v8626_v15  ;;  %v8736_v38 = vpack.c.bf16 %v3922_v25, %v14744_v10  ;;  %vm18589_vm13 = vcmask 990208   ;;  %v10209_v39 = vpop.permute.xlu0 %10208 }
 0x93b   : > { %v15028_v28 = vsel %vm18589_vm13, %v10030_v35, %v10031_v2  ;;  %v3996_v13 = vsel %vm1396_vm10, %v10191_v49, %v10195_v33  ;;  %v8628_v23 = vpack.c.bf16 %v3920_v6, %v18590_v56  ;;  %v8738_v4 = vpack.c.bf16 %v3997_v36, %v14785_v29  ;;  %vm18591_vm0 = vmmov %vm18589_vm13  ;;  %v10214_v49 = vpop.permute.xlu1 %10213  ;;  %v18604_v36 = vld [vmem:[#allocation175_spill] sm:$0xff] }
 0x93c   : > { %v15034_v20 = vsel %vm18591_vm0, %v10025_v63, %v10026_v54  ;;  %v18592_v11 = vunpack.i.h.bf16 %v14195_v26  ;;  %8737 = vmatpush1.bf16.msra.mxu1 %v8736_v38  ;;  %v8630_v10 = vpack.c.bf16 %v3995_v62, %v14775_v24  ;;  %vm18593_vm12 = vcmask 64512   ;;  %vm18595_vm15 = vmmov %vm18591_vm0  ;;  %v18597_v24 = vld [vmem:[#allocation134_spill] sm:$0xff]  ;;  %v18606_v62 = vld [vmem:[#allocation167_spill] sm:$0xff] }
 0x93d   : > { %v4071_v61 = vsel %vm18593_vm12, %v10205_v31, %v10206_v42  ;;  %v10211_v44 = vunpack.i.h.bf16 %v10209_v39  ;;  %v10210_v45 = vunpack.i.l.bf16 %v10209_v39  ;;  %8629 = vmatpush1.bf16.msra.mxu0 %v8628_v23  ;;  %8739 = vmatprep.subr.bf16.mxu1 %v8738_v4  ;;  %vm18594_vm14 = vmmov %vm18593_vm12  ;;  %v15043_v33 = vsel %vm18595_vm15, %v10026_v54, %v10030_v35  ;;  %v18601_v54 = vld [vmem:[#allocation139_spill] sm:$0xff]  ;;  %v18611_v39 = vld [vmem:[#allocation104_spill] sm:$0xff] }
 0x93e   : > { %v3994_v59 = vsel %vm1396_vm10, %v18592_v11, %v10190_v46  ;;  %v4069_v29 = vsel %vm18594_vm14, %v10200_v41, %v10201_v52  ;;  %vm18596_vm9 = vcmask 982016   ;;  %v10216_v46 = vunpack.i.h.bf16 %v10214_v49  ;;  %8631 = vmatprep.subr.bf16.mxu0 %v8630_v10  ;;  %vm18599_vm13 = vmmov %vm18593_vm12  ;;  %v10224_v15 = vpop.permute.xlu0 %10223 }
 0x93f   : > { %v15048_v26 = vsel %vm18596_vm9, %v10035_v8, %v10036_v12  ;;  %v10215_v25 = vunpack.i.l.bf16 %v10214_v49  ;;  %v8740_v19 = vpack.c.bf16 %v3996_v13, %v18597_v24  ;;  %v10041_v30 = vunpack.i.h.bf16 %v18598_v9  ;;  %vm18603_vm0 = vmmov %vm18593_vm12 }
 0x940   : > { %v4070_v16 = vsel %vm18599_vm13, %v10201_v52, %v10205_v31  ;;  %v8632_v63 = vpack.c.bf16 %v3994_v59, %v18600_v0  ;;  %v8742_v40 = vpack.c.bf16 %v4071_v61, %v14823_v27  ;;  %v10040_v35 = vunpack.i.l.bf16 %v18598_v9  ;;  %v10219_v52 = vpop.permute.xlu1 %10218 }
 0x941   : > { %v18602_v6 = vunpack.i.h.bf16 %v18601_v54  ;;  %8741 = vmatpush1.bf16.msra.mxu1 %v8740_v19  ;;  %v8634_v42 = vpack.c.bf16 %v4069_v29, %v18604_v36  ;;  %vm18605_vm12 = vcmask 56320   ;;  %v10051_v8 = vunpack.i.h.bf16 %v18606_v62  ;;  %v18613_v29 = vld [vmem:[#allocation166_spill] sm:$0xff] }
 0x942   : > { %v4145_v58 = vsel %vm18605_vm12, %v10215_v25, %v10216_v46  ;;  %v10226_v38 = vunpack.i.h.bf16 %v10224_v15  ;;  %v10225_v31 = vunpack.i.l.bf16 %v10224_v15  ;;  %8633 = vmatpush1.bf16.msra.mxu0 %v8632_v63  ;;  %8743 = vmatprep.subr.bf16.mxu1 %v8742_v40  ;;  %vm18607_vm14 = vmmov %vm18605_vm12  ;;  %v10050_v13 = vunpack.i.l.bf16 %v18606_v62  ;;  %v10229_v24 = vpop.permute.xlu0 %10228 }
 0x943   : > { %v4068_v32 = vsel %vm18603_vm0, %v18602_v6, %v10200_v41  ;;  %v4143_v27 = vsel %vm18607_vm14, %v10210_v45, %v10211_v44  ;;  %v10221_v56 = vunpack.i.h.bf16 %v10219_v52  ;;  %v10220_v23 = vunpack.i.l.bf16 %v10219_v52  ;;  %8635 = vmatprep.subr.bf16.mxu0 %v8634_v42  ;;  %v18608_v41 = vld [vmem:[#allocation176_spill] sm:$0xff]  ;;  %vm18609_vm15 = vmmov %vm18605_vm12 }
 0x944   : > { %v8744_v4 = vpack.c.bf16 %v4070_v16, %v18608_v41  ;;  %v4142_v11 = vsel %vm18609_vm15, %v10001_v47, %v10210_v45  ;;  %vm18610_vm9 = vmmov %vm18605_vm12  ;;  %v8636_v10 = vpack.c.bf16 %v4068_v32, %v18611_v39  ;;  %v8746_v61 = vpack.c.bf16 %v4145_v58, %v14911_v37  ;;  %v10234_v37 = vpop.permute.xlu1 %10233 }
 0x945   : > { %v4144_v59 = vsel %vm18610_vm9, %v10211_v44, %v10215_v25  ;;  %vm18612_vm13 = vcmask 982016   ;;  %v10046_v46 = vunpack.i.h.bf16 %v18613_v29  ;;  %v8638_v19 = vpack.c.bf16 %v4143_v27, %v14891_v43  ;;  %v18615_v44 = vld [vmem:[#allocation170_spill] sm:$0xff]  ;;  %v18618_v43 = vld [vmem:[#allocation128_spill] sm:$0xff] }
 0x946   : > { %v15074_v49 = vsel %vm18612_vm13, %v10040_v35, %v10041_v30  ;;  %8745 = vmatpush1.bf16.msra.mxu1 %v8744_v4  ;;  %vm18614_vm0 = vcmask 7168   ;;  %v10045_v47 = vunpack.i.l.bf16 %v18613_v29  ;;  %v10056_v45 = vunpack.i.h.bf16 %v18615_v44  ;;  %8637 = vmatpush1.bf16.msra.mxu0 %v8636_v10  ;;  %vm18619_vm15 = vmmov %vm18612_vm13  ;;  %v10244_v52 = vpop.permute.xlu0 %10243  ;;  %v18625_v27 = vld [vmem:[#allocation130_spill] sm:$0xff] }
 0x947   : > { %v4219_v17 = vsel %vm18614_vm0, %v10225_v31, %v10226_v38  ;;  %v10055_v25 = vunpack.i.l.bf16 %v18615_v44  ;;  %8747 = vmatprep.subr.bf16.mxu1 %v8746_v61  ;;  %vm18616_vm12 = vmmov %vm18614_vm0  ;;  %vm18617_vm14 = vcmask 973824   ;;  %8639 = vmatprep.subr.bf16.mxu0 %v8638_v19  ;;  %v8640_v63 = vpack.c.bf16 %v4142_v11, %v18618_v43  ;;  %v18631_v43 = vld [vmem:[#allocation119_spill] sm:$0xff] }
 0x948   : > { %v4217_v16 = vsel %vm18616_vm12, %v10220_v23, %v10221_v56  ;;  %v15086_v0 = vsel %vm18617_vm14, %v10050_v13, %v10051_v8  ;;  %v8748_v40 = vpack.c.bf16 %v4144_v59, %v14864_v7  ;;  %v15093_v54 = vsel %vm18619_vm15, %v10036_v12, %v10040_v35  ;;  %vm18620_vm9 = vmmov %vm18614_vm0  ;;  %v18623_v12 = vld [vmem:[#allocation123_spill] sm:$0xff] }
 0x949   : > { %v4218_v6 = vsel %vm18620_vm9, %v10221_v56, %v10225_v31  ;;  %vm18621_vm13 = vmmov %vm18614_vm0  ;;  %v10231_v15 = vunpack.i.h.bf16 %v10229_v24  ;;  %v8750_v36 = vpack.c.bf16 %v4219_v17, %v14961_v21  ;;  %v10230_v42 = vunpack.i.l.bf16 %v10229_v24  ;;  %v10239_v31 = vpop.permute.xlu1 %10238  ;;  %v18626_v56 = vld [vmem:[#allocation131_spill] sm:$0xff] }
 0x94a   : > { %v4216_v32 = vsel %vm18621_vm13, %v10011_v60, %v10220_v23  ;;  %v10236_v58 = vunpack.i.h.bf16 %v10234_v37  ;;  %v10235_v38 = vunpack.i.l.bf16 %v10234_v37  ;;  %8749 = vmatpush1.bf16.msra.mxu1 %v8748_v40  ;;  %v8642_v7 = vpack.c.bf16 %v4217_v16, %v14927_v55  ;;  %vm18622_vm0 = vmmov %vm18617_vm14  ;;  %8641 = vmatpush1.bf16.msra.mxu0 %v8640_v63  ;;  %v15119_v29 = vpop.permute.xlu0 %10248  ;;  %v18630_v17 = vld [vmem:[#allocation127_spill] sm:$0xff]  ;;  %v18632_v63 = vld [vmem:[#allocation101_spill] sm:$0xff] }
 0x94b   : > { %v15102_v5 = vsel %vm18622_vm0, %v10045_v47, %v10046_v46  ;;  %v10060_v35 = vunpack.i.l.bf16 %v18623_v12  ;;  %8751 = vmatprep.subr.bf16.mxu1 %v8750_v36  ;;  %vm18624_vm12 = vmmov %vm18622_vm0  ;;  %v15111_v60 = vsel %vm463_vm7, %v10055_v25, %v10056_v45  ;;  %v10061_v21 = vunpack.i.h.bf16 %v18623_v12 }
 0x94c   : > { %v15106_v48 = vsel %vm18624_vm12, %v10046_v46, %v10050_v13  ;;  %v10085_v55 = vunpack.i.l.bf16 %v18625_v27  ;;  %8643 = vmatprep.subr.bf16.mxu0 %v8642_v7  ;;  %v8644_v23 = vpack.c.bf16 %v4216_v32, %v18626_v56  ;;  %v8752_v41 = vpack.c.bf16 %v4218_v6, %v14916_v14  ;;  %v18627_v13 = vld [vmem:[#allocation102_spill] sm:$0xff]  ;;  %v18634_v6 = vld [vmem:[#allocation132_spill] sm:$0xff] }
 0x94d   : > { %v10246_v4 = vunpack.i.h.bf16 %v10244_v52  ;;  %v10245_v11 = vunpack.i.l.bf16 %v10244_v52  ;;  %v10241_v59 = vunpack.i.h.bf16 %v10239_v31  ;;  %v10240_v39 = vunpack.i.l.bf16 %v10239_v31  ;;  %v10254_v16 = vpop.permute.xlu1 %10253  ;;  %v18638_v52 = vld [vmem:[#allocation100_spill] sm:$0xff] }
 0x94e   : > { %v10071_v10 = vunpack.i.h.bf16 %v18627_v13  ;;  %v10086_v61 = vunpack.i.h.bf16 %v18625_v27  ;;  %8753 = vmatpush1.bf16.msra.mxu1 %v8752_v41  ;;  %vm18628_vm14 = vcmask 1039360   ;;  %v15124_v19 = vsel %vm463_vm7, %v10056_v45, %v10060_v35  ;;  %8645 = vmatpush1.bf16.msra.mxu0 %v8644_v23  ;;  %v18637_v45 = vld [vmem:[#allocation117_spill] sm:$0xff] }
 0x94f   : > { %v4307_v46 = vsel %vm18628_vm14, %v10230_v42, %v10231_v15  ;;  %vm18629_vm15 = vmmov %vm18628_vm14  ;;  %v10070_v14 = vunpack.i.l.bf16 %v18627_v13  ;;  %v10066_v47 = vunpack.i.h.bf16 %v18630_v17  ;;  %v10065_v37 = vunpack.i.l.bf16 %v18630_v17 }
 0x950   : > { %v4309_v24 = vsel %vm18629_vm15, %v10235_v38, %v10236_v58  ;;  %v18633_v40 = vpack.c.bf16 %v18631_v43, %v18632_v63  ;;  %v10090_v32 = vunpack.i.l.bf16 %v18634_v6  ;;  %vm18635_vm9 = vmmov %vm18628_vm14  ;;  %v18639_v7 = vpack.c.bf16 %v18637_v45, %v18638_v52  ;;  %v18643_v43 = vld [vmem:[#allocation118_spill] sm:$0xff]  ;;  %v18644_v63 = vld [vmem:[#allocation99_spill] sm:$0xff] }
 0x951   : > { %v4306_v36 = vsel %vm18635_vm9, %v10086_v61, %v10230_v42  ;;  %vm18636_vm13 = vmmov %vm18635_vm9  ;;  %v8650_v31 = vpack.c.bf16 %v4307_v46, %v15005_v3  ;;  %vm18641_vm12 = vcmask 990208   ;;  %v10251_v41 = vunpack.i.h.bf16 %v15119_v29  ;;  %v10264_v61 = vpop.permute.xlu0 %10263  ;;  %v18648_v46 = vld [vmem:[#allocation98_spill] sm:$0xff] }
 0x952   : > { %8755 = vmatprep.subr.bf16.mxu1 %v18633_v40  ;;  %v4308_v58 = vsel %vm18636_vm13, %v10231_v15, %v10235_v38  ;;  %8647 = vmatprep.subr.bf16.mxu0 %v18639_v7  ;;  %vm18640_vm0 = vmmov %vm18635_vm9  ;;  %v4381_v56 = vsel %vm18641_vm12, %v10240_v39, %v10241_v59  ;;  %v10250_v42 = vunpack.i.l.bf16 %v15119_v29  ;;  %v10256_v15 = vunpack.i.h.bf16 %v10254_v16 }
 0x953   : > { %v4305_v12 = vsel %vm18640_vm0, %v10021_v57, %v10085_v55  ;;  %vm18642_vm14 = vmmov %vm18641_vm12  ;;  %v10255_v38 = vunpack.i.l.bf16 %v10254_v16  ;;  %v18645_v40 = vpack.c.bf16 %v18643_v43, %v18644_v63  ;;  %v10091_v50 = vunpack.i.h.bf16 %v18634_v6  ;;  %v18646_v57 = vld [vmem:[#allocation135_spill] sm:$0xff]  ;;  %v18647_v55 = vld [vmem:[#allocation116_spill] sm:$0xff] }
 0x954   : > { %v8758_v27 = vpack.c.bf16 %v4309_v24, %v4305_v12  ;;  %v4383_v23 = vsel %vm18642_vm14, %v10245_v11, %v10246_v4  ;;  %v10095_v3 = vunpack.i.l.bf16 %v18646_v57  ;;  %v18649_v24 = vpack.c.bf16 %v18647_v55, %v18648_v46  ;;  %v10259_v4 = vpop.permute.xlu1 %10258  ;;  %vm18650_vm15 = vmmov %vm18641_vm12  ;;  %v18660_v55 = vld [vmem:[#allocation137_spill] sm:$0xff] }
 0x955   : > { %8757 = vmatpush1.bf16.msra.mxu1 %v18645_v40  ;;  %v15155_v45 = vsel %vm463_vm7, %v10060_v35, %v10061_v21  ;;  %v15160_v29 = vsel %vm575_vm6, %v10070_v14, %v10071_v10  ;;  %v8652_v16 = vpack.c.bf16 %v4306_v36, %v14972_v1  ;;  %v8760_v6 = vpack.c.bf16 %v4308_v58, %v14996_v18  ;;  %vm18651_vm9 = vmmov %vm18641_vm12  ;;  %v10274_v58 = vpop.permute.xlu0 %10273 }
 0x956   : > { %8649 = vmatpush1.bf16.msra.mxu0 %v18649_v24  ;;  %8759 = vmatprep.subr.bf16.mxu1 %v8758_v27  ;;  %v4379_v52 = vsel %vm18650_vm15, %v10031_v2, %v10090_v32  ;;  %v15172_v35 = vsel %vm575_vm6, %v10065_v37, %v10066_v47  ;;  %v4382_v21 = vsel %vm18651_vm9, %v10241_v59, %v10245_v11  ;;  %vm18652_vm13 = vmmov %vm18651_vm9  ;;  %v10266_v36 = vunpack.i.h.bf16 %v10264_v61  ;;  %v18656_v11 = vld [vmem:[#allocation133_spill] sm:$0xff] }
 0x957   : > { %8651 = vmatprep.subr.bf16.mxu0 %v8650_v31  ;;  %v4380_v10 = vsel %vm18652_vm13, %v10091_v50, %v10240_v39  ;;  %v8654_v7 = vpack.c.bf16 %v4381_v56, %v15043_v33  ;;  %v8762_v1 = vpack.c.bf16 %v4383_v23, %v4379_v52  ;;  %v10265_v18 = vunpack.i.l.bf16 %v10264_v61 }
 0x958   : > { %vm18653_vm0 = vcmask 982016   ;;  %v10096_v32 = vunpack.i.h.bf16 %v18646_v57  ;;  %v10261_v12 = vunpack.i.h.bf16 %v10259_v4  ;;  %v10260_v31 = vunpack.i.l.bf16 %v10259_v4  ;;  %v10269_v27 = vpop.permute.xlu1 %10268  ;;  %v5204_v57 = vld [vmem:[#allocation10] sm:$0xff] }
 0x959   : > { %8761 = vmatpush1.bf16.msra.mxu1 %v8760_v6  ;;  %v4455_v51 = vsel %vm18653_vm0, %v10250_v42, %v10251_v41  ;;  %vm18654_vm12 = vmmov %vm18653_vm0  ;;  %v10101_v59 = vunpack.i.h.bf16 %v18656_v11  ;;  %v10100_v39 = vunpack.i.l.bf16 %v18656_v11  ;;  %v8656_v56 = vpack.c.bf16 %v4380_v10, %v15034_v20  ;;  %v5209_v10 = vld [vmem:[#allocation10 + $0x28] sm:$0xff] }
 0x95a   : > { %v4457_v2 = vsel %vm18654_vm12, %v10255_v38, %v10256_v15  ;;  %8653 = vmatpush1.bf16.msra.mxu0 %v8652_v16  ;;  %8763 = vmatprep.subr.bf16.mxu1 %v8762_v1  ;;  %vm18655_vm14 = vmmov %vm18653_vm0  ;;  %v8764_v23 = vpack.c.bf16 %v4382_v21, %v15028_v28  ;;  %v8658_v43 = vpack.c.bf16 %v4455_v51, %v15093_v54  ;;  %v10276_v40 = vunpack.i.h.bf16 %v10274_v58  ;;  %v5208_v51 = vld [vmem:[#allocation10 + $0x20] sm:$0xff] }
 0x95b   : > { %v4453_v33 = vsel %vm18655_vm14, %v10041_v30, %v10095_v3  ;;  %8655 = vmatprep.subr.bf16.mxu0 %v8654_v7  ;;  %vm18657_vm15 = vmmov %vm18653_vm0  ;;  %v10275_v9 = vunpack.i.l.bf16 %v10274_v58  ;;  %v10271_v50 = vunpack.i.h.bf16 %v10269_v27  ;;  %v15190_v30 = vpop.permute.xlu0 %10278  ;;  %vm18659_vm13 = vcmask 973824  }
 0x95c   : > { %v4454_v15 = vsel %vm18657_vm15, %v10096_v32, %v10250_v42  ;;  %vm18658_vm9 = vmmov %vm18653_vm0  ;;  %v8766_v63 = vpack.c.bf16 %v4457_v2, %v4453_v33  ;;  %v4531_v3 = vsel %vm18659_vm13, %v10265_v18, %v10266_v36  ;;  %v10106_v20 = vunpack.i.h.bf16 %v18660_v55  ;;  %v10289_v42 = vpop.permute.xlu1 %10288 }
 0x95d   : > { %v4456_v61 = vsel %vm18658_vm9, %v10251_v41, %v10255_v38  ;;  %8765 = vmatpush1.bf16.msra.mxu1 %v8764_v23  ;;  %v10105_v28 = vunpack.i.l.bf16 %v18660_v55  ;;  %v10270_v46 = vunpack.i.l.bf16 %v10269_v27  ;;  %vm18661_vm0 = vmmov %vm18659_vm13  ;;  %v10291_v41 = vunpack.i.h.bf16 %v10289_v42 }
 0x95e   : > { %8657 = vmatpush1.bf16.msra.mxu0 %v8656_v56  ;;  %8767 = vmatprep.subr.bf16.mxu1 %v8766_v63  ;;  %v4529_v54 = vsel %vm18661_vm0, %v10260_v31, %v10261_v12  ;;  %v10290_v38 = vunpack.i.l.bf16 %v10289_v42  ;;  %v8768_v24 = vpack.c.bf16 %v4456_v61, %v15074_v49  ;;  %vm18662_vm12 = vmmov %vm18661_vm0  ;;  %v8660_v52 = vpack.c.bf16 %v4454_v15, %v15048_v26 }
 0x95f   : > { %8659 = vmatprep.subr.bf16.mxu0 %v8658_v43  ;;  %v4527_v4 = vsel %vm18662_vm12, %v10051_v8, %v10100_v39  ;;  %vm18663_vm14 = vmmov %vm18661_vm0  ;;  %v4604_v7 = vsel %vm463_vm7, %v10271_v50, %v10275_v9  ;;  %v10284_v1 = vpop.permute.xlu0 %10283  ;;  %v8662_v49 = vpack.c.bf16 %v4529_v54, %v15106_v48  ;;  %v4605_v62 = vsel %vm463_vm7, %v10275_v9, %v10276_v40  ;;  %v5207_v39 = vld [vmem:[#allocation10 + $0x18] sm:$0xff] }
 0x960   : > { %v4530_v16 = vsel %vm18663_vm14, %v10261_v12, %v10265_v18  ;;  %vm18664_vm15 = vmmov %vm18661_vm0  ;;  %5653 = vmatmul.mubr.f32.vlgmr.msra.gmra.mrb[4].mxu1 %v5204_v57  ;;  %v8770_v21 = vpack.c.bf16 %v4531_v3, %v4527_v4  ;;  %v4602_v8 = vsel %vm463_vm7, %v10106_v20, %v10270_v46  ;;  %v10281_v36 = vunpack.i.h.bf16 %v15190_v30  ;;  %v15209_v26 = vpop.permute.xlu1 %10293 }
 0x961   : > { %v4528_v6 = vsel %vm18664_vm15, %v10101_v59, %v10260_v31  ;;  %5499 = vmatmul.mubr.f32.vlgmr.msra.gmra.mrb[4].mxu0 %v5204_v57  ;;  %8769 = vmatpush1.bf16.msra.mxu1 %v8768_v24  ;;  %v10280_v18 = vunpack.i.l.bf16 %v15190_v30  ;;  %v4603_v58 = vsel %vm463_vm7, %v10270_v46, %v10271_v50  ;;  %v4598_v2 = vsel %vm463_vm7, %v10105_v28, %v10055_v25 }
 0x962   : > { %8661 = vmatpush1.bf16.msra.mxu0 %v8660_v52  ;;  %8771 = vmatprep.subr.bf16.mxu1 %v8770_v21  ;;  %v8772_v48 = vpack.c.bf16 %v4530_v16, %v15086_v0  ;;  %v4679_v32 = vsel %vm575_vm6, %v10290_v38, %v10291_v41  ;;  %v10286_v12 = vunpack.i.h.bf16 %v10284_v1  ;;  %v10285_v31 = vunpack.i.l.bf16 %v10284_v1 }
 0x963   : > { %8663 = vmatprep.subr.bf16.mxu0 %v8662_v49  ;;  %5504 = vmatprep.mubr.f32.mxu0 %v5209_v10  ;;  %v8664_v27 = vpack.c.bf16 %v4528_v6, %v15102_v5  ;;  %v8774_v33 = vpack.c.bf16 %v4605_v62, %v15155_v45  ;;  %v10299_v11 = vpop.permute.xlu0 %10298  ;;  %v8666_v59 = vpack.c.bf16 %v4603_v58, %v15111_v60  ;;  %v10296_v45 = vunpack.i.h.bf16 %v15209_v26 }
 0x964   : > { %5658 = vmatprep.mubr.f32.mxu1 %v5209_v10  ;;  %v8668_v44 = vpack.c.bf16 %v4602_v8, %v4598_v2  ;;  %v8776_v25 = vpack.c.bf16 %v4604_v7, %v15124_v19  ;;  %v4678_v0 = vsel %vm575_vm6, %v10281_v36, %v10290_v38  ;;  %v10304_v56 = vpop.permute.xlu1 %10303  ;;  %v4677_v23 = vsel %vm575_vm6, %v10280_v18, %v10281_v36 }
 0x965   : > { %8773 = vmatpush1.bf16.msra.mxu1 %v8772_v48  ;;  %5505 = vmatmul.mubr.f32.gmra.mrb[6].mxu0 %v5208_v51  ;;  %v8778_v5 = vpack.c.bf16 %v4679_v32, %v15160_v29  ;;  %v10295_v15 = vunpack.i.l.bf16 %v15209_v26  ;;  %v10306_v61 = vunpack.i.h.bf16 %v10304_v56  ;;  %v10305_v60 = vunpack.i.l.bf16 %v10304_v56 }
 0x966   : > { %8665 = vmatpush1.bf16.msra.mxu0 %v8664_v27  ;;  %8775 = vmatprep.subr.bf16.mxu1 %v8774_v33  ;;  %v4672_v19 = vsel %vm575_vm6, %v10285_v31, %v10065_v37  ;;  %v4676_v43 = vsel %vm575_vm6, %v10286_v12, %v10280_v18  ;;  %v10301_v63 = vunpack.i.h.bf16 %v10299_v11  ;;  %v10300_v40 = vunpack.i.l.bf16 %v10299_v11 }
 0x967   : > { %8667 = vmatprep.subr.bf16.mxu0 %v8666_v59  ;;  %5659 = vmatmul.mubr.f32.gmra.mrb[6].mxu1 %v5208_v51  ;;  %v10309_v29 = vpop.permute.xlu0 %10308  ;;  %v8670_v9 = vpack.c.bf16 %v4677_v23, %v15172_v35  ;;  %v4674_v50 = vsel %vm575_vm6, %v10066_v47, %v10070_v14  ;;  %v4751_v3 = vsel %vm687_vm5, %v10305_v60, %v10306_v61  ;;  %vm18665_vm9 = vcmask 449536  }
 0x968   : > { %8365 = vmatprep.mubr.msk.f32.mxu0 %vm2953_vm11, %v5207_v39  ;;  %8367 = vmatprep.mubr.msk.f32.mxu1 %vm2953_vm11, %v5207_v39  ;;  %v10311_v30 = vunpack.i.h.bf16 %v10309_v29  ;;  %v10310_v37 = vunpack.i.l.bf16 %v10309_v29  ;;  %v10314_v57 = vpop.permute.xlu1 %10313  ;;  %v8672_v28 = vpack.c.bf16 %v4676_v43, %v4672_v19  ;;  %v8780_v46 = vpack.c.bf16 %v4678_v0, %v4674_v50  ;;  %vm18666_vm13 = vmmov %vm18665_vm9 }
 0x969   : > { %8777 = vmatpush1.bf16.msra.mxu1 %v8776_v25  ;;  %v10316_v55 = vunpack.i.h.bf16 %v10314_v57  ;;  %v10315_v20 = vunpack.i.l.bf16 %v10314_v57  ;;  %v4747_v13 = vsel %vm687_vm5, %v10295_v15, %v10296_v45  ;;  %v4749_v17 = vsel %vm687_vm5, %v10300_v40, %v10301_v63  ;;  %vm18667_vm0 = vmmov %vm18665_vm9 }
 0x96a   : > { %8669 = vmatpush1.bf16.msra.mxu0 %v8668_v44  ;;  %8779 = vmatprep.subr.bf16.mxu1 %v8778_v5  ;;  %v4752_v35 = vsel %vm687_vm5, %v10306_v61, %v10310_v37  ;;  %v4753_v14 = vsel %vm687_vm5, %v10310_v37, %v10311_v30  ;;  %v8674_v41 = vpack.c.bf16 %v4751_v3, %v4747_v13  ;;  %vm18668_vm12 = vmmov %vm18667_vm0 }
 0x96b   : > { %8671 = vmatprep.subr.bf16.mxu0 %v8670_v9  ;;  %v4746_v47 = vsel %vm687_vm5, %v10315_v20, %v10295_v15  ;;  %v4750_v42 = vsel %vm687_vm5, %v10316_v55, %v10305_v60  ;;  %v10319_v54 = vpop.permute.xlu0 %10318  ;;  %v8782_v38 = vpack.c.bf16 %v4753_v14, %v4749_v17  ;;  %v4748_v24 = vsel %vm687_vm5, %v10296_v45, %v10300_v40  ;;  %vm18669_vm14 = vmmov %vm18667_vm0 }
 0x96c   : > { %v10324_v4 = vpop.permute.xlu1 %10323  ;;  %v8676_v16 = vpack.c.bf16 %v4750_v42, %v4746_v47  ;;  %v8784_v6 = vpack.c.bf16 %v4752_v35, %v4748_v24  ;;  %v10321_v52 = vunpack.i.h.bf16 %v10319_v54  ;;  %v10320_v21 = vunpack.i.l.bf16 %v10319_v54  ;;  %vm18670_vm15 = vmmov %vm18667_vm0 }
 0x96d   : > { %8781 = vmatpush1.bf16.msra.mxu1 %v8780_v46  ;;  %v10325_v10 = vunpack.i.l.bf16 %v10324_v4  ;;  %v10326_v7 = vunpack.i.h.bf16 %v10324_v4 }
 0x96e   : > { %8673 = vmatpush1.bf16.msra.mxu0 %v8672_v28  ;;  %8783 = vmatprep.subr.bf16.mxu1 %v8782_v38  ;;  %v4821_v58 = vsel %vm799_vm4, %v10320_v21, %v10321_v52 }
 0x96f   : > { %8675 = vmatprep.subr.bf16.mxu0 %v8674_v41  ;;  %v10329_v1 = vpop.permute.xlu0 %10328  ;;  %v4822_v26 = vsel %vm799_vm4, %v10321_v52, %v10325_v10  ;;  %v4823_v12 = vsel %vm799_vm4, %v10325_v10, %v10326_v7 }
 0x970   : > { %v10331_v49 = vunpack.i.h.bf16 %v10329_v1  ;;  %v10330_v62 = vunpack.i.l.bf16 %v10329_v1  ;;  %v10334_v8 = vpop.permute.xlu1 %10333 }
 0x971   : > { %8785 = vmatpush1.bf16.msra.mxu1 %v8784_v6  ;;  %v10336_v36 = vunpack.i.h.bf16 %v10334_v8  ;;  %v10335_v18 = vunpack.i.l.bf16 %v10334_v8 }
 0x972   : > { %8677 = vmatpush1.bf16.msra.mxu0 %v8676_v16  ;;  %v4825_v51 = vsel %vm799_vm4, %v10330_v62, %v10331_v49 }
 0x973   : > { %v4826_v2 = vsel %vm799_vm4, %v10331_v49, %v10335_v18  ;;  %v10339_v48 = vpop.permute.xlu0 %10338  ;;  %v8678_v32 = vpack.c.bf16 %v4825_v51, %v4821_v58  ;;  %v4827_v31 = vsel %vm799_vm4, %v10335_v18, %v10336_v36 }
 0x974   : > { %v10341_v27 = vunpack.i.h.bf16 %v10339_v48  ;;  %v10340_v33 = vunpack.i.l.bf16 %v10339_v48  ;;  %v10344_v11 = vpop.permute.xlu1 %10343  ;;  %v8786_v59 = vpack.c.bf16 %v4827_v31, %v4823_v12  ;;  %v8788_v44 = vpack.c.bf16 %v4826_v2, %v4822_v26 }
 0x975   : > { %8679 = vmatprep.subr.bf16.mxu0 %v8678_v32  ;;  %v10346_v0 = vunpack.i.h.bf16 %v10344_v11  ;;  %v10345_v56 = vunpack.i.l.bf16 %v10344_v11 }
 0x976   : > { %v4820_v25 = vsel %vm799_vm4, %v10340_v33, %v10320_v21  ;;  %v4824_v39 = vsel %vm799_vm4, %v10341_v27, %v10330_v62  ;;  %8787 = vmatprep.subr.bf16.mxu1 %v8786_v59 }
 0x977   : > { %v10349_v23 = vpop.permute.xlu0 %10348  ;;  %8789 = vmatpush1.bf16.msra.mxu1 %v8788_v44  ;;  %v8680_v5 = vpack.c.bf16 %v4824_v39, %v4820_v25  ;;  %v4885_v63 = vsel %vm864_vm8, %v10345_v56, %v10346_v0 }
 0x978   : > { %v10354_v45 = vpop.permute.xlu1 %10353  ;;  %v10351_v60 = vunpack.i.h.bf16 %v10349_v23  ;;  %v10350_v19 = vunpack.i.l.bf16 %v10349_v23 }
 0x979   : > { %v10356_v15 = vunpack.i.h.bf16 %v10354_v45  ;;  %v10355_v61 = vunpack.i.l.bf16 %v10354_v45  ;;  %8681 = vmatpush1.bf16.msra.mxu0 %v8680_v5 }
 0x97a   : > { %v4886_v3 = vsel %vm864_vm8, %v10346_v0, %v10350_v19  ;;  %v4887_v20 = vsel %vm864_vm8, %v10350_v19, %v10351_v60 }
 0x97b   : > { %v10359_v43 = vpop.permute.xlu0 %10358  ;;  %v4889_v40 = vsel %vm864_vm8, %v10355_v61, %v10356_v15 }
 0x97c   : > { %v10361_v29 = vunpack.i.h.bf16 %v10359_v43  ;;  %v10360_v9 = vunpack.i.l.bf16 %v10359_v43  ;;  %v10364_v50 = vpop.permute.xlu1 %10363  ;;  %v8682_v30 = vpack.c.bf16 %v4889_v40, %v4885_v63 }
 0x97d   : > { %v10366_v37 = vunpack.i.h.bf16 %v10364_v50  ;;  %v10365_v57 = vunpack.i.l.bf16 %v10364_v50 }
 0x97e   : > { %v4890_v55 = vsel %vm864_vm8, %v10356_v15, %v10360_v9  ;;  %8683 = vmatprep.subr.bf16.mxu0 %v8682_v30  ;;  %v4891_v28 = vsel %vm864_vm8, %v10360_v9, %v10361_v29 }
 0x97f   : > { %v4884_v46 = vsel %vm864_vm8, %v10365_v57, %v10345_v56  ;;  %v4888_v35 = vsel %vm864_vm8, %v10366_v37, %v10355_v61  ;;  %v10369_v13 = vpop.permute.xlu0 %10368  ;;  %v8790_v17 = vpack.c.bf16 %v4891_v28, %v4887_v20  ;;  %v8792_v14 = vpack.c.bf16 %v4890_v55, %v4886_v3 }
 0x980   : > { %v10374_v47 = vpop.permute.xlu1 %10373  ;;  %v8684_v42 = vpack.c.bf16 %v4888_v35, %v4884_v46  ;;  %v10371_v54 = vunpack.i.h.bf16 %v10369_v13  ;;  %v10370_v41 = vunpack.i.l.bf16 %v10369_v13 }
 0x981   : > { %8791 = vmatprep.subr.bf16.mxu1 %v8790_v17  ;;  %v10375_v38 = vunpack.i.l.bf16 %v10374_v47  ;;  %v10376_v24 = vunpack.i.h.bf16 %v10374_v47 }
 0x982   : > { %8685 = vmatpush1.bf16.msra.mxu0 %v8684_v42  ;;  %8793 = vmatpush1.bf16.msra.mxu1 %v8792_v14  ;;  %v4959_v1 = vsel %vm750_vm3, %v10370_v41, %v10371_v54 }
 0x983   : > { %v10379_v4 = vpop.permute.xlu0 %10378  ;;  %v4960_v7 = vsel %vm750_vm3, %v10371_v54, %v10375_v38  ;;  %v4961_v18 = vsel %vm750_vm3, %v10375_v38, %v10376_v24 }
 0x984   : > { %v10381_v16 = vunpack.i.h.bf16 %v10379_v4  ;;  %v10380_v6 = vunpack.i.l.bf16 %v10379_v4  ;;  %v10384_v52 = vpop.permute.xlu1 %10383 }
 0x985   : > { %v10386_v21 = vunpack.i.h.bf16 %v10384_v52  ;;  %v10385_v10 = vunpack.i.l.bf16 %v10384_v52 }
 0x986   : > { %v4963_v49 = vsel %vm750_vm3, %v10380_v6, %v10381_v16 }
 0x987   : > { %v4964_v62 = vsel %vm750_vm3, %v10381_v16, %v10385_v10  ;;  %v10389_v8 = vpop.permute.xlu0 %10388  ;;  %v8686_v36 = vpack.c.bf16 %v4963_v49, %v4959_v1  ;;  %v4965_v26 = vsel %vm750_vm3, %v10385_v10, %v10386_v21 }
 0x988   : > { %v10391_v58 = vunpack.i.h.bf16 %v10389_v8  ;;  %v10390_v51 = vunpack.i.l.bf16 %v10389_v8  ;;  %v10394_v2 = vpop.permute.xlu1 %10393  ;;  %v8794_v48 = vpack.c.bf16 %v4965_v26, %v4961_v18  ;;  %v8796_v32 = vpack.c.bf16 %v4964_v62, %v4960_v7 }
 0x989   : > { %8687 = vmatprep.subr.bf16.mxu0 %v8686_v36  ;;  %v10396_v27 = vunpack.i.h.bf16 %v10394_v2  ;;  %v10395_v33 = vunpack.i.l.bf16 %v10394_v2 }
 0x98a   : > { %v4958_v12 = vsel %vm750_vm3, %v10390_v51, %v10370_v41  ;;  %v4962_v31 = vsel %vm750_vm3, %v10391_v58, %v10380_v6  ;;  %8795 = vmatprep.subr.bf16.mxu1 %v8794_v48 }
 0x98b   : > { %v10399_v11 = vpop.permute.xlu0 %10398  ;;  %8797 = vmatpush1.bf16.msra.mxu1 %v8796_v32  ;;  %v8688_v59 = vpack.c.bf16 %v4962_v31, %v4958_v12  ;;  %v5033_v5 = vsel %vm638_vm2, %v10395_v33, %v10396_v27 }
 0x98c   : > { %v10404_v44 = vpop.permute.xlu1 %10403  ;;  %v10401_v0 = vunpack.i.h.bf16 %v10399_v11  ;;  %v10400_v56 = vunpack.i.l.bf16 %v10399_v11 }
 0x98d   : > { %v10406_v25 = vunpack.i.h.bf16 %v10404_v44  ;;  %v10405_v39 = vunpack.i.l.bf16 %v10404_v44  ;;  %8689 = vmatpush1.bf16.msra.mxu0 %v8688_v59 }
 0x98e   : > { %v5034_v40 = vsel %vm638_vm2, %v10396_v27, %v10400_v56  ;;  %v5035_v9 = vsel %vm638_vm2, %v10400_v56, %v10401_v0 }
 0x98f   : > { %v10409_v23 = vpop.permute.xlu0 %10408  ;;  %v5037_v45 = vsel %vm638_vm2, %v10405_v39, %v10406_v25 }
 0x990   : > { %v10411_v15 = vunpack.i.h.bf16 %v10409_v23  ;;  %v10410_v61 = vunpack.i.l.bf16 %v10409_v23  ;;  %v10414_v60 = vpop.permute.xlu1 %10413  ;;  %v8690_v19 = vpack.c.bf16 %v5037_v45, %v5033_v5 }
 0x991   : > { %v10416_v43 = vunpack.i.h.bf16 %v10414_v60  ;;  %v10415_v63 = vunpack.i.l.bf16 %v10414_v60 }
 0x992   : > { %v5038_v29 = vsel %vm638_vm2, %v10406_v25, %v10410_v61  ;;  %8691 = vmatprep.subr.bf16.mxu0 %v8690_v19  ;;  %v5039_v50 = vsel %vm638_vm2, %v10410_v61, %v10411_v15 }
 0x993   : > { %v5032_v30 = vsel %vm638_vm2, %v10415_v63, %v10395_v33  ;;  %v5036_v37 = vsel %vm638_vm2, %v10416_v43, %v10405_v39  ;;  %v10419_v57 = vpop.permute.xlu0 %10418  ;;  %v8798_v3 = vpack.c.bf16 %v5039_v50, %v5035_v9  ;;  %v8800_v55 = vpack.c.bf16 %v5038_v29, %v5034_v40  ;;  %v5206_v9 = vld [vmem:[#allocation10 + $0x10] sm:$0xff]  ;;  %v5211_v50 = vld [vmem:[#allocation10 + $0x38] sm:$0xff] }
 0x994   : > { %v10424_v20 = vpop.permute.xlu1 %10423  ;;  %v8692_v28 = vpack.c.bf16 %v5036_v37, %v5032_v30  ;;  %v10421_v46 = vunpack.i.h.bf16 %v10419_v57  ;;  %v10420_v35 = vunpack.i.l.bf16 %v10419_v57  ;;  %v5210_v30 = vld [vmem:[#allocation10 + $0x30] sm:$0xff] }
 0x995   : > { %8799 = vmatprep.subr.bf16.mxu1 %v8798_v3  ;;  %v10425_v13 = vunpack.i.l.bf16 %v10424_v20  ;;  %v10426_v17 = vunpack.i.h.bf16 %v10424_v20 }
 0x996   : > { %8693 = vmatpush1.bf16.msra.mxu0 %v8692_v28  ;;  %8801 = vmatpush1.bf16.msra.mxu1 %v8800_v55  ;;  %v5107_v4 = vsel %vm17752_vm1, %v10420_v35, %v10421_v46 }
 0x997   : > { %v10429_v14 = vpop.permute.xlu0 %10428  ;;  %v5108_v24 = vsel %vm17752_vm1, %v10421_v46, %v10425_v13  ;;  %v5109_v10 = vsel %vm17752_vm1, %v10425_v13, %v10426_v17  ;;  %v18677_v13 = vmov 0.0  }
 0x998   : > { %v10431_v47 = vunpack.i.h.bf16 %v10429_v14  ;;  %v10430_v42 = vunpack.i.l.bf16 %v10429_v14  ;;  %v10434_v54 = vpop.permute.xlu1 %10433 }
 0x999   : > { %v10436_v41 = vunpack.i.h.bf16 %v10434_v54  ;;  %v10435_v38 = vunpack.i.l.bf16 %v10434_v54 }
 0x99a   : > { %v5111_v16 = vsel %vm17752_vm1, %v10430_v42, %v10431_v47 }
 0x99b   : > { %v5112_v6 = vsel %vm17752_vm1, %v10431_v47, %v10435_v38  ;;  %v10439_v52 = vpop.permute.xlu0 %10438  ;;  %v8694_v21 = vpack.c.bf16 %v5111_v16, %v5107_v4  ;;  %v5113_v7 = vsel %vm17752_vm1, %v10435_v38, %v10436_v41  ;;  %v18679_v16 = vld [vmem:[#allocation48_spill] sm:$0xff] }
 0x99c   : > { %v10441_v1 = vunpack.i.h.bf16 %v10439_v52  ;;  %v10440_v49 = vunpack.i.l.bf16 %v10439_v52  ;;  %v10444_v62 = vpop.permute.xlu1 %10443  ;;  %v8802_v8 = vpack.c.bf16 %v5113_v7, %v5109_v10  ;;  %v8804_v36 = vpack.c.bf16 %v5112_v6, %v5108_v24  ;;  %v18678_v24 = vld [vmem:[#allocation57_spill] sm:$0xff]  ;;  %v18680_v52 = vld [vmem:[#allocation103_spill] sm:$0xff] }
 0x99d   : > { %8695 = vmatprep.subr.bf16.mxu0 %v8694_v21  ;;  %v10446_v58 = vunpack.i.h.bf16 %v10444_v62  ;;  %v10445_v51 = vunpack.i.l.bf16 %v10444_v62  ;;  %v18681_v10 = vld [vmem:[#allocation63_spill] sm:$0xff]  ;;  %v18683_v62 = vld [vmem:[#allocation58_spill] sm:$0xff] }
 0x99e   : > { %v5106_v18 = vsel %vm17752_vm1, %v10440_v49, %v10420_v35  ;;  %v5110_v26 = vsel %vm17752_vm1, %v10441_v1, %v10430_v42  ;;  %8803 = vmatprep.subr.bf16.mxu1 %v8802_v8  ;;  %vm18671_vm1 = vmmov %vm18667_vm0  ;;  %v18682_v1 = vld [vmem:[#allocation105_spill] sm:$0xff] }
 0x99f   : > { %v10449_v2 = vpop.permute.xlu0 %10448  ;;  %8805 = vmatpush1.bf16.msra.mxu1 %v8804_v36  ;;  %v8696_v48 = vpack.c.bf16 %v5110_v26, %v5106_v18  ;;  %v5181_v59 = vsel %vm18665_vm9, %v10445_v51, %v10446_v58  ;;  %vm18672_vm9 = vmmov %vm18667_vm0  ;;  %v18684_v36 = vld [vmem:[#allocation106_spill] sm:$0xff] }
 0x9a0   : > { %v10454_v32 = vpop.permute.xlu1 %10453  ;;  %v10451_v27 = vunpack.i.h.bf16 %v10449_v2  ;;  %v10450_v33 = vunpack.i.l.bf16 %v10449_v2  ;;  %v18685_v26 = vld [vmem:[#allocation66_spill] sm:$0xff] }
 0x9a1   : > { %v10456_v12 = vunpack.i.h.bf16 %v10454_v32  ;;  %v10455_v31 = vunpack.i.l.bf16 %v10454_v32  ;;  %8697 = vmatpush1.bf16.msra.mxu0 %v8696_v48  ;;  %v18687_v48 = vld [vmem:[#allocation67_spill] sm:$0xff] }
 0x9a2   : > { %v5182_v45 = vsel %vm18667_vm0, %v10446_v58, %v10450_v33  ;;  %v5183_v61 = vsel %vm18669_vm14, %v10450_v33, %v10451_v27  ;;  %v18689_v27 = vld [vmem:[#allocation72_spill] sm:$0xff]  ;;  %vm18915_vm0 = vcmask 7168   ;;  %vm18935_vm14 = vcmask 990208  }
 0x9a3   : > { %v10459_v11 = vpop.permute.xlu0 %10458  ;;  %v5185_v44 = vsel %vm18666_vm13, %v10455_v31, %v10456_v12  ;;  %vm18905_vm13 = vcmask 56320  }
 0x9a4   : > { %v10461_v25 = vunpack.i.h.bf16 %v10459_v11  ;;  %v10460_v39 = vunpack.i.l.bf16 %v10459_v11  ;;  %v10464_v0 = vpop.permute.xlu1 %10463  ;;  %v8698_v56 = vpack.c.bf16 %v5185_v44, %v5181_v59  ;;  %v18690_v11 = vld [vmem:[#allocation109_spill] sm:$0xff]  ;;  %v18691_v44 = vld [vmem:[#allocation74_spill] sm:$0xff] }
 0x9a5   : > { %v10466_v23 = vunpack.i.h.bf16 %v10464_v0  ;;  %v10465_v5 = vunpack.i.l.bf16 %v10464_v0 }
 0x9a6   : > { %v5186_v15 = vsel %vm18668_vm12, %v10456_v12, %v10460_v39  ;;  %8699 = vmatprep.subr.bf16.mxu0 %v8698_v56  ;;  %v5187_v60 = vsel %vm18670_vm15, %v10460_v39, %v10461_v25  ;;  %v18688_v12 = vld [vmem:[#allocation108_spill] sm:$0xff]  ;;  %v18692_v39 = vld [vmem:[#allocation110_spill] sm:$0xff]  ;;  %vm18926_vm12 = vcmask 1039360   ;;  %vm18943_vm15 = vcmask 982016  }
 0x9a7   : > { %v5180_v19 = vsel %vm18671_vm1, %v10465_v5, %v10445_v51  ;;  %v5184_v43 = vsel %vm18672_vm9, %v10466_v23, %v10455_v31  ;;  %v8806_v63 = vpack.c.bf16 %v5187_v60, %v5183_v61  ;;  %v8808_v40 = vpack.c.bf16 %v5186_v15, %v5182_v45  ;;  %v18686_v51 = vld [vmem:[#allocation107_spill] sm:$0xff]  ;;  %v18693_v56 = vld [vmem:[#allocation54_spill] sm:$0xff] }
 0x9a8   : > { %v8700_v29 = vpack.c.bf16 %v5184_v43, %v5180_v19  ;;  %v18694_v5 = vld [vmem:[#allocation51_spill] sm:$0xff]  ;;  %vm18895_vm1 = vcmask 64512   ;;  %vm18947_vm9 = vcmask 973824  }
 0x9a9   : > { %8807 = vmatprep.subr.bf16.mxu1 %v8806_v63  ;;  %v18695_v15 = vld [vmem:[#allocation111_spill] sm:$0xff]  ;;  %v18697_v63 = vld [vmem:[#allocation41_spill] sm:$0xff] }
 0x9aa   : > { %8701 = vmatpush1.bf16.msra.mxu0 %v8700_v29  ;;  %8809 = vmatpush1.bf16.msra.mxu1 %v8808_v40  ;;  %v18696_v60 = vld [vmem:[#allocation39_spill] sm:$0xff] }
 0x9ad   : > { %5576 = vmatmul.mubr.f32.vlgmr.msra.gmra.mrb[4].mxu0 %v5206_v9  ;;  %5730 = vmatmul.mubr.f32.vlgmr.msra.gmra.mrb[4].mxu1 %v5206_v9 }
 0x9ae   : > { %8366 = vmatprep.mubr.msk.f32.mxu0 %vm2953_vm11, %v5211_v50  ;;  %8368 = vmatprep.mubr.msk.f32.mxu1 %vm2953_vm11, %v5211_v50  ;;  %v18699_v50 = vld [vmem:[#allocation52_spill] sm:$0xff] }
 0x9b1   : > { %5582 = vmatmul.mubr.f32.gmra.mrb[6].mxu0 %v5210_v30  ;;  %5736 = vmatmul.mubr.f32.gmra.mrb[6].mxu1 %v5210_v30 }
 0xa80   : > { %v5577_v37 = vpop.f32.mrb[4].mxu0  ;;  %v5731_v57 = vpop.f32.mrb[4].mxu1 }
 0xa81   : > { %v15296_v3 = vmax.f32 %v5577_v37, 0.0  ;;  %v15298_v55 = vmax.f32 %v5731_v57, 0.0  ;;  %v5579_v20 = vpop.f32.mrb[5].mxu0  ;;  %v5733_v28 = vpop.f32.mrb[5].mxu1  ;;  %v18700_v37 = vld [vmem:[#allocation53_spill] sm:$0xff] }
 0xa82   : > { %v15300_v46 = vmax.f32 %v5579_v20, 0.0  ;;  %v15302_v35 = vmax.f32 %v5733_v28, 0.0 }
 0xa83   : > { %18673 = vst [vmem:[#allocation178_spill] sm:$0xff] %v15296_v3  ;;  %18674 = vst [vmem:[#allocation177_spill] sm:$0xff] %v15298_v55  ;;  %v10487_v17 = vpack.i.bf16 %v15296_v3, %v18677_v13  ;;  %v5843_v4 = vmul.f32 %v15296_v3, %v18678_v24  ;;  %v5769_v6 = vmul.f32 %v15296_v3, %v18679_v16 }
 0xa84   : > { %18675 = vst [vmem:[#allocation138_spill] sm:$0xff] %v15300_v46  ;;  %18676 = vst [vmem:[#allocation144_spill] sm:$0xff] %v15302_v35  ;;  %v5583_v14 = vpop.f32.mrb[6].mxu0  ;;  %v5737_v47 = vpop.f32.mrb[6].mxu1  ;;  %v10492_v42 = vpack.i.bf16 %v15298_v55, %v15300_v46  ;;  %v10497_v38 = vpack.i.bf16 %v18677_v13, %v15302_v35  ;;  %v5991_v7 = vmul.f32 %v15296_v3, %v18681_v10 }
 0xa85   : > { %v5739_v54 = vpop.f32.mrb[7].mxu1  ;;  %10488 = vrot.lane.b32.xlu0 %v10487_v17, %s11391_s12  ;;  %v5585_v41 = vpop.f32.mrb[7].mxu0  ;;  %v10517_v21 = vpack.i.bf16 %v5843_v4, %v18680_v52  ;;  %v10512_v49 = vpack.i.bf16 %v5769_v6, %v18682_v1  ;;  %v5917_v8 = vmul.f32 %v15296_v3, %v18683_v62  ;;  %v6129_v58 = vmul.f32 %v15296_v3, %v18685_v26  ;;  %v18702_v17 = vld [vmem:[#allocation62_spill] sm:$0xff] }
 0xa86   : > { %10493 = vrot.lane.b32.xlu1 %v10492_v42, %s11391_s12  ;;  %v10527_v18 = vpack.i.bf16 %v5991_v7, %v18684_v36  ;;  %v6203_v32 = vmul.f32 %v15296_v3, %v18687_v48  ;;  %v6277_v33 = vmul.f32 %v15296_v3, %v18689_v27  ;;  %v6351_v25 = vmul.f32 %v15296_v3, %v18691_v44 }
 0xa87   : > { %v10522_v2 = vpack.i.bf16 %v5917_v8, %v18686_v51  ;;  %v10532_v31 = vpack.i.bf16 %v6129_v58, %v18688_v12  ;;  %v5770_v23 = vmul.f32 %v15300_v46, %v18693_v56  ;;  %v5771_v45 = vmul.f32 %v15298_v55, %v18694_v5  ;;  %v18708_v8 = vld [vmem:[#allocation60_spill] sm:$0xff]  ;;  %v18709_v58 = vld [vmem:[#allocation61_spill] sm:$0xff] }
 0xa88   : > { %v10537_v59 = vpack.i.bf16 %v6203_v32, %v18690_v11  ;;  %v10542_v0 = vpack.i.bf16 %v6277_v33, %v18692_v39  ;;  %v10547_v61 = vpack.i.bf16 %v6351_v25, %v18695_v15  ;;  %v5772_v19 = vmul.f32 %v15302_v35, %v18696_v60  ;;  %v18710_v32 = vld [vmem:[#allocation47_spill] sm:$0xff]  ;;  %v18711_v25 = vld [vmem:[#allocation65_spill] sm:$0xff] }
 0xa89   : > { %10498 = vrot.lane.b32.xlu0 %v10497_v38, %s11391_s12  ;;  %v10552_v43 = vpack.i.bf16 %v5771_v45, %v5770_v23  ;;  %v5846_v40 = vmul.f32 %v15302_v35, %v18697_v63  ;;  %v15356_v29 = vmax.f32 %v5737_v47, 0.0  ;;  %v5844_v30 = vmul.f32 %v15300_v46, %v18699_v50  ;;  %v18712_v23 = vld [vmem:[#allocation64_spill] sm:$0xff] }
 0xa8a   : > { %10503 = vrot.lane.b32.xlu1 %v10492_v42, %s11391_s12  ;;  %v10557_v9 = vpack.i.bf16 %v18682_v1, %v5772_v19  ;;  %v5845_v57 = vmul.f32 %v15298_v55, %v18700_v37  ;;  %v15363_v20 = vmax.f32 %v5739_v54, 0.0  ;;  %v5918_v42 = vmul.f32 %v15300_v46, %v18702_v17  ;;  %v18707_v54 = vld [vmem:[#allocation45_spill] sm:$0xff] }
 0xa8b   : > { %18698 = vst [vmem:[#allocation147_spill] sm:$0xff] %v15356_v29  ;;  %v10567_v28 = vpack.i.bf16 %v18680_v52, %v5846_v40  ;;  %v15370_v47 = vmax.f32 %v5583_v14, 0.0  ;;  %v15372_v6 = vmax.f32 %v5585_v41, 0.0  ;;  %v5994_v52 = vmul.f32 %v15302_v35, %v18707_v54  ;;  %v18721_v14 = vld [vmem:[#allocation81_spill] sm:$0xff] }
 0xa8c   : > { %18701 = vst [vmem:[#allocation153_spill] sm:$0xff] %v15363_v20  ;;  %v10562_v1 = vpack.i.bf16 %v5845_v57, %v5844_v30  ;;  %v6131_v45 = vmul.f32 %v15298_v55, %v18712_v23  ;;  %v18716_v57 = vld [vmem:[#allocation56_spill] sm:$0xff]  ;;  %v15428_v22 = vmul.f32 %v15298_v55, %v18721_v14  ;;  %v15432_v15 = vmul.f32 %v15302_v35, %v18722_v34 }
 0xa8d   : > { %10508 = vrot.lane.b32.xlu0 %v10497_v38, %s11391_s12  ;;  %v18703_v38 = vld [vmem:[#allocation59_spill] sm:$0xff]  ;;  %18704 = vst [vmem:[#allocation171_spill] sm:$0xff] %v15370_v47  ;;  %18705 = vst [vmem:[#allocation152_spill] sm:$0xff] %v15372_v6  ;;  %v18724_v34 = vld [vmem:[#allocation80_spill] sm:$0xff] }
 0xa8e   : > { %10518 = vrot.lane.b32.xlu1 %v10517_v21, %s11394_s0  ;;  %v5919_v4 = vmul.f32 %v15298_v55, %v18703_v38  ;;  %v18706_v21 = vld [vmem:[#allocation43_spill] sm:$0xff] }
 0xa8f   : > { %v5920_v7 = vmul.f32 %v15302_v35, %v18706_v21 }
 0xa91   : > { %10513 = vrot.lane.b32.xlu0 %v10512_v49, %s11395_s9  ;;  %v10572_v49 = vpack.i.bf16 %v5919_v4, %v5918_v42  ;;  %v10577_v41 = vpack.i.bf16 %v18686_v51, %v5920_v7  ;;  %v18718_v4 = vld [vmem:[#allocation69_spill] sm:$0xff] }
 0xa92   : > { %10528 = vrot.lane.b32.xlu1 %v10527_v18, %s11392_s11  ;;  %v5992_v18 = vmul.f32 %v15300_v46, %v18708_v8  ;;  %v15414_v7 = vmul.f32 %v15298_v55, %v18718_v4 }
 0xa95   : > { %10523 = vrot.lane.b32.xlu0 %v10522_v2, %s11393_s8  ;;  %v5993_v2 = vmul.f32 %v15298_v55, %v18709_v58 }
 0xa96   : > { %10533 = vrot.lane.b32.xlu1 %v10532_v31, %s11390_s26  ;;  %v6132_v31 = vmul.f32 %v15302_v35, %v18710_v32 }
 0xa97   : > { %v10582_v33 = vpack.i.bf16 %v5993_v2, %v5992_v18  ;;  %v18723_v2 = vld [vmem:[#allocation78_spill] sm:$0xff] }
 0xa98   : > { %v10597_v13 = vpack.i.bf16 %v18688_v12, %v6132_v31  ;;  %v15448_v12 = vmul.f32 %v15300_v46, %v18724_v34  ;;  %v18725_v31 = vld [vmem:[#allocation82_spill] sm:$0xff] }
 0xa99   : > { %10538 = vrot.lane.b32.xlu0 %v10537_v59, %s11389_s17  ;;  %v10587_v59 = vpack.i.bf16 %v18684_v36, %v5994_v52  ;;  %v6280_v36 = vmul.f32 %v15302_v35, %v18716_v57  ;;  %v18719_v52 = vld [vmem:[#allocation75_spill] sm:$0xff] }
 0xa9a   : > { %10543 = vrot.lane.b32.xlu1 %v10542_v0, %s11388_s13  ;;  %v6130_v0 = vmul.f32 %v15300_v46, %v18711_v25 }
 0xa9c   : > { %v10592_v53 = vpack.i.bf16 %v6131_v45, %v6130_v0  ;;  %v15460_v0 = vmul.f32 %v15372_v6, %v18693_v56  ;;  %v15467_v45 = vmul.f32 %v15356_v29, %v18694_v5 }
 0xa9d   : > { %10548 = vrot.lane.b32.xlu0 %v10547_v61, %s18100_s2  ;;  %v18713_v61 = vld [vmem:[#allocation71_spill] sm:$0xff] }
 0xa9e   : > { %10553 = vrot.lane.b32.xlu1 %v10552_v43, %s11395_s9  ;;  %v6204_v19 = vmul.f32 %v15300_v46, %v18713_v61  ;;  %v18714_v43 = vld [vmem:[#allocation68_spill] sm:$0xff]  ;;  %18727 = vst [vmem:[#allocation180_spill] sm:$0xff] %v15460_v0  ;;  %18728 = vst [vmem:[#allocation179_spill] sm:$0xff] %v15467_v45  ;;  %v15518_v45 = vmul.f32 %v15356_v29, %v18709_v58  ;;  %v18752_v0 = vld [vmem:[#allocation75_spill] sm:$0xff] }
 0xa9f   : > { %v6205_v40 = vmul.f32 %v15298_v55, %v18714_v43 }
 0xaa0   : > { %18739 = vst [vmem:[#allocation159_spill] sm:$0xff] %v15518_v45  ;;  %v18748_v45 = vld [vmem:[#allocation86_spill] sm:$0xff] }
 0xaa1   : > { %10558 = vrot.lane.b32.xlu0 %v10557_v9, %s11395_s9  ;;  %v18715_v9 = vld [vmem:[#allocation49_spill] sm:$0xff]  ;;  %v10602_v44 = vpack.i.bf16 %v6205_v40, %v6204_v19  ;;  %v15475_v19 = vmul.f32 %v15356_v29, %v18700_v37  ;;  %v18731_v40 = vld [vmem:[#allocation84_spill] sm:$0xff] }
 0xaa2   : > { %10568 = vrot.lane.b32.xlu1 %v10567_v28, %s11394_s0  ;;  %v6206_v30 = vmul.f32 %v15302_v35, %v18715_v9  ;;  %v18717_v28 = vld [vmem:[#allocation70_spill] sm:$0xff] }
 0xaa3   : > { %v15410_v42 = vmul.f32 %v15300_v46, %v18717_v28  ;;  %18730 = vst [vmem:[#allocation154_spill] sm:$0xff] %v15475_v19  ;;  %v15527_v19 = vmul.f32 %v15363_v20, %v18707_v54 }
 0xaa5   : > { %10563 = vrot.lane.b32.xlu0 %v10562_v1, %s11394_s0  ;;  %v15418_v1 = vmul.f32 %v15300_v46, %v18719_v52  ;;  %v10617_v52 = vpack.i.bf16 %v18692_v39, %v6280_v36  ;;  %v15456_v39 = vmul.f32 %v15370_v47, %v18679_v16  ;;  %v15485_v36 = vmul.f32 %v15363_v20, %v18697_v63 }
 0xaa6   : > { %10573 = vrot.lane.b32.xlu1 %v10572_v49, %s11393_s8  ;;  %v18720_v49 = vld [vmem:[#allocation77_spill] sm:$0xff]  ;;  %18740 = vst [vmem:[#allocation168_spill] sm:$0xff] %v15527_v19  ;;  %v15545_v63 = vmul.f32 %v15372_v6, %v18708_v8  ;;  %v15581_v19 = vmul.f32 %v15372_v6, %v18711_v25 }
 0xaa7   : > { %v15422_v51 = vmul.f32 %v15298_v55, %v18720_v49  ;;  %v10607_v49 = vpack.i.bf16 %v18690_v11, %v6206_v30  ;;  %v15452_v11 = vmul.f32 %v15296_v3, %v18725_v31  ;;  %18726 = vst [vmem:[#allocation120_spill] sm:$0xff] %v15456_v39  ;;  %v15479_v30 = vmul.f32 %v15300_v46, %v18731_v40  ;;  %v18743_v39 = vld [vmem:[#allocation83_spill] sm:$0xff] }
 0xaa8   : > { %18732 = vst [vmem:[#allocation161_spill] sm:$0xff] %v15485_v36  ;;  %v18742_v36 = vld [vmem:[#allocation85_spill] sm:$0xff]  ;;  %18744 = vst [vmem:[#allocation182_spill] sm:$0xff] %v15545_v63  ;;  %v15599_v63 = vmul.f32 %v15363_v20, %v18715_v9 }
 0xaa9   : > { %10578 = vrot.lane.b32.xlu0 %v10577_v41, %s11393_s8  ;;  %v10612_v41 = vpack.i.bf16 %v15414_v7, %v15410_v42  ;;  %v10622_v18 = vpack.i.bf16 %v15422_v51, %v15418_v1  ;;  %v15471_v51 = vmul.f32 %v15363_v20, %v18696_v60  ;;  %v15489_v42 = vmul.f32 %v15370_v47, %v18678_v24 }
 0xaaa   : > { %10588 = vrot.lane.b32.xlu1 %v10587_v59, %s11392_s11  ;;  %v15443_v59 = vmul.f32 %v15296_v3, %v18723_v2  ;;  %v15495_v7 = vmul.f32 %v15372_v6, %v18699_v50  ;;  %v15499_v1 = vmul.f32 %v15370_v47, %v18683_v62  ;;  %v15510_v60 = vmul.f32 %v15356_v29, %v18703_v38 }
 0xaab   : > { %18729 = vst [vmem:[#allocation155_spill] sm:$0xff] %v15471_v51  ;;  %18733 = vst [vmem:[#allocation160_spill] sm:$0xff] %v15489_v42  ;;  %v15535_v51 = vmul.f32 %v15298_v55, %v18742_v36  ;;  %v15572_v42 = vmul.f32 %v15370_v47, %v18685_v26 }
 0xaac   : > { %18734 = vst [vmem:[#allocation157_spill] sm:$0xff] %v15495_v7  ;;  %18735 = vst [vmem:[#allocation174_spill] sm:$0xff] %v15499_v1  ;;  %v10627_v54 = vpack.i.bf16 %v15448_v12, %v15443_v59  ;;  %v18745_v1 = vld [vmem:[#allocation89_spill] sm:$0xff]  ;;  %v15557_v7 = vmul.f32 %v15356_v29, %v18712_v23  ;;  %v15568_v12 = vmul.f32 %v15363_v20, %v18710_v32 }
 0xaad   : > { %10583 = vrot.lane.b32.xlu0 %v10582_v33, %s11392_s11  ;;  %18737 = vst [vmem:[#allocation121_spill] sm:$0xff] %v15510_v60  ;;  %v15514_v33 = vmul.f32 %v15363_v20, %v18706_v21  ;;  %v15531_v21 = vmul.f32 %v15370_v47, %v18681_v10  ;;  %v15585_v59 = vmul.f32 %v15370_v47, %v18687_v48  ;;  %18751 = vst [vmem:[#allocation148_spill] sm:$0xff] %v15599_v63 }
 0xaae   : > { %10598 = vrot.lane.b32.xlu1 %v10597_v13, %s11390_s26  ;;  %v15503_v13 = vmul.f32 %v15372_v6, %v18702_v17  ;;  %18746 = vst [vmem:[#allocation181_spill] sm:$0xff] %v15557_v7  ;;  %v15589_v32 = vmul.f32 %v15372_v6, %v18713_v61  ;;  %v15615_v7 = vmul.f32 %v15370_v47, %v18689_v27 }
 0xaaf   : > { %18738 = vst [vmem:[#allocation172_spill] sm:$0xff] %v15514_v33  ;;  %18741 = vst [vmem:[#allocation149_spill] sm:$0xff] %v15531_v21  ;;  %v15603_v33 = vmul.f32 %v15356_v29, %v18718_v4  ;;  %v15611_v21 = vmul.f32 %v15363_v20, %v18716_v57  ;;  %v15622_v4 = vmul.f32 %v15372_v6, %v18717_v28 }
 0xab0   : > { %18736 = vst [vmem:[#allocation173_spill] sm:$0xff] %v15503_v13  ;;  %v15551_v13 = vmul.f32 %v15298_v55, %v18745_v1  ;;  %18749 = vst [vmem:[#allocation169_spill] sm:$0xff] %v15585_v59  ;;  %v15626_v23 = vmul.f32 %v15372_v6, %v18752_v0  ;;  %v18753_v59 = vld [vmem:[#allocation77_spill] sm:$0xff]  ;;  %v15643_v63 = vmul.f32 %v15372_v6, %v18724_v34  ;;  %v18771_v34 = vld [vmem:[#allocation23_spill] sm:$0xff] }
 0xab1   : > { %10593 = vrot.lane.b32.xlu0 %v10592_v53, %s11390_s26  ;;  %v18747_v53 = vld [vmem:[#allocation87_spill] sm:$0xff]  ;;  %v15630_v57 = vmul.f32 %v15356_v29, %v18753_v59  ;;  %v15663_v59 = vmul.f32 %v15356_v29, %v18742_v36  ;;  %v15681_v36 = vmul.f32 %v15372_v6, %v18731_v40 }
 0xab2   : > { %10603 = vrot.lane.b32.xlu1 %v10602_v44, %s11389_s17  ;;  %v15539_v44 = vmul.f32 %v15302_v35, %v18743_v39  ;;  %v15562_v60 = vmul.f32 %v15302_v35, %v18747_v53  ;;  %v15700_v40 = vmul.f32 %v15363_v20, %v18747_v53 }
 0xab3   : > { %18757 = vst [vmem:[#allocation162_spill] sm:$0xff] %v15663_v59  ;;  %18761 = vst [vmem:[#allocation113_spill] sm:$0xff] %v15681_v36  ;;  %v15714_v59 = vmul.f32 %v15370_v47, %v18771_v34 }
 0xab4   : > { %18766 = vst [vmem:[#allocation115_spill] sm:$0xff] %v15700_v40  ;;  %v18786_v40 = vld [vmem:[#allocation90_spill] sm:$0xff] }
 0xab5   : > { %10608 = vrot.lane.b32.xlu0 %v10607_v49, %s11389_s17  ;;  %v15577_v49 = vmul.f32 %v15296_v3, %v18748_v45  ;;  %18772 = vst [vmem:[#allocation124_spill] sm:$0xff] %v15714_v59  ;;  %v18782_v59 = vld [vmem:[#allocation33_spill] sm:$0xff] }
 0xab6   : > { %10618 = vrot.lane.b32.xlu1 %v10617_v52, %s11388_s13  ;;  %v15595_v52 = vmul.f32 %v15356_v29, %v18714_v43 }
 0xab8   : > { %18750 = vst [vmem:[#allocation136_spill] sm:$0xff] %v15595_v52  ;;  %v15639_v52 = vmul.f32 %v15370_v47, %v18723_v2  ;;  %v10642_v2 = vpack.i.bf16 %v15539_v44, %v15535_v51  ;;  %v15677_v51 = vmul.f32 %v15370_v47, %v18725_v31  ;;  %v15696_v31 = vmul.f32 %v15356_v29, %v18745_v1 }
 0xab9   : > { %10613 = vrot.lane.b32.xlu0 %v10612_v41, %s11388_s13  ;;  %v10637_v41 = vpack.i.bf16 %v15479_v30, %v15452_v11  ;;  %v15651_v11 = vmul.f32 %v15356_v29, %v18721_v14  ;;  %v18755_v30 = vld [vmem:[#allocation79_spill] sm:$0xff]  ;;  %v18759_v14 = vpack.i.bf16 %v15432_v15, %v15428_v22  ;;  %v18763_v15 = vld [vmem:[#allocation88_spill] sm:$0xff]  ;;  %v18769_v22 = vld [vmem:[#allocation22_spill] sm:$0xff] }
 0xaba   : > { %10623 = vrot.lane.b32.xlu1 %v10622_v18, %s18100_s2  ;;  %v15655_v9 = vmul.f32 %v15363_v20, %v18755_v30  ;;  %v15667_v18 = vmul.f32 %v15363_v20, %v18743_v39  ;;  %18760 = vst [vmem:[#allocation151_spill] sm:$0xff] %v15677_v51  ;;  %v15685_v39 = vmul.f32 %v15370_v47, %v18748_v45  ;;  %18765 = vst [vmem:[#allocation125_spill] sm:$0xff] %v15696_v31  ;;  %v18773_v51 = vld [vmem:[#allocation25_spill] sm:$0xff]  ;;  %v18777_v31 = vld [vmem:[#allocation27_spill] sm:$0xff] }
 0xabb   : > { %18754 = vst [vmem:[#allocation163_spill] sm:$0xff] %v15651_v11  ;;  %v15692_v44 = vmul.f32 %v15372_v6, %v18763_v15  ;;  %v15710_v30 = vmul.f32 %v15363_v20, %v18769_v22  ;;  %v6574_v1 = vmul.f32 %v15300_v46, %v18763_v15  ;;  %v15724_v36 = vmul.f32 %v15372_v6, %v18773_v51 }
 0xabc   : > { %18756 = vst [vmem:[#allocation164_spill] sm:$0xff] %v15655_v9  ;;  %18758 = vst [vmem:[#allocation122_spill] sm:$0xff] %v15667_v18  ;;  %v6647_v18 = vmul.f32 %v15296_v3, %v18771_v34  ;;  %v18775_v9 = vld [vmem:[#allocation26_spill] sm:$0xff]  ;;  %v10652_v45 = vpack.i.bf16 %v15562_v60, %v15551_v13  ;;  %v6648_v53 = vmul.f32 %v15300_v46, %v18773_v51 }
 0xabd   : > { %10633 = vrot.lane.b32.xlu0 %v18759_v14, %s11397_s20  ;;  %18762 = vst [vmem:[#allocation150_spill] sm:$0xff] %v15685_v39  ;;  %18764 = vst [vmem:[#allocation112_spill] sm:$0xff] %v15692_v44  ;;  %v18767_v14 = vld [vmem:[#allocation24_spill] sm:$0xff]  ;;  %v15733_v15 = vmul.f32 %v15372_v6, %v18775_v9  ;;  %v15744_v34 = vmul.f32 %v15356_v29, %v18777_v31  ;;  %v18781_v13 = vld [vmem:[#allocation34_spill] sm:$0xff]  ;;  %v10647_v51 = vpack.i.bf16 %v6574_v1, %v15577_v49 }
 0xabe   : > { %10628 = vrot.lane.b32.xlu1 %v10627_v54, %s11397_s20  ;;  %v15706_v54 = vmul.f32 %v15356_v29, %v18767_v14  ;;  %18770 = vst [vmem:[#allocation114_spill] sm:$0xff] %v15710_v30  ;;  %18774 = vst [vmem:[#allocation158_spill] sm:$0xff] %v15724_v36  ;;  %v6649_v11 = vmul.f32 %v15298_v55, %v18767_v14  ;;  %v15756_v60 = vmul.f32 %v15356_v29, %v18781_v13  ;;  %v18784_v14 = vld [vmem:[#allocation35_spill] sm:$0xff]  ;;  %v18787_v1 = vld [vmem:[#allocation94_spill] sm:$0xff] }
 0xabf   : > { %18776 = vst [vmem:[#allocation126_spill] sm:$0xff] %v15733_v15  ;;  %18778 = vst [vmem:[#allocation134_spill] sm:$0xff] %v15744_v34  ;;  %v15763_v36 = vmul.f32 %v15372_v6, %v18782_v59  ;;  %v6739_v39 = vmul.f32 %v15302_v35, %v18786_v40  ;;  %v18789_v15 = vld [vmem:[#allocation96_spill] sm:$0xff]  ;;  %v10657_v40 = vpack.i.bf16 %v6648_v53, %v6647_v18 }
 0xac0   : > { %18768 = vst [vmem:[#allocation156_spill] sm:$0xff] %v15706_v54  ;;  %v6650_v54 = vmul.f32 %v15302_v35, %v18769_v22  ;;  %v15767_v22 = vmul.f32 %v15356_v29, %v18784_v14  ;;  %v15783_v34 = vmul.f32 %v15356_v29, %v18789_v15  ;;  %v6737_v44 = vmul.f32 %v15300_v46, %v18775_v9 }
 0xac1   : > { %10638 = vrot.lane.b32.xlu0 %v10637_v41, %s11399_s30  ;;  %18783 = vst [vmem:[#allocation129_spill] sm:$0xff] %v15763_v36  ;;  %v15779_v41 = vmul.f32 %v15372_v6, %v18787_v1  ;;  %v15795_v49 = vmul.f32 %v15356_v29, %v18693_v56  ;;  %v15805_v18 = vmul.f32 %v15356_v29, %v18699_v50 }
 0xac2   : > { %10643 = vrot.lane.b32.xlu1 %v10642_v2, %s11399_s30  ;;  %v18779_v2 = vld [vmem:[#allocation32_spill] sm:$0xff]  ;;  %18785 = vst [vmem:[#allocation139_spill] sm:$0xff] %v15767_v22  ;;  %18790 = vst [vmem:[#allocation167_spill] sm:$0xff] %v15783_v34  ;;  %v10662_v36 = vpack.i.bf16 %v6650_v54, %v6649_v11  ;;  %v15816_v11 = vmul.f32 %v15356_v29, %v18702_v17  ;;  %v18797_v54 = vld [vmem:[#allocation30_spill] sm:$0xff]  ;;  %v15843_v9 = vmul.f32 %v15372_v6, %v18685_v26 }
 0xac3   : > { %v15752_v30 = vmul.f32 %v15372_v6, %v18779_v2  ;;  %18788 = vst [vmem:[#allocation175_spill] sm:$0xff] %v15779_v41  ;;  %18792 = vst [vmem:[#allocation104_spill] sm:$0xff] %v15795_v49  ;;  %v10672_v53 = vpack.i.bf16 %v18797_v54, %v6739_v39  ;;  %v6811_v22 = vmul.f32 %v15300_v46, %v18779_v2  ;;  %v18813_v34 = vld [vmem:[#allocation97_spill] sm:$0xff] }
 0xac4   : > { %18794 = vst [vmem:[#allocation170_spill] sm:$0xff] %v15805_v18  ;;  %18796 = vst [vmem:[#allocation123_spill] sm:$0xff] %v15816_v11  ;;  %v15836_v39 = vmul.f32 %v15356_v29, %v18708_v8  ;;  %v15847_v41 = vmul.f32 %v15356_v29, %v18711_v25  ;;  %v18803_v11 = vld [vmem:[#allocation92_spill] sm:$0xff]  ;;  %v15875_v18 = vmul.f32 %v15356_v29, %v18717_v28 }
 0xac5   : > { %18780 = vst [vmem:[#allocation165_spill] sm:$0xff] %v15752_v30  ;;  %10653 = vrot.lane.b32.xlu0 %v10652_v45, %s11401_s14  ;;  %v15787_v45 = vmul.f32 %v15372_v6, %v18679_v16  ;;  %v15801_v30 = vmul.f32 %v15372_v6, %v18678_v24  ;;  %18801 = vst [vmem:[#allocation102_spill] sm:$0xff] %v15843_v9  ;;  %v6960_v9 = vmul.f32 %v15298_v55, %v18789_v15 }
 0xac6   : > { %10648 = vrot.lane.b32.xlu1 %v10647_v51, %s11401_s14  ;;  %v6738_v51 = vmul.f32 %v15298_v55, %v18777_v31  ;;  %v15812_v31 = vmul.f32 %v15372_v6, %v18683_v62  ;;  %18800 = vst [vmem:[#allocation131_spill] sm:$0xff] %v15836_v39  ;;  %18802 = vst [vmem:[#allocation127_spill] sm:$0xff] %v15847_v41  ;;  %v15871_v39 = vmul.f32 %v15372_v6, %v18689_v27 }
 0xac7   : > { %18791 = vst [vmem:[#allocation176_spill] sm:$0xff] %v15787_v45  ;;  %18793 = vst [vmem:[#allocation166_spill] sm:$0xff] %v15801_v30  ;;  %v18798_v45 = vld [vmem:[#allocation91_spill] sm:$0xff]  ;;  %v6887_v30 = vmul.f32 %v15302_v35, %v18803_v11  ;;  %v7033_v15 = vmul.f32 %v15300_v46, %v18679_v16 }
 0xac8   : > { %18795 = vst [vmem:[#allocation128_spill] sm:$0xff] %v15812_v31  ;;  %v6813_v49 = vmul.f32 %v15302_v35, %v18798_v45  ;;  %v10667_v2 = vpack.i.bf16 %v6738_v51, %v6737_v44  ;;  %v15854_v44 = vmul.f32 %v15372_v6, %v18687_v48  ;;  %v15858_v51 = vmul.f32 %v15356_v29, %v18713_v61 }
 0xac9   : > { %10658 = vrot.lane.b32.xlu0 %v10657_v40, %s11403_s27  ;;  %v6812_v40 = vmul.f32 %v15298_v55, %v18781_v13  ;;  %18807 = vst [vmem:[#allocation132_spill] sm:$0xff] %v15871_v39  ;;  %18808 = vst [vmem:[#allocation117_spill] sm:$0xff] %v15875_v18 }
 0xaca   : > { %10663 = vrot.lane.b32.xlu1 %v10662_v36, %s11403_s27  ;;  %v15832_v36 = vmul.f32 %v15372_v6, %v18681_v10  ;;  %18804 = vst [vmem:[#allocation119_spill] sm:$0xff] %v15854_v44  ;;  %18805 = vst [vmem:[#allocation101_spill] sm:$0xff] %v15858_v51  ;;  %v6959_v51 = vmul.f32 %v15300_v46, %v18787_v1 }
 0xacb   : > { %v10677_v31 = vpack.i.bf16 %v6812_v40, %v6811_v22  ;;  %v18812_v22 = vld [vmem:[#allocation37_spill] sm:$0xff]  ;;  %v18814_v40 = vld [vmem:[#allocation95_spill] sm:$0xff] }
 0xacc   : > { %18799 = vst [vmem:[#allocation130_spill] sm:$0xff] %v15832_v36  ;;  %v6885_v36 = vmul.f32 %v15300_v46, %v18782_v59  ;;  %v10692_v44 = vpack.i.bf16 %v18812_v22, %v6887_v30  ;;  %v7035_v30 = vmul.f32 %v15302_v35, %v18694_v5 }
 0xacd   : > { %10673 = vrot.lane.b32.xlu0 %v10672_v53, %s11402_s29  ;;  %v18806_v53 = vld [vmem:[#allocation31_spill] sm:$0xff] }
 0xace   : > { %10668 = vrot.lane.b32.xlu1 %v10667_v2, %s11402_s29  ;;  %v10682_v13 = vpack.i.bf16 %v18806_v53, %v6813_v49  ;;  %v6886_v2 = vmul.f32 %v15298_v55, %v18784_v14  ;;  %v18809_v49 = vld [vmem:[#allocation74_spill] sm:$0xff]  ;;  %v15884_v14 = vmul.f32 %v15356_v29, %v18752_v0  ;;  %v6961_v0 = vmul.f32 %v15302_v35, %v18813_v34 }
 0xacf   : > { %v15879_v59 = vmul.f32 %v15372_v6, %v18809_v49 }
 0xad0   : > { %18811 = vst [vmem:[#allocation118_spill] sm:$0xff] %v15884_v14  ;;  %v10687_v41 = vpack.i.bf16 %v6886_v2, %v6885_v36  ;;  %v10702_v1 = vpack.i.bf16 %v18814_v40, %v6961_v0  ;;  %v18815_v36 = vld [vmem:[#allocation183_spill] sm:$0xff]  ;;  %v7109_v0 = vmul.f32 %v15302_v35, %v18700_v37  ;;  %v18816_v2 = vld [vmem:[#allocation184_spill] sm:$0xff]  ;;  %v18834_v14 = vld [vmem:[#allocation93_spill] sm:$0xff] }
 0xad1   : > { %18810 = vst [vmem:[#allocation100_spill] sm:$0xff] %v15879_v59  ;;  %10678 = vrot.lane.b32.xlu0 %v10677_v31, %s11400_s3  ;;  %v7034_v31 = vmul.f32 %v15298_v55, %v18693_v56  ;;  %v7183_v56 = vmul.f32 %v15302_v35, %v18703_v38  ;;  %v6963_v39 = vmul.f32 %v15370_v47, %v18834_v14 }
 0xad2   : > { %10683 = vrot.lane.b32.xlu1 %v10682_v13, %s11400_s3  ;;  %v10697_v13 = vpack.i.bf16 %v6960_v9, %v6959_v51  ;;  %v7108_v9 = vmul.f32 %v15298_v55, %v18699_v50  ;;  %v7182_v50 = vmul.f32 %v15298_v55, %v18702_v17  ;;  %v7393_v17 = vmul.f32 %v15300_v46, %v18685_v26 }
 0xad3   : > { %v10707_v51 = vpack.i.bf16 %v7034_v31, %v7033_v15  ;;  %v18817_v31 = vld [vmem:[#allocation141_spill] sm:$0xff]  ;;  %v7256_v15 = vmul.f32 %v15298_v55, %v18708_v8  ;;  %v7467_v26 = vmul.f32 %v15300_v46, %v18687_v48 }
 0xad5   : > { %10693 = vrot.lane.b32.xlu0 %v10692_v44, %s11398_s7  ;;  %v10712_v44 = vpack.i.bf16 %v18815_v36, %v7035_v30  ;;  %v10732_v30 = vpack.i.bf16 %v18817_v31, %v7183_v56  ;;  %v7469_v56 = vmul.f32 %v15302_v35, %v18714_v43 }
 0xad6   : > { %10688 = vrot.lane.b32.xlu1 %v10687_v41, %s11398_s7  ;;  %v7107_v41 = vmul.f32 %v15300_v46, %v18678_v24  ;;  %v7181_v24 = vmul.f32 %v15300_v46, %v18683_v62 }
 0xad8   : > { %v10717_v16 = vpack.i.bf16 %v7108_v9, %v7107_v41  ;;  %v7257_v41 = vmul.f32 %v15302_v35, %v18709_v58  ;;  %v7394_v9 = vmul.f32 %v15298_v55, %v18711_v25  ;;  %v7468_v25 = vmul.f32 %v15298_v55, %v18713_v61 }
 0xad9   : > { %10698 = vrot.lane.b32.xlu0 %v10697_v13, %s11396_s19  ;;  %v10722_v13 = vpack.i.bf16 %v18816_v2, %v7109_v0  ;;  %v18819_v0 = vld [vmem:[#allocation64_spill] sm:$0xff]  ;;  %v10767_v61 = vpack.i.bf16 %v15370_v47, %v15296_v3 }
 0xada   : > { %10703 = vrot.lane.b32.xlu1 %v10702_v1, %s11396_s19  ;;  %v7255_v1 = vmul.f32 %v15300_v46, %v18681_v10  ;;  %v7395_v8 = vmul.f32 %v15302_v35, %v18819_v0 }
 0xadc   : > { %v10737_v62 = vpack.i.bf16 %v7256_v15, %v7255_v1  ;;  %v18822_v1 = vld [vmem:[#allocation142_spill] sm:$0xff] }
 0xadd   : > { %10713 = vrot.lane.b32.xlu0 %v10712_v44, %s11395_s9  ;;  %v10727_v44 = vpack.i.bf16 %v7182_v50, %v7181_v24  ;;  %v15952_v50 = vpop.permute.xlu0 %10473  ;;  %v10762_v15 = vpack.i.bf16 %v18822_v1, %v7469_v56  ;;  %v18827_v56 = vld [vmem:[#allocation76_spill] sm:$0xff] }
 0xade   : > { %10708 = vrot.lane.b32.xlu1 %v10707_v51, %s11395_s9  ;;  %v18818_v51 = vld [vmem:[#allocation140_spill] sm:$0xff]  ;;  %18821 = vst [vmem:[#allocation99_spill] sm:$0xff] %v15952_v50 }
 0xadf   : > { %v10742_v10 = vpack.i.bf16 %v18818_v51, %v7257_v41 }
 0xae1   : > { %10718 = vrot.lane.b32.xlu0 %v10717_v16, %s11394_s0  ;;  %v10747_v16 = vpack.i.bf16 %v7394_v9, %v7393_v17  ;;  %v15961_v41 = vpop.permute.xlu0 %10483  ;;  %v18826_v9 = vmov 0.0  }
 0xae2   : > { %10723 = vrot.lane.b32.xlu1 %v10722_v13, %s11394_s0  ;;  %v18820_v13 = vld [vmem:[#allocation143_spill] sm:$0xff]  ;;  %18823 = vst [vmem:[#allocation135_spill] sm:$0xff] %v15961_v41 }
 0xae3   : > { %v10752_v24 = vpack.i.bf16 %v18820_v13, %v7395_v8  ;;  %v6356_v8 = vmul.f32 %v15370_v47, %v18809_v49 }
 0xae5   : > { %10733 = vrot.lane.b32.xlu0 %v10732_v30, %s11393_s8  ;;  %v15955_v30 = vpop.permute.xlu1 %10468 }
 0xae6   : > { %10728 = vrot.lane.b32.xlu1 %v10727_v44, %s11393_s8  ;;  %v10757_v44 = vpack.i.bf16 %v7468_v25, %v7467_v26  ;;  %v18828_v26 = vpack.i.bf16 %v15372_v6, %v15370_v47 }
 0xae9   : > { %10738 = vrot.lane.b32.xlu0 %v10737_v62, %s11392_s11  ;;  %v15963_v48 = vpop.permute.xlu1 %10478  ;;  %v18825_v62 = vpack.i.bf16 %v15363_v20, %v15356_v29 }
 0xaea   : > { %10743 = vrot.lane.b32.xlu1 %v10742_v10, %s11392_s11  ;;  %18824 = vst [vmem:[#allocation116_spill] sm:$0xff] %v15963_v48  ;;  %v10787_v10 = vpack.i.bf16 %v18826_v9, %v15363_v20  ;;  %v18831_v9 = vld [vmem:[#allocation28_spill] sm:$0xff] }
 0xaeb   : > { %v6741_v48 = vmul.f32 %v15370_v47, %v18831_v9 }
 0xaed   : > { %10748 = vrot.lane.b32.xlu0 %v10747_v16, %s11390_s26 }
 0xaee   : > { %10753 = vrot.lane.b32.xlu1 %v10752_v24, %s11390_s26  ;;  %v6354_v24 = vmul.f32 %v15302_v35, %v18827_v56 }
 0xaf1   : > { %10763 = vrot.lane.b32.xlu0 %v10762_v15, %s11389_s17  ;;  %v10792_v15 = vpack.i.bf16 %v6356_v8, %v6354_v24  ;;  %v6736_v8 = vmul.f32 %v15296_v3, %v18831_v9 }
 0xaf2   : > { %10758 = vrot.lane.b32.xlu1 %v10757_v44, %s11389_s17  ;;  %v18829_v44 = vld [vmem:[#allocation29_spill] sm:$0xff] }
 0xaf5   : > { %10778 = vrot.lane.b32.xlu0 %v18825_v62, %s11391_s12 }
 0xaf6   : > { %10768 = vrot.lane.b32.xlu1 %v10767_v61, %s11391_s12  ;;  %v6815_v61 = vmul.f32 %v15370_v47, %v18829_v44 }
 0xaf7   : > { %v15972_v17 = vpop.permute.xlu0 %10488 }
 0xaf8   : > { %v15978_v16 = vpop.permute.xlu1 %10493 }
 0xaf9   : > { %10788 = vrot.lane.b32.xlu0 %v10787_v10, %s11391_s12  ;;  %v6810_v10 = vmul.f32 %v15296_v3, %v18829_v44 }
 0xafa   : > { %10773 = vrot.lane.b32.xlu1 %v18828_v26, %s11391_s12  ;;  %v18832_v26 = vpack.i.bf16 %v15356_v29, %v15372_v6  ;;  %v18839_v6 = vld [vmem:[#allocation38_spill] sm:$0xff] }
 0xafb   : > { %v15987_v25 = vpop.permute.xlu0 %10498  ;;  %v10802_v59 = vpack.i.bf16 %v6815_v61, %v6810_v10 }
 0xafc   : > { %v15991_v62 = vpop.permute.xlu1 %10503 }
 0xafd   : > { %18830 = vst [vmem:[#allocation98_spill] sm:$0xff] %v15991_v62  ;;  %10793 = vrot.lane.b32.xlu0 %v10792_v15, %s18100_s2  ;;  %v10797_v15 = vpack.i.bf16 %v6741_v48, %v6736_v8  ;;  %v18835_v62 = vld [vmem:[#allocation36_spill] sm:$0xff] }
 0xafe   : > { %10783 = vrot.lane.b32.xlu1 %v18832_v26, %s11391_s12  ;;  %v6889_v44 = vmul.f32 %v15370_v47, %v18835_v62  ;;  %v6958_v26 = vmul.f32 %v15296_v3, %v18834_v14  ;;  %v6884_v9 = vmul.f32 %v15296_v3, %v18835_v62  ;;  %v7032_v62 = vmul.f32 %v15296_v3, %v18839_v6 }
 0xaff   : > { %v16004_v24 = vpop.permute.xlu0 %10508 }
 0xb00   : > { %18833 = vst [vmem:[#allocation133_spill] sm:$0xff] %v16004_v24  ;;  %v16008_v18 = vpop.permute.xlu1 %10518  ;;  %v10812_v10 = vpack.i.bf16 %v6963_v39, %v6958_v26  ;;  %v18837_v24 = vld [vmem:[#allocation40_spill] sm:$0xff]  ;;  %v10807_v8 = vpack.i.bf16 %v6889_v44, %v6884_v9 }
 0xb01   : > { %10803 = vrot.lane.b32.xlu0 %v10802_v59, %s11400_s3  ;;  %v7111_v29 = vmul.f32 %v15370_v47, %v18837_v24  ;;  %v7037_v59 = vmul.f32 %v15370_v47, %v18839_v6  ;;  %v7106_v14 = vmul.f32 %v15296_v3, %v18837_v24  ;;  %v18840_v26 = vld [vmem:[#allocation44_spill] sm:$0xff] }
 0xb02   : > { %10798 = vrot.lane.b32.xlu1 %v10797_v15, %s11402_s29  ;;  %v7254_v24 = vmul.f32 %v15296_v3, %v18840_v26 }
 0xb03   : > { %v16018_v61 = vpop.permute.xlu0 %10513  ;;  %v10822_v15 = vpack.i.bf16 %v7111_v29, %v7106_v14  ;;  %v10817_v9 = vpack.i.bf16 %v7037_v59, %v7032_v62  ;;  %v18844_v14 = vld [vmem:[#allocation46_spill] sm:$0xff] }
 0xb04   : > { %18836 = vst [vmem:[#allocation137_spill] sm:$0xff] %v16018_v61  ;;  %v16022_v48 = vpop.permute.xlu1 %10528  ;;  %v18842_v61 = vld [vmem:[#allocation42_spill] sm:$0xff] }
 0xb05   : > { %18838 = vst [vmem:[#allocation57_spill] sm:$0xff] %v16022_v48  ;;  %10813 = vrot.lane.b32.xlu0 %v10812_v10, %s11396_s19  ;;  %v7259_v48 = vmul.f32 %v15370_v47, %v18840_v26  ;;  %v7185_v10 = vmul.f32 %v15370_v47, %v18842_v61  ;;  %v7180_v6 = vmul.f32 %v15296_v3, %v18842_v61 }
 0xb06   : > { %10808 = vrot.lane.b32.xlu1 %v10807_v8, %s11398_s7 }
 0xb07   : > { %v16032_v39 = vpop.permute.xlu0 %10523  ;;  %v10832_v8 = vpack.i.bf16 %v7259_v48, %v7254_v24  ;;  %v10827_v62 = vpack.i.bf16 %v7185_v10, %v7180_v6  ;;  %v18848_v48 = vld [vmem:[#allocation180_spill] sm:$0xff] }
 0xb08   : > { %v16036_v44 = vpop.permute.xlu1 %10533  ;;  %v18849_v24 = vld [vmem:[#allocation120_spill] sm:$0xff] }
 0xb09   : > { %18841 = vst [vmem:[#allocation48_spill] sm:$0xff] %v16036_v44  ;;  %10823 = vrot.lane.b32.xlu0 %v10822_v15, %s11394_s0  ;;  %v7397_v44 = vmul.f32 %v15370_v47, %v18844_v14  ;;  %v7392_v15 = vmul.f32 %v15296_v3, %v18844_v14  ;;  %v18854_v14 = vld [vmem:[#allocation179_spill] sm:$0xff] }
 0xb0a   : > { %10818 = vrot.lane.b32.xlu1 %v10817_v9, %s11395_s9 }
 0xb0b   : > { %v16046_v29 = vpop.permute.xlu0 %10538  ;;  %v10837_v9 = vpack.i.bf16 %v7397_v44, %v7392_v15  ;;  %v18856_v44 = vld [vmem:[#allocation161_spill] sm:$0xff]  ;;  %v18857_v15 = vld [vmem:[#allocation154_spill] sm:$0xff] }
 0xb0c   : > { %18843 = vst [vmem:[#allocation103_spill] sm:$0xff] %v16046_v29  ;;  %v16050_v59 = vpop.permute.xlu1 %10543  ;;  %v18850_v29 = vpack.i.bf16 %v18848_v48, %v18849_v24  ;;  %v18862_v48 = vld [vmem:[#allocation160_spill] sm:$0xff] }
 0xb0d   : > { %18845 = vst [vmem:[#allocation63_spill] sm:$0xff] %v16050_v59  ;;  %10833 = vrot.lane.b32.xlu0 %v10832_v8, %s11392_s11  ;;  %v18853_v8 = vld [vmem:[#allocation155_spill] sm:$0xff] }
 0xb0e   : > { %10828 = vrot.lane.b32.xlu1 %v10827_v62, %s11393_s8  ;;  %v18855_v62 = vpack.i.bf16 %v18853_v8, %v18854_v14 }
 0xb0f   : > { %v16056_v26 = vpop.permute.xlu0 %10548 }
 0xb10   : > { %18846 = vst [vmem:[#allocation105_spill] sm:$0xff] %v16056_v26  ;;  %v16058_v61 = vpop.permute.xlu1 %10553 }
 0xb11   : > { %18847 = vst [vmem:[#allocation58_spill] sm:$0xff] %v16058_v61  ;;  %10838 = vrot.lane.b32.xlu0 %v10837_v9, %s11390_s26  ;;  %v18858_v61 = vpack.i.bf16 %v18856_v44, %v18857_v15  ;;  %v18870_v44 = vld [vmem:[#allocation172_spill] sm:$0xff]  ;;  %v18871_v15 = vld [vmem:[#allocation121_spill] sm:$0xff] }
 0xb12   : > { %10843 = vrot.lane.b32.xlu1 %v18850_v29, %s11395_s9  ;;  %v18861_v29 = vld [vmem:[#allocation157_spill] sm:$0xff] }
 0xb13   : > { %v16065_v10 = vpop.permute.xlu0 %10558  ;;  %v18863_v24 = vpack.i.bf16 %v18861_v29, %v18862_v48  ;;  %v18873_v29 = vld [vmem:[#allocation168_spill] sm:$0xff]  ;;  %v18874_v48 = vld [vmem:[#allocation159_spill] sm:$0xff] }
 0xb14   : > { %18851 = vst [vmem:[#allocation106_spill] sm:$0xff] %v16065_v10  ;;  %v16067_v6 = vpop.permute.xlu1 %10568  ;;  %v18865_v10 = vld [vmem:[#allocation174_spill] sm:$0xff] }
 0xb15   : > { %18852 = vst [vmem:[#allocation66_spill] sm:$0xff] %v16067_v6  ;;  %10848 = vrot.lane.b32.xlu0 %v18855_v62, %s11395_s9  ;;  %v18864_v6 = vld [vmem:[#allocation173_spill] sm:$0xff]  ;;  %v18869_v62 = vld [vmem:[#allocation50_spill] sm:$0xff] }
 0xb16   : > { %10858 = vrot.lane.b32.xlu1 %v18858_v61, %s11394_s0  ;;  %v18866_v59 = vpack.i.bf16 %v18864_v6, %v18865_v10  ;;  %v7471_v61 = vmul.f32 %v15370_v47, %v18869_v62  ;;  %v7541_v6 = vmul.f32 %v15300_v46, %v18689_v27  ;;  %v18879_v27 = vld [vmem:[#allocation181_spill] sm:$0xff] }
 0xb17   : > { %v16077_v9 = vpop.permute.xlu0 %10563 }
 0xb18   : > { %18859 = vst [vmem:[#allocation107_spill] sm:$0xff] %v16077_v9  ;;  %v16079_v26 = vpop.permute.xlu1 %10573 }
 0xb19   : > { %18860 = vst [vmem:[#allocation67_spill] sm:$0xff] %v16079_v26  ;;  %10853 = vrot.lane.b32.xlu0 %v18863_v24, %s11394_s0  ;;  %v18872_v26 = vpack.i.bf16 %v18870_v44, %v18871_v15  ;;  %v18875_v24 = vpack.i.bf16 %v18873_v29, %v18874_v48  ;;  %v18877_v15 = vld [vmem:[#allocation149_spill] sm:$0xff] }
 0xb1a   : > { %10863 = vrot.lane.b32.xlu1 %v18866_v59, %s11393_s8  ;;  %v7466_v59 = vmul.f32 %v15296_v3, %v18869_v62 }
 0xb1b   : > { %v16089_v8 = vpop.permute.xlu0 %10578 }
 0xb1c   : > { %18867 = vst [vmem:[#allocation108_spill] sm:$0xff] %v16089_v8  ;;  %v16091_v14 = vpop.permute.xlu1 %10588  ;;  %v10882_v44 = vpack.i.bf16 %v7471_v61, %v7466_v59 }
 0xb1d   : > { %18868 = vst [vmem:[#allocation72_spill] sm:$0xff] %v16091_v14  ;;  %10868 = vrot.lane.b32.xlu0 %v18872_v26, %s11393_s8  ;;  %v7542_v14 = vmul.f32 %v15298_v55, %v18717_v28  ;;  %v18876_v26 = vld [vmem:[#allocation182_spill] sm:$0xff]  ;;  %v18880_v28 = vpack.i.bf16 %v15568_v12, %v18879_v27  ;;  %v18884_v12 = vld [vmem:[#allocation148_spill] sm:$0xff] }
 0xb1e   : > { %10878 = vrot.lane.b32.xlu1 %v18875_v24, %s11392_s11  ;;  %v18878_v9 = vpack.i.bf16 %v18876_v26, %v18877_v15  ;;  %v18885_v26 = vld [vmem:[#allocation136_spill] sm:$0xff] }
 0xb1f   : > { %v16105_v10 = vpop.permute.xlu0 %10583  ;;  %v10887_v62 = vpack.i.bf16 %v7542_v14, %v7541_v6  ;;  %v18882_v14 = vld [vmem:[#allocation169_spill] sm:$0xff]  ;;  %v18886_v15 = vpack.i.bf16 %v18884_v12, %v18885_v26 }
 0xb20   : > { %v16111_v8 = vpop.permute.xlu1 %10598  ;;  %v18883_v59 = vpack.i.bf16 %v15589_v32, %v18882_v14  ;;  %v18892_v14 = vld [vmem:[#allocation111_spill] sm:$0xff] }
 0xb21   : > { %10873 = vrot.lane.b32.xlu0 %v18878_v9, %s11392_s11  ;;  %v18881_v9 = vpack.i.bf16 %v15581_v19, %v15572_v42  ;;  %v6359_v42 = vmul.f32 %v15363_v20, %v18827_v56 }
 0xb22   : > { %10883 = vrot.lane.b32.xlu1 %v10882_v44, %s11389_s17 }
 0xb23   : > { %v16118_v29 = vpop.permute.xlu0 %10593 }
 0xb24   : > { %v16120_v48 = vpop.permute.xlu1 %10603 }
 0xb25   : > { %10888 = vrot.lane.b32.xlu0 %v10887_v62, %s11388_s13  ;;  %v18887_v62 = vpack.i.bf16 %v15611_v21, %v15603_v33  ;;  %v18889_v33 = vpack.i.bf16 %v15630_v57, %v15626_v23  ;;  %v18894_v23 = vpack.i.bf16 %v15643_v63, %v15639_v52  ;;  %v18902_v52 = vld [vmem:[#allocation122_spill] sm:$0xff] }
 0xb26   : > { %10898 = vrot.lane.b32.xlu1 %v18880_v28, %s11390_s26 }
 0xb27   : > { %v16127_v61 = vpop.permute.xlu0 %10608 }
 0xb28   : > { %v16129_v24 = vpop.permute.xlu1 %10618 }
 0xb29   : > { %10893 = vrot.lane.b32.xlu0 %v18881_v9, %s11390_s26  ;;  %v18888_v9 = vpack.i.bf16 %v15622_v4, %v15615_v7 }
 0xb2a   : > { %10903 = vrot.lane.b32.xlu1 %v18883_v59, %s11389_s17  ;;  %v10927_v59 = vpack.i.bf16 %v18892_v14, %v6359_v42  ;;  %v18903_v14 = vld [vmem:[#allocation162_spill] sm:$0xff] }
 0xb2b   : > { %v16139_v6 = vpop.permute.xlu0 %10613 }
 0xb2c   : > { %v16141_v44 = vpop.permute.xlu1 %10623 }
 0xb2d   : > { %10908 = vrot.lane.b32.xlu0 %v18886_v15, %s11389_s17 }
 0xb2e   : > { %10918 = vrot.lane.b32.xlu1 %v18887_v62, %s11388_s13 }
 0xb2f   : > { %v16151_v19 = vpop.permute.xlu0 %10633 }
 0xb30   : > { %v17839_v32 = vunpack.i.l.bf16 %v16151_v19  ;;  %v16156_v27 = vpop.permute.xlu1 %10628 }
 0xb31   : > { %v17838_v28 = vunpack.i.h.bf16 %v16156_v27  ;;  %10913 = vrot.lane.b32.xlu0 %v18888_v9, %s11388_s13  ;;  %v18899_v9 = vld [vmem:[#allocation164_spill] sm:$0xff] }
 0xb32   : > { %10923 = vrot.lane.b32.xlu1 %v18889_v33, %s18100_s2  ;;  %v18900_v33 = vld [vmem:[#allocation163_spill] sm:$0xff] }
 0xb33   : > { %v16172_v21 = vsel %vm1396_vm10, %v17838_v28, %v17839_v32  ;;  %v16174_v56 = vpop.permute.xlu0 %10638  ;;  %v18901_v63 = vpack.i.bf16 %v18899_v9, %v18900_v33  ;;  %v18909_v33 = vld [vmem:[#allocation113_spill] sm:$0xff] }
 0xb34   : > { %18890 = vst [vmem:[#allocation109_spill] sm:$0xff] %v16172_v21  ;;  %18891 = vst [vmem:[#allocation110_spill] sm:$0xff] %v16174_v56  ;;  %v17837_v12 = vunpack.i.h.bf16 %v16174_v56  ;;  %v16178_v4 = vpop.permute.xlu1 %10643  ;;  %v18929_v21 = vld [vmem:[#allocation55_spill] sm:$0xff] }
 0xb35   : > { %18893 = vst [vmem:[#allocation54_spill] sm:$0xff] %v16178_v4  ;;  %v17836_v7 = vunpack.i.l.bf16 %v16178_v4  ;;  %10928 = vrot.lane.b32.xlu0 %v10927_v59, %s18100_s2  ;;  %v18904_v59 = vpack.i.bf16 %v18902_v52, %v18903_v14  ;;  %v18912_v14 = vld [vmem:[#allocation112_spill] sm:$0xff]  ;;  %v18938_v4 = vld [vmem:[#allocation90_spill] sm:$0xff] }
 0xb36   : > { %10933 = vrot.lane.b32.xlu1 %v18894_v23, %s11397_s20  ;;  %v6744_v56 = vmul.f32 %v15363_v20, %v18938_v4 }
 0xb37   : > { %v16191_v57 = vsel %vm18895_vm1, %v17837_v12, %v17836_v7  ;;  %v16193_v26 = vpop.permute.xlu0 %10653  ;;  %vm19014_vm1 = vmmov %vm18935_vm14 }
 0xb38   : > { %18896 = vst [vmem:[#allocation51_spill] sm:$0xff] %v16191_v57  ;;  %18897 = vst [vmem:[#allocation39_spill] sm:$0xff] %v16193_v26  ;;  %v17840_v15 = vunpack.i.l.bf16 %v16193_v26  ;;  %v16196_v62 = vpop.permute.xlu1 %10648 }
 0xb39   : > { %18898 = vst [vmem:[#allocation41_spill] sm:$0xff] %v16196_v62  ;;  %v17841_v42 = vunpack.i.h.bf16 %v16196_v62  ;;  %10938 = vrot.lane.b32.xlu0 %v18901_v63, %s11397_s20  ;;  %v18910_v63 = vld [vmem:[#allocation151_spill] sm:$0xff]  ;;  %v7545_v62 = vmul.f32 %v15370_v47, %v18929_v21 }
 0xb3a   : > { %10948 = vrot.lane.b32.xlu1 %v18904_v59, %s11399_s30  ;;  %v18911_v52 = vpack.i.bf16 %v18909_v33, %v18910_v63  ;;  %v18913_v59 = vld [vmem:[#allocation150_spill] sm:$0xff]  ;;  %v18919_v33 = vld [vmem:[#allocation69_spill] sm:$0xff] }
 0xb3b   : > { %v16212_v23 = vsel %vm18905_vm13, %v17841_v42, %v17840_v15  ;;  %v16214_v7 = vpop.permute.xlu0 %10658  ;;  %v18914_v32 = vpack.i.bf16 %v18912_v14, %v18913_v59  ;;  %v7543_v63 = vmul.f32 %v15302_v35, %v18919_v33  ;;  %v18921_v14 = vld [vmem:[#allocation125_spill] sm:$0xff]  ;;  %vm19018_vm13 = vmmov %vm18926_vm12 }
 0xb3c   : > { %18906 = vst [vmem:[#allocation52_spill] sm:$0xff] %v16212_v23  ;;  %18907 = vst [vmem:[#allocation53_spill] sm:$0xff] %v16214_v7  ;;  %v17844_v12 = vunpack.i.h.bf16 %v16214_v7  ;;  %v16217_v28 = vpop.permute.xlu1 %10663  ;;  %v18923_v7 = vld [vmem:[#allocation114_spill] sm:$0xff] }
 0xb3d   : > { %18908 = vst [vmem:[#allocation62_spill] sm:$0xff] %v16217_v28  ;;  %v17845_v9 = vunpack.i.l.bf16 %v16217_v28  ;;  %10943 = vrot.lane.b32.xlu0 %v18911_v52, %s11399_s30 }
 0xb3e   : > { %10953 = vrot.lane.b32.xlu1 %v18914_v32, %s11401_s14  ;;  %v18920_v32 = vld [vmem:[#allocation115_spill] sm:$0xff] }
 0xb3f   : > { %v16233_v15 = vsel %vm18915_vm0, %v17844_v12, %v17845_v9  ;;  %v16235_v42 = vpop.permute.xlu0 %10673  ;;  %v18922_v59 = vpack.i.bf16 %v18920_v32, %v18921_v14  ;;  %v18924_v12 = vld [vmem:[#allocation156_spill] sm:$0xff]  ;;  %vm19031_vm0 = vmmov %vm18947_vm9 }
 0xb40   : > { %18916 = vst [vmem:[#allocation59_spill] sm:$0xff] %v16233_v15  ;;  %18917 = vst [vmem:[#allocation43_spill] sm:$0xff] %v16235_v42  ;;  %v17854_v23 = vunpack.i.l.bf16 %v16235_v42  ;;  %v16238_v57 = vpop.permute.xlu1 %10668  ;;  %v18925_v9 = vpack.i.bf16 %v18923_v7, %v18924_v12  ;;  %v18932_v7 = vld [vmem:[#allocation158_spill] sm:$0xff] }
 0xb41   : > { %18918 = vst [vmem:[#allocation45_spill] sm:$0xff] %v16238_v57  ;;  %v17855_v52 = vunpack.i.h.bf16 %v16238_v57  ;;  %10958 = vrot.lane.b32.xlu0 %v18922_v59, %s11401_s14  ;;  %v18931_v59 = vld [vmem:[#allocation145_spill] sm:$0xff] }
 0xb42   : > { %10968 = vrot.lane.b32.xlu1 %v18925_v9, %s11403_s27  ;;  %v10972_v26 = vpack.i.bf16 %v18931_v59, %v7543_v63  ;;  %v18933_v9 = vld [vmem:[#allocation124_spill] sm:$0xff] }
 0xb43   : > { %v16256_v15 = vsel %vm18926_vm12, %v17855_v52, %v17854_v23  ;;  %v16258_v28 = vpop.permute.xlu0 %10678  ;;  %v18934_v42 = vpack.i.bf16 %v18932_v7, %v18933_v9  ;;  %v7540_v23 = vmul.f32 %v15296_v3, %v18929_v21  ;;  %v6818_v21 = vmul.f32 %v15363_v20, %v18798_v45  ;;  %v18940_v9 = vld [vmem:[#allocation134_spill] sm:$0xff] }
 0xb44   : > { %18927 = vst [vmem:[#allocation60_spill] sm:$0xff] %v16256_v15  ;;  %18928 = vst [vmem:[#allocation61_spill] sm:$0xff] %v16258_v28  ;;  %v17861_v32 = vunpack.i.h.bf16 %v16258_v28  ;;  %v16263_v14 = vpop.permute.xlu1 %10683  ;;  %v10987_v45 = vpack.i.bf16 %v18797_v54, %v6744_v56  ;;  %v6892_v56 = vmul.f32 %v15363_v20, %v18803_v11  ;;  %vm19039_vm12 = vcmask 457728  }
 0xb45   : > { %18930 = vst [vmem:[#allocation47_spill] sm:$0xff] %v16263_v14  ;;  %v17860_v12 = vunpack.i.l.bf16 %v16263_v14  ;;  %10963 = vrot.lane.b32.xlu0 %v18934_v42, %s11403_s27  ;;  %v10977_v15 = vpack.i.bf16 %v7545_v62, %v7540_v23  ;;  %s19280_s27 = sshll.u32 %s11693_s4, 5 }
 0xb46   : > { %10973 = vrot.lane.b32.xlu1 %v10972_v26, %s11388_s13 }
 0xb47   : > { %v16279_v52 = vsel %vm18935_vm14, %v17861_v32, %v17860_v12  ;;  %v16281_v63 = vpop.permute.xlu0 %10693  ;;  %v18941_v12 = vld [vmem:[#allocation126_spill] sm:$0xff]  ;;  %vm19042_vm14 = vmmov %vm18943_vm15 }
 0xb48   : > { %18936 = vst [vmem:[#allocation65_spill] sm:$0xff] %v16279_v52  ;;  %18937 = vst [vmem:[#allocation71_spill] sm:$0xff] %v16281_v63  ;;  %v17865_v42 = vunpack.i.l.bf16 %v16281_v63  ;;  %v16286_v7 = vpop.permute.xlu1 %10688  ;;  %v18942_v32 = vpack.i.bf16 %v18940_v9, %v18941_v12  ;;  %v6966_v9 = vmul.f32 %v15363_v20, %v18813_v34  ;;  %v18997_v63 = vld [vmem:[#allocation137_spill] sm:$0xff] }
 0xb49   : > { %18939 = vst [vmem:[#allocation68_spill] sm:$0xff] %v16286_v7  ;;  %v17862_v26 = vunpack.i.h.bf16 %v16286_v7  ;;  %10978 = vrot.lane.b32.xlu0 %v10977_v15, %s11388_s13  ;;  %v10997_v15 = vpack.i.bf16 %v18806_v53, %v6818_v21 }
 0xb4a   : > { %10983 = vrot.lane.b32.xlu1 %v18942_v32, %s11402_s29 }
 0xb4b   : > { %v16301_v4 = vsel %vm18943_vm15, %v17862_v26, %v17865_v42  ;;  %v16303_v62 = vpop.permute.xlu0 %10698  ;;  %v18951_v26 = vld [vmem:[#allocation165_spill] sm:$0xff]  ;;  %vm19046_vm15 = vcmask 449536  }
 0xb4c   : > { %18944 = vst [vmem:[#allocation49_spill] sm:$0xff] %v16301_v4  ;;  %18945 = vst [vmem:[#allocation56_spill] sm:$0xff] %v16303_v62  ;;  %v17864_v23 = vunpack.i.h.bf16 %v16303_v62  ;;  %v16307_v52 = vpop.permute.xlu1 %10703  ;;  %v18954_v42 = vld [vmem:[#allocation129_spill] sm:$0xff]  ;;  %v11007_v4 = vpack.i.bf16 %v18812_v22, %v6892_v56  ;;  %v7040_v56 = vmul.f32 %v15363_v20, %v18694_v5 }
 0xb4d   : > { %18946 = vst [vmem:[#allocation70_spill] sm:$0xff] %v16307_v52  ;;  %v17863_v12 = vunpack.i.l.bf16 %v16307_v52  ;;  %10988 = vrot.lane.b32.xlu0 %v10987_v45, %s11402_s29  ;;  %v7679_v45 = vld [vmem:[#allocation12 + $0x8] sm:$0xff]  ;;  %v18994_v52 = vld [vmem:[#allocation102_spill] sm:$0xff]  ;;  %s8377_s29 = sshll.u32 %s11462_s25, 9  ;;  %s8194_s25 = scalar_lea.sflag [#allocation6], %s11693_s4 }
 0xb4e   : > { %10998 = vrot.lane.b32.xlu1 %v10997_v15, %s11400_s3  ;;  %7969 = vmatprep.mubr.f32.mxu0 %v7679_v45 }
 0xb4f   : > { %v16318_v32 = vsel %vm18947_vm9, %v17864_v23, %v17863_v12  ;;  %v16320_v54 = vpop.permute.xlu0 %10713  ;;  %v18952_v12 = vpack.i.bf16 %v15756_v60, %v18951_v26  ;;  %v18953_v23 = vld [vmem:[#allocation139_spill] sm:$0xff]  ;;  %8111 = vmatprep.mubr.f32.mxu1 %v7679_v45  ;;  %vm19078_vm9 = vmmov %vm19039_vm12 }
 0xb50   : > { %18948 = vst [vmem:[#allocation81_spill] sm:$0xff] %v16318_v32  ;;  %18949 = vst [vmem:[#allocation78_spill] sm:$0xff] %v16320_v54  ;;  %v17869_v53 = vunpack.i.l.bf16 %v16320_v54  ;;  %v16325_v21 = vpop.permute.xlu1 %10708  ;;  %v18955_v11 = vpack.i.bf16 %v18953_v23, %v18954_v42 }
 0xb51   : > { %18950 = vst [vmem:[#allocation80_spill] sm:$0xff] %v16325_v21  ;;  %v17866_v15 = vunpack.i.h.bf16 %v16325_v21  ;;  %10993 = vrot.lane.b32.xlu0 %v18952_v12, %s11400_s3  ;;  %v11017_v12 = vpack.i.bf16 %v18814_v40, %v6966_v9 }
 0xb52   : > { %11003 = vrot.lane.b32.xlu1 %v18955_v11, %s11398_s7  ;;  %v18962_v11 = vld [vmem:[#allocation167_spill] sm:$0xff] }
 0xb53   : > { %v16343_v34 = vsel %vm463_vm7, %v17866_v15, %v17869_v53  ;;  %v16345_v32 = vpop.permute.xlu0 %10718 }
 0xb54   : > { %18956 = vst [vmem:[#allocation82_spill] sm:$0xff] %v16343_v34  ;;  %18957 = vst [vmem:[#allocation84_spill] sm:$0xff] %v16345_v32  ;;  %v17868_v60 = vunpack.i.h.bf16 %v16345_v32  ;;  %v16349_v26 = vpop.permute.xlu1 %10723 }
 0xb55   : > { %18958 = vst [vmem:[#allocation85_spill] sm:$0xff] %v16349_v26  ;;  %v17867_v42 = vunpack.i.l.bf16 %v16349_v26  ;;  %11008 = vrot.lane.b32.xlu0 %v11007_v4, %s11398_s7  ;;  %v7114_v4 = vmul.f32 %v15363_v20, %v18700_v37  ;;  %v18999_v26 = vld [vmem:[#allocation119_spill] sm:$0xff] }
 0xb56   : > { %11018 = vrot.lane.b32.xlu1 %v11017_v12, %s11396_s19  ;;  %v18963_v12 = vld [vmem:[#allocation175_spill] sm:$0xff] }
 0xb57   : > { %v16360_v23 = vsel %vm575_vm6, %v17868_v60, %v17867_v42  ;;  %v16362_v22 = vpop.permute.xlu0 %10733  ;;  %v18964_v15 = vpack.i.bf16 %v18962_v11, %v18963_v12  ;;  %v18965_v42 = vld [vmem:[#allocation104_spill] sm:$0xff]  ;;  %v18974_v12 = vld [vmem:[#allocation170_spill] sm:$0xff] }
 0xb58   : > { %18959 = vst [vmem:[#allocation83_spill] sm:$0xff] %v16360_v23  ;;  %18960 = vst [vmem:[#allocation89_spill] sm:$0xff] %v16362_v22  ;;  %v17873_v40 = vunpack.i.l.bf16 %v16362_v22  ;;  %v16367_v9 = vpop.permute.xlu1 %10728  ;;  %v18966_v60 = vld [vmem:[#allocation176_spill] sm:$0xff]  ;;  %v11027_v23 = vpack.i.bf16 %v18815_v36, %v7040_v56  ;;  %v10520_v22 = vunpack.i.l.bf16 %v16008_v18 }
 0xb59   : > { %18961 = vst [vmem:[#allocation87_spill] sm:$0xff] %v16367_v9  ;;  %v17870_v45 = vunpack.i.h.bf16 %v16367_v9  ;;  %11013 = vrot.lane.b32.xlu0 %v18964_v15, %s11396_s19  ;;  %v18967_v53 = vpack.i.bf16 %v18965_v42, %v18966_v60  ;;  %v11037_v15 = vpack.i.bf16 %v18816_v2, %v7114_v4  ;;  %v7188_v42 = vmul.f32 %v15363_v20, %v18703_v38 }
 0xb5b   : > { %11023 = vrot.lane.b32.xlu1 %v18967_v53, %s11395_s9  ;;  %v16385_v5 = vsel %vm687_vm5, %v17870_v45, %v17873_v40  ;;  %v16387_v37 = vpop.permute.xlu0 %10738 }
 0xb5c   : > { %18968 = vst [vmem:[#allocation86_spill] sm:$0xff] %v16385_v5  ;;  %18969 = vst [vmem:[#allocation79_spill] sm:$0xff] %v16387_v37  ;;  %v17871_v34 = vunpack.i.h.bf16 %v16387_v37  ;;  %v16391_v11 = vpop.permute.xlu1 %10743 }
 0xb5d   : > { %18970 = vst [vmem:[#allocation88_spill] sm:$0xff] %v16391_v11  ;;  %v17872_v60 = vunpack.i.l.bf16 %v16391_v11  ;;  %11028 = vrot.lane.b32.xlu0 %v11027_v23, %s11395_s9  ;;  %v7262_v23 = vmul.f32 %v15363_v20, %v18709_v58 }
 0xb5f   : > { %11038 = vrot.lane.b32.xlu1 %v11037_v15, %s11394_s0  ;;  %v16402_v53 = vsel %vm799_vm4, %v17871_v34, %v17872_v60  ;;  %v16404_v36 = vpop.permute.xlu0 %10748  ;;  %v18975_v15 = vld [vmem:[#allocation166_spill] sm:$0xff]  ;;  %v18977_v34 = vld [vmem:[#allocation123_spill] sm:$0xff]  ;;  %v18978_v60 = vld [vmem:[#allocation128_spill] sm:$0xff] }
 0xb60   : > { %18971 = vst [vmem:[#allocation24_spill] sm:$0xff] %v16402_v53  ;;  %18972 = vst [vmem:[#allocation22_spill] sm:$0xff] %v16404_v36  ;;  %v17875_v2 = vunpack.i.h.bf16 %v16404_v36  ;;  %v16409_v56 = vpop.permute.xlu1 %10753  ;;  %v18976_v45 = vpack.i.bf16 %v18974_v12, %v18975_v15  ;;  %v18979_v40 = vpack.i.bf16 %v18977_v34, %v18978_v60  ;;  %v11047_v53 = vpack.i.bf16 %v18817_v31, %v7188_v42 }
 0xb61   : > { %18973 = vst [vmem:[#allocation23_spill] sm:$0xff] %v16409_v56  ;;  %v17874_v4 = vunpack.i.l.bf16 %v16409_v56  ;;  %v7615_v34 = vmul.f32 %v15300_v46, %v18809_v49 }
 0xb62   : > { %11033 = vrot.lane.b32.xlu0 %v18976_v45, %s11394_s0  ;;  %v11057_v45 = vpack.i.bf16 %v18818_v51, %v7262_v23 }
 0xb63   : > { %11043 = vrot.lane.b32.xlu1 %v18979_v40, %s11393_s8  ;;  %v16427_v38 = vsel %vm750_vm3, %v17875_v2, %v17874_v4  ;;  %v16429_v58 = vpop.permute.xlu0 %10763  ;;  %v18982_v40 = vld [vmem:[#allocation75_spill] sm:$0xff]  ;;  %v18983_v4 = vld [vmem:[#allocation77_spill] sm:$0xff] }
 0xb64   : > { %18980 = vst [vmem:[#allocation25_spill] sm:$0xff] %v16427_v38  ;;  %18981 = vst [vmem:[#allocation26_spill] sm:$0xff] %v16429_v58  ;;  %v17878_v5 = vunpack.i.l.bf16 %v16429_v58  ;;  %v16433_v12 = vpop.permute.xlu1 %10758  ;;  %v7616_v60 = vmul.f32 %v15298_v55, %v18982_v40  ;;  %v7617_v31 = vmul.f32 %v15302_v35, %v18983_v4  ;;  %v7400_v40 = vmul.f32 %v15363_v20, %v18819_v0 }
 0xb65   : > { %v17879_v15 = vunpack.i.h.bf16 %v16433_v12  ;;  %v7474_v38 = vmul.f32 %v15363_v20, %v18714_v43  ;;  %v10491_v0 = vunpack.i.h.bf16 %v15972_v17  ;;  %v16474_v43 = vmul.f32 %v15363_v20, %v18983_v4 }
 0xb66   : > { %11048 = vrot.lane.b32.xlu0 %v11047_v53, %s11393_s8  ;;  %v11062_v23 = vpack.i.bf16 %v7616_v60, %v7615_v34  ;;  %v18985_v53 = vld [vmem:[#allocation131_spill] sm:$0xff]  ;;  %v7548_v34 = vmul.f32 %v15363_v20, %v18919_v33  ;;  %v10490_v60 = vunpack.i.l.bf16 %v15972_v17  ;;  %v10495_v33 = vunpack.i.l.bf16 %v15978_v16  ;;  %s11405_s8 = smov [#allocation15]  }
 0xb67   : > { %11058 = vrot.lane.b32.xlu1 %v11057_v45, %s11392_s11  ;;  %v16450_v51 = vsel %vm638_vm2, %v17879_v15, %v17878_v5  ;;  %v16452_v49 = vpop.permute.xlu0 %10778  ;;  %v18986_v45 = vld [vmem:[#allocation130_spill] sm:$0xff]  ;;  %v11077_v17 = vpack.i.bf16 %v18820_v13, %v7400_v40  ;;  %v11087_v4 = vpack.i.bf16 %v18822_v1, %v7474_v38  ;;  %v18993_v38 = vld [vmem:[#allocation127_spill] sm:$0xff]  ;;  %v18996_v5 = vunpack.i.h.bf16 %v16008_v18  ;;  %s11297_s0 = sshll.u32 %s11405_s8, 4  ;;  %s11298_s0 = int_to_ptr.vmem [resolvable:$false] %s11297_s0 }
 0xb68   : > { %18984 = vst [vmem:[#allocation27_spill] sm:$0xff] %v16450_v51  ;;  %v10769_v42 = vpop.permute.xlu1 %10768  ;;  %v18987_v2 = vpack.i.bf16 %v18985_v53, %v18986_v45  ;;  %v18988_v15 = vld [vmem:[#allocation146_spill] sm:$0xff]  ;;  %v11097_v13 = vpack.i.bf16 %v18931_v59, %v7548_v34  ;;  %v16500_v40 = vsel %vm864_vm8, %v10490_v60, %v10491_v0  ;;  %v16516_v34 = vsel %vm864_vm8, %v10491_v0, %v10495_v33  ;;  %s11299_s9 = scalar_lea.vmem %s11298_s0, 1024 }
 0xb69   : > { %v11067_v51 = vpack.i.bf16 %v18988_v15, %v7617_v31  ;;  %v10496_v31 = vunpack.i.h.bf16 %v15978_v16  ;;  %v10771_v60 = vunpack.i.h.bf16 %v10769_v42  ;;  %v18995_v55 = vpack.i.bf16 %v18993_v38, %v18994_v52 }
 0xb6a   : > { %11053 = vrot.lane.b32.xlu0 %v18987_v2, %s11392_s11  ;;  %v18990_v2 = vld [vmem:[#allocation73_spill] sm:$0xff]  ;;  %v16528_v16 = vsel %vm575_vm6, %v10520_v22, %v18996_v5  ;;  %v19028_v20 = vunpack.i.h.bf16 %v16032_v39  ;;  %s17263_s11 = scalar_lea.hbm %s17313_s6, %s8377_s29 }
 0xb6b   : > { %11063 = vrot.lane.b32.xlu1 %v11062_v23, %s18100_s2  ;;  %v16470_v53 = vpop.permute.xlu0 %10788  ;;  %v16478_v45 = vmul.f32 %v15370_v47, %v18990_v2  ;;  %v16492_v11 = vmul.f32 %v15296_v3, %v18990_v2  ;;  %v10500_v23 = vunpack.i.l.bf16 %v15987_v25  ;;  %v16509_v2 = vsel %vm864_vm8, %v10495_v33, %v10496_v31  ;;  %v18998_v33 = vld [vmem:[#allocation101_spill] sm:$0xff] }
 0xb6c   : > { %18989 = vst [vmem:[#allocation32_spill] sm:$0xff] %v16470_v53  ;;  %v16483_v58 = vpop.permute.xlu1 %10773  ;;  %v19000_v1 = vpack.i.bf16 %v18998_v33, %v18999_v26  ;;  %v19001_v47 = vld [vmem:[#allocation57_spill] sm:$0xff]  ;;  %v19004_v22 = vunpack.i.l.bf16 %v16470_v53  ;;  %v19012_v53 = vld [vmem:[#allocation103_spill] sm:$0xff] }
 0xb6d   : > { %v16537_v54 = vsel %vm864_vm8, %v10496_v31, %v10500_v23  ;;  %v10530_v31 = vunpack.i.l.bf16 %v19001_v47 }
 0xb6e   : > { %11068 = vrot.lane.b32.xlu0 %v11067_v51, %s18100_s2  ;;  %v10770_v51 = vunpack.i.l.bf16 %v10769_v42  ;;  %v10515_v42 = vunpack.i.l.bf16 %v18997_v63 }
 0xb6f   : > { %11078 = vrot.lane.b32.xlu1 %v11077_v17, %s11390_s26  ;;  %v16502_v56 = vpop.permute.xlu0 %10793  ;;  %v18991_v17 = vld [vmem:[#allocation98_spill] sm:$0xff] }
 0xb70   : > { %v16513_v59 = vpop.permute.xlu1 %10783 }
 0xb71   : > { %18992 = vst [vmem:[#allocation34_spill] sm:$0xff] %v16513_v59  ;;  %v19005_v5 = vunpack.i.h.bf16 %v16513_v59  ;;  %v19007_v26 = vunpack.i.l.bf16 %v16513_v59 }
 0xb72   : > { %11073 = vrot.lane.b32.xlu0 %v18995_v55, %s11390_s26  ;;  %v19002_v55 = vunpack.i.l.bf16 %v18991_v17  ;;  %v19023_v17 = vunpack.i.h.bf16 %v18997_v63 }
 0xb73   : > { %11083 = vrot.lane.b32.xlu1 %v19000_v1, %s11389_s17  ;;  %v16550_v0 = vsel %vm864_vm8, %v19005_v5, %v19004_v22  ;;  %v16555_v1 = vsel %vm864_vm8, %v10771_v60, %v19007_v26  ;;  %v16557_v23 = vpop.permute.xlu0 %10803  ;;  %v10525_v5 = vunpack.i.l.bf16 %v16032_v39  ;;  %v10540_v22 = vunpack.i.l.bf16 %v19012_v53  ;;  %v19016_v60 = vld [vmem:[#allocation63_spill] sm:$0xff] }
 0xb74   : > { %v16543_v38 = vsel %vm864_vm8, %v10770_v51, %v19002_v55  ;;  %19006 = vst [vmem:[#allocation35_spill] sm:$0xff] %v16550_v0  ;;  %19008 = vst [vmem:[#allocation94_spill] sm:$0xff] %v16555_v1  ;;  %v10805_v55 = vunpack.i.l.bf16 %v16557_v23  ;;  %v16564_v52 = vpop.permute.xlu1 %10798  ;;  %v19011_v0 = vld [vmem:[#allocation48_spill] sm:$0xff]  ;;  %v19021_v51 = vld [vmem:[#allocation105_spill] sm:$0xff]  ;;  %v16599_v3 = vsel %vm463_vm7, %v10515_v42, %v19023_v17 }
 0xb75   : > { %19003 = vst [vmem:[#allocation33_spill] sm:$0xff] %v16543_v38  ;;  %19009 = vst [vmem:[#allocation96_spill] sm:$0xff] %v16557_v23  ;;  %v10800_v26 = vunpack.i.l.bf16 %v16564_v52  ;;  %v10535_v33 = vunpack.i.l.bf16 %v19011_v0  ;;  %v19013_v38 = vunpack.i.l.bf16 %v16258_v28  ;;  %v10545_v23 = vunpack.i.l.bf16 %v19016_v60  ;;  %v19029_v17 = vld [vmem:[#allocation58_spill] sm:$0xff] }
 0xb76   : > { %19010 = vst [vmem:[#allocation30_spill] sm:$0xff] %v16564_v52  ;;  %11088 = vrot.lane.b32.xlu0 %v11087_v4, %s11389_s17  ;;  %v19017_v4 = vunpack.i.l.bf16 %v16238_v57  ;;  %v19026_v57 = vld [vmem:[#allocation132_spill] sm:$0xff]  ;;  %v16615_v35 = vsel %vm687_vm5, %v10525_v5, %v19028_v20  ;;  %v10556_v42 = vunpack.i.h.bf16 %v19029_v17  ;;  %v10555_v46 = vunpack.i.l.bf16 %v19029_v17  ;;  %v19033_v28 = vld [vmem:[#allocation118_spill] sm:$0xff] }
 0xb77   : > { %v16577_v1 = vsel %vm19014_vm1, %v10805_v55, %v19013_v38  ;;  %11098 = vrot.lane.b32.xlu1 %v11097_v13, %s11388_s13  ;;  %v16588_v52 = vpop.permute.xlu0 %10813  ;;  %v10550_v38 = vunpack.i.l.bf16 %v19021_v51  ;;  %v19025_v55 = vld [vmem:[#allocation117_spill] sm:$0xff]  ;;  %v19037_v20 = vunpack.i.h.bf16 %v19012_v53  ;;  %v19041_v17 = vunpack.i.l.bf16 %v16286_v7  ;;  %vm19081_vm1 = vmmov %vm19078_vm9 }
 0xb78   : > { %19015 = vst [vmem:[#allocation91_spill] sm:$0xff] %v16577_v1  ;;  %v16586_v59 = vsel %vm19018_vm13, %v10800_v26, %v19017_v4  ;;  %19020 = vst [vmem:[#allocation31_spill] sm:$0xff] %v16588_v52  ;;  %v10815_v13 = vunpack.i.l.bf16 %v16588_v52  ;;  %v16594_v1 = vpop.permute.xlu1 %10808  ;;  %v19024_v26 = vunpack.i.h.bf16 %v19001_v47  ;;  %v19027_v52 = vpack.i.bf16 %v19025_v55, %v19026_v57 }
 0xb79   : > { %19019 = vst [vmem:[#allocation92_spill] sm:$0xff] %v16586_v59  ;;  %19022 = vst [vmem:[#allocation74_spill] sm:$0xff] %v16594_v1  ;;  %v10810_v59 = vunpack.i.l.bf16 %v16594_v1  ;;  %v19034_v1 = vld [vmem:[#allocation100_spill] sm:$0xff]  ;;  %v19036_v57 = vunpack.i.h.bf16 %v19011_v0  ;;  %v16636_v5 = vsel %vm638_vm2, %v10540_v22, %v19037_v20  ;;  %v19038_v55 = vunpack.i.h.bf16 %v19016_v60 }
 0xb7a   : > { %v16604_v4 = vsel %vm799_vm4, %v10530_v31, %v19024_v26  ;;  %11093 = vrot.lane.b32.xlu0 %v19027_v52, %s11388_s13  ;;  %v19030_v31 = vunpack.i.l.bf16 %v16303_v62  ;;  %v19035_v14 = vpack.i.bf16 %v19033_v28, %v19034_v1  ;;  %v19045_v1 = vunpack.i.h.bf16 %v19021_v51  ;;  %vm19082_vm13 = vmmov %vm19046_vm15  ;;  %s363_s13 = scalar_lea.vmem [#allocation15], %s19280_s27 }
 0xb7b   : > { %v16631_v52 = vsel %vm750_vm3, %v10535_v33, %v19036_v57  ;;  %v16646_v28 = vsel %vm19042_vm14, %v10810_v59, %v19041_v17  ;;  %v19052_v57 = vld [vmem:[#allocation67_spill] sm:$0xff]  ;;  %v19053_v7 = vunpack.i.l.bf16 %v16345_v32  ;;  %v19055_v17 = vpack.i.bf16 %v16478_v45, %v16492_v11  ;;  %s8208_s17 = sshll.u32 %s363_s13, 4  ;;  %s17265_s17 = int_to_ptr.vmem [resolvable:$true] %s8208_s17 }
 0xb7c   : > { %v16622_v26 = vsel %vm19031_vm0, %v10815_v13, %v19030_v31  ;;  %11103 = vrot.lane.b32.xlu1 %v19035_v14, %s18100_s2  ;;  %v16641_v13 = vsel %vm19039_vm12, %v10545_v23, %v19038_v55  ;;  %19043 = vst [vmem:[#allocation95_spill] sm:$0xff] %v16646_v28  ;;  %v16648_v14 = vpop.permute.xlu0 %10823  ;;  %v16653_v33 = vsel %vm19046_vm15, %v10550_v38, %v19045_v1  ;;  %v19048_v31 = vld [vmem:[#allocation106_spill] sm:$0xff]  ;;  %v16658_v23 = vpop.permute.xlu1 %10818  ;;  %v19050_v55 = vld [vmem:[#allocation107_spill] sm:$0xff]  ;;  %v10575_v62 = vunpack.i.l.bf16 %v19052_v57  ;;  %vm19084_vm0 = vmmov %vm19081_vm1  ;;  %p11300_p3 = scmp.lt.s32.totalorder %s17265_s17, %s11298_s0 }
 0xb7d   : > { %19032 = vst [vmem:[#allocation37_spill] sm:$0xff] %v16622_v26  ;;  %19040 = vst [vmem:[#allocation97_spill] sm:$0xff] %v16641_v13  ;;  %v10560_v22 = vunpack.i.l.bf16 %v19048_v31  ;;  %v10825_v20 = vunpack.i.l.bf16 %v16648_v14  ;;  %v10566_v26 = vunpack.i.h.bf16 %v19050_v55  ;;  %v10565_v59 = vunpack.i.l.bf16 %v19050_v55 }
 0xb7e   : > { %19044 = vst [vmem:[#allocation183_spill] sm:$0xff] %v16648_v14  ;;  %19047 = vst [vmem:[#allocation184_spill] sm:$0xff] %v16653_v33  ;;  %v10820_v28 = vunpack.i.l.bf16 %v16658_v23  ;;  %v19051_v38 = vpack.i.bf16 %v18988_v15, %v16474_v43  ;;  %v16669_v1 = vsel %vm463_vm7, %v10555_v46, %v10556_v42  ;;  %v10576_v14 = vunpack.i.h.bf16 %v19052_v57  ;;  %v19056_v43 = vld [vmem:[#allocation66_spill] sm:$0xff] }
 0xb7f   : > { %19049 = vst [vmem:[#allocation141_spill] sm:$0xff] %v16658_v23  ;;  %v16676_v55 = vsel %vm575_vm6, %v10825_v20, %v19053_v7  ;;  %v10561_v15 = vunpack.i.h.bf16 %v19048_v31  ;;  %v19057_v23 = vunpack.i.l.bf16 %v16325_v21  ;;  %v19060_v32 = vunpack.i.h.bf16 %v18997_v63  ;;  %vm19086_vm12 = vmmov %vm19082_vm13 }
 0xb80   : > { %11108 = vrot.lane.b32.xlu0 %v19051_v38, %s18100_s2  ;;  %19054 = vst [vmem:[#allocation140_spill] sm:$0xff] %v16676_v55  ;;  %11113 = vrot.lane.b32.xlu1 %v19055_v17, %s18100_s2  ;;  %v16689_v57 = vpop.permute.xlu0 %10833  ;;  %v10570_v20 = vunpack.i.l.bf16 %v19056_v43  ;;  %v17933_v11 = vunpack.i.l.bf16 %v16387_v37  ;;  %v16697_v31 = vpop.permute.xlu1 %10828  ;;  %v5811_v17 = vsel %vm463_vm7, %v10556_v42, %v10560_v22  ;;  %v16701_v38 = vsel %vm575_vm6, %v10565_v59, %v10566_v26  ;;  %vm19089_vm14 = vmmov %vm19084_vm0 }
 0xb81   : > { %v16687_v41 = vsel %vm463_vm7, %v10820_v28, %v19057_v23  ;;  %19059 = vst [vmem:[#allocation143_spill] sm:$0xff] %v16689_v57  ;;  %v5809_v7 = vsel %vm463_vm7, %v19060_v32, %v10555_v46  ;;  %v10835_v45 = vunpack.i.l.bf16 %v16689_v57  ;;  %19061 = vst [vmem:[#allocation142_spill] sm:$0xff] %v16697_v31  ;;  %v19062_v28 = vld [vmem:[#allocation108_spill] sm:$0xff]  ;;  %v10830_v63 = vunpack.i.l.bf16 %v16697_v31 }
 0xb82   : > { %19058 = vst [vmem:[#allocation64_spill] sm:$0xff] %v16687_v41  ;;  %v10580_v23 = vunpack.i.l.bf16 %v19062_v28  ;;  %v16707_v46 = vsel %vm687_vm5, %v10575_v62, %v10576_v14  ;;  %v16715_v57 = vsel %vm575_vm6, %v10566_v26, %v10570_v20  ;;  %v19064_v42 = vunpack.i.h.bf16 %v16008_v18  ;;  %vm19091_vm15 = vmmov %vm19084_vm0 }
 0xb83   : > { %v16712_v32 = vsel %vm799_vm4, %v10835_v45, %v17933_v11  ;;  %v10586_v55 = vunpack.i.h.bf16 %v16105_v10  ;;  %v10585_v31 = vunpack.i.l.bf16 %v16105_v10  ;;  %v19065_v41 = vunpack.i.l.bf16 %v16367_v9 }
 0xb84   : > { %19063 = vst [vmem:[#allocation76_spill] sm:$0xff] %v16712_v32  ;;  %v16720_v22 = vsel %vm575_vm6, %v19064_v42, %v10565_v59  ;;  %v16729_v37 = vpop.permute.xlu0 %10838  ;;  %v19068_v45 = vunpack.i.h.bf16 %v16032_v39  ;;  %v19069_v59 = vld [vmem:[#allocation72_spill] sm:$0xff]  ;;  %v17941_v42 = vunpack.i.l.bf16 %v16404_v36  ;;  %v10844_v11 = vpop.permute.xlu1 %10843  ;;  %v10600_v39 = vunpack.i.l.bf16 %v16111_v8 }
 0xb85   : > { %v16727_v21 = vsel %vm687_vm5, %v10830_v63, %v19065_v41  ;;  %19067 = vst [vmem:[#allocation28_spill] sm:$0xff] %v16729_v37  ;;  %v10840_v10 = vunpack.i.l.bf16 %v16729_v37  ;;  %v10590_v32 = vunpack.i.l.bf16 %v19069_v59  ;;  %v10846_v41 = vunpack.i.h.bf16 %v10844_v11 }
 0xb86   : > { %19066 = vst [vmem:[#allocation29_spill] sm:$0xff] %v16727_v21  ;;  %v16734_v26 = vsel %vm687_vm5, %v19068_v45, %v10575_v62  ;;  %v10845_v63 = vunpack.i.l.bf16 %v10844_v11  ;;  %v16742_v21 = vsel %vm687_vm5, %v10576_v14, %v10580_v23  ;;  %v10596_v62 = vunpack.i.h.bf16 %v16118_v29 }
 0xb87   : > { %v10595_v45 = vunpack.i.l.bf16 %v16118_v29  ;;  %v16750_v20 = vsel %vm750_vm3, %v10840_v10, %v17941_v42  ;;  %v16753_v18 = vsel %vm799_vm4, %v10585_v31, %v10586_v55  ;;  %v16758_v23 = vsel %vm799_vm4, %v10586_v55, %v10590_v32 }
 0xb88   : > { %19070 = vst [vmem:[#allocation93_spill] sm:$0xff] %v16750_v20  ;;  %v5812_v37 = vsel %vm463_vm7, %v10561_v15, %v10845_v63  ;;  %v10849_v11 = vpop.permute.xlu0 %10848  ;;  %v5813_v14 = vsel %vm463_vm7, %v10845_v63, %v10846_v41  ;;  %v10859_v50 = vpop.permute.xlu1 %10858  ;;  %v10606_v10 = vunpack.i.h.bf16 %v16120_v48 }
 0xb89   : > { %v8812_v9 = vpack.c.bf16 %v5812_v37, %v16599_v3  ;;  %v10851_v33 = vunpack.i.h.bf16 %v10849_v11  ;;  %v10850_v29 = vunpack.i.l.bf16 %v10849_v11  ;;  %v8810_v36 = vpack.c.bf16 %v5813_v14, %v5809_v7 }
 0xb8a   : > { %v10861_v20 = vunpack.i.h.bf16 %v10859_v50  ;;  %v10860_v13 = vunpack.i.l.bf16 %v10859_v50  ;;  %v16764_v15 = vsel %vm750_vm3, %v10595_v45, %v10596_v62  ;;  %v19071_v3 = vunpack.i.h.bf16 %v19001_v47 }
 0xb8b   : > { %v5814_v63 = vsel %vm463_vm7, %v10846_v41, %v10850_v29  ;;  %8811 = vmatprep.subr.bf16.mxu0 %v8810_v36  ;;  %v5815_v55 = vsel %vm463_vm7, %v10850_v29, %v10851_v33  ;;  %v16776_v14 = vsel %vm750_vm3, %v10596_v62, %v10600_v39  ;;  %v19072_v47 = vunpack.i.h.bf16 %v19011_v0 }
 0xb8c   : > { %v16771_v37 = vsel %vm799_vm4, %v19071_v3, %v10585_v31  ;;  %v8920_v7 = vpack.c.bf16 %v5814_v63, %v16669_v1  ;;  %v10854_v32 = vpop.permute.xlu0 %10853  ;;  %8813 = vmatpush1.bf16.msra.mxu0 %v8812_v9  ;;  %v8918_v11 = vpack.c.bf16 %v5815_v55, %v5811_v17  ;;  %v5889_v50 = vsel %vm575_vm6, %v10860_v13, %v10861_v20  ;;  %v10864_v36 = vpop.permute.xlu1 %10863 }
 0xb8d   : > { %v10856_v42 = vunpack.i.h.bf16 %v10854_v32  ;;  %v10855_v41 = vunpack.i.l.bf16 %v10854_v32  ;;  %v8922_v33 = vpack.c.bf16 %v5889_v50, %v16715_v57  ;;  %v16782_v31 = vsel %vm750_vm3, %v19072_v47, %v10595_v45 }
 0xb8e   : > { %v19073_v9 = vunpack.i.l.bf16 %v16120_v48  ;;  %v10781_v17 = vunpack.i.h.bf16 %v16452_v49  ;;  %v10866_v20 = vunpack.i.h.bf16 %v10864_v36  ;;  %v10865_v39 = vunpack.i.l.bf16 %v10864_v36  ;;  %8919 = vmatprep.subr.bf16.mxu1 %v8918_v11 }
 0xb8f   : > { %v10780_v62 = vunpack.i.l.bf16 %v16452_v49  ;;  %v19074_v57 = vunpack.i.h.bf16 %v19056_v43  ;;  %v5888_v45 = vsel %vm575_vm6, %v10856_v42, %v10860_v13  ;;  %8921 = vmatpush1.bf16.msra.mxu1 %v8920_v7  ;;  %v5887_v29 = vsel %vm575_vm6, %v10855_v41, %v10856_v42 }
 0xb90   : > { %v16789_v1 = vsel %vm638_vm2, %v19073_v9, %v10606_v10  ;;  %v10776_v63 = vunpack.i.h.bf16 %v16483_v58  ;;  %v8924_v3 = vpack.c.bf16 %v5888_v45, %v16701_v38  ;;  %v10869_v32 = vpop.permute.xlu0 %10868  ;;  %8923 = vmatprep.subr.bf16.mxu1 %v8922_v33  ;;  %v8814_v11 = vpack.c.bf16 %v5887_v29, %v16720_v22  ;;  %v10879_v36 = vpop.permute.xlu1 %10878 }
 0xb91   : > { %v5886_v0 = vsel %vm575_vm6, %v19074_v57, %v10855_v41  ;;  %v10775_v49 = vunpack.i.l.bf16 %v16483_v58  ;;  %v10871_v43 = vunpack.i.h.bf16 %v10869_v32  ;;  %v10870_v50 = vunpack.i.l.bf16 %v10869_v32 }
 0xb92   : > { %v8816_v55 = vpack.c.bf16 %v5886_v0, %v16528_v16  ;;  %v5961_v13 = vsel %vm687_vm5, %v10865_v39, %v10866_v20  ;;  %v19075_v7 = vunpack.i.h.bf16 %v19062_v28  ;;  %v10881_v41 = vunpack.i.h.bf16 %v10879_v36  ;;  %8815 = vmatprep.subr.bf16.mxu0 %v8814_v11 }
 0xb93   : > { %v10880_v47 = vunpack.i.l.bf16 %v10879_v36  ;;  %v8818_v16 = vpack.c.bf16 %v5961_v13, %v16734_v26  ;;  %v10610_v38 = vunpack.i.l.bf16 %v16127_v61  ;;  %v10620_v22 = vunpack.i.l.bf16 %v16129_v24  ;;  %8925 = vmatpush1.bf16.msra.mxu1 %v8924_v3 }
 0xb94   : > { %v5960_v42 = vsel %vm687_vm5, %v19075_v7, %v10865_v39  ;;  %v5962_v58 = vsel %vm687_vm5, %v10866_v20, %v10870_v50  ;;  %8817 = vmatpush1.bf16.msra.mxu0 %v8816_v55  ;;  %v5963_v33 = vsel %vm687_vm5, %v10870_v50, %v10871_v43  ;;  %v10616_v9 = vunpack.i.h.bf16 %v16139_v6  ;;  %v10874_v39 = vpop.permute.xlu0 %10873  ;;  %v16817_v32 = vpop.permute.xlu1 %10883 }
 0xb95   : > { %v8928_v28 = vpack.c.bf16 %v5962_v58, %v16707_v46  ;;  %8819 = vmatprep.subr.bf16.mxu0 %v8818_v16  ;;  %v8926_v57 = vpack.c.bf16 %v5963_v33, %v16742_v21  ;;  %v6037_v26 = vsel %vm799_vm4, %v10880_v47, %v10881_v41  ;;  %v8820_v0 = vpack.c.bf16 %v5960_v42, %v16615_v35 }
 0xb96   : > { %v10876_v45 = vunpack.i.h.bf16 %v10874_v39  ;;  %v10875_v29 = vunpack.i.l.bf16 %v10874_v39  ;;  %v8930_v20 = vpack.c.bf16 %v6037_v26, %v16758_v23  ;;  %v10760_v55 = vunpack.i.l.bf16 %v16433_v12 }
 0xb97   : > { %v10885_v3 = vunpack.i.l.bf16 %v16817_v32  ;;  %8927 = vmatprep.subr.bf16.mxu1 %v8926_v57  ;;  %v6099_v46 = vsel %vm864_vm8, %v10775_v49, %v10776_v63  ;;  %v6101_v11 = vsel %vm864_vm8, %v10780_v62, %v10781_v17  ;;  %v10615_v21 = vunpack.i.l.bf16 %v16139_v6 }
 0xb98   : > { %v19076_v43 = vunpack.i.h.bf16 %v19069_v59  ;;  %v6036_v50 = vsel %vm799_vm4, %v10876_v45, %v10880_v47  ;;  %8821 = vmatpush1.bf16.msra.mxu0 %v8820_v0  ;;  %8929 = vmatpush1.bf16.msra.mxu1 %v8928_v28  ;;  %v6035_v23 = vsel %vm799_vm4, %v10875_v29, %v10876_v45  ;;  %v16837_v6 = vpop.permute.xlu0 %10888  ;;  %v10626_v7 = vunpack.i.h.bf16 %v16141_v44  ;;  %v10899_v47 = vpop.permute.xlu1 %10898 }
 0xb99   : > { %v8932_v13 = vpack.c.bf16 %v6036_v50, %v16753_v18  ;;  %v16835_v17 = vsel %vm638_vm2, %v10885_v3, %v10760_v55  ;;  %8931 = vmatprep.subr.bf16.mxu1 %v8930_v20  ;;  %v8822_v59 = vpack.c.bf16 %v6035_v23, %v16771_v37  ;;  %v10625_v42 = vunpack.i.l.bf16 %v16141_v44  ;;  %v19107_v44 = vld [vmem:[#allocation41_spill] sm:$0xff] }
 0xb9a   : > { %v6034_v35 = vsel %vm799_vm4, %v19076_v43, %v10875_v29  ;;  %v6100_v41 = vsel %vm864_vm8, %v10776_v63, %v10780_v62  ;;  %v19077_v18 = vunpack.i.h.bf16 %v15987_v25  ;;  %v10901_v58 = vunpack.i.h.bf16 %v10899_v47 }
 0xb9b   : > { %v8824_v36 = vpack.c.bf16 %v6034_v35, %v16604_v4  ;;  %v8934_v4 = vpack.c.bf16 %v6101_v11, %v16537_v54  ;;  %v10900_v33 = vunpack.i.l.bf16 %v10899_v47  ;;  %8823 = vmatprep.subr.bf16.mxu0 %v8822_v59  ;;  %v8826_v28 = vpack.c.bf16 %v6099_v46, %v16516_v34 }
 0xb9c   : > { %v6098_v16 = vsel %vm864_vm8, %v19077_v18, %v10775_v49  ;;  %v10601_v37 = vunpack.i.h.bf16 %v16111_v8  ;;  %v16850_v39 = vsel %vm19078_vm9, %v10615_v21, %v10616_v9  ;;  %8933 = vmatpush1.bf16.msra.mxu1 %v8932_v13  ;;  %v19079_v62 = vunpack.i.l.bf16 %v16120_v48  ;;  %v10894_v8 = vpop.permute.xlu0 %10893  ;;  %v10904_v29 = vpop.permute.xlu1 %10903  ;;  %v19088_v18 = vld [vmem:[#allocation110_spill] sm:$0xff]  ;;  %vm19092_vm9 = vmmov %vm19084_vm0 }
 0xb9d   : > { %8825 = vmatpush1.bf16.msra.mxu0 %v8824_v36  ;;  %v19080_v54 = vunpack.i.h.bf16 %v19012_v53  ;;  %v6245_v63 = vsel %vm638_vm2, %v10606_v10, %v10610_v38  ;;  %v10611_v49 = vunpack.i.h.bf16 %v16127_v61  ;;  %v8936_v34 = vpack.c.bf16 %v6100_v41, %v16509_v2  ;;  %8935 = vmatprep.subr.bf16.mxu1 %v8934_v4 }
 0xb9e   : > { %8827 = vmatprep.subr.bf16.mxu0 %v8826_v28  ;;  %v6175_v57 = vsel %vm750_vm3, %v10900_v33, %v10901_v58  ;;  %v16864_v26 = vsel %vm19081_vm1, %v10616_v9, %v10620_v22  ;;  %v8828_v53 = vpack.c.bf16 %v6098_v16, %v16500_v40  ;;  %v10896_v0 = vunpack.i.h.bf16 %v10894_v8  ;;  %vm19093_vm1 = vmmov %vm19084_vm0 }
 0xb9f   : > { %v6243_v25 = vsel %vm638_vm2, %v19080_v54, %v19079_v62  ;;  %v10895_v45 = vunpack.i.l.bf16 %v10894_v8  ;;  %v8938_v48 = vpack.c.bf16 %v6175_v57, %v16776_v14  ;;  %v16871_v61 = vsel %vm19082_vm13, %v10625_v42, %v10626_v7 }
 0xba0   : > { %v10906_v2 = vunpack.i.h.bf16 %v10904_v29  ;;  %v10905_v10 = vunpack.i.l.bf16 %v10904_v29  ;;  %v19083_v38 = vunpack.i.h.bf16 %v19016_v60  ;;  %v10636_v22 = vunpack.i.h.bf16 %v16151_v19  ;;  %8937 = vmatpush1.bf16.msra.mxu1 %v8936_v34  ;;  %v10909_v11 = vpop.permute.xlu0 %10908  ;;  %v10919_v36 = vpop.permute.xlu1 %10918 }
 0xba1   : > { %v6172_v40 = vsel %vm750_vm3, %v10601_v37, %v10895_v45  ;;  %v6174_v9 = vsel %vm750_vm3, %v10896_v0, %v10900_v33  ;;  %8829 = vmatpush1.bf16.msra.mxu0 %v8828_v53  ;;  %v6173_v14 = vsel %vm750_vm3, %v10895_v45, %v10896_v0  ;;  %8939 = vmatprep.subr.bf16.mxu1 %v8938_v48  ;;  %v10630_v35 = vunpack.i.l.bf16 %v16156_v27  ;;  %v19094_v0 = vld [vmem:[#allocation97_spill] sm:$0xff] }
 0xba2   : > { %v16876_v20 = vsel %vm19084_vm0, %v19083_v38, %v10615_v21  ;;  %v8832_v3 = vpack.c.bf16 %v6172_v40, %v16631_v52  ;;  %v8940_v46 = vpack.c.bf16 %v6174_v9, %v16764_v15  ;;  %v8830_v60 = vpack.c.bf16 %v6173_v14, %v16782_v31  ;;  %v19096_v38 = vld [vmem:[#allocation99_spill] sm:$0xff]  ;;  %vm19099_vm0 = vmmov %vm19086_vm12 }
 0xba3   : > { %v19085_v21 = vunpack.i.h.bf16 %v19021_v51  ;;  %v10911_v50 = vunpack.i.h.bf16 %v10909_v11  ;;  %v10910_v23 = vunpack.i.l.bf16 %v10909_v11  ;;  %v6247_v13 = vsel %vm638_vm2, %v10905_v10, %v10906_v2 }
 0xba4   : > { %v6246_v52 = vsel %vm638_vm2, %v10611_v49, %v10905_v10  ;;  %v10921_v59 = vunpack.i.h.bf16 %v10919_v36  ;;  %v10920_v15 = vunpack.i.l.bf16 %v10919_v36  ;;  %8831 = vmatprep.subr.bf16.mxu0 %v8830_v60  ;;  %v8834_v41 = vpack.c.bf16 %v6247_v13, %v6243_v25  ;;  %8941 = vmatpush1.bf16.msra.mxu1 %v8940_v46  ;;  %v10914_v33 = vpop.permute.xlu0 %10913  ;;  %v10924_v25 = vpop.permute.xlu1 %10923  ;;  %v19101_v60 = vld [vmem:[#allocation54_spill] sm:$0xff]  ;;  %v19105_v36 = vld [vmem:[#allocation39_spill] sm:$0xff] }
 0xba5   : > { %v16888_v43 = vsel %vm19086_vm12, %v19085_v21, %v10625_v42  ;;  %v10621_v31 = vunpack.i.h.bf16 %v16129_v24  ;;  %v6248_v51 = vsel %vm638_vm2, %v10906_v2, %v10910_v23  ;;  %8833 = vmatpush1.bf16.msra.mxu0 %v8832_v3  ;;  %v6249_v42 = vsel %vm638_vm2, %v10910_v23, %v10911_v50  ;;  %vm19100_vm12 = vmmov %vm19099_vm0 }
 0xba6   : > { %v19087_v47 = vunpack.i.l.bf16 %v16151_v19  ;;  %v10640_v16 = vunpack.i.l.bf16 %v19088_v18  ;;  %v8944_v58 = vpack.c.bf16 %v6248_v51, %v16789_v1  ;;  %8835 = vmatprep.subr.bf16.mxu0 %v8834_v41  ;;  %v8942_v28 = vpack.c.bf16 %v6249_v42, %v6245_v63 }
 0xba7   : > { %v6323_v24 = vsel %vm19089_vm14, %v10920_v15, %v10921_v59  ;;  %v8836_v37 = vpack.c.bf16 %v6246_v52, %v16636_v5  ;;  %v10916_v62 = vunpack.i.h.bf16 %v10914_v33  ;;  %v10915_v54 = vunpack.i.l.bf16 %v10914_v33  ;;  %vm19102_vm14 = vmmov %vm19099_vm0  ;;  %v19106_v52 = vld [vmem:[#allocation184_spill] sm:$0xff] }
 0xba8   : > { %v16899_v4 = vsel %vm1396_vm10, %v19087_v47, %v10636_v22  ;;  %v8946_v49 = vpack.c.bf16 %v6323_v24, %v16864_v26  ;;  %v19090_v19 = vunpack.i.l.bf16 %v15955_v30  ;;  %v10796_v8 = vunpack.i.h.bf16 %v16502_v56  ;;  %8943 = vmatprep.subr.bf16.mxu1 %v8942_v28  ;;  %v10929_v48 = vpop.permute.xlu0 %10928  ;;  %v10934_v3 = vpop.permute.xlu1 %10933 }
 0xba9   : > { %v10926_v1 = vunpack.i.h.bf16 %v10924_v25  ;;  %v10925_v57 = vunpack.i.l.bf16 %v10924_v25  ;;  %v10795_v63 = vunpack.i.l.bf16 %v16502_v56  ;;  %v6320_v53 = vsel %vm19091_vm15, %v10621_v31, %v10915_v54  ;;  %8837 = vmatpush1.bf16.msra.mxu0 %v8836_v37  ;;  %8945 = vmatpush1.bf16.msra.mxu1 %v8944_v58  ;;  %vm19103_vm15 = vmmov %vm19099_vm0 }
 0xbaa   : > { %v16909_v34 = vsel %vm1396_vm10, %v19090_v19, %v10630_v35  ;;  %v6322_v5 = vsel %vm19092_vm9, %v10916_v62, %v10920_v15  ;;  %v6321_v26 = vsel %vm19093_vm1, %v10915_v54, %v10916_v62  ;;  %v8840_v45 = vpack.c.bf16 %v6320_v53, %v19094_v0  ;;  %8947 = vmatprep.subr.bf16.mxu1 %v8946_v49  ;;  %vm19104_vm9 = vmmov %vm19099_vm0  ;;  %v19109_v62 = vld [vmem:[#allocation116_spill] sm:$0xff] }
 0xbab   : > { %v8948_v29 = vpack.c.bf16 %v6322_v5, %v16850_v39  ;;  %v8838_v2 = vpack.c.bf16 %v6321_v26, %v16876_v20  ;;  %v19095_v10 = vunpack.i.h.bf16 %v16156_v27  ;;  %v19097_v22 = vunpack.i.l.bf16 %v19096_v38 }
 0xbac   : > { %vm19098_vm13 = vcmask 64512   ;;  %v10931_v9 = vunpack.i.h.bf16 %v10929_v48  ;;  %v10930_v14 = vunpack.i.l.bf16 %v10929_v48  ;;  %v6395_v39 = vsel %vm19099_vm0, %v10796_v8, %v10925_v57  ;;  %v10939_v15 = vpop.permute.xlu0 %10938  ;;  %v10949_v47 = vpop.permute.xlu1 %10948 }
 0xbad   : > { %v6465_v56 = vsel %vm1396_vm10, %v10630_v35, %v19095_v10  ;;  %v16927_v40 = vsel %vm19098_vm13, %v19097_v22, %v10640_v16  ;;  %v6396_v46 = vsel %vm19100_vm12, %v10925_v57, %v10926_v1  ;;  %v10936_v11 = vunpack.i.h.bf16 %v10934_v3  ;;  %8839 = vmatprep.subr.bf16.mxu0 %v8838_v2  ;;  %8949 = vmatpush1.bf16.msra.mxu1 %v8948_v29  ;;  %vm19111_vm1 = vmmov %vm19098_vm13 }
 0xbae   : > { %v10935_v20 = vunpack.i.l.bf16 %v10934_v3  ;;  %v8842_v27 = vpack.c.bf16 %v6395_v39, %v16888_v43  ;;  %v10646_v21 = vunpack.i.h.bf16 %v19101_v60  ;;  %v6394_v35 = vsel %vm19102_vm14, %v10931_v9, %v10796_v8  ;;  %8841 = vmatpush1.bf16.msra.mxu0 %v8840_v45  ;;  %vm19114_vm13 = vmmov %vm19111_vm1  ;;  %v19124_v39 = vld [vmem:[#allocation62_spill] sm:$0xff] }
 0xbaf   : > { %v6393_v50 = vsel %vm19103_vm15, %v10626_v7, %v10795_v63  ;;  %v6397_v23 = vsel %vm19104_vm9, %v10926_v1, %v10930_v14  ;;  %v10656_v13 = vunpack.i.h.bf16 %v19105_v36  ;;  %v8844_v59 = vpack.c.bf16 %v6394_v35, %v19106_v52  ;;  %vm19115_vm0 = vmmov %vm19111_vm1  ;;  %v19126_v35 = vld [vmem:[#allocation53_spill] sm:$0xff] }
 0xbb0   : > { %8843 = vmatprep.subr.bf16.mxu0 %v8842_v27  ;;  %v8950_v41 = vpack.c.bf16 %v6397_v23, %v6393_v50  ;;  %v6469_v43 = vsel %vm1396_vm10, %v10935_v20, %v10936_v11  ;;  %v8952_v31 = vpack.c.bf16 %v6396_v46, %v16871_v61  ;;  %v10941_v51 = vunpack.i.h.bf16 %v10939_v15  ;;  %v10944_v1 = vpop.permute.xlu0 %10943  ;;  %v10954_v29 = vpop.permute.xlu1 %10953  ;;  %vm19121_vm14 = vmmov %vm19115_vm0 }
 0xbb1   : > { %v10940_v42 = vunpack.i.l.bf16 %v10939_v15  ;;  %v8846_v58 = vpack.c.bf16 %v6469_v43, %v6465_v56  ;;  %v10650_v33 = vunpack.i.l.bf16 %v19107_v44  ;;  %v19108_v7 = vunpack.i.h.bf16 %v15955_v30  ;;  %v19112_v30 = vld [vmem:[#allocation109_spill] sm:$0xff]  ;;  %vm19122_vm15 = vmmov %vm19115_vm0  ;;  %v19129_v43 = vld [vmem:[#allocation135_spill] sm:$0xff] }
 0xbb2   : > { %v10951_v24 = vunpack.i.h.bf16 %v10949_v47  ;;  %v10950_v37 = vunpack.i.l.bf16 %v10949_v47  ;;  %8951 = vmatprep.subr.bf16.mxu1 %v8950_v41  ;;  %v10481_v54 = vunpack.i.h.bf16 %v19109_v62  ;;  %8845 = vmatpush1.bf16.msra.mxu0 %v8844_v59  ;;  %v19110_v49 = vunpack.i.h.bf16 %v19088_v18  ;;  %vm19123_vm9 = vmmov %vm19115_vm0  ;;  %v19133_v47 = vld [vmem:[#allocation52_spill] sm:$0xff] }
 0xbb3   : > { %v6468_v28 = vsel %vm1396_vm10, %v19108_v7, %v10935_v20  ;;  %v6470_v25 = vsel %vm1396_vm10, %v10936_v11, %v10940_v42  ;;  %8953 = vmatpush1.bf16.msra.mxu1 %v8952_v31  ;;  %v6471_v61 = vsel %vm1396_vm10, %v10940_v42, %v10941_v51  ;;  %8847 = vmatprep.subr.bf16.mxu0 %v8846_v58  ;;  %v19113_v63 = vunpack.i.l.bf16 %v19101_v60  ;;  %v19125_v20 = vld [vmem:[#allocation51_spill] sm:$0xff] }
 0xbb4   : > { %v6539_v19 = vsel %vm19111_vm1, %v10640_v16, %v19110_v49  ;;  %v8956_v8 = vpack.c.bf16 %v6470_v25, %v19112_v30  ;;  %v8954_v57 = vpack.c.bf16 %v6471_v61, %v16899_v4  ;;  %v6545_v5 = vsel %vm19115_vm0, %v10950_v37, %v10951_v24  ;;  %v10959_v60 = vpop.permute.xlu0 %10958 }
 0xbb5   : > { %v6541_v53 = vsel %vm19114_vm13, %v19113_v63, %v10646_v21  ;;  %v8848_v26 = vpack.c.bf16 %v6468_v28, %v16909_v34  ;;  %v10946_v0 = vunpack.i.h.bf16 %v10944_v1  ;;  %v10945_v45 = vunpack.i.l.bf16 %v10944_v1 }
 0xbb6   : > { %v8958_v18 = vpack.c.bf16 %v6545_v5, %v6541_v53  ;;  %v10956_v48 = vunpack.i.h.bf16 %v10954_v29  ;;  %v10955_v16 = vunpack.i.l.bf16 %v10954_v29  ;;  %8955 = vmatprep.subr.bf16.mxu1 %v8954_v57  ;;  %v19116_v2 = vunpack.i.h.bf16 %v19107_v44 }
 0xbb7   : > { %vm19117_vm10 = vcmask 56320   ;;  %v19118_v4 = vunpack.i.l.bf16 %v19105_v36  ;;  %v10480_v22 = vunpack.i.l.bf16 %v19109_v62  ;;  %v19120_v9 = vunpack.i.h.bf16 %v19096_v38  ;;  %8849 = vmatpush1.bf16.msra.mxu0 %v8848_v26  ;;  %8957 = vmatpush1.bf16.msra.mxu1 %v8956_v8  ;;  %v10969_v36 = vpop.permute.xlu1 %10968  ;;  %v19140_v8 = vld [vmem:[#allocation43_spill] sm:$0xff] }
 0xbb8   : > { %v6613_v10 = vsel %vm19117_vm10, %v10650_v33, %v19116_v2  ;;  %vm19119_vm12 = vmmov %vm19117_vm10  ;;  %v6544_v14 = vsel %vm19122_vm15, %v10946_v0, %v10950_v37  ;;  %v6543_v3 = vsel %vm19123_vm9, %v10945_v45, %v10946_v0  ;;  %v10666_v46 = vunpack.i.h.bf16 %v19124_v39  ;;  %8959 = vmatprep.subr.bf16.mxu1 %v8958_v18  ;;  %v10964_v44 = vpop.permute.xlu0 %10963  ;;  %v19145_v0 = vld [vmem:[#allocation59_spill] sm:$0xff] }
 0xbb9   : > { %v6615_v56 = vsel %vm19119_vm12, %v19118_v4, %v10656_v13  ;;  %v6542_v34 = vsel %vm19121_vm14, %v19120_v9, %v10945_v45  ;;  %v8960_v27 = vpack.c.bf16 %v6544_v14, %v19125_v20  ;;  %v8850_v21 = vpack.c.bf16 %v6543_v3, %v6539_v19  ;;  %vm19127_vm1 = vmmov %vm19117_vm10  ;;  %v19148_v4 = vld [vmem:[#allocation152_spill] sm:$0xff]  ;;  %v19150_v9 = vld [vmem:[#allocation153_spill] sm:$0xff] }
 0xbba   : > { %v8852_v11 = vpack.c.bf16 %v6542_v34, %v16927_v40  ;;  %v10660_v50 = vunpack.i.l.bf16 %v19126_v35  ;;  %v10961_v38 = vunpack.i.h.bf16 %v10959_v60  ;;  %v10960_v23 = vunpack.i.l.bf16 %v10959_v60  ;;  %vm19128_vm13 = vmmov %vm19127_vm1  ;;  %v19151_v14 = vld [vmem:[#allocation178_spill] sm:$0xff]  ;;  %v19152_v3 = vld [vmem:[#allocation171_spill] sm:$0xff] }
 0xbbb   : > { %v6617_v13 = vsel %vm19127_vm1, %v10955_v16, %v10956_v48  ;;  %v6616_v52 = vsel %vm19128_vm13, %v10481_v54, %v10955_v16  ;;  %v10971_v59 = vunpack.i.h.bf16 %v10969_v36  ;;  %v10970_v15 = vunpack.i.l.bf16 %v10969_v36  ;;  %8851 = vmatprep.subr.bf16.mxu0 %v8850_v21  ;;  %vm19130_vm0 = vmmov %vm19127_vm1  ;;  %8961 = vmatpush1.bf16.msra.mxu1 %v8960_v27  ;;  %v16988_v25 = vpop.permute.xlu1 %10973  ;;  %v19154_v20 = vld [vmem:[#allocation30_spill] sm:$0xff] }
 0xbbc   : > { %v8854_v41 = vpack.c.bf16 %v6617_v13, %v6613_v10  ;;  %v10485_v40 = vunpack.i.l.bf16 %v19129_v43  ;;  %v6612_v31 = vsel %vm19130_vm0, %v10480_v22, %v10650_v33  ;;  %vm19131_vm10 = vmmov %vm19130_vm0  ;;  %8853 = vmatpush1.bf16.msra.mxu0 %v8852_v11  ;;  %v19134_v28 = vunpack.i.l.bf16 %v19124_v39  ;;  %v17001_v29 = vpop.permute.xlu0 %10978  ;;  %v19147_v10 = vld [vmem:[#allocation138_spill] sm:$0xff]  ;;  %v19149_v22 = vld [vmem:[#allocation144_spill] sm:$0xff] }
 0xbbd   : > { %v6618_v51 = vsel %vm19131_vm10, %v10956_v48, %v10960_v23  ;;  %vm19132_vm12 = vmmov %vm19130_vm0  ;;  %vm19135_vm14 = vcmask 7168   ;;  %v8856_v62 = vpack.c.bf16 %v6616_v52, %v6612_v31  ;;  %v10966_v54 = vunpack.i.h.bf16 %v10964_v44  ;;  %v19146_v48 = vld [vmem:[#allocation47_spill] sm:$0xff]  ;;  %v19165_v31 = vld [vmem:[#allocation61_spill] sm:$0xff] }
 0xbbe   : > { %v6619_v42 = vsel %vm19132_vm12, %v10960_v23, %v10961_v38  ;;  %v8964_v58 = vpack.c.bf16 %v6618_v51, %v19133_v47  ;;  %8855 = vmatprep.subr.bf16.mxu0 %v8854_v41  ;;  %v6689_v24 = vsel %vm19135_vm14, %v19134_v28, %v10666_v46  ;;  %vm19136_vm15 = vmmov %vm19135_vm14  ;;  %v10965_v33 = vunpack.i.l.bf16 %v10964_v44  ;;  %v19153_v46 = vld [vmem:[#allocation71_spill] sm:$0xff]  ;;  %v19157_v23 = vld [vmem:[#allocation45_spill] sm:$0xff] }
 0xbbf   : > { %v8962_v7 = vpack.c.bf16 %v6619_v42, %v6615_v56  ;;  %v6693_v37 = vsel %vm19136_vm15, %v10970_v15, %v10971_v59  ;;  %vm19137_vm9 = vmmov %vm19135_vm14  ;;  %v19138_v19 = vunpack.i.h.bf16 %v19126_v35  ;;  %v10676_v1 = vunpack.i.h.bf16 %v19140_v8  ;;  %v10984_v2 = vpop.permute.xlu1 %10983  ;;  %v19155_v35 = vld [vmem:[#allocation177_spill] sm:$0xff] }
 0xbc0   : > { %v8966_v61 = vpack.c.bf16 %v6693_v37, %v6689_v24  ;;  %v6686_v49 = vsel %vm19137_vm9, %v10485_v40, %v10660_v50  ;;  %vm19139_vm1 = vmmov %vm19137_vm9  ;;  %v19141_v57 = vunpack.i.h.bf16 %v19129_v43  ;;  %8857 = vmatpush1.bf16.msra.mxu0 %v8856_v62  ;;  %v10686_v16 = vunpack.i.h.bf16 %v19146_v48  ;;  %v10989_v43 = vpop.permute.xlu0 %10988 }
 0xbc1   : > { %8963 = vmatprep.subr.bf16.mxu1 %v8962_v7  ;;  %v6687_v30 = vsel %vm19139_vm1, %v10660_v50, %v19138_v19  ;;  %vm19142_vm13 = vmmov %vm19139_vm1  ;;  %v8862_v56 = vpack.c.bf16 %v19148_v4, %v19147_v10  ;;  %v8970_v34 = vpack.c.bf16 %v19150_v9, %v19149_v22  ;;  %v8864_v39 = vpack.c.bf16 %v19152_v3, %v19151_v14  ;;  %v19156_v50 = vld [vmem:[#allocation147_spill] sm:$0xff] }
 0xbc2   : > { %v6690_v63 = vsel %vm19142_vm13, %v19141_v57, %v10965_v33  ;;  %vm19143_vm0 = vmmov %vm19139_vm1  ;;  %8965 = vmatpush1.bf16.msra.mxu1 %v8964_v58  ;;  %v10696_v11 = vunpack.i.h.bf16 %v19153_v46  ;;  %v10801_v27 = vunpack.i.h.bf16 %v19154_v20  ;;  %v10986_v60 = vunpack.i.h.bf16 %v10984_v2  ;;  %v19169_v58 = vld [vmem:[#allocation92_spill] sm:$0xff] }
 0xbc3   : > { %v6692_v53 = vsel %vm19143_vm0, %v10966_v54, %v10970_v15  ;;  %vm19144_vm10 = vmmov %vm19143_vm0  ;;  %v8860_v26 = vpack.c.bf16 %v6690_v63, %v6686_v49  ;;  %8967 = vmatprep.subr.bf16.mxu1 %v8966_v61  ;;  %v10985_v21 = vunpack.i.l.bf16 %v10984_v2  ;;  %v8972_v38 = vpack.c.bf16 %v19156_v50, %v19155_v35  ;;  %v10999_v24 = vpop.permute.xlu1 %10998  ;;  %v19183_v2 = vld [vmem:[#allocation96_spill] sm:$0xff] }
 0xbc4   : > { %v6691_v5 = vsel %vm19144_vm10, %v10965_v33, %v10966_v54  ;;  %v8968_v45 = vpack.c.bf16 %v6692_v53, %v19145_v0  ;;  %v19158_v36 = vunpack.i.h.bf16 %v19157_v23  ;;  %v19159_v13 = vunpack.i.l.bf16 %v19157_v23  ;;  %v19181_v0 = vld [vmem:[#allocation60_spill] sm:$0xff]  ;;  %v19192_v23 = vld [vmem:[#allocation91_spill] sm:$0xff] }
 0xbc5   : > { %v8858_v18 = vpack.c.bf16 %v6691_v5, %v6687_v30  ;;  %vm19160_vm12 = vcmask 1039360   ;;  %v19161_v59 = vunpack.i.l.bf16 %v19140_v8  ;;  %v19166_v51 = vunpack.i.h.bf16 %v19165_v31  ;;  %v19180_v5 = vld [vmem:[#allocation70_spill] sm:$0xff] }
 0xbc6   : > { %8969 = vmatpush1.bf16.msra.mxu1 %v8968_v45  ;;  %v6777_v52 = vsel %vm19160_vm12, %v19159_v13, %v19158_v36  ;;  %vm19162_vm14 = vmmov %vm19160_vm12  ;;  %v19167_v42 = vunpack.i.l.bf16 %v19165_v31  ;;  %vm19168_vm1 = vcmask 990208   ;;  %v10991_v7 = vunpack.i.h.bf16 %v10989_v43  ;;  %v19193_v13 = vld [vmem:[#allocation65_spill] sm:$0xff] }
 0xbc7   : > { %8859 = vmatprep.subr.bf16.mxu0 %v8858_v18  ;;  %v6779_v15 = vsel %vm19162_vm14, %v19161_v59, %v10676_v1  ;;  %vm19163_vm15 = vmmov %vm19160_vm12  ;;  %8971 = vmatprep.subr.bf16.mxu1 %v8970_v34  ;;  %v10990_v28 = vunpack.i.l.bf16 %v10989_v43  ;;  %v11001_v62 = vunpack.i.h.bf16 %v10999_v24  ;;  %v11000_v54 = vunpack.i.l.bf16 %v10999_v24  ;;  %v19176_v1 = vld [vmem:[#allocation68_spill] sm:$0xff]  ;;  %v10994_v18 = vpop.permute.xlu0 %10993  ;;  %v11004_v22 = vpop.permute.xlu1 %11003  ;;  %v19184_v34 = vld [vmem:[#allocation74_spill] sm:$0xff] }
 0xbc8   : > { %8861 = vmatpush1.bf16.msra.mxu0 %v8860_v26  ;;  %v6780_v41 = vsel %vm19163_vm15, %v10801_v27, %v10985_v21  ;;  %vm19164_vm9 = vmmov %vm19160_vm12  ;;  %v6851_v47 = vsel %vm19168_vm1, %v19167_v42, %v19166_v51  ;;  %v19170_v33 = vunpack.i.l.bf16 %v19146_v48  ;;  %v19172_v49 = vunpack.i.l.bf16 %v19153_v46  ;;  %v19185_v46 = vld [vmem:[#allocation56_spill] sm:$0xff]  ;;  %v19195_v43 = vld [vmem:[#allocation95_spill] sm:$0xff] }
 0xbc9   : > { %8863 = vmatprep.subr.bf16.mxu0 %v8862_v56  ;;  %v6781_v40 = vsel %vm19164_vm9, %v10985_v21, %v10986_v60  ;;  %v8868_v44 = vpack.c.bf16 %v6780_v41, %v19169_v58  ;;  %vm19171_vm13 = vmmov %vm19168_vm1  ;;  %vm19173_vm0 = vcmask 982016   ;;  %v19177_v57 = vunpack.i.h.bf16 %v19176_v1 }
 0xbca   : > { %v8866_v37 = vpack.c.bf16 %v6781_v40, %v6777_v52  ;;  %v6853_v61 = vsel %vm19171_vm13, %v19170_v33, %v10686_v16  ;;  %v17036_v19 = vsel %vm19173_vm0, %v19172_v49, %v10696_v11  ;;  %vm19174_vm10 = vmmov %vm19164_vm9  ;;  %8973 = vmatpush1.bf16.msra.mxu1 %v8972_v38  ;;  %v19178_v63 = vunpack.i.l.bf16 %v19176_v1 }
 0xbcb   : > { %v6782_v30 = vsel %vm19174_vm10, %v10986_v60, %v10990_v28  ;;  %vm19175_vm12 = vmmov %vm19164_vm9  ;;  %v10706_v26 = vunpack.i.h.bf16 %v19180_v5  ;;  %v10806_v10 = vunpack.i.h.bf16 %v19183_v2  ;;  %v10996_v4 = vunpack.i.h.bf16 %v10994_v18  ;;  %v19189_v60 = vld [vmem:[#allocation78_spill] sm:$0xff]  ;;  %v11019_v42 = vpop.permute.xlu1 %11018 }
 0xbcc   : > { %8865 = vmatpush1.bf16.msra.mxu0 %v8864_v39  ;;  %v6783_v8 = vsel %vm19175_vm12, %v10990_v28, %v10991_v7  ;;  %vm19179_vm14 = vmmov %vm19173_vm0  ;;  %v8976_v45 = vpack.c.bf16 %v6782_v30, %v19181_v0  ;;  %v10995_v56 = vunpack.i.l.bf16 %v10994_v18  ;;  %v10811_v14 = vunpack.i.h.bf16 %v19184_v34  ;;  %v19208_v18 = vld [vmem:[#allocation31_spill] sm:$0xff] }
 0xbcd   : > { %v6925_v53 = vsel %vm19179_vm14, %v19178_v63, %v19177_v57  ;;  %8867 = vmatprep.subr.bf16.mxu0 %v8866_v37  ;;  %v8974_v48 = vpack.c.bf16 %v6783_v8, %v6779_v15  ;;  %vm19182_vm15 = vmmov %vm19168_vm1  ;;  %v11006_v3 = vunpack.i.h.bf16 %v11004_v22  ;;  %v11005_v39 = vunpack.i.l.bf16 %v11004_v22  ;;  %v11009_v15 = vpop.permute.xlu0 %11008  ;;  %v19203_v8 = vld [vmem:[#allocation49_spill] sm:$0xff] }
 0xbce   : > { %v6857_v16 = vsel %vm19182_vm15, %v11000_v54, %v11001_v62  ;;  %v19186_v11 = vunpack.i.h.bf16 %v19185_v46  ;;  %v19187_v20 = vunpack.i.l.bf16 %v19185_v46  ;;  %vm19188_vm9 = vcmask 973824   ;;  %vm19190_vm13 = vmmov %vm19168_vm1  ;;  %v19199_v62 = vld [vmem:[#allocation98_spill] sm:$0xff] }
 0xbcf   : > { %v8978_v9 = vpack.c.bf16 %v6857_v16, %v6853_v61  ;;  %8975 = vmatprep.subr.bf16.mxu1 %v8974_v48  ;;  %v10716_v21 = vunpack.i.h.bf16 %v19189_v60  ;;  %v6854_v35 = vsel %vm19168_vm1, %v10806_v10, %v10995_v56  ;;  %v6856_v50 = vsel %vm19190_vm13, %v10996_v4, %v11000_v54  ;;  %vm19191_vm0 = vmmov %vm19168_vm1  ;;  %v7678_v61 = vld [vmem:[#allocation12] sm:$0xff]  ;;  %v11024_v10 = vpop.permute.xlu1 %11023 }
 0xbd0   : > { %v17055_v27 = vsel %vm19188_vm9, %v19187_v20, %v19186_v11  ;;  %8869 = vmatpush1.bf16.msra.mxu0 %v8868_v44  ;;  %8977 = vmatpush1.bf16.msra.mxu1 %v8976_v45  ;;  %v6855_v38 = vsel %vm19191_vm0, %v10995_v56, %v10996_v4  ;;  %v8872_v36 = vpack.c.bf16 %v6854_v35, %v19192_v23  ;;  %vm19194_vm10 = vmmov %vm19179_vm14  ;;  %v11011_v31 = vunpack.i.h.bf16 %v11009_v15  ;;  %v19209_v56 = vld [vmem:[#allocation85_spill] sm:$0xff] }
 0xbd1   : > { %v8980_v52 = vpack.c.bf16 %v6856_v50, %v19193_v13  ;;  %v6928_v59 = vsel %vm19194_vm10, %v10811_v14, %v11005_v39  ;;  %8979 = vmatprep.subr.bf16.mxu1 %v8978_v9  ;;  %v8870_v41 = vpack.c.bf16 %v6855_v38, %v6851_v47  ;;  %v11010_v51 = vunpack.i.l.bf16 %v11009_v15  ;;  %vm19196_vm12 = vmmov %vm19194_vm10  ;;  %v11014_v57 = vpop.permute.xlu0 %11013  ;;  %v19210_v9 = vld [vmem:[#allocation141_spill] sm:$0xff] }
 0xbd2   : > { %v8876_v40 = vpack.c.bf16 %v6928_v59, %v19195_v43  ;;  %v6929_v58 = vsel %vm19196_vm12, %v11005_v39, %v11006_v3  ;;  %v11021_v44 = vunpack.i.h.bf16 %v11019_v42  ;;  %v11020_v7 = vunpack.i.l.bf16 %v11019_v42  ;;  %vm19198_vm14 = vmmov %vm19188_vm9  ;;  %v19211_v39 = vld [vmem:[#allocation89_spill] sm:$0xff] }
 0xbd3   : > { %8871 = vmatprep.subr.bf16.mxu0 %v8870_v41  ;;  %v8874_v28 = vpack.c.bf16 %v6929_v58, %v6925_v53  ;;  %v19197_v24 = vunpack.i.l.bf16 %v19180_v5  ;;  %v10506_v54 = vunpack.i.h.bf16 %v19199_v62  ;;  %vm19200_vm15 = vmmov %vm19194_vm10  ;;  %v19202_v49 = vunpack.i.l.bf16 %v19189_v60  ;;  %v19205_v5 = vld [vmem:[#allocation80_spill] sm:$0xff]  ;;  %v19216_v50 = vld [vmem:[#allocation81_spill] sm:$0xff]  ;;  %v11039_v43 = vpop.permute.xlu1 %11038 }
 0xbd4   : > { %v6930_v33 = vsel %vm19200_vm15, %v11006_v3, %v11010_v51  ;;  %8873 = vmatpush1.bf16.msra.mxu0 %v8872_v36  ;;  %8981 = vmatpush1.bf16.msra.mxu1 %v8980_v52  ;;  %vm19201_vm9 = vmmov %vm19194_vm10  ;;  %v19207_v0 = vunpack.i.l.bf16 %v19205_v5  ;;  %v10816_v48 = vunpack.i.h.bf16 %v19208_v18  ;;  %v11016_v16 = vunpack.i.h.bf16 %v11014_v57  ;;  %v7681_v3 = vld [vmem:[#allocation12 + $0x18] sm:$0xff]  ;;  %v19217_v52 = vld [vmem:[#allocation64_spill] sm:$0xff] }
 0xbd5   : > { %v7001_v37 = vsel %vm19198_vm14, %v19197_v24, %v10706_v26  ;;  %v6931_v47 = vsel %vm19201_vm9, %v11010_v51, %v11011_v31  ;;  %v17075_v30 = vsel %vm463_vm7, %v19202_v49, %v10716_v21  ;;  %v8984_v1 = vpack.c.bf16 %v6930_v33, %v19203_v8  ;;  %8875 = vmatprep.subr.bf16.mxu0 %v8874_v28  ;;  %vm19204_vm1 = vmmov %vm19198_vm14  ;;  %v19215_v21 = vld [vmem:[#allocation37_spill] sm:$0xff]  ;;  %v11029_v36 = vpop.permute.xlu0 %11028  ;;  %v19218_v58 = vld [vmem:[#allocation84_spill] sm:$0xff] }
 0xbd6   : > { %v8982_v63 = vpack.c.bf16 %v6931_v47, %v17036_v19  ;;  %v7005_v53 = vsel %vm19204_vm1, %v11020_v7, %v11021_v44  ;;  %v19206_v26 = vunpack.i.h.bf16 %v19205_v5  ;;  %v11015_v2 = vunpack.i.l.bf16 %v11014_v57  ;;  %vm19212_vm13 = vmmov %vm19204_vm1  ;;  %v19223_v49 = vld [vmem:[#allocation133_spill] sm:$0xff] }
 0xbd7   : > { %v8986_v4 = vpack.c.bf16 %v7005_v53, %v7001_v37  ;;  %v10726_v22 = vunpack.i.h.bf16 %v19209_v56  ;;  %v10821_v34 = vunpack.i.h.bf16 %v19210_v9  ;;  %v11026_v14 = vunpack.i.h.bf16 %v11024_v10  ;;  %7970 = vmatmul.mubr.f32.vlgmr.msra.gmra.mrb[8].mxu0 %v7678_v61  ;;  %vm19213_vm0 = vmmov %vm19204_vm1  ;;  %8112 = vmatmul.mubr.f32.vlgmr.msra.gmra.mrb[8].mxu1 %v7678_v61 }
 0xbd8   : > { %v7073_v45 = vsel %vm463_vm7, %v19207_v0, %v19206_v26  ;;  %v11025_v19 = vunpack.i.l.bf16 %v11024_v10  ;;  %8983 = vmatprep.subr.bf16.mxu1 %v8982_v63  ;;  %v10736_v46 = vunpack.i.h.bf16 %v19211_v39  ;;  %v7002_v11 = vsel %vm19212_vm13, %v10816_v48, %v11015_v2  ;;  %8877 = vmatpush1.bf16.msra.mxu0 %v8876_v40  ;;  %vm19214_vm10 = vmmov %vm19213_vm0  ;;  %v19225_v26 = vld [vmem:[#allocation183_spill] sm:$0xff]  ;;  %v11044_v48 = vpop.permute.xlu1 %11043 }
 0xbd9   : > { %v7004_v20 = vsel %vm19213_vm0, %v11016_v16, %v11020_v7  ;;  %v7003_v60 = vsel %vm19214_vm10, %v11015_v2, %v11016_v16  ;;  %v8880_v35 = vpack.c.bf16 %v7002_v11, %v19215_v21  ;;  %8985 = vmatpush1.bf16.msra.mxu1 %v8984_v1  ;;  %v11031_v15 = vunpack.i.h.bf16 %v11029_v36  ;;  %8369 = vmatprep.mubr.msk.f32.mxu0 %vm2953_vm11, %v7681_v3  ;;  %v19224_v1 = vld [vmem:[#allocation82_spill] sm:$0xff]  ;;  %v11034_v63 = vpop.permute.xlu0 %11033  ;;  %v19231_v11 = vld [vmem:[#allocation140_spill] sm:$0xff] }
 0xbda   : > { %v8988_v38 = vpack.c.bf16 %v7004_v20, %v19216_v50  ;;  %v7076_v23 = vsel %vm463_vm7, %v10821_v34, %v11025_v19  ;;  %v8878_v13 = vpack.c.bf16 %v7003_v60, %v17055_v27  ;;  %v11030_v41 = vunpack.i.l.bf16 %v11029_v36  ;;  %8987 = vmatprep.subr.bf16.mxu1 %v8986_v4  ;;  %8370 = vmatprep.mubr.msk.f32.mxu1 %vm2953_vm11, %v7681_v3  ;;  %v19226_v2 = vld [vmem:[#allocation142_spill] sm:$0xff]  ;;  %v19232_v60 = vld [vmem:[#allocation83_spill] sm:$0xff] }
 0xbdb   : > { %v8884_v59 = vpack.c.bf16 %v7076_v23, %v19217_v52  ;;  %v7077_v40 = vsel %vm463_vm7, %v11025_v19, %v11026_v14  ;;  %v11041_v31 = vunpack.i.h.bf16 %v11039_v43  ;;  %v11040_v51 = vunpack.i.l.bf16 %v11039_v43  ;;  %v19233_v23 = vld [vmem:[#allocation29_spill] sm:$0xff] }
 0xbdc   : > { %8879 = vmatprep.subr.bf16.mxu0 %v8878_v13  ;;  %v8882_v42 = vpack.c.bf16 %v7077_v40, %v7073_v45  ;;  %v19219_v44 = vunpack.i.h.bf16 %v19218_v58  ;;  %v19220_v7 = vunpack.i.l.bf16 %v19218_v58  ;;  %v7078_v28 = vsel %vm463_vm7, %v11026_v14, %v11030_v41 }
 0xbdd   : > { %8881 = vmatpush1.bf16.msra.mxu0 %v8880_v35  ;;  %v7079_v24 = vsel %vm463_vm7, %v11030_v41, %v11031_v15  ;;  %v19221_v37 = vunpack.i.l.bf16 %v19209_v56  ;;  %v19222_v47 = vunpack.i.l.bf16 %v19211_v39  ;;  %v10511_v8 = vunpack.i.h.bf16 %v19223_v49  ;;  %8989 = vmatpush1.bf16.msra.mxu1 %v8988_v38  ;;  %v11049_v50 = vpop.permute.xlu0 %11048  ;;  %v11059_v15 = vpop.permute.xlu1 %11058 }
 0xbde   : > { %v7147_v27 = vsel %vm575_vm6, %v19220_v7, %v19219_v44  ;;  %v8992_v57 = vpack.c.bf16 %v7078_v28, %v19224_v1  ;;  %8883 = vmatprep.subr.bf16.mxu0 %v8882_v42  ;;  %v8990_v53 = vpack.c.bf16 %v7079_v24, %v17075_v30  ;;  %v7153_v5 = vsel %vm575_vm6, %v11040_v51, %v11041_v31  ;;  %v19230_v30 = vld [vmem:[#allocation88_spill] sm:$0xff] }
 0xbdf   : > { %v7149_v33 = vsel %vm575_vm6, %v19221_v37, %v10726_v22  ;;  %v7223_v61 = vsel %vm687_vm5, %v19222_v47, %v10736_v46  ;;  %v10826_v0 = vunpack.i.h.bf16 %v19225_v26  ;;  %v11036_v45 = vunpack.i.h.bf16 %v11034_v63  ;;  %v19227_v22 = vld [vmem:[#allocation87_spill] sm:$0xff]  ;;  %v19239_v47 = vld [vmem:[#allocation86_spill] sm:$0xff] }
 0xbe0   : > { %v11035_v18 = vunpack.i.l.bf16 %v11034_v63  ;;  %v8994_v16 = vpack.c.bf16 %v7153_v5, %v7149_v33  ;;  %v10831_v10 = vunpack.i.h.bf16 %v19226_v2  ;;  %v11046_v4 = vunpack.i.h.bf16 %v11044_v48  ;;  %8991 = vmatprep.subr.bf16.mxu1 %v8990_v53  ;;  %v19240_v5 = vld [vmem:[#allocation143_spill] sm:$0xff] }
 0xbe1   : > { %v11045_v56 = vunpack.i.l.bf16 %v11044_v48  ;;  %v19228_v9 = vunpack.i.h.bf16 %v19227_v22  ;;  %v19229_v34 = vunpack.i.l.bf16 %v19227_v22  ;;  %v10746_v19 = vunpack.i.h.bf16 %v19230_v30  ;;  %8885 = vmatpush1.bf16.msra.mxu0 %v8884_v59  ;;  %8993 = vmatpush1.bf16.msra.mxu1 %v8992_v57  ;;  %v19234_v59 = vld [vmem:[#allocation32_spill] sm:$0xff]  ;;  %v11054_v57 = vpop.permute.xlu0 %11053 }
 0xbe2   : > { %v7150_v3 = vsel %vm575_vm6, %v10826_v0, %v11035_v18  ;;  %v7152_v39 = vsel %vm575_vm6, %v11036_v45, %v11040_v51  ;;  %v7151_v46 = vsel %vm575_vm6, %v11035_v18, %v11036_v45  ;;  %v11051_v13 = vunpack.i.h.bf16 %v11049_v50  ;;  %8995 = vmatprep.subr.bf16.mxu1 %v8994_v16  ;;  %v17148_v18 = vpop.permute.xlu1 %11063  ;;  %v19241_v16 = vld [vmem:[#allocation23_spill] sm:$0xff] }
 0xbe3   : > { %v7221_v14 = vsel %vm687_vm5, %v19229_v34, %v19228_v9  ;;  %v8888_v20 = vpack.c.bf16 %v7150_v3, %v19231_v11  ;;  %v8996_v21 = vpack.c.bf16 %v7152_v39, %v19232_v60  ;;  %v7224_v35 = vsel %vm687_vm5, %v10831_v10, %v11045_v56  ;;  %v19242_v10 = vld [vmem:[#allocation26_spill] sm:$0xff]  ;;  %v19247_v11 = vld [vmem:[#allocation76_spill] sm:$0xff] }
 0xbe4   : > { %v8886_v38 = vpack.c.bf16 %v7151_v46, %v7147_v27  ;;  %v8892_v36 = vpack.c.bf16 %v7224_v35, %v19233_v23  ;;  %v11050_v52 = vunpack.i.l.bf16 %v11049_v50  ;;  %v7225_v41 = vsel %vm687_vm5, %v11045_v56, %v11046_v4  ;;  %v19236_v27 = vld [vmem:[#allocation79_spill] sm:$0xff]  ;;  %v19243_v56 = vld [vmem:[#allocation34_spill] sm:$0xff]  ;;  %v19248_v60 = vld [vmem:[#allocation24_spill] sm:$0xff] }
 0xbe5   : > { %v10791_v43 = vunpack.i.h.bf16 %v19234_v59  ;;  %v11061_v40 = vunpack.i.h.bf16 %v11059_v15  ;;  %v11060_v31 = vunpack.i.l.bf16 %v11059_v15  ;;  %v8890_v51 = vpack.c.bf16 %v7225_v41, %v7221_v14  ;;  %8997 = vmatpush1.bf16.msra.mxu1 %v8996_v21  ;;  %v17167_v35 = vpop.permute.xlu0 %11068  ;;  %v19250_v15 = vld [vmem:[#allocation22_spill] sm:$0xff] }
 0xbe6   : > { %8887 = vmatprep.subr.bf16.mxu0 %v8886_v38  ;;  %v7226_v42 = vsel %vm687_vm5, %v11046_v4, %v11050_v52  ;;  %v7227_v58 = vsel %vm687_vm5, %v11050_v52, %v11051_v13  ;;  %v19235_v44 = vunpack.i.l.bf16 %v19230_v30  ;;  %v19237_v28 = vunpack.i.h.bf16 %v19236_v27  ;;  %v11079_v23 = vpop.permute.xlu1 %11078 }
 0xbe7   : > { %8889 = vmatpush1.bf16.msra.mxu0 %v8888_v20  ;;  %v19238_v24 = vunpack.i.l.bf16 %v19236_v27  ;;  %v10510_v33 = vunpack.i.l.bf16 %v19223_v49  ;;  %v9000_v1 = vpack.c.bf16 %v7226_v42, %v19239_v47  ;;  %v8998_v63 = vpack.c.bf16 %v7227_v58, %v7223_v61  ;;  %v19254_v58 = vld [vmem:[#allocation35_spill] sm:$0xff] }
 0xbe8   : > { %v7297_v7 = vsel %vm799_vm4, %v19235_v44, %v10746_v19  ;;  %8891 = vmatprep.subr.bf16.mxu0 %v8890_v51  ;;  %v7301_v53 = vsel %vm799_vm4, %v11060_v31, %v11061_v40  ;;  %v10836_v26 = vunpack.i.h.bf16 %v19240_v5  ;;  %v11056_v0 = vunpack.i.h.bf16 %v11054_v57 }
 0xbe9   : > { %v7295_v37 = vsel %vm799_vm4, %v19238_v24, %v19237_v28  ;;  %v11055_v45 = vunpack.i.l.bf16 %v11054_v57  ;;  %v9002_v48 = vpack.c.bf16 %v7301_v53, %v7297_v7  ;;  %v10756_v2 = vunpack.i.h.bf16 %v19241_v16  ;;  %8999 = vmatprep.subr.bf16.mxu1 %v8998_v63  ;;  %v19257_v28 = vld [vmem:[#allocation28_spill] sm:$0xff] }
 0xbea   : > { %v10766_v4 = vunpack.i.h.bf16 %v19242_v10  ;;  %v19244_v22 = vunpack.i.h.bf16 %v19243_v56  ;;  %v19245_v9 = vunpack.i.l.bf16 %v19243_v56  ;;  %v19246_v34 = vunpack.i.l.bf16 %v19234_v59  ;;  %9001 = vmatpush1.bf16.msra.mxu1 %v9000_v1  ;;  %v11084_v63 = vpop.permute.xlu1 %11083 }
 0xbeb   : > { %v10891_v30 = vunpack.i.h.bf16 %v16837_v6  ;;  %v7298_v19 = vsel %vm799_vm4, %v10836_v26, %v11055_v45  ;;  %v7300_v3 = vsel %vm799_vm4, %v11056_v0, %v11060_v31  ;;  %8893 = vmatpush1.bf16.msra.mxu0 %v8892_v36  ;;  %v7299_v39 = vsel %vm799_vm4, %v11055_v45, %v11056_v0  ;;  %9003 = vmatprep.subr.bf16.mxu1 %v9002_v48 }
 0xbec   : > { %v7363_v61 = vsel %vm864_vm8, %v19245_v9, %v19244_v22  ;;  %v7365_v14 = vsel %vm864_vm8, %v19246_v34, %v10791_v43  ;;  %v10890_v46 = vunpack.i.l.bf16 %v16837_v6  ;;  %v8896_v20 = vpack.c.bf16 %v7298_v19, %v19247_v11  ;;  %v19262_v22 = vld [vmem:[#allocation93_spill] sm:$0xff] }
 0xbed   : > { %v9004_v21 = vpack.c.bf16 %v7300_v3, %v19248_v60  ;;  %v8894_v50 = vpack.c.bf16 %v7299_v39, %v7295_v37  ;;  %v7360_v38 = vsel %vm864_vm8, %v10506_v54, %v10510_v33  ;;  %v19249_v36 = vunpack.i.l.bf16 %v19199_v62 }
 0xbee   : > { %v7361_v52 = vsel %vm864_vm8, %v10510_v33, %v10511_v8  ;;  %v19251_v41 = vunpack.i.h.bf16 %v19250_v15  ;;  %v19252_v59 = vunpack.i.l.bf16 %v19250_v15  ;;  %v11081_v40 = vunpack.i.h.bf16 %v11079_v23  ;;  %v11074_v33 = vpop.permute.xlu0 %11073 }
 0xbef   : > { %v7359_v13 = vsel %vm864_vm8, %v19249_v36, %v10506_v54  ;;  %v11080_v31 = vunpack.i.l.bf16 %v11079_v23  ;;  %8895 = vmatprep.subr.bf16.mxu0 %v8894_v50  ;;  %v19253_v42 = vunpack.i.l.bf16 %v19241_v16  ;;  %v9008_v54 = vpack.c.bf16 %v19254_v58, %v7360_v38  ;;  %9005 = vmatpush1.bf16.msra.mxu1 %v9004_v21 }
 0xbf0   : > { %v7433_v43 = vsel %vm750_vm3, %v19252_v59, %v19251_v41  ;;  %v8898_v51 = vpack.c.bf16 %v7363_v61, %v7359_v13  ;;  %8897 = vmatpush1.bf16.msra.mxu0 %v8896_v20  ;;  %v9006_v49 = vpack.c.bf16 %v7365_v14, %v7361_v52  ;;  %v19255_v8 = vunpack.i.h.bf16 %v16433_v12  ;;  %v19263_v61 = vld [vmem:[#allocation25_spill] sm:$0xff]  ;;  %v11099_v20 = vpop.permute.xlu1 %11098  ;;  %v19266_v41 = vld [vmem:[#allocation27_spill] sm:$0xff] }
 0xbf1   : > { %v7435_v62 = vsel %vm750_vm3, %v19253_v42, %v10756_v2  ;;  %v19256_v7 = vunpack.i.l.bf16 %v19242_v10  ;;  %v10841_v24 = vunpack.i.h.bf16 %v19257_v28  ;;  %v10886_v37 = vunpack.i.h.bf16 %v16817_v32  ;;  %v19259_v2 = vld [vmem:[#allocation94_spill] sm:$0xff]  ;;  %v19260_v10 = vld [vmem:[#allocation33_spill] sm:$0xff] }
 0xbf2   : > { %v7507_v44 = vsel %vm638_vm2, %v10760_v55, %v19255_v8  ;;  %8899 = vmatprep.subr.bf16.mxu0 %v8898_v51  ;;  %v7439_v47 = vsel %vm750_vm3, %v11080_v31, %v11081_v40  ;;  %vm19258_vm4 = vcmask 457728   ;;  %v10976_v55 = vunpack.i.h.bf16 %v16988_v25  ;;  %9007 = vmatprep.subr.bf16.mxu1 %v9006_v49  ;;  %v11089_v14 = vpop.permute.xlu0 %11088 }
 0xbf3   : > { %v7509_v27 = vsel %vm638_vm2, %v19256_v7, %v10766_v4  ;;  %v17205_v12 = vsel %vm19258_vm4, %v10890_v46, %v10891_v30  ;;  %v11076_v1 = vunpack.i.h.bf16 %v11074_v33  ;;  %v11075_v57 = vunpack.i.l.bf16 %v11074_v33  ;;  %9009 = vmatpush1.bf16.msra.mxu1 %v9008_v54 }
 0xbf4   : > { %v9010_v53 = vpack.c.bf16 %v7439_v47, %v7435_v62  ;;  %v10975_v32 = vunpack.i.l.bf16 %v16988_v25  ;;  %v10980_v5 = vunpack.i.l.bf16 %v17001_v29  ;;  %v11086_v26 = vunpack.i.h.bf16 %v11084_v63  ;;  %v11104_v62 = vpop.permute.xlu1 %11103 }
 0xbf5   : > { %v11085_v0 = vunpack.i.l.bf16 %v11084_v63  ;;  %v11066_v45 = vunpack.i.h.bf16 %v17148_v18  ;;  %v7436_v48 = vsel %vm750_vm3, %v10841_v24, %v11075_v57  ;;  %v7438_v16 = vsel %vm750_vm3, %v11076_v1, %v11080_v31 }
 0xbf6   : > { %v19261_v4 = vpack.c.bf16 %v19259_v2, %v19260_v10  ;;  %v7437_v56 = vsel %vm750_vm3, %v11075_v57, %v11076_v1  ;;  %v8904_v9 = vpack.c.bf16 %v7436_v48, %v19262_v22  ;;  %v9012_v25 = vpack.c.bf16 %v7438_v16, %v19263_v61  ;;  %9011 = vmatprep.subr.bf16.mxu1 %v9010_v53  ;;  %vm19264_vm3 = vmmov %vm19258_vm4  ;;  %v7680_v16 = vld [vmem:[#allocation12 + $0x10] sm:$0xff]  ;;  %v7898_v2 = vld [vmem:[%s11707_s10] sm:$0xff] }
 0xbf7   : > { %v7510_v34 = vsel %vm638_vm2, %v10886_v37, %v11085_v0  ;;  %v8902_v19 = vpack.c.bf16 %v7437_v56, %v7433_v43  ;;  %v11091_v39 = vunpack.i.h.bf16 %v11089_v14  ;;  %v11090_v11 = vunpack.i.l.bf16 %v11089_v14  ;;  %vm19265_vm5 = vmmov %vm19264_vm3  ;;  %v11094_v43 = vpop.permute.xlu0 %11093  ;;  %v7900_v10 = vld [vmem:[%s11707_s10 + $0x10] sm:$0xff]  ;;  %v7901_v22 = vld [vmem:[%s11707_s10 + $0x18] sm:$0xff] }
 0xbf8   : > { %8901 = vmatpush1.bf16.msra.mxu0 %v19261_v4  ;;  %v8908_v3 = vpack.c.bf16 %v7510_v34, %v16835_v17  ;;  %v7511_v60 = vsel %vm638_vm2, %v11085_v0, %v11086_v26  ;;  %v11065_v21 = vunpack.i.l.bf16 %v17148_v18  ;;  %v11101_v50 = vunpack.i.h.bf16 %v11099_v20  ;;  %9013 = vmatpush1.bf16.msra.mxu1 %v9012_v25  ;;  %vm19267_vm6 = vmmov %vm19264_vm3  ;;  %v11114_v1 = vpop.permute.xlu1 %11113  ;;  %v7899_v4 = vld [vmem:[%s11707_s10 + $0x8] sm:$0xff]  ;;  %s11293_s10 = scalar_lea.vmem %s17265_s17, 512 }
 0xbf9   : > { %v11100_v38 = vunpack.i.l.bf16 %v11099_v20  ;;  %8903 = vmatprep.subr.bf16.mxu0 %v8902_v19  ;;  %v8906_v23 = vpack.c.bf16 %v7511_v60, %v7507_v44  ;;  %v7582_v36 = vsel %vm19264_vm3, %v10891_v30, %v10975_v32  ;;  %v7512_v13 = vsel %vm638_vm2, %v11086_v26, %v11090_v11  ;;  %vm19268_vm7 = vmmov %vm19264_vm3  ;;  %p11294_p2 = scmp.ne.s32.totalorder %s17265_s17, %s11293_s10  ;;  %p11301_p8 = scmp.lt.s32.totalorder %s11299_s9, %s11293_s10 }
 0xbfa   : > { %v7513_v17 = vsel %vm638_vm2, %v11090_v11, %v11091_v39  ;;  %v7583_v52 = vsel %vm19265_vm5, %v10975_v32, %v10976_v55  ;;  %v10981_v15 = vunpack.i.h.bf16 %v17001_v29  ;;  %v9016_v59 = vpack.c.bf16 %v7512_v13, %v19266_v41  ;;  %vm19270_vm8 = vmmov %vm19264_vm3 }
 0xbfb   : > { %v9014_v40 = vpack.c.bf16 %v7513_v17, %v7509_v27  ;;  %v7587_v31 = vsel %vm19267_vm6, %v11100_v38, %v11101_v50  ;;  %v7580_v30 = vsel %vm19268_vm7, %v10980_v5, %v10890_v46  ;;  %v11096_v51 = vunpack.i.h.bf16 %v11094_v43  ;;  %vm19271_vm11 = vmmov %vm19264_vm3  ;;  %v11109_v24 = vpop.permute.xlu0 %11108  ;;  %p11295_p0 = pnand %p11294_p2, %p19281_p13  ;;  %p11302_p4 = por %p11301_p8, %p11300_p3 }
 0xbfc   : > { %8905 = vmatpush1.bf16.msra.mxu0 %v8904_v9  ;;  %v11095_v42 = vunpack.i.l.bf16 %v11094_v43  ;;  %v9018_v58 = vpack.c.bf16 %v7587_v31, %v7583_v52  ;;  %v11071_v54 = vunpack.i.h.bf16 %v17167_v35  ;;  %v11106_v49 = vunpack.i.h.bf16 %v11104_v62  ;;  %vm19272_vm12 = vmmov %vm19264_vm3 }
 0xbfd   : > { %8907 = vmatprep.subr.bf16.mxu0 %v8906_v23  ;;  %v11105_v29 = vunpack.i.l.bf16 %v11104_v62  ;;  %9015 = vmatprep.subr.bf16.mxu1 %v9014_v40  ;;  %vm19269_vm2 = vcmask 449536   ;;  %v11070_v44 = vunpack.i.l.bf16 %v17167_v35  ;;  %v7586_v6 = vsel %vm19271_vm11, %v11096_v51, %v11100_v38  ;;  %p11296_p6 = pneg %p11295_p0 }
 0xbfe   : > { %v7655_v8 = vsel %vm19269_vm2, %v11065_v21, %v11066_v45  ;;  %v7584_v7 = vsel %vm19270_vm8, %v10981_v15, %v11095_v42  ;;  %v7585_v46 = vsel %vm19272_vm12, %v11095_v42, %v11096_v51  ;;  %v9020_v28 = vpack.c.bf16 %v7586_v6, %v7582_v36  ;;  %9017 = vmatpush1.bf16.msra.mxu1 %v9016_v59  ;;  %vm19273_vm14 = vmmov %vm19269_vm2 }
 0xbff   : > { %v8912_v27 = vpack.c.bf16 %v7584_v7, %v7580_v30  ;;  %v8910_v37 = vpack.c.bf16 %v7585_v46, %v17205_v12  ;;  %v7659_v33 = vsel %vm19273_vm14, %v11105_v29, %v11106_v49  ;;  %v11111_v47 = vunpack.i.h.bf16 %v11109_v24  ;;  %9019 = vmatprep.subr.bf16.mxu1 %v9018_v58  ;;  %vm19274_vm15 = vmmov %vm19269_vm2  ;;  %p11303_p10 = pnand %p11302_p4, %p11296_p6 }
 0xc00   : > { %8909 = vmatpush1.bf16.msra.mxu0 %v8908_v3  ;;  %v11110_v55 = vunpack.i.l.bf16 %v11109_v24  ;;  %v8914_v35 = vpack.c.bf16 %v7659_v33, %v7655_v8  ;;  %v11116_v57 = vunpack.i.h.bf16 %v11114_v1  ;;  %v11115_v63 = vunpack.i.l.bf16 %v11114_v1  ;;  %vm19275_vm9 = vmmov %vm19269_vm2 }
 0xc01   : > { %8911 = vmatprep.subr.bf16.mxu0 %v8910_v37  ;;  %v7656_v53 = vsel %vm19274_vm15, %v11066_v45, %v11070_v44  ;;  %vm19276_vm1 = vmmov %vm19269_vm2 }
 0xc02   : > { %v7660_v32 = vsel %vm19275_vm9, %v11106_v49, %v11110_v55  ;;  %v7657_v12 = vsel %vm19276_vm1, %v11070_v44, %v11071_v54  ;;  %vm19277_vm13 = vmmov %vm19276_vm1  ;;  %9021 = vmatpush1.bf16.msra.mxu1 %v9020_v28 }
 0xc03   : > { %v7661_v5 = vsel %vm19277_vm13, %v11110_v55, %v11111_v47  ;;  %v9024_v26 = vpack.c.bf16 %v7660_v32, %v7656_v53  ;;  %vm19278_vm0 = vmmov %vm19276_vm1 }
 0xc04   : > { %8913 = vmatpush1.bf16.msra.mxu0 %v8912_v27  ;;  %v7654_v0 = vsel %vm19278_vm0, %v11115_v63, %v11065_v21  ;;  %vm19279_vm10 = vmmov %vm19278_vm0  ;;  %v9022_v45 = vpack.c.bf16 %v7661_v5, %v7657_v12 }
 0xc05   : > { %v7658_v48 = vsel %vm19279_vm10, %v11116_v57, %v11105_v29  ;;  %8915 = vmatprep.subr.bf16.mxu0 %v8914_v35 }
 0xc06   : > { %v8916_v18 = vpack.c.bf16 %v7658_v48, %v7654_v0  ;;  %9023 = vmatprep.subr.bf16.mxu1 %v9022_v45 }
 0xc07   : > { %9025 = vmatpush1.bf16.msra.mxu1 %v9024_v26 }
 0xc08   : > { %8917 = vmatpush1.bf16.msra.mxu0 %v8916_v18 }
 0xc0a   : > { %8183 = vmatmul.mubr.f32.vlgmr.msra.gmra.mrb[8].mxu1 %v7680_v16 }
 0xc0b   : > { %8041 = vmatmul.mubr.f32.vlgmr.msra.gmra.mrb[8].mxu0 %v7680_v16 }
 0xcdd   : > { %v8184_v61 = vpop.f32.mrb[8].mxu1 }
 0xcde   : > { %v8042_v56 = vpop.f32.mrb[8].mxu0  ;;  %v9028_v34 = vadd.f32 %v8184_v61, %v7900_v10  ;;  %v8186_v19 = vpop.f32.mrb[9].mxu1 }
 0xcdf   : > { %v9026_v9 = vadd.f32 %v8042_v56, %v7898_v2  ;;  %v8044_v25 = vpop.f32.mrb[9].mxu0  ;;  %v9029_v3 = vadd.f32 %v8186_v19, %v7901_v22 }
 0xce0   : > { %v9027_v14 = vadd.f32 %v8044_v25, %v7899_v4  ;;  %8191 = vst [vmem:[%s363_s13 + $0x10] sm:$0xff] %v9028_v34 }
 0xce1   : > { %8189 = vst [vmem:[%s363_s13] sm:$0xff] %v9026_v9  ;;  %8192 = vst [vmem:[%s363_s13 + $0x18] sm:$0xff] %v9029_v3 }
 0xce2   : > { %8190 = vst [vmem:[%s363_s13 + $0x8] sm:$0xff] %v9027_v14 }
 0xce3   : > { %11306 = shalt.err (!%p11303_p10)
}
 0xce4   : > { %s11307_s4 = scalar_lea.hbm %s17263_s11, 512  ;;  %s11311_s7 = scalar_lea.hbm %s17313_s6, 1024 }
 0xce5   : > { %p11308_p11 = scmp.ne.s32.totalorder %s17263_s11, %s11307_s4  ;;  %p11312_p7 = scmp.lt.u32.totalorder %s17263_s11, %s17313_s6 }
 0xce6   : > { %p11313_p12 = scmp.lt.u32.totalorder %s11311_s7, %s11307_s4  ;;  %p11315_p2 = scmp.lt.u32.totalorder %s11307_s4, %s17263_s11 }
 0xce7   : > { %p11309_p9 = pnand %p11308_p11, %p19281_p13 }
 0xce8   : > { %p11314_p1 = por %p11313_p12, %p11312_p7 }
 0xce9   : > { %p11310_p5 = pneg %p11309_p9 }
 0xcea   : > { %p11316_p0 = por %p11315_p2, %p11314_p1 }
 0xcec   : > { %p11317_p6 = pnand %p11316_p0, %p11310_p5 }
 0xcee   : > { %11320 = shalt.err (!%p11317_p6)
}
 0xcef   : > { %9073 = dma.vmem_to_hbm [thread:$0]  (%p19281_p13), %s17265_s17, 512, %s17263_s11, %s8194_s25  }
 0xcf0 PF: > { %s8220_s14 = sand.u32 1, %s11363_s21   ;;  %p19282_p3 = scmp.ne.s32.totalorder %s17947_s28, 0 }
 0xcf1   : > { %p19283_p8 = scmp.ge.s32.totalorder %s11375_s24, 2  ;;  %s8221_s2 = scalar_lea.sflag [#allocation6], %s8220_s14 }
 0xcf3   : > { %p9096_p4 = pnand %p19283_p8, %p19282_p3 }
 0xcf5   : > { %11358 = dma.done.wait (!%p9096_p4), %s8221_s2, 512  }
 0xcf6   : > { %11360 = vsyncadd (!%p9096_p4), %s8221_s2, 4294966784  ;;  %p24_p10 = scmp.ge.s32.totalorder %s11599_s18, 4   ;;  %s19284_s21 = smov %s11367_s22 }
 0xcf7   : > { %s19285_s22 = smov %s11371_s23  ;;  %s19286_s23 = smov %s11615_s16 }
 0xcf8   : > { %s19287_s24 = smov %s11599_s18  ;;  %26 = sbr.rel (!%p24_p10) target bundleno = 14 (0xe), region = 118 }
 0xcff   :  { %8226 = vsyncpa [#allocation5], 1 }
 0xd00   :  { %8228 = vsyncpa [#allocation5 + $0x1], 1 }
 0xd01   :  { %8229 = vsyncpa [#allocation8], 1 }
 0xd02   :  { %8231 = vsyncpa [#allocation8 + $0x1], 1 }
 0xd03   :  { %8232 = vsyncpa [#allocation11], 1 }
 0xd04   :  { %8233 = vsyncpa [#allocation14], 1 }
 0xd05   :  { %8234 = vsyncpa [#allocation6], 1 }
 0xd06   :  { %8236 = vsyncpa [#allocation6 + $0x1], 1 }

</bundles_post_ra>
